<compile_context>
chip_gen: v6e
topology: v6e:2x2x1
jax: 0.10.0
libtpu: 0.0.40
codegen_flags: <defaults>
</compile_context>

<pallas_src>
import jax
import jax.numpy as jnp
from jax.experimental import pallas as pl
from jax.experimental.pallas import tpu as pltpu

NEG_SLOPE = 0.05
BN_EPS = 1e-5

_OUT_LANES = 128   # lane-dense final slab (48 real columns + zero padding)


def _vmem():
    return pl.BlockSpec(memory_space=pltpu.MemorySpace.VMEM)


# --------------------------- fused forward kernel ----------------------------

def _make_kernel(n_img, hc, depth):
    """Fully fused conv1..deconv2 kernel for n_img x 1 x (4*hc) x (4*hc) inputs.

    All activations live on a coarse hc x hc grid, stored as a zero-padded flattened
    VMEM slab of shape (R, C): PTOP zero margin rows, then n_img contiguous padded
    (hc+2) x (hc+2) grids (row-major), then a bottom zero margin.  Valid (interior)
    rows are selected by a precomputed 0/1 mask; every layer reads 9 whole-slab
    shifted views (one matmul per tap) and writes one aligned full-width store."""
    d = depth
    Gc = hc + 2                          # padded coarse-grid side == row stride
    img_rows = Gc * Gc                   # rows per image
    M = n_img * img_rows                 # image-region rows == matmul M everywhere
    PTOP = ((Gc + 1 + 7) // 8) * 8       # top margin >= max tap shift, 8-aligned
    R = ((PTOP + M + Gc + 1 + 7) // 8) * 8   # total scratch rows (bottom margin incl.)
    n_valid = n_img * hc * hc            # valid rows (per phase block)
    inv_n = 1.0 / n_valid
    inv_n4 = 1.0 / (4 * n_valid)         # phase-pooled BN (conv1 / deconv1)
    shifts = [dh * Gc + dw for dh in (-1, 0, 1) for dw in (-1, 0, 1)]

    def shift_conv(buf, w_ref):
        """9-tap conv: one whole-slab matmul per tap.  Non-interior output rows are
        garbage and are zeroed by the masked BN that follows."""
        acc = None
        for t, s in enumerate(shifts):
            slab = buf[pl.ds(PTOP + s, M), :].astype(jnp.bfloat16)
            part = jnp.dot(slab, w_ref[t], preferred_element_type=jnp.float32)
            acc = part if acc is None else acc + part
        return acc

    def pool4(v, c):
        # Pool a (1, 4c) per-phase-block statistic over the 4 blocks and replicate
        # back.  Single-row lane ops only (negligible cost).
        s = v[:, 0:c] + v[:, c:2 * c] + v[:, 2 * c:3 * c] + v[:, 3 * c:4 * c]
        return jnp.concatenate([s, s, s, s], axis=1)

    def bn_lrelu(y, mask, gamma, beta, inv_cnt, pool_c=0):
        """Masked training-mode BatchNorm + LeakyReLU on the full (M, C) slab.
        Rows with mask == 0 come out exactly zero (so the padding ring stays zero)."""
        ym = y * mask
        s = jnp.sum(ym, axis=0, keepdims=True)
        if pool_c:
            s = pool4(s, pool_c)
        m = s * inv_cnt
        cen = (y - m) * mask                              # masked, centered
        sq = jnp.sum(cen * cen, axis=0, keepdims=True)    # E[(x-m)^2], not E[x^2]-m^2
        if pool_c:
            sq = pool4(sq, pool_c)
        scale = jax.lax.rsqrt(sq * inv_cnt + BN_EPS) * gamma
        z = cen * scale + beta * mask
        return jnp.where(z >= 0.0, z, NEG_SLOPE * z)

    def kernel(p1_ref, mask_ref,
               w1_ref, g1_ref, b1_ref,
               w2_ref, g2_ref, b2_ref,
               w3_ref, g3_ref, b3_ref,
               w4_ref, g4_ref, b4_ref,
               wd1_ref, g5_ref, b5_ref,
               wd2_ref, bd2_ref,
               o_ref, buf_a, buf_b, buf_c):
        # Zero scratch once: margins and the padding ring must read as zero.
        buf_a[...] = jnp.zeros_like(buf_a)
        buf_b[...] = jnp.zeros_like(buf_b)
        buf_c[...] = jnp.zeros_like(buf_c)
        mask = mask_ref[...]

        def store(buf, z):
            buf[pl.ds(PTOP, M), :] = z        # single aligned full-width store

        # conv1: block-diagonal space-to-depth matmul + BN1 (phase-pooled) + LReLU.
        y = jnp.dot(p1_ref[...], w1_ref[...], preferred_element_type=jnp.float32)
        store(buf_a, bn_lrelu(y, mask, g1_ref[...], b1_ref[...], inv_n4, pool_c=d))
        # conv2: stride-2 4x4 conv as a 9-tap shift conv over the phase-stacked input.
        store(buf_b, bn_lrelu(shift_conv(buf_a, w2_ref), mask,
                              g2_ref[...], b2_ref[...], inv_n))
        # conv3 / conv4: 3x3 stride-1 convs.
        store(buf_c, bn_lrelu(shift_conv(buf_b, w3_ref), mask,
                              g3_ref[...], b3_ref[...], inv_n))
        store(buf_b, bn_lrelu(shift_conv(buf_c, w4_ref), mask,
                              g4_ref[...], b4_ref[...], inv_n))
        # deconv1: sub-pixel (phase-stacked) transpose conv + phase-pooled BN5 + LReLU.
        store(buf_a, bn_lrelu(shift_conv(buf_b, wd1_ref), mask,
                              g5_ref[...], b5_ref[...], inv_n4, pool_c=d))
        # deconv2: 16 sub-pixel positions x 3 channels (lane-dense slab) + bias + tanh.
        o_ref[...] = jnp.tanh(shift_conv(buf_a, wd2_ref) + bd2_ref[...])

    return kernel, M, R


# --------------------------- parameter packing --------------------------------

# conv2 (stride-2 forward conv): coarse shift da -> [(input phase p, kernel tap i), ...]
_S2MAP = {-1: ((1, 0),), 0: ((0, 1), (1, 2)), 1: ((0, 3),)}
# deconv1 (ConvTranspose k=4,s=2,p=1): output parity r -> [(coarse shift, tap i), ...]
_D1MAP = {0: ((-1, 3), (0, 1)), 1: ((0, 2), (1, 0))}
# deconv2: sub-pixel offset oh in [0,4) -> [(coarse shift, input phase, tap i), ...]
_D2MAP = {0: ((-1, 1, 3), (0, 0, 1)),
          1: ((0, 0, 2), (0, 1, 0)),
          2: ((0, 0, 3), (0, 1, 1)),
          3: ((0, 1, 2), (1, 0, 0))}


def pack_params(p):
    """One-time reshaping of the PyTorch-layout parameters into kernel operands."""
    d = p["conv1_w"].shape[0]
    d2 = 2 * d

    # conv1 as a block-diagonal (4*16, 4*d) weight producing the space-to-depth
    # (phase-stacked) layout directly; BN1 scale/shift tiled over the 4 phase blocks.
    w1 = p["conv1_w"].reshape(d, 16).T                     # (16, d), K-order (i, j)
    w1bd = jnp.zeros((4 * 16, 4 * d), jnp.float32)
    for blk in range(4):
        w1bd = w1bd.at[16 * blk:16 * blk + 16, d * blk:d * blk + d].set(w1)

    packed = {
        "w1": w1bd.astype(jnp.bfloat16),
        "g1": jnp.tile(p["bn1_g"], 4).reshape(1, -1),
        "b1": jnp.tile(p["bn1_b"], 4).reshape(1, -1),
        "g2": p["bn2_g"].reshape(1, -1), "b2": p["bn2_b"].reshape(1, -1),
        # 3x3 convs as 9 stacked per-tap (Cin, Cout) matrices, tap = (dh+1)*3+(dw+1).
        "w3": p["conv3_w"].transpose(2, 3, 1, 0).reshape(9, d2, d2).astype(jnp.bfloat16),
        "g3": p["bn3_g"].reshape(1, -1), "b3": p["bn3_b"].reshape(1, -1),
        "w4": p["conv4_w"].transpose(2, 3, 1, 0).reshape(9, d2, d2).astype(jnp.bfloat16),
        "g4": p["bn4_g"].reshape(1, -1), "b4": p["bn4_b"].reshape(1, -1),
        # BN5 scale/shift tiled over the 4 phase blocks of deconv1's stacked output.
        "g5": jnp.tile(p["bn5_g"], 4).reshape(1, -1),
        "b5": jnp.tile(p["bn5_b"], 4).reshape(1, -1),
    }

    # conv2 (4x4, stride 2) as 9 per-shift (4*d, 2*d) matrices acting on the
    # phase-stacked conv1 output (K = 4*d = 256: natively fills the 2x256 MXU).
    w2 = p["conv2_w"]                                      # (2d, d, 4, 4)
    w2s = jnp.zeros((3, 3, 4 * d, d2), jnp.float32)
    for da in (-1, 0, 1):
        for pp, i in _S2MAP[da]:
            for db in (-1, 0, 1):
                for qq, j in _S2MAP[db]:
                    blk = (pp * 2 + qq) * d
                    w2s = w2s.at[da + 1, db + 1, blk:blk + d, :].add(w2[:, :, i, j].T)
    packed["w2"] = w2s.reshape(9, 4 * d, d2).astype(jnp.bfloat16)

    # deconv1 (ConvTranspose d2 -> d): phase-stacked per-shift weights (9, d2, 4*d).
    wd1 = p["deconv1_w"]                                   # (d2, d, 4, 4)
    wd1s = jnp.zeros((3, 3, d2, 4 * d), jnp.float32)
    for r in (0, 1):
        for s in (0, 1):
            for dh, i in _D1MAP[r]:
                for dw, j in _D1MAP[s]:
                    blk = (r * 2 + s) * d
                    wd1s = wd1s.at[dh + 1, dw + 1, :, blk:blk + d].add(wd1[:, :, i, j])
    packed["wd1"] = wd1s.reshape(9, d2, 4 * d).astype(jnp.bfloat16)

    # deconv2 (ConvTranspose d -> 3) reading the phase-stacked deconv1 output:
    # per-shift weights (9, 4*d, 128) producing 16 sub-pixel x 3 channel columns.
    wd2 = p["deconv2_w"]                                   # (d, 3, 4, 4)
    wd2s = jnp.zeros((3, 3, 4 * d, _OUT_LANES), jnp.float32)
    for oh in range(4):
        for dh, ph, i in _D2MAP[oh]:
            for ow in range(4):
                for dw, pw, j in _D2MAP[ow]:
                    rblk = (ph * 2 + pw) * d
                    cblk = (oh * 4 + ow) * 3
                    wd2s = wd2s.at[dh + 1, dw + 1, rblk:rblk + d,
                                   cblk:cblk + 3].add(wd2[:, :, i, j])
    packed["wd2"] = wd2s.reshape(9, 4 * d, _OUT_LANES).astype(jnp.bfloat16)
    packed["bd2"] = (jnp.zeros((1, _OUT_LANES), jnp.float32)
                     .at[:, :48].set(jnp.tile(p["deconv2_b"], 16)[None, :]))
    # NOTE: conv1..conv4 / deconv1 biases are omitted: a per-channel constant added
    # before (training-mode) BatchNorm is exactly cancelled by the mean subtraction.
    return packed


# ------------------------------ JAX glue --------------------------------------

@jax.jit
def g12_forward(packed, x):
    N, cin, H, W = x.shape
    assert cin == 1 and H == W and H % 4 == 0
    hc = H // 4                      # coarse (conv2-output) grid side
    ho2 = H // 2                     # conv1 output grid side
    d = packed["g2"].shape[1] // 2
    G = hc + 2

    # conv1 im2col (stride-2 4x4, Cin=1) -> space-to-depth -> padded coarse grid rows.
    xp = jnp.pad(x, ((0, 0), (0, 0), (1, 1), (1, 1)))
    cols = [xp[:, 0, i:i + 2 * ho2 - 1:2, j:j + 2 * ho2 - 1:2]
            for i in range(4) for j in range(4)]           # 16 x (N, ho2, ho2)
    p1 = jnp.stack(cols, axis=-1)                          # (N, ho2, ho2, 16), K=(i,j)
    p1 = (p1.reshape(N, hc, 2, hc, 2, 16)
            .transpose(0, 1, 3, 2, 4, 5)                   # (n, ho, wo, p, q, 16)
            .reshape(N, hc, hc, 4 * 16))
    p1 = jnp.pad(p1, ((0, 0), (1, 1), (1, 1), (0, 0)))     # embed in padded coarse grid
    p1 = p1.reshape(N * G * G, 4 * 16)

    # 0/1 validity mask over the padded coarse grid rows.
    mask = jnp.pad(jnp.ones((N, hc, hc, 1), jnp.float32),
                   ((0, 0), (1, 1), (1, 1), (0, 0))).reshape(N * G * G, 1)

    kernel, M, R = _make_kernel(N, hc, d)

    weight_args = (packed["w1"], packed["g1"], packed["b1"],
                   packed["w2"], packed["g2"], packed["b2"],
                   packed["w3"], packed["g3"], packed["b3"],
                   packed["w4"], packed["g4"], packed["b4"],
                   packed["wd1"], packed["g5"], packed["b5"],
                   packed["wd2"], packed["bd2"])
    flops = 2 * M * (64 * 4 * d
                     + 9 * (4 * d * 2 * d            # conv2
                            + 2 * (2 * d * 2 * d)    # conv3 + conv4
                            + 2 * d * 4 * d          # deconv1
                            + 4 * d * _OUT_LANES))   # deconv2
    bytes_accessed = int(p1.size * 2 + mask.size * 4 + M * _OUT_LANES * 4
                         + sum(a.size * a.dtype.itemsize for a in weight_args))

    out = pl.pallas_call(
        kernel,
        out_shape=jax.ShapeDtypeStruct((M, _OUT_LANES), jnp.float32),
        in_specs=[_vmem()] * 19,
        out_specs=_vmem(),
        scratch_shapes=[
            pltpu.VMEM((R, 4 * d), jnp.float32),   # conv1 s2d out / deconv1 out
            pltpu.VMEM((R, 2 * d), jnp.float32),   # conv2 out / conv4 out
            pltpu.VMEM((R, 2 * d), jnp.float32),   # conv3 out
        ],
        cost_estimate=pl.CostEstimate(flops=int(flops),
                                      transcendentals=int(M * _OUT_LANES),
                                      bytes_accessed=bytes_accessed),
    )(p1.astype(jnp.bfloat16), mask, *weight_args)

    # Sub-pixel reassembly of the final (N, 3, 4*hc, 4*hc) output.
    out = out.reshape(N, G, G, _OUT_LANES)[:, 1:1 + hc, 1:1 + hc, :48]
    out = out.reshape(N, hc, hc, 4, 4, 3)                  # (n, ho, wo, oh, ow, c)
    out = out.transpose(0, 5, 1, 3, 2, 4).reshape(N, 3, 4 * hc, 4 * hc)
    return out


# ------------------------------ parameters ------------------------------------

def init_params(key, depth=64):
    keys = jax.random.split(key, 12)
    it = iter(keys)

    def conv(cin, cout, k):
        w = 0.1 * jax.random.normal(next(it), (cout, cin, k, k), jnp.float32)
        b = 0.01 * jax.random.normal(next(it), (cout,), jnp.float32)
        return w, b

    def deconv(cin, cout, k):
        w = 0.1 * jax.random.normal(next(it), (cin, cout, k, k), jnp.float32)
        b = 0.01 * jax.random.normal(next(it), (cout,), jnp.float32)
        return w, b

    def bn(c):
        return jnp.ones((c,), jnp.float32), jnp.zeros((c,), jnp.float32)

    p = {}
    p["conv1_w"], p["conv1_b"] = conv(1, depth, 4)        # conv biases are kept for
    p["bn1_g"], p["bn1_b"] = bn(depth)                    # parameter fidelity, but they
    p["conv2_w"], p["conv2_b"] = conv(depth, depth * 2, 4)   # are no-ops before BN and
    p["bn2_g"], p["bn2_b"] = bn(depth * 2)                # are not fed to the kernel.
    p["conv3_w"], p["conv3_b"] = conv(depth * 2, depth * 2, 3)
    p["bn3_g"], p["bn3_b"] = bn(depth * 2)
    p["conv4_w"], p["conv4_b"] = conv(depth * 2, depth * 2, 3)
    p["bn4_g"], p["bn4_b"] = bn(depth * 2)
    p["deconv1_w"], p["deconv1_b"] = deconv(depth * 2, depth, 4)
    p["bn5_g"], p["bn5_b"] = bn(depth)
    p["deconv2_w"], p["deconv2_b"] = deconv(depth, 3, 4)
    return p


# --------------------------------- main ----------------------------------------

if __name__ == "__main__":
    key = jax.random.PRNGKey(0)
    depth = 64
    params = init_params(key, depth=depth)
    x = jax.random.normal(jax.random.fold_in(key, 123), (2, 1, 16, 16), jnp.float32)

    packed = pack_params(params)
    out = jax.block_until_ready(g12_forward(packed, x))

    assert out.shape == (2, 3, 16, 16), out.shape
    assert out.dtype == jnp.float32
    assert bool(jnp.all(jnp.isfinite(out)))
    assert bool(jnp.all(jnp.abs(out) <= 1.0))  # tanh range
    print("KERNEL_OK")
</pallas_src>

<mosaic_0001>
module attributes {stable_mosaic.version = 11 : i64} {
  func.func @kernel(%arg0: memref<72x64xbf16, #tpu.memory_space<vmem>>, %arg1: memref<72x1xf32, #tpu.memory_space<vmem>>, %arg2: memref<64x256xbf16, #tpu.memory_space<vmem>>, %arg3: memref<1x256xf32, #tpu.memory_space<vmem>>, %arg4: memref<1x256xf32, #tpu.memory_space<vmem>>, %arg5: memref<9x256x128xbf16, #tpu.memory_space<vmem>>, %arg6: memref<1x128xf32, #tpu.memory_space<vmem>>, %arg7: memref<1x128xf32, #tpu.memory_space<vmem>>, %arg8: memref<9x128x128xbf16, #tpu.memory_space<vmem>>, %arg9: memref<1x128xf32, #tpu.memory_space<vmem>>, %arg10: memref<1x128xf32, #tpu.memory_space<vmem>>, %arg11: memref<9x128x128xbf16, #tpu.memory_space<vmem>>, %arg12: memref<1x128xf32, #tpu.memory_space<vmem>>, %arg13: memref<1x128xf32, #tpu.memory_space<vmem>>, %arg14: memref<9x128x256xbf16, #tpu.memory_space<vmem>>, %arg15: memref<1x256xf32, #tpu.memory_space<vmem>>, %arg16: memref<1x256xf32, #tpu.memory_space<vmem>>, %arg17: memref<9x256x128xbf16, #tpu.memory_space<vmem>>, %arg18: memref<1x128xf32, #tpu.memory_space<vmem>>, %arg19: memref<72x128xf32, #tpu.memory_space<vmem>>, %arg20: memref<88x256xf32, #tpu.memory_space<vmem>>, %arg21: memref<88x128xf32, #tpu.memory_space<vmem>>, %arg22: memref<88x128xf32, #tpu.memory_space<vmem>>) attributes {dimension_semantics = [], scalar_prefetch = 0 : i64, scratch_operands = 3 : i64, tpu.core_type = #tpu.core_type<tc>} {
    %cst = arith.constant 0.000000e+00 : f32
    %0 = vector.broadcast %cst : f32 to vector<88x256xf32>
    %c0 = arith.constant 0 : index
    %c0_0 = arith.constant 0 : index
    %1 = vector.load %arg20[%c0, %c0_0] : memref<88x256xf32, #tpu.memory_space<vmem>>, vector<88x256xf32>
    tpu.vector_store %arg20[%c0, %c0_0], %0 {strides = array<i32>} : memref<88x256xf32, #tpu.memory_space<vmem>>, vector<88x256xf32>,
    %cst_1 = arith.constant 0.000000e+00 : f32
    %2 = vector.broadcast %cst_1 : f32 to vector<88x128xf32>
    %c0_2 = arith.constant 0 : index
    %c0_3 = arith.constant 0 : index
    %3 = vector.load %arg21[%c0_2, %c0_3] : memref<88x128xf32, #tpu.memory_space<vmem>>, vector<88x128xf32>
    tpu.vector_store %arg21[%c0_2, %c0_3], %2 {strides = array<i32>} : memref<88x128xf32, #tpu.memory_space<vmem>>, vector<88x128xf32>,
    %cst_4 = arith.constant 0.000000e+00 : f32
    %4 = vector.broadcast %cst_4 : f32 to vector<88x128xf32>
    %c0_5 = arith.constant 0 : index
    %c0_6 = arith.constant 0 : index
    %5 = vector.load %arg22[%c0_5, %c0_6] : memref<88x128xf32, #tpu.memory_space<vmem>>, vector<88x128xf32>
    tpu.vector_store %arg22[%c0_5, %c0_6], %4 {strides = array<i32>} : memref<88x128xf32, #tpu.memory_space<vmem>>, vector<88x128xf32>,
    %c0_7 = arith.constant 0 : index
    %c0_8 = arith.constant 0 : index
    %6 = vector.load %arg1[%c0_7, %c0_8] : memref<72x1xf32, #tpu.memory_space<vmem>>, vector<72x1xf32>
    %c0_9 = arith.constant 0 : index
    %c0_10 = arith.constant 0 : index
    %7 = vector.load %arg0[%c0_9, %c0_10] : memref<72x64xbf16, #tpu.memory_space<vmem>>, vector<72x64xbf16>
    %c0_11 = arith.constant 0 : index
    %c0_12 = arith.constant 0 : index
    %8 = vector.load %arg2[%c0_11, %c0_12] : memref<64x256xbf16, #tpu.memory_space<vmem>>, vector<64x256xbf16>
    %cst_13 = arith.constant dense<0.000000e+00> : vector<72x256xf32>
    %9 = tpu.matmul %7, %8, %cst_13 {dimension_numbers = #tpu.dot_dimension_numbers<[1], [0], [0], [1], [0, 0, 1, 1], [], []>} : vector<72x64xbf16>, vector<64x256xbf16>, vector<72x256xf32> -> vector<72x256xf32>
    %c0_14 = arith.constant 0 : index
    %c0_15 = arith.constant 0 : index
    %10 = vector.load %arg3[%c0_14, %c0_15] : memref<1x256xf32, #tpu.memory_space<vmem>>, vector<1x256xf32>
    %c0_16 = arith.constant 0 : index
    %c0_17 = arith.constant 0 : index
    %11 = vector.load %arg4[%c0_16, %c0_17] : memref<1x256xf32, #tpu.memory_space<vmem>>, vector<1x256xf32>
    %12 = vector.broadcast %6 : vector<72x1xf32> to vector<72x256xf32>
    %13 = arith.mulf %9, %12 : vector<72x256xf32>
    %cst_18 = arith.constant dense<0.000000e+00> : vector<256xf32>
    %14 = vector.multi_reduction <add>, %13, %cst_18 [0] : vector<72x256xf32> to vector<256xf32>
    %15 = vector.shape_cast %14 : vector<256xf32> to vector<1x256xf32>
    %16 = vector.extract_strided_slice %15 {offsets = [0, 0], sizes = [1, 64], strides = [1, 1]} : vector<1x256xf32> to vector<1x64xf32>
    %17 = vector.extract_strided_slice %15 {offsets = [0, 64], sizes = [1, 64], strides = [1, 1]} : vector<1x256xf32> to vector<1x64xf32>
    %18 = arith.addf %16, %17 : vector<1x64xf32>
    %19 = vector.extract_strided_slice %15 {offsets = [0, 128], sizes = [1, 64], strides = [1, 1]} : vector<1x256xf32> to vector<1x64xf32>
    %20 = arith.addf %18, %19 : vector<1x64xf32>
    %21 = vector.extract_strided_slice %15 {offsets = [0, 192], sizes = [1, 64], strides = [1, 1]} : vector<1x256xf32> to vector<1x64xf32>
    %22 = arith.addf %20, %21 : vector<1x64xf32>
    %23 = tpu.concatenate %22, %22, %22, %22 in 1 : vector<1x64xf32>, vector<1x64xf32>, vector<1x64xf32>, vector<1x64xf32> -> vector<1x256xf32>
    %cst_19 = arith.constant 7.812500e-03 : f32
    %24 = vector.broadcast %cst_19 : f32 to vector<1x256xf32>
    %25 = arith.mulf %23, %24 : vector<1x256xf32>
    %26 = vector.broadcast %25 : vector<1x256xf32> to vector<72x256xf32>
    %27 = arith.subf %9, %26 : vector<72x256xf32>
    %28 = vector.broadcast %6 : vector<72x1xf32> to vector<72x256xf32>
    %29 = arith.mulf %27, %28 : vector<72x256xf32>
    %30 = arith.mulf %29, %29 : vector<72x256xf32>
    %cst_20 = arith.constant dense<0.000000e+00> : vector<256xf32>
    %31 = vector.multi_reduction <add>, %30, %cst_20 [0] : vector<72x256xf32> to vector<256xf32>
    %32 = vector.shape_cast %31 : vector<256xf32> to vector<1x256xf32>
    %33 = vector.extract_strided_slice %32 {offsets = [0, 0], sizes = [1, 64], strides = [1, 1]} : vector<1x256xf32> to vector<1x64xf32>
    %34 = vector.extract_strided_slice %32 {offsets = [0, 64], sizes = [1, 64], strides = [1, 1]} : vector<1x256xf32> to vector<1x64xf32>
    %35 = arith.addf %33, %34 : vector<1x64xf32>
    %36 = vector.extract_strided_slice %32 {offsets = [0, 128], sizes = [1, 64], strides = [1, 1]} : vector<1x256xf32> to vector<1x64xf32>
    %37 = arith.addf %35, %36 : vector<1x64xf32>
    %38 = vector.extract_strided_slice %32 {offsets = [0, 192], sizes = [1, 64], strides = [1, 1]} : vector<1x256xf32> to vector<1x64xf32>
    %39 = arith.addf %37, %38 : vector<1x64xf32>
    %40 = tpu.concatenate %39, %39, %39, %39 in 1 : vector<1x64xf32>, vector<1x64xf32>, vector<1x64xf32>, vector<1x64xf32> -> vector<1x256xf32>
    %cst_21 = arith.constant 7.812500e-03 : f32
    %41 = vector.broadcast %cst_21 : f32 to vector<1x256xf32>
    %42 = arith.mulf %40, %41 : vector<1x256xf32>
    %cst_22 = arith.constant 9.99999974E-6 : f32
    %43 = vector.broadcast %cst_22 : f32 to vector<1x256xf32>
    %44 = arith.addf %42, %43 : vector<1x256xf32>
    %45 = math.rsqrt %44 : vector<1x256xf32>
    %46 = arith.mulf %45, %10 : vector<1x256xf32>
    %47 = vector.broadcast %46 : vector<1x256xf32> to vector<72x256xf32>
    %48 = arith.mulf %29, %47 : vector<72x256xf32>
    %49 = vector.broadcast %11 : vector<1x256xf32> to vector<72x256xf32>
    %50 = vector.broadcast %6 : vector<72x1xf32> to vector<72x256xf32>
    %51 = arith.mulf %49, %50 : vector<72x256xf32>
    %52 = arith.addf %48, %51 : vector<72x256xf32>
    %cst_23 = arith.constant 0.000000e+00 : f32
    %53 = vector.broadcast %cst_23 : f32 to vector<72x256xf32>
    %54 = arith.cmpf oge, %52, %53 : vector<72x256xf32>
    %cst_24 = arith.constant 5.000000e-02 : f32
    %55 = vector.broadcast %cst_24 : f32 to vector<72x256xf32>
    %56 = arith.mulf %55, %52 : vector<72x256xf32>
    %57 = arith.select %54, %52, %56 : vector<72x256xi1>, vector<72x256xf32>
    %c8 = arith.constant 8 : index
    %c0_25 = arith.constant 0 : index
    %58 = vector.load %arg20[%c8, %c0_25] : memref<88x256xf32, #tpu.memory_space<vmem>>, vector<72x256xf32>
    tpu.vector_store %arg20[%c8, %c0_25], %57 {strides = array<i32>} : memref<88x256xf32, #tpu.memory_space<vmem>>, vector<72x256xf32>,
    %c1 = arith.constant 1 : index
    %c0_26 = arith.constant 0 : index
    %59 = vector.load %arg20[%c1, %c0_26] : memref<88x256xf32, #tpu.memory_space<vmem>>, vector<72x256xf32>
    %60 = arith.truncf %59 : vector<72x256xf32> to vector<72x256xbf16>
    %c0_27 = arith.constant 0 : index
    %c0_28 = arith.constant 0 : index
    %c0_29 = arith.constant 0 : index
    %61 = vector.load %arg5[%c0_27, %c0_28, %c0_29] : memref<9x256x128xbf16, #tpu.memory_space<vmem>>, vector<1x256x128xbf16>
    %62 = vector.shape_cast %61 : vector<1x256x128xbf16> to vector<256x128xbf16>
    %cst_30 = arith.constant dense<0.000000e+00> : vector<72x128xf32>
    %63 = tpu.matmul %60, %62, %cst_30 {dimension_numbers = #tpu.dot_dimension_numbers<[1], [0], [0], [1], [0, 0, 1, 1], [], []>} : vector<72x256xbf16>, vector<256x128xbf16>, vector<72x128xf32> -> vector<72x128xf32>
    %c2 = arith.constant 2 : index
    %c0_31 = arith.constant 0 : index
    %64 = vector.load %arg20[%c2, %c0_31] : memref<88x256xf32, #tpu.memory_space<vmem>>, vector<72x256xf32>
    %65 = arith.truncf %64 : vector<72x256xf32> to vector<72x256xbf16>
    %c1_32 = arith.constant 1 : index
    %c0_33 = arith.constant 0 : index
    %c0_34 = arith.constant 0 : index
    %66 = vector.load %arg5[%c1_32, %c0_33, %c0_34] : memref<9x256x128xbf16, #tpu.memory_space<vmem>>, vector<1x256x128xbf16>
    %67 = vector.shape_cast %66 : vector<1x256x128xbf16> to vector<256x128xbf16>
    %cst_35 = arith.constant dense<0.000000e+00> : vector<72x128xf32>
    %68 = tpu.matmul %65, %67, %cst_35 {dimension_numbers = #tpu.dot_dimension_numbers<[1], [0], [0], [1], [0, 0, 1, 1], [], []>} : vector<72x256xbf16>, vector<256x128xbf16>, vector<72x128xf32> -> vector<72x128xf32>
    %69 = arith.addf %63, %68 : vector<72x128xf32>
    %c3 = arith.constant 3 : index
    %c0_36 = arith.constant 0 : index
    %70 = vector.load %arg20[%c3, %c0_36] : memref<88x256xf32, #tpu.memory_space<vmem>>, vector<72x256xf32>
    %71 = arith.truncf %70 : vector<72x256xf32> to vector<72x256xbf16>
    %c2_37 = arith.constant 2 : index
    %c0_38 = arith.constant 0 : index
    %c0_39 = arith.constant 0 : index
    %72 = vector.load %arg5[%c2_37, %c0_38, %c0_39] : memref<9x256x128xbf16, #tpu.memory_space<vmem>>, vector<1x256x128xbf16>
    %73 = vector.shape_cast %72 : vector<1x256x128xbf16> to vector<256x128xbf16>
    %cst_40 = arith.constant dense<0.000000e+00> : vector<72x128xf32>
    %74 = tpu.matmul %71, %73, %cst_40 {dimension_numbers = #tpu.dot_dimension_numbers<[1], [0], [0], [1], [0, 0, 1, 1], [], []>} : vector<72x256xbf16>, vector<256x128xbf16>, vector<72x128xf32> -> vector<72x128xf32>
    %75 = arith.addf %69, %74 : vector<72x128xf32>
    %c7 = arith.constant 7 : index
    %c0_41 = arith.constant 0 : index
    %76 = vector.load %arg20[%c7, %c0_41] : memref<88x256xf32, #tpu.memory_space<vmem>>, vector<72x256xf32>
    %77 = arith.truncf %76 : vector<72x256xf32> to vector<72x256xbf16>
    %c3_42 = arith.constant 3 : index
    %c0_43 = arith.constant 0 : index
    %c0_44 = arith.constant 0 : index
    %78 = vector.load %arg5[%c3_42, %c0_43, %c0_44] : memref<9x256x128xbf16, #tpu.memory_space<vmem>>, vector<1x256x128xbf16>
    %79 = vector.shape_cast %78 : vector<1x256x128xbf16> to vector<256x128xbf16>
    %cst_45 = arith.constant dense<0.000000e+00> : vector<72x128xf32>
    %80 = tpu.matmul %77, %79, %cst_45 {dimension_numbers = #tpu.dot_dimension_numbers<[1], [0], [0], [1], [0, 0, 1, 1], [], []>} : vector<72x256xbf16>, vector<256x128xbf16>, vector<72x128xf32> -> vector<72x128xf32>
    %81 = arith.addf %75, %80 : vector<72x128xf32>
    %c8_46 = arith.constant 8 : index
    %c0_47 = arith.constant 0 : index
    %82 = vector.load %arg20[%c8_46, %c0_47] : memref<88x256xf32, #tpu.memory_space<vmem>>, vector<72x256xf32>
    %83 = arith.truncf %82 : vector<72x256xf32> to vector<72x256xbf16>
    %c4 = arith.constant 4 : index
    %c0_48 = arith.constant 0 : index
    %c0_49 = arith.constant 0 : index
    %84 = vector.load %arg5[%c4, %c0_48, %c0_49] : memref<9x256x128xbf16, #tpu.memory_space<vmem>>, vector<1x256x128xbf16>
    %85 = vector.shape_cast %84 : vector<1x256x128xbf16> to vector<256x128xbf16>
    %cst_50 = arith.constant dense<0.000000e+00> : vector<72x128xf32>
    %86 = tpu.matmul %83, %85, %cst_50 {dimension_numbers = #tpu.dot_dimension_numbers<[1], [0], [0], [1], [0, 0, 1, 1], [], []>} : vector<72x256xbf16>, vector<256x128xbf16>, vector<72x128xf32> -> vector<72x128xf32>
    %87 = arith.addf %81, %86 : vector<72x128xf32>
    %c9 = arith.constant 9 : index
    %c0_51 = arith.constant 0 : index
    %88 = vector.load %arg20[%c9, %c0_51] : memref<88x256xf32, #tpu.memory_space<vmem>>, vector<72x256xf32>
    %89 = arith.truncf %88 : vector<72x256xf32> to vector<72x256xbf16>
    %c5 = arith.constant 5 : index
    %c0_52 = arith.constant 0 : index
    %c0_53 = arith.constant 0 : index
    %90 = vector.load %arg5[%c5, %c0_52, %c0_53] : memref<9x256x128xbf16, #tpu.memory_space<vmem>>, vector<1x256x128xbf16>
    %91 = vector.shape_cast %90 : vector<1x256x128xbf16> to vector<256x128xbf16>
    %cst_54 = arith.constant dense<0.000000e+00> : vector<72x128xf32>
    %92 = tpu.matmul %89, %91, %cst_54 {dimension_numbers = #tpu.dot_dimension_numbers<[1], [0], [0], [1], [0, 0, 1, 1], [], []>} : vector<72x256xbf16>, vector<256x128xbf16>, vector<72x128xf32> -> vector<72x128xf32>
    %93 = arith.addf %87, %92 : vector<72x128xf32>
    %c13 = arith.constant 13 : index
    %c0_55 = arith.constant 0 : index
    %94 = vector.load %arg20[%c13, %c0_55] : memref<88x256xf32, #tpu.memory_space<vmem>>, vector<72x256xf32>
    %95 = arith.truncf %94 : vector<72x256xf32> to vector<72x256xbf16>
    %c6 = arith.constant 6 : index
    %c0_56 = arith.constant 0 : index
    %c0_57 = arith.constant 0 : index
    %96 = vector.load %arg5[%c6, %c0_56, %c0_57] : memref<9x256x128xbf16, #tpu.memory_space<vmem>>, vector<1x256x128xbf16>
    %97 = vector.shape_cast %96 : vector<1x256x128xbf16> to vector<256x128xbf16>
    %cst_58 = arith.constant dense<0.000000e+00> : vector<72x128xf32>
    %98 = tpu.matmul %95, %97, %cst_58 {dimension_numbers = #tpu.dot_dimension_numbers<[1], [0], [0], [1], [0, 0, 1, 1], [], []>} : vector<72x256xbf16>, vector<256x128xbf16>, vector<72x128xf32> -> vector<72x128xf32>
    %99 = arith.addf %93, %98 : vector<72x128xf32>
    %c14 = arith.constant 14 : index
    %c0_59 = arith.constant 0 : index
    %100 = vector.load %arg20[%c14, %c0_59] : memref<88x256xf32, #tpu.memory_space<vmem>>, vector<72x256xf32>
    %101 = arith.truncf %100 : vector<72x256xf32> to vector<72x256xbf16>
    %c7_60 = arith.constant 7 : index
    %c0_61 = arith.constant 0 : index
    %c0_62 = arith.constant 0 : index
    %102 = vector.load %arg5[%c7_60, %c0_61, %c0_62] : memref<9x256x128xbf16, #tpu.memory_space<vmem>>, vector<1x256x128xbf16>
    %103 = vector.shape_cast %102 : vector<1x256x128xbf16> to vector<256x128xbf16>
    %cst_63 = arith.constant dense<0.000000e+00> : vector<72x128xf32>
    %104 = tpu.matmul %101, %103, %cst_63 {dimension_numbers = #tpu.dot_dimension_numbers<[1], [0], [0], [1], [0, 0, 1, 1], [], []>} : vector<72x256xbf16>, vector<256x128xbf16>, vector<72x128xf32> -> vector<72x128xf32>
    %105 = arith.addf %99, %104 : vector<72x128xf32>
    %c15 = arith.constant 15 : index
    %c0_64 = arith.constant 0 : index
    %106 = vector.load %arg20[%c15, %c0_64] : memref<88x256xf32, #tpu.memory_space<vmem>>, vector<72x256xf32>
    %107 = arith.truncf %106 : vector<72x256xf32> to vector<72x256xbf16>
    %c8_65 = arith.constant 8 : index
    %c0_66 = arith.constant 0 : index
    %c0_67 = arith.constant 0 : index
    %108 = vector.load %arg5[%c8_65, %c0_66, %c0_67] : memref<9x256x128xbf16, #tpu.memory_space<vmem>>, vector<1x256x128xbf16>
    %109 = vector.shape_cast %108 : vector<1x256x128xbf16> to vector<256x128xbf16>
    %cst_68 = arith.constant dense<0.000000e+00> : vector<72x128xf32>
    %110 = tpu.matmul %107, %109, %cst_68 {dimension_numbers = #tpu.dot_dimension_numbers<[1], [0], [0], [1], [0, 0, 1, 1], [], []>} : vector<72x256xbf16>, vector<256x128xbf16>, vector<72x128xf32> -> vector<72x128xf32>
    %111 = arith.addf %105, %110 : vector<72x128xf32>
    %c0_69 = arith.constant 0 : index
    %c0_70 = arith.constant 0 : index
    %112 = vector.load %arg6[%c0_69, %c0_70] : memref<1x128xf32, #tpu.memory_space<vmem>>, vector<1x128xf32>
    %c0_71 = arith.constant 0 : index
    %c0_72 = arith.constant 0 : index
    %113 = vector.load %arg7[%c0_71, %c0_72] : memref<1x128xf32, #tpu.memory_space<vmem>>, vector<1x128xf32>
    %114 = vector.broadcast %6 : vector<72x1xf32> to vector<72x128xf32>
    %115 = arith.mulf %111, %114 : vector<72x128xf32>
    %cst_73 = arith.constant dense<0.000000e+00> : vector<128xf32>
    %116 = vector.multi_reduction <add>, %115, %cst_73 [0] : vector<72x128xf32> to vector<128xf32>
    %117 = vector.shape_cast %116 : vector<128xf32> to vector<1x128xf32>
    %cst_74 = arith.constant 3.125000e-02 : f32
    %118 = vector.broadcast %cst_74 : f32 to vector<1x128xf32>
    %119 = arith.mulf %117, %118 : vector<1x128xf32>
    %120 = vector.broadcast %119 : vector<1x128xf32> to vector<72x128xf32>
    %121 = arith.subf %111, %120 : vector<72x128xf32>
    %122 = vector.broadcast %6 : vector<72x1xf32> to vector<72x128xf32>
    %123 = arith.mulf %121, %122 : vector<72x128xf32>
    %124 = arith.mulf %123, %123 : vector<72x128xf32>
    %cst_75 = arith.constant dense<0.000000e+00> : vector<128xf32>
    %125 = vector.multi_reduction <add>, %124, %cst_75 [0] : vector<72x128xf32> to vector<128xf32>
    %126 = vector.shape_cast %125 : vector<128xf32> to vector<1x128xf32>
    %cst_76 = arith.constant 3.125000e-02 : f32
    %127 = vector.broadcast %cst_76 : f32 to vector<1x128xf32>
    %128 = arith.mulf %126, %127 : vector<1x128xf32>
    %cst_77 = arith.constant 9.99999974E-6 : f32
    %129 = vector.broadcast %cst_77 : f32 to vector<1x128xf32>
    %130 = arith.addf %128, %129 : vector<1x128xf32>
    %131 = math.rsqrt %130 : vector<1x128xf32>
    %132 = arith.mulf %131, %112 : vector<1x128xf32>
    %133 = vector.broadcast %132 : vector<1x128xf32> to vector<72x128xf32>
    %134 = arith.mulf %123, %133 : vector<72x128xf32>
    %135 = vector.broadcast %113 : vector<1x128xf32> to vector<72x128xf32>
    %136 = vector.broadcast %6 : vector<72x1xf32> to vector<72x128xf32>
    %137 = arith.mulf %135, %136 : vector<72x128xf32>
    %138 = arith.addf %134, %137 : vector<72x128xf32>
    %cst_78 = arith.constant 0.000000e+00 : f32
    %139 = vector.broadcast %cst_78 : f32 to vector<72x128xf32>
    %140 = arith.cmpf oge, %138, %139 : vector<72x128xf32>
    %cst_79 = arith.constant 5.000000e-02 : f32
    %141 = vector.broadcast %cst_79 : f32 to vector<72x128xf32>
    %142 = arith.mulf %141, %138 : vector<72x128xf32>
    %143 = arith.select %140, %138, %142 : vector<72x128xi1>, vector<72x128xf32>
    %c8_80 = arith.constant 8 : index
    %c0_81 = arith.constant 0 : index
    %144 = vector.load %arg21[%c8_80, %c0_81] : memref<88x128xf32, #tpu.memory_space<vmem>>, vector<72x128xf32>
    tpu.vector_store %arg21[%c8_80, %c0_81], %143 {strides = array<i32>} : memref<88x128xf32, #tpu.memory_space<vmem>>, vector<72x128xf32>,
    %c1_82 = arith.constant 1 : index
    %c0_83 = arith.constant 0 : index
    %145 = vector.load %arg21[%c1_82, %c0_83] : memref<88x128xf32, #tpu.memory_space<vmem>>, vector<72x128xf32>
    %146 = arith.truncf %145 : vector<72x128xf32> to vector<72x128xbf16>
    %c0_84 = arith.constant 0 : index
    %c0_85 = arith.constant 0 : index
    %c0_86 = arith.constant 0 : index
    %147 = vector.load %arg8[%c0_84, %c0_85, %c0_86] : memref<9x128x128xbf16, #tpu.memory_space<vmem>>, vector<1x128x128xbf16>
    %148 = vector.shape_cast %147 : vector<1x128x128xbf16> to vector<128x128xbf16>
    %cst_87 = arith.constant dense<0.000000e+00> : vector<72x128xf32>
    %149 = tpu.matmul %146, %148, %cst_87 {dimension_numbers = #tpu.dot_dimension_numbers<[1], [0], [0], [1], [0, 0, 1, 1], [], []>} : vector<72x128xbf16>, vector<128x128xbf16>, vector<72x128xf32> -> vector<72x128xf32>
    %c2_88 = arith.constant 2 : index
    %c0_89 = arith.constant 0 : index
    %150 = vector.load %arg21[%c2_88, %c0_89] : memref<88x128xf32, #tpu.memory_space<vmem>>, vector<72x128xf32>
    %151 = arith.truncf %150 : vector<72x128xf32> to vector<72x128xbf16>
    %c1_90 = arith.constant 1 : index
    %c0_91 = arith.constant 0 : index
    %c0_92 = arith.constant 0 : index
    %152 = vector.load %arg8[%c1_90, %c0_91, %c0_92] : memref<9x128x128xbf16, #tpu.memory_space<vmem>>, vector<1x128x128xbf16>
    %153 = vector.shape_cast %152 : vector<1x128x128xbf16> to vector<128x128xbf16>
    %cst_93 = arith.constant dense<0.000000e+00> : vector<72x128xf32>
    %154 = tpu.matmul %151, %153, %cst_93 {dimension_numbers = #tpu.dot_dimension_numbers<[1], [0], [0], [1], [0, 0, 1, 1], [], []>} : vector<72x128xbf16>, vector<128x128xbf16>, vector<72x128xf32> -> vector<72x128xf32>
    %155 = arith.addf %149, %154 : vector<72x128xf32>
    %c3_94 = arith.constant 3 : index
    %c0_95 = arith.constant 0 : index
    %156 = vector.load %arg21[%c3_94, %c0_95] : memref<88x128xf32, #tpu.memory_space<vmem>>, vector<72x128xf32>
    %157 = arith.truncf %156 : vector<72x128xf32> to vector<72x128xbf16>
    %c2_96 = arith.constant 2 : index
    %c0_97 = arith.constant 0 : index
    %c0_98 = arith.constant 0 : index
    %158 = vector.load %arg8[%c2_96, %c0_97, %c0_98] : memref<9x128x128xbf16, #tpu.memory_space<vmem>>, vector<1x128x128xbf16>
    %159 = vector.shape_cast %158 : vector<1x128x128xbf16> to vector<128x128xbf16>
    %cst_99 = arith.constant dense<0.000000e+00> : vector<72x128xf32>
    %160 = tpu.matmul %157, %159, %cst_99 {dimension_numbers = #tpu.dot_dimension_numbers<[1], [0], [0], [1], [0, 0, 1, 1], [], []>} : vector<72x128xbf16>, vector<128x128xbf16>, vector<72x128xf32> -> vector<72x128xf32>
    %161 = arith.addf %155, %160 : vector<72x128xf32>
    %c7_100 = arith.constant 7 : index
    %c0_101 = arith.constant 0 : index
    %162 = vector.load %arg21[%c7_100, %c0_101] : memref<88x128xf32, #tpu.memory_space<vmem>>, vector<72x128xf32>
    %163 = arith.truncf %162 : vector<72x128xf32> to vector<72x128xbf16>
    %c3_102 = arith.constant 3 : index
    %c0_103 = arith.constant 0 : index
    %c0_104 = arith.constant 0 : index
    %164 = vector.load %arg8[%c3_102, %c0_103, %c0_104] : memref<9x128x128xbf16, #tpu.memory_space<vmem>>, vector<1x128x128xbf16>
    %165 = vector.shape_cast %164 : vector<1x128x128xbf16> to vector<128x128xbf16>
    %cst_105 = arith.constant dense<0.000000e+00> : vector<72x128xf32>
    %166 = tpu.matmul %163, %165, %cst_105 {dimension_numbers = #tpu.dot_dimension_numbers<[1], [0], [0], [1], [0, 0, 1, 1], [], []>} : vector<72x128xbf16>, vector<128x128xbf16>, vector<72x128xf32> -> vector<72x128xf32>
    %167 = arith.addf %161, %166 : vector<72x128xf32>
    %c8_106 = arith.constant 8 : index
    %c0_107 = arith.constant 0 : index
    %168 = vector.load %arg21[%c8_106, %c0_107] : memref<88x128xf32, #tpu.memory_space<vmem>>, vector<72x128xf32>
    %169 = arith.truncf %168 : vector<72x128xf32> to vector<72x128xbf16>
    %c4_108 = arith.constant 4 : index
    %c0_109 = arith.constant 0 : index
    %c0_110 = arith.constant 0 : index
    %170 = vector.load %arg8[%c4_108, %c0_109, %c0_110] : memref<9x128x128xbf16, #tpu.memory_space<vmem>>, vector<1x128x128xbf16>
    %171 = vector.shape_cast %170 : vector<1x128x128xbf16> to vector<128x128xbf16>
    %cst_111 = arith.constant dense<0.000000e+00> : vector<72x128xf32>
    %172 = tpu.matmul %169, %171, %cst_111 {dimension_numbers = #tpu.dot_dimension_numbers<[1], [0], [0], [1], [0, 0, 1, 1], [], []>} : vector<72x128xbf16>, vector<128x128xbf16>, vector<72x128xf32> -> vector<72x128xf32>
    %173 = arith.addf %167, %172 : vector<72x128xf32>
    %c9_112 = arith.constant 9 : index
    %c0_113 = arith.constant 0 : index
    %174 = vector.load %arg21[%c9_112, %c0_113] : memref<88x128xf32, #tpu.memory_space<vmem>>, vector<72x128xf32>
    %175 = arith.truncf %174 : vector<72x128xf32> to vector<72x128xbf16>
    %c5_114 = arith.constant 5 : index
    %c0_115 = arith.constant 0 : index
    %c0_116 = arith.constant 0 : index
    %176 = vector.load %arg8[%c5_114, %c0_115, %c0_116] : memref<9x128x128xbf16, #tpu.memory_space<vmem>>, vector<1x128x128xbf16>
    %177 = vector.shape_cast %176 : vector<1x128x128xbf16> to vector<128x128xbf16>
    %cst_117 = arith.constant dense<0.000000e+00> : vector<72x128xf32>
    %178 = tpu.matmul %175, %177, %cst_117 {dimension_numbers = #tpu.dot_dimension_numbers<[1], [0], [0], [1], [0, 0, 1, 1], [], []>} : vector<72x128xbf16>, vector<128x128xbf16>, vector<72x128xf32> -> vector<72x128xf32>
    %179 = arith.addf %173, %178 : vector<72x128xf32>
    %c13_118 = arith.constant 13 : index
    %c0_119 = arith.constant 0 : index
    %180 = vector.load %arg21[%c13_118, %c0_119] : memref<88x128xf32, #tpu.memory_space<vmem>>, vector<72x128xf32>
    %181 = arith.truncf %180 : vector<72x128xf32> to vector<72x128xbf16>
    %c6_120 = arith.constant 6 : index
    %c0_121 = arith.constant 0 : index
    %c0_122 = arith.constant 0 : index
    %182 = vector.load %arg8[%c6_120, %c0_121, %c0_122] : memref<9x128x128xbf16, #tpu.memory_space<vmem>>, vector<1x128x128xbf16>
    %183 = vector.shape_cast %182 : vector<1x128x128xbf16> to vector<128x128xbf16>
    %cst_123 = arith.constant dense<0.000000e+00> : vector<72x128xf32>
    %184 = tpu.matmul %181, %183, %cst_123 {dimension_numbers = #tpu.dot_dimension_numbers<[1], [0], [0], [1], [0, 0, 1, 1], [], []>} : vector<72x128xbf16>, vector<128x128xbf16>, vector<72x128xf32> -> vector<72x128xf32>
    %185 = arith.addf %179, %184 : vector<72x128xf32>
    %c14_124 = arith.constant 14 : index
    %c0_125 = arith.constant 0 : index
    %186 = vector.load %arg21[%c14_124, %c0_125] : memref<88x128xf32, #tpu.memory_space<vmem>>, vector<72x128xf32>
    %187 = arith.truncf %186 : vector<72x128xf32> to vector<72x128xbf16>
    %c7_126 = arith.constant 7 : index
    %c0_127 = arith.constant 0 : index
    %c0_128 = arith.constant 0 : index
    %188 = vector.load %arg8[%c7_126, %c0_127, %c0_128] : memref<9x128x128xbf16, #tpu.memory_space<vmem>>, vector<1x128x128xbf16>
    %189 = vector.shape_cast %188 : vector<1x128x128xbf16> to vector<128x128xbf16>
    %cst_129 = arith.constant dense<0.000000e+00> : vector<72x128xf32>
    %190 = tpu.matmul %187, %189, %cst_129 {dimension_numbers = #tpu.dot_dimension_numbers<[1], [0], [0], [1], [0, 0, 1, 1], [], []>} : vector<72x128xbf16>, vector<128x128xbf16>, vector<72x128xf32> -> vector<72x128xf32>
    %191 = arith.addf %185, %190 : vector<72x128xf32>
    %c15_130 = arith.constant 15 : index
    %c0_131 = arith.constant 0 : index
    %192 = vector.load %arg21[%c15_130, %c0_131] : memref<88x128xf32, #tpu.memory_space<vmem>>, vector<72x128xf32>
    %193 = arith.truncf %192 : vector<72x128xf32> to vector<72x128xbf16>
    %c8_132 = arith.constant 8 : index
    %c0_133 = arith.constant 0 : index
    %c0_134 = arith.constant 0 : index
    %194 = vector.load %arg8[%c8_132, %c0_133, %c0_134] : memref<9x128x128xbf16, #tpu.memory_space<vmem>>, vector<1x128x128xbf16>
    %195 = vector.shape_cast %194 : vector<1x128x128xbf16> to vector<128x128xbf16>
    %cst_135 = arith.constant dense<0.000000e+00> : vector<72x128xf32>
    %196 = tpu.matmul %193, %195, %cst_135 {dimension_numbers = #tpu.dot_dimension_numbers<[1], [0], [0], [1], [0, 0, 1, 1], [], []>} : vector<72x128xbf16>, vector<128x128xbf16>, vector<72x128xf32> -> vector<72x128xf32>
    %197 = arith.addf %191, %196 : vector<72x128xf32>
    %c0_136 = arith.constant 0 : index
    %c0_137 = arith.constant 0 : index
    %198 = vector.load %arg9[%c0_136, %c0_137] : memref<1x128xf32, #tpu.memory_space<vmem>>, vector<1x128xf32>
    %c0_138 = arith.constant 0 : index
    %c0_139 = arith.constant 0 : index
    %199 = vector.load %arg10[%c0_138, %c0_139] : memref<1x128xf32, #tpu.memory_space<vmem>>, vector<1x128xf32>
    %200 = vector.broadcast %6 : vector<72x1xf32> to vector<72x128xf32>
    %201 = arith.mulf %197, %200 : vector<72x128xf32>
    %cst_140 = arith.constant dense<0.000000e+00> : vector<128xf32>
    %202 = vector.multi_reduction <add>, %201, %cst_140 [0] : vector<72x128xf32> to vector<128xf32>
    %203 = vector.shape_cast %202 : vector<128xf32> to vector<1x128xf32>
    %cst_141 = arith.constant 3.125000e-02 : f32
    %204 = vector.broadcast %cst_141 : f32 to vector<1x128xf32>
    %205 = arith.mulf %203, %204 : vector<1x128xf32>
    %206 = vector.broadcast %205 : vector<1x128xf32> to vector<72x128xf32>
    %207 = arith.subf %197, %206 : vector<72x128xf32>
    %208 = vector.broadcast %6 : vector<72x1xf32> to vector<72x128xf32>
    %209 = arith.mulf %207, %208 : vector<72x128xf32>
    %210 = arith.mulf %209, %209 : vector<72x128xf32>
    %cst_142 = arith.constant dense<0.000000e+00> : vector<128xf32>
    %211 = vector.multi_reduction <add>, %210, %cst_142 [0] : vector<72x128xf32> to vector<128xf32>
    %212 = vector.shape_cast %211 : vector<128xf32> to vector<1x128xf32>
    %cst_143 = arith.constant 3.125000e-02 : f32
    %213 = vector.broadcast %cst_143 : f32 to vector<1x128xf32>
    %214 = arith.mulf %212, %213 : vector<1x128xf32>
    %cst_144 = arith.constant 9.99999974E-6 : f32
    %215 = vector.broadcast %cst_144 : f32 to vector<1x128xf32>
    %216 = arith.addf %214, %215 : vector<1x128xf32>
    %217 = math.rsqrt %216 : vector<1x128xf32>
    %218 = arith.mulf %217, %198 : vector<1x128xf32>
    %219 = vector.broadcast %218 : vector<1x128xf32> to vector<72x128xf32>
    %220 = arith.mulf %209, %219 : vector<72x128xf32>
    %221 = vector.broadcast %199 : vector<1x128xf32> to vector<72x128xf32>
    %222 = vector.broadcast %6 : vector<72x1xf32> to vector<72x128xf32>
    %223 = arith.mulf %221, %222 : vector<72x128xf32>
    %224 = arith.addf %220, %223 : vector<72x128xf32>
    %cst_145 = arith.constant 0.000000e+00 : f32
    %225 = vector.broadcast %cst_145 : f32 to vector<72x128xf32>
    %226 = arith.cmpf oge, %224, %225 : vector<72x128xf32>
    %cst_146 = arith.constant 5.000000e-02 : f32
    %227 = vector.broadcast %cst_146 : f32 to vector<72x128xf32>
    %228 = arith.mulf %227, %224 : vector<72x128xf32>
    %229 = arith.select %226, %224, %228 : vector<72x128xi1>, vector<72x128xf32>
    %c8_147 = arith.constant 8 : index
    %c0_148 = arith.constant 0 : index
    %230 = vector.load %arg22[%c8_147, %c0_148] : memref<88x128xf32, #tpu.memory_space<vmem>>, vector<72x128xf32>
    tpu.vector_store %arg22[%c8_147, %c0_148], %229 {strides = array<i32>} : memref<88x128xf32, #tpu.memory_space<vmem>>, vector<72x128xf32>,
    %c1_149 = arith.constant 1 : index
    %c0_150 = arith.constant 0 : index
    %231 = vector.load %arg22[%c1_149, %c0_150] : memref<88x128xf32, #tpu.memory_space<vmem>>, vector<72x128xf32>
    %232 = arith.truncf %231 : vector<72x128xf32> to vector<72x128xbf16>
    %c0_151 = arith.constant 0 : index
    %c0_152 = arith.constant 0 : index
    %c0_153 = arith.constant 0 : index
    %233 = vector.load %arg11[%c0_151, %c0_152, %c0_153] : memref<9x128x128xbf16, #tpu.memory_space<vmem>>, vector<1x128x128xbf16>
    %234 = vector.shape_cast %233 : vector<1x128x128xbf16> to vector<128x128xbf16>
    %cst_154 = arith.constant dense<0.000000e+00> : vector<72x128xf32>
    %235 = tpu.matmul %232, %234, %cst_154 {dimension_numbers = #tpu.dot_dimension_numbers<[1], [0], [0], [1], [0, 0, 1, 1], [], []>} : vector<72x128xbf16>, vector<128x128xbf16>, vector<72x128xf32> -> vector<72x128xf32>
    %c2_155 = arith.constant 2 : index
    %c0_156 = arith.constant 0 : index
    %236 = vector.load %arg22[%c2_155, %c0_156] : memref<88x128xf32, #tpu.memory_space<vmem>>, vector<72x128xf32>
    %237 = arith.truncf %236 : vector<72x128xf32> to vector<72x128xbf16>
    %c1_157 = arith.constant 1 : index
    %c0_158 = arith.constant 0 : index
    %c0_159 = arith.constant 0 : index
    %238 = vector.load %arg11[%c1_157, %c0_158, %c0_159] : memref<9x128x128xbf16, #tpu.memory_space<vmem>>, vector<1x128x128xbf16>
    %239 = vector.shape_cast %238 : vector<1x128x128xbf16> to vector<128x128xbf16>
    %cst_160 = arith.constant dense<0.000000e+00> : vector<72x128xf32>
    %240 = tpu.matmul %237, %239, %cst_160 {dimension_numbers = #tpu.dot_dimension_numbers<[1], [0], [0], [1], [0, 0, 1, 1], [], []>} : vector<72x128xbf16>, vector<128x128xbf16>, vector<72x128xf32> -> vector<72x128xf32>
    %241 = arith.addf %235, %240 : vector<72x128xf32>
    %c3_161 = arith.constant 3 : index
    %c0_162 = arith.constant 0 : index
    %242 = vector.load %arg22[%c3_161, %c0_162] : memref<88x128xf32, #tpu.memory_space<vmem>>, vector<72x128xf32>
    %243 = arith.truncf %242 : vector<72x128xf32> to vector<72x128xbf16>
    %c2_163 = arith.constant 2 : index
    %c0_164 = arith.constant 0 : index
    %c0_165 = arith.constant 0 : index
    %244 = vector.load %arg11[%c2_163, %c0_164, %c0_165] : memref<9x128x128xbf16, #tpu.memory_space<vmem>>, vector<1x128x128xbf16>
    %245 = vector.shape_cast %244 : vector<1x128x128xbf16> to vector<128x128xbf16>
    %cst_166 = arith.constant dense<0.000000e+00> : vector<72x128xf32>
    %246 = tpu.matmul %243, %245, %cst_166 {dimension_numbers = #tpu.dot_dimension_numbers<[1], [0], [0], [1], [0, 0, 1, 1], [], []>} : vector<72x128xbf16>, vector<128x128xbf16>, vector<72x128xf32> -> vector<72x128xf32>
    %247 = arith.addf %241, %246 : vector<72x128xf32>
    %c7_167 = arith.constant 7 : index
    %c0_168 = arith.constant 0 : index
    %248 = vector.load %arg22[%c7_167, %c0_168] : memref<88x128xf32, #tpu.memory_space<vmem>>, vector<72x128xf32>
    %249 = arith.truncf %248 : vector<72x128xf32> to vector<72x128xbf16>
    %c3_169 = arith.constant 3 : index
    %c0_170 = arith.constant 0 : index
    %c0_171 = arith.constant 0 : index
    %250 = vector.load %arg11[%c3_169, %c0_170, %c0_171] : memref<9x128x128xbf16, #tpu.memory_space<vmem>>, vector<1x128x128xbf16>
    %251 = vector.shape_cast %250 : vector<1x128x128xbf16> to vector<128x128xbf16>
    %cst_172 = arith.constant dense<0.000000e+00> : vector<72x128xf32>
    %252 = tpu.matmul %249, %251, %cst_172 {dimension_numbers = #tpu.dot_dimension_numbers<[1], [0], [0], [1], [0, 0, 1, 1], [], []>} : vector<72x128xbf16>, vector<128x128xbf16>, vector<72x128xf32> -> vector<72x128xf32>
    %253 = arith.addf %247, %252 : vector<72x128xf32>
    %c8_173 = arith.constant 8 : index
    %c0_174 = arith.constant 0 : index
    %254 = vector.load %arg22[%c8_173, %c0_174] : memref<88x128xf32, #tpu.memory_space<vmem>>, vector<72x128xf32>
    %255 = arith.truncf %254 : vector<72x128xf32> to vector<72x128xbf16>
    %c4_175 = arith.constant 4 : index
    %c0_176 = arith.constant 0 : index
    %c0_177 = arith.constant 0 : index
    %256 = vector.load %arg11[%c4_175, %c0_176, %c0_177] : memref<9x128x128xbf16, #tpu.memory_space<vmem>>, vector<1x128x128xbf16>
    %257 = vector.shape_cast %256 : vector<1x128x128xbf16> to vector<128x128xbf16>
    %cst_178 = arith.constant dense<0.000000e+00> : vector<72x128xf32>
    %258 = tpu.matmul %255, %257, %cst_178 {dimension_numbers = #tpu.dot_dimension_numbers<[1], [0], [0], [1], [0, 0, 1, 1], [], []>} : vector<72x128xbf16>, vector<128x128xbf16>, vector<72x128xf32> -> vector<72x128xf32>
    %259 = arith.addf %253, %258 : vector<72x128xf32>
    %c9_179 = arith.constant 9 : index
    %c0_180 = arith.constant 0 : index
    %260 = vector.load %arg22[%c9_179, %c0_180] : memref<88x128xf32, #tpu.memory_space<vmem>>, vector<72x128xf32>
    %261 = arith.truncf %260 : vector<72x128xf32> to vector<72x128xbf16>
    %c5_181 = arith.constant 5 : index
    %c0_182 = arith.constant 0 : index
    %c0_183 = arith.constant 0 : index
    %262 = vector.load %arg11[%c5_181, %c0_182, %c0_183] : memref<9x128x128xbf16, #tpu.memory_space<vmem>>, vector<1x128x128xbf16>
    %263 = vector.shape_cast %262 : vector<1x128x128xbf16> to vector<128x128xbf16>
    %cst_184 = arith.constant dense<0.000000e+00> : vector<72x128xf32>
    %264 = tpu.matmul %261, %263, %cst_184 {dimension_numbers = #tpu.dot_dimension_numbers<[1], [0], [0], [1], [0, 0, 1, 1], [], []>} : vector<72x128xbf16>, vector<128x128xbf16>, vector<72x128xf32> -> vector<72x128xf32>
    %265 = arith.addf %259, %264 : vector<72x128xf32>
    %c13_185 = arith.constant 13 : index
    %c0_186 = arith.constant 0 : index
    %266 = vector.load %arg22[%c13_185, %c0_186] : memref<88x128xf32, #tpu.memory_space<vmem>>, vector<72x128xf32>
    %267 = arith.truncf %266 : vector<72x128xf32> to vector<72x128xbf16>
    %c6_187 = arith.constant 6 : index
    %c0_188 = arith.constant 0 : index
    %c0_189 = arith.constant 0 : index
    %268 = vector.load %arg11[%c6_187, %c0_188, %c0_189] : memref<9x128x128xbf16, #tpu.memory_space<vmem>>, vector<1x128x128xbf16>
    %269 = vector.shape_cast %268 : vector<1x128x128xbf16> to vector<128x128xbf16>
    %cst_190 = arith.constant dense<0.000000e+00> : vector<72x128xf32>
    %270 = tpu.matmul %267, %269, %cst_190 {dimension_numbers = #tpu.dot_dimension_numbers<[1], [0], [0], [1], [0, 0, 1, 1], [], []>} : vector<72x128xbf16>, vector<128x128xbf16>, vector<72x128xf32> -> vector<72x128xf32>
    %271 = arith.addf %265, %270 : vector<72x128xf32>
    %c14_191 = arith.constant 14 : index
    %c0_192 = arith.constant 0 : index
    %272 = vector.load %arg22[%c14_191, %c0_192] : memref<88x128xf32, #tpu.memory_space<vmem>>, vector<72x128xf32>
    %273 = arith.truncf %272 : vector<72x128xf32> to vector<72x128xbf16>
    %c7_193 = arith.constant 7 : index
    %c0_194 = arith.constant 0 : index
    %c0_195 = arith.constant 0 : index
    %274 = vector.load %arg11[%c7_193, %c0_194, %c0_195] : memref<9x128x128xbf16, #tpu.memory_space<vmem>>, vector<1x128x128xbf16>
    %275 = vector.shape_cast %274 : vector<1x128x128xbf16> to vector<128x128xbf16>
    %cst_196 = arith.constant dense<0.000000e+00> : vector<72x128xf32>
    %276 = tpu.matmul %273, %275, %cst_196 {dimension_numbers = #tpu.dot_dimension_numbers<[1], [0], [0], [1], [0, 0, 1, 1], [], []>} : vector<72x128xbf16>, vector<128x128xbf16>, vector<72x128xf32> -> vector<72x128xf32>
    %277 = arith.addf %271, %276 : vector<72x128xf32>
    %c15_197 = arith.constant 15 : index
    %c0_198 = arith.constant 0 : index
    %278 = vector.load %arg22[%c15_197, %c0_198] : memref<88x128xf32, #tpu.memory_space<vmem>>, vector<72x128xf32>
    %279 = arith.truncf %278 : vector<72x128xf32> to vector<72x128xbf16>
    %c8_199 = arith.constant 8 : index
    %c0_200 = arith.constant 0 : index
    %c0_201 = arith.constant 0 : index
    %280 = vector.load %arg11[%c8_199, %c0_200, %c0_201] : memref<9x128x128xbf16, #tpu.memory_space<vmem>>, vector<1x128x128xbf16>
    %281 = vector.shape_cast %280 : vector<1x128x128xbf16> to vector<128x128xbf16>
    %cst_202 = arith.constant dense<0.000000e+00> : vector<72x128xf32>
    %282 = tpu.matmul %279, %281, %cst_202 {dimension_numbers = #tpu.dot_dimension_numbers<[1], [0], [0], [1], [0, 0, 1, 1], [], []>} : vector<72x128xbf16>, vector<128x128xbf16>, vector<72x128xf32> -> vector<72x128xf32>
    %283 = arith.addf %277, %282 : vector<72x128xf32>
    %c0_203 = arith.constant 0 : index
    %c0_204 = arith.constant 0 : index
    %284 = vector.load %arg12[%c0_203, %c0_204] : memref<1x128xf32, #tpu.memory_space<vmem>>, vector<1x128xf32>
    %c0_205 = arith.constant 0 : index
    %c0_206 = arith.constant 0 : index
    %285 = vector.load %arg13[%c0_205, %c0_206] : memref<1x128xf32, #tpu.memory_space<vmem>>, vector<1x128xf32>
    %286 = vector.broadcast %6 : vector<72x1xf32> to vector<72x128xf32>
    %287 = arith.mulf %283, %286 : vector<72x128xf32>
    %cst_207 = arith.constant dense<0.000000e+00> : vector<128xf32>
    %288 = vector.multi_reduction <add>, %287, %cst_207 [0] : vector<72x128xf32> to vector<128xf32>
    %289 = vector.shape_cast %288 : vector<128xf32> to vector<1x128xf32>
    %cst_208 = arith.constant 3.125000e-02 : f32
    %290 = vector.broadcast %cst_208 : f32 to vector<1x128xf32>
    %291 = arith.mulf %289, %290 : vector<1x128xf32>
    %292 = vector.broadcast %291 : vector<1x128xf32> to vector<72x128xf32>
    %293 = arith.subf %283, %292 : vector<72x128xf32>
    %294 = vector.broadcast %6 : vector<72x1xf32> to vector<72x128xf32>
    %295 = arith.mulf %293, %294 : vector<72x128xf32>
    %296 = arith.mulf %295, %295 : vector<72x128xf32>
    %cst_209 = arith.constant dense<0.000000e+00> : vector<128xf32>
    %297 = vector.multi_reduction <add>, %296, %cst_209 [0] : vector<72x128xf32> to vector<128xf32>
    %298 = vector.shape_cast %297 : vector<128xf32> to vector<1x128xf32>
    %cst_210 = arith.constant 3.125000e-02 : f32
    %299 = vector.broadcast %cst_210 : f32 to vector<1x128xf32>
    %300 = arith.mulf %298, %299 : vector<1x128xf32>
    %cst_211 = arith.constant 9.99999974E-6 : f32
    %301 = vector.broadcast %cst_211 : f32 to vector<1x128xf32>
    %302 = arith.addf %300, %301 : vector<1x128xf32>
    %303 = math.rsqrt %302 : vector<1x128xf32>
    %304 = arith.mulf %303, %284 : vector<1x128xf32>
    %305 = vector.broadcast %304 : vector<1x128xf32> to vector<72x128xf32>
    %306 = arith.mulf %295, %305 : vector<72x128xf32>
    %307 = vector.broadcast %285 : vector<1x128xf32> to vector<72x128xf32>
    %308 = vector.broadcast %6 : vector<72x1xf32> to vector<72x128xf32>
    %309 = arith.mulf %307, %308 : vector<72x128xf32>
    %310 = arith.addf %306, %309 : vector<72x128xf32>
    %cst_212 = arith.constant 0.000000e+00 : f32
    %311 = vector.broadcast %cst_212 : f32 to vector<72x128xf32>
    %312 = arith.cmpf oge, %310, %311 : vector<72x128xf32>
    %cst_213 = arith.constant 5.000000e-02 : f32
    %313 = vector.broadcast %cst_213 : f32 to vector<72x128xf32>
    %314 = arith.mulf %313, %310 : vector<72x128xf32>
    %315 = arith.select %312, %310, %314 : vector<72x128xi1>, vector<72x128xf32>
    %c8_214 = arith.constant 8 : index
    %c0_215 = arith.constant 0 : index
    %316 = vector.load %arg21[%c8_214, %c0_215] : memref<88x128xf32, #tpu.memory_space<vmem>>, vector<72x128xf32>
    tpu.vector_store %arg21[%c8_214, %c0_215], %315 {strides = array<i32>} : memref<88x128xf32, #tpu.memory_space<vmem>>, vector<72x128xf32>,
    %c1_216 = arith.constant 1 : index
    %c0_217 = arith.constant 0 : index
    %317 = vector.load %arg21[%c1_216, %c0_217] : memref<88x128xf32, #tpu.memory_space<vmem>>, vector<72x128xf32>
    %318 = arith.truncf %317 : vector<72x128xf32> to vector<72x128xbf16>
    %c0_218 = arith.constant 0 : index
    %c0_219 = arith.constant 0 : index
    %c0_220 = arith.constant 0 : index
    %319 = vector.load %arg14[%c0_218, %c0_219, %c0_220] : memref<9x128x256xbf16, #tpu.memory_space<vmem>>, vector<1x128x256xbf16>
    %320 = vector.shape_cast %319 : vector<1x128x256xbf16> to vector<128x256xbf16>
    %cst_221 = arith.constant dense<0.000000e+00> : vector<72x256xf32>
    %321 = tpu.matmul %318, %320, %cst_221 {dimension_numbers = #tpu.dot_dimension_numbers<[1], [0], [0], [1], [0, 0, 1, 1], [], []>} : vector<72x128xbf16>, vector<128x256xbf16>, vector<72x256xf32> -> vector<72x256xf32>
    %c2_222 = arith.constant 2 : index
    %c0_223 = arith.constant 0 : index
    %322 = vector.load %arg21[%c2_222, %c0_223] : memref<88x128xf32, #tpu.memory_space<vmem>>, vector<72x128xf32>
    %323 = arith.truncf %322 : vector<72x128xf32> to vector<72x128xbf16>
    %c1_224 = arith.constant 1 : index
    %c0_225 = arith.constant 0 : index
    %c0_226 = arith.constant 0 : index
    %324 = vector.load %arg14[%c1_224, %c0_225, %c0_226] : memref<9x128x256xbf16, #tpu.memory_space<vmem>>, vector<1x128x256xbf16>
    %325 = vector.shape_cast %324 : vector<1x128x256xbf16> to vector<128x256xbf16>
    %cst_227 = arith.constant dense<0.000000e+00> : vector<72x256xf32>
    %326 = tpu.matmul %323, %325, %cst_227 {dimension_numbers = #tpu.dot_dimension_numbers<[1], [0], [0], [1], [0, 0, 1, 1], [], []>} : vector<72x128xbf16>, vector<128x256xbf16>, vector<72x256xf32> -> vector<72x256xf32>
    %327 = arith.addf %321, %326 : vector<72x256xf32>
    %c3_228 = arith.constant 3 : index
    %c0_229 = arith.constant 0 : index
    %328 = vector.load %arg21[%c3_228, %c0_229] : memref<88x128xf32, #tpu.memory_space<vmem>>, vector<72x128xf32>
    %329 = arith.truncf %328 : vector<72x128xf32> to vector<72x128xbf16>
    %c2_230 = arith.constant 2 : index
    %c0_231 = arith.constant 0 : index
    %c0_232 = arith.constant 0 : index
    %330 = vector.load %arg14[%c2_230, %c0_231, %c0_232] : memref<9x128x256xbf16, #tpu.memory_space<vmem>>, vector<1x128x256xbf16>
    %331 = vector.shape_cast %330 : vector<1x128x256xbf16> to vector<128x256xbf16>
    %cst_233 = arith.constant dense<0.000000e+00> : vector<72x256xf32>
    %332 = tpu.matmul %329, %331, %cst_233 {dimension_numbers = #tpu.dot_dimension_numbers<[1], [0], [0], [1], [0, 0, 1, 1], [], []>} : vector<72x128xbf16>, vector<128x256xbf16>, vector<72x256xf32> -> vector<72x256xf32>
    %333 = arith.addf %327, %332 : vector<72x256xf32>
    %c7_234 = arith.constant 7 : index
    %c0_235 = arith.constant 0 : index
    %334 = vector.load %arg21[%c7_234, %c0_235] : memref<88x128xf32, #tpu.memory_space<vmem>>, vector<72x128xf32>
    %335 = arith.truncf %334 : vector<72x128xf32> to vector<72x128xbf16>
    %c3_236 = arith.constant 3 : index
    %c0_237 = arith.constant 0 : index
    %c0_238 = arith.constant 0 : index
    %336 = vector.load %arg14[%c3_236, %c0_237, %c0_238] : memref<9x128x256xbf16, #tpu.memory_space<vmem>>, vector<1x128x256xbf16>
    %337 = vector.shape_cast %336 : vector<1x128x256xbf16> to vector<128x256xbf16>
    %cst_239 = arith.constant dense<0.000000e+00> : vector<72x256xf32>
    %338 = tpu.matmul %335, %337, %cst_239 {dimension_numbers = #tpu.dot_dimension_numbers<[1], [0], [0], [1], [0, 0, 1, 1], [], []>} : vector<72x128xbf16>, vector<128x256xbf16>, vector<72x256xf32> -> vector<72x256xf32>
    %339 = arith.addf %333, %338 : vector<72x256xf32>
    %c8_240 = arith.constant 8 : index
    %c0_241 = arith.constant 0 : index
    %340 = vector.load %arg21[%c8_240, %c0_241] : memref<88x128xf32, #tpu.memory_space<vmem>>, vector<72x128xf32>
    %341 = arith.truncf %340 : vector<72x128xf32> to vector<72x128xbf16>
    %c4_242 = arith.constant 4 : index
    %c0_243 = arith.constant 0 : index
    %c0_244 = arith.constant 0 : index
    %342 = vector.load %arg14[%c4_242, %c0_243, %c0_244] : memref<9x128x256xbf16, #tpu.memory_space<vmem>>, vector<1x128x256xbf16>
    %343 = vector.shape_cast %342 : vector<1x128x256xbf16> to vector<128x256xbf16>
    %cst_245 = arith.constant dense<0.000000e+00> : vector<72x256xf32>
    %344 = tpu.matmul %341, %343, %cst_245 {dimension_numbers = #tpu.dot_dimension_numbers<[1], [0], [0], [1], [0, 0, 1, 1], [], []>} : vector<72x128xbf16>, vector<128x256xbf16>, vector<72x256xf32> -> vector<72x256xf32>
    %345 = arith.addf %339, %344 : vector<72x256xf32>
    %c9_246 = arith.constant 9 : index
    %c0_247 = arith.constant 0 : index
    %346 = vector.load %arg21[%c9_246, %c0_247] : memref<88x128xf32, #tpu.memory_space<vmem>>, vector<72x128xf32>
    %347 = arith.truncf %346 : vector<72x128xf32> to vector<72x128xbf16>
    %c5_248 = arith.constant 5 : index
    %c0_249 = arith.constant 0 : index
    %c0_250 = arith.constant 0 : index
    %348 = vector.load %arg14[%c5_248, %c0_249, %c0_250] : memref<9x128x256xbf16, #tpu.memory_space<vmem>>, vector<1x128x256xbf16>
    %349 = vector.shape_cast %348 : vector<1x128x256xbf16> to vector<128x256xbf16>
    %cst_251 = arith.constant dense<0.000000e+00> : vector<72x256xf32>
    %350 = tpu.matmul %347, %349, %cst_251 {dimension_numbers = #tpu.dot_dimension_numbers<[1], [0], [0], [1], [0, 0, 1, 1], [], []>} : vector<72x128xbf16>, vector<128x256xbf16>, vector<72x256xf32> -> vector<72x256xf32>
    %351 = arith.addf %345, %350 : vector<72x256xf32>
    %c13_252 = arith.constant 13 : index
    %c0_253 = arith.constant 0 : index
    %352 = vector.load %arg21[%c13_252, %c0_253] : memref<88x128xf32, #tpu.memory_space<vmem>>, vector<72x128xf32>
    %353 = arith.truncf %352 : vector<72x128xf32> to vector<72x128xbf16>
    %c6_254 = arith.constant 6 : index
    %c0_255 = arith.constant 0 : index
    %c0_256 = arith.constant 0 : index
    %354 = vector.load %arg14[%c6_254, %c0_255, %c0_256] : memref<9x128x256xbf16, #tpu.memory_space<vmem>>, vector<1x128x256xbf16>
    %355 = vector.shape_cast %354 : vector<1x128x256xbf16> to vector<128x256xbf16>
    %cst_257 = arith.constant dense<0.000000e+00> : vector<72x256xf32>
    %356 = tpu.matmul %353, %355, %cst_257 {dimension_numbers = #tpu.dot_dimension_numbers<[1], [0], [0], [1], [0, 0, 1, 1], [], []>} : vector<72x128xbf16>, vector<128x256xbf16>, vector<72x256xf32> -> vector<72x256xf32>
    %357 = arith.addf %351, %356 : vector<72x256xf32>
    %c14_258 = arith.constant 14 : index
    %c0_259 = arith.constant 0 : index
    %358 = vector.load %arg21[%c14_258, %c0_259] : memref<88x128xf32, #tpu.memory_space<vmem>>, vector<72x128xf32>
    %359 = arith.truncf %358 : vector<72x128xf32> to vector<72x128xbf16>
    %c7_260 = arith.constant 7 : index
    %c0_261 = arith.constant 0 : index
    %c0_262 = arith.constant 0 : index
    %360 = vector.load %arg14[%c7_260, %c0_261, %c0_262] : memref<9x128x256xbf16, #tpu.memory_space<vmem>>, vector<1x128x256xbf16>
    %361 = vector.shape_cast %360 : vector<1x128x256xbf16> to vector<128x256xbf16>
    %cst_263 = arith.constant dense<0.000000e+00> : vector<72x256xf32>
    %362 = tpu.matmul %359, %361, %cst_263 {dimension_numbers = #tpu.dot_dimension_numbers<[1], [0], [0], [1], [0, 0, 1, 1], [], []>} : vector<72x128xbf16>, vector<128x256xbf16>, vector<72x256xf32> -> vector<72x256xf32>
    %363 = arith.addf %357, %362 : vector<72x256xf32>
    %c15_264 = arith.constant 15 : index
    %c0_265 = arith.constant 0 : index
    %364 = vector.load %arg21[%c15_264, %c0_265] : memref<88x128xf32, #tpu.memory_space<vmem>>, vector<72x128xf32>
    %365 = arith.truncf %364 : vector<72x128xf32> to vector<72x128xbf16>
    %c8_266 = arith.constant 8 : index
    %c0_267 = arith.constant 0 : index
    %c0_268 = arith.constant 0 : index
    %366 = vector.load %arg14[%c8_266, %c0_267, %c0_268] : memref<9x128x256xbf16, #tpu.memory_space<vmem>>, vector<1x128x256xbf16>
    %367 = vector.shape_cast %366 : vector<1x128x256xbf16> to vector<128x256xbf16>
    %cst_269 = arith.constant dense<0.000000e+00> : vector<72x256xf32>
    %368 = tpu.matmul %365, %367, %cst_269 {dimension_numbers = #tpu.dot_dimension_numbers<[1], [0], [0], [1], [0, 0, 1, 1], [], []>} : vector<72x128xbf16>, vector<128x256xbf16>, vector<72x256xf32> -> vector<72x256xf32>
    %369 = arith.addf %363, %368 : vector<72x256xf32>
    %c0_270 = arith.constant 0 : index
    %c0_271 = arith.constant 0 : index
    %370 = vector.load %arg15[%c0_270, %c0_271] : memref<1x256xf32, #tpu.memory_space<vmem>>, vector<1x256xf32>
    %c0_272 = arith.constant 0 : index
    %c0_273 = arith.constant 0 : index
    %371 = vector.load %arg16[%c0_272, %c0_273] : memref<1x256xf32, #tpu.memory_space<vmem>>, vector<1x256xf32>
    %372 = vector.broadcast %6 : vector<72x1xf32> to vector<72x256xf32>
    %373 = arith.mulf %369, %372 : vector<72x256xf32>
    %cst_274 = arith.constant dense<0.000000e+00> : vector<256xf32>
    %374 = vector.multi_reduction <add>, %373, %cst_274 [0] : vector<72x256xf32> to vector<256xf32>
    %375 = vector.shape_cast %374 : vector<256xf32> to vector<1x256xf32>
    %376 = vector.extract_strided_slice %375 {offsets = [0, 0], sizes = [1, 64], strides = [1, 1]} : vector<1x256xf32> to vector<1x64xf32>
    %377 = vector.extract_strided_slice %375 {offsets = [0, 64], sizes = [1, 64], strides = [1, 1]} : vector<1x256xf32> to vector<1x64xf32>
    %378 = arith.addf %376, %377 : vector<1x64xf32>
    %379 = vector.extract_strided_slice %375 {offsets = [0, 128], sizes = [1, 64], strides = [1, 1]} : vector<1x256xf32> to vector<1x64xf32>
    %380 = arith.addf %378, %379 : vector<1x64xf32>
    %381 = vector.extract_strided_slice %375 {offsets = [0, 192], sizes = [1, 64], strides = [1, 1]} : vector<1x256xf32> to vector<1x64xf32>
    %382 = arith.addf %380, %381 : vector<1x64xf32>
    %383 = tpu.concatenate %382, %382, %382, %382 in 1 : vector<1x64xf32>, vector<1x64xf32>, vector<1x64xf32>, vector<1x64xf32> -> vector<1x256xf32>
    %cst_275 = arith.constant 7.812500e-03 : f32
    %384 = vector.broadcast %cst_275 : f32 to vector<1x256xf32>
    %385 = arith.mulf %383, %384 : vector<1x256xf32>
    %386 = vector.broadcast %385 : vector<1x256xf32> to vector<72x256xf32>
    %387 = arith.subf %369, %386 : vector<72x256xf32>
    %388 = vector.broadcast %6 : vector<72x1xf32> to vector<72x256xf32>
    %389 = arith.mulf %387, %388 : vector<72x256xf32>
    %390 = arith.mulf %389, %389 : vector<72x256xf32>
    %cst_276 = arith.constant dense<0.000000e+00> : vector<256xf32>
    %391 = vector.multi_reduction <add>, %390, %cst_276 [0] : vector<72x256xf32> to vector<256xf32>
    %392 = vector.shape_cast %391 : vector<256xf32> to vector<1x256xf32>
    %393 = vector.extract_strided_slice %392 {offsets = [0, 0], sizes = [1, 64], strides = [1, 1]} : vector<1x256xf32> to vector<1x64xf32>
    %394 = vector.extract_strided_slice %392 {offsets = [0, 64], sizes = [1, 64], strides = [1, 1]} : vector<1x256xf32> to vector<1x64xf32>
    %395 = arith.addf %393, %394 : vector<1x64xf32>
    %396 = vector.extract_strided_slice %392 {offsets = [0, 128], sizes = [1, 64], strides = [1, 1]} : vector<1x256xf32> to vector<1x64xf32>
    %397 = arith.addf %395, %396 : vector<1x64xf32>
    %398 = vector.extract_strided_slice %392 {offsets = [0, 192], sizes = [1, 64], strides = [1, 1]} : vector<1x256xf32> to vector<1x64xf32>
    %399 = arith.addf %397, %398 : vector<1x64xf32>
    %400 = tpu.concatenate %399, %399, %399, %399 in 1 : vector<1x64xf32>, vector<1x64xf32>, vector<1x64xf32>, vector<1x64xf32> -> vector<1x256xf32>
    %cst_277 = arith.constant 7.812500e-03 : f32
    %401 = vector.broadcast %cst_277 : f32 to vector<1x256xf32>
    %402 = arith.mulf %400, %401 : vector<1x256xf32>
    %cst_278 = arith.constant 9.99999974E-6 : f32
    %403 = vector.broadcast %cst_278 : f32 to vector<1x256xf32>
    %404 = arith.addf %402, %403 : vector<1x256xf32>
    %405 = math.rsqrt %404 : vector<1x256xf32>
    %406 = arith.mulf %405, %370 : vector<1x256xf32>
    %407 = vector.broadcast %406 : vector<1x256xf32> to vector<72x256xf32>
    %408 = arith.mulf %389, %407 : vector<72x256xf32>
    %409 = vector.broadcast %371 : vector<1x256xf32> to vector<72x256xf32>
    %410 = vector.broadcast %6 : vector<72x1xf32> to vector<72x256xf32>
    %411 = arith.mulf %409, %410 : vector<72x256xf32>
    %412 = arith.addf %408, %411 : vector<72x256xf32>
    %cst_279 = arith.constant 0.000000e+00 : f32
    %413 = vector.broadcast %cst_279 : f32 to vector<72x256xf32>
    %414 = arith.cmpf oge, %412, %413 : vector<72x256xf32>
    %cst_280 = arith.constant 5.000000e-02 : f32
    %415 = vector.broadcast %cst_280 : f32 to vector<72x256xf32>
    %416 = arith.mulf %415, %412 : vector<72x256xf32>
    %417 = arith.select %414, %412, %416 : vector<72x256xi1>, vector<72x256xf32>
    %c8_281 = arith.constant 8 : index
    %c0_282 = arith.constant 0 : index
    %418 = vector.load %arg20[%c8_281, %c0_282] : memref<88x256xf32, #tpu.memory_space<vmem>>, vector<72x256xf32>
    tpu.vector_store %arg20[%c8_281, %c0_282], %417 {strides = array<i32>} : memref<88x256xf32, #tpu.memory_space<vmem>>, vector<72x256xf32>,
    %c1_283 = arith.constant 1 : index
    %c0_284 = arith.constant 0 : index
    %419 = vector.load %arg20[%c1_283, %c0_284] : memref<88x256xf32, #tpu.memory_space<vmem>>, vector<72x256xf32>
    %420 = arith.truncf %419 : vector<72x256xf32> to vector<72x256xbf16>
    %c0_285 = arith.constant 0 : index
    %c0_286 = arith.constant 0 : index
    %c0_287 = arith.constant 0 : index
    %421 = vector.load %arg17[%c0_285, %c0_286, %c0_287] : memref<9x256x128xbf16, #tpu.memory_space<vmem>>, vector<1x256x128xbf16>
    %422 = vector.shape_cast %421 : vector<1x256x128xbf16> to vector<256x128xbf16>
    %cst_288 = arith.constant dense<0.000000e+00> : vector<72x128xf32>
    %423 = tpu.matmul %420, %422, %cst_288 {dimension_numbers = #tpu.dot_dimension_numbers<[1], [0], [0], [1], [0, 0, 1, 1], [], []>} : vector<72x256xbf16>, vector<256x128xbf16>, vector<72x128xf32> -> vector<72x128xf32>
    %c2_289 = arith.constant 2 : index
    %c0_290 = arith.constant 0 : index
    %424 = vector.load %arg20[%c2_289, %c0_290] : memref<88x256xf32, #tpu.memory_space<vmem>>, vector<72x256xf32>
    %425 = arith.truncf %424 : vector<72x256xf32> to vector<72x256xbf16>
    %c1_291 = arith.constant 1 : index
    %c0_292 = arith.constant 0 : index
    %c0_293 = arith.constant 0 : index
    %426 = vector.load %arg17[%c1_291, %c0_292, %c0_293] : memref<9x256x128xbf16, #tpu.memory_space<vmem>>, vector<1x256x128xbf16>
    %427 = vector.shape_cast %426 : vector<1x256x128xbf16> to vector<256x128xbf16>
    %cst_294 = arith.constant dense<0.000000e+00> : vector<72x128xf32>
    %428 = tpu.matmul %425, %427, %cst_294 {dimension_numbers = #tpu.dot_dimension_numbers<[1], [0], [0], [1], [0, 0, 1, 1], [], []>} : vector<72x256xbf16>, vector<256x128xbf16>, vector<72x128xf32> -> vector<72x128xf32>
    %429 = arith.addf %423, %428 : vector<72x128xf32>
    %c3_295 = arith.constant 3 : index
    %c0_296 = arith.constant 0 : index
    %430 = vector.load %arg20[%c3_295, %c0_296] : memref<88x256xf32, #tpu.memory_space<vmem>>, vector<72x256xf32>
    %431 = arith.truncf %430 : vector<72x256xf32> to vector<72x256xbf16>
    %c2_297 = arith.constant 2 : index
    %c0_298 = arith.constant 0 : index
    %c0_299 = arith.constant 0 : index
    %432 = vector.load %arg17[%c2_297, %c0_298, %c0_299] : memref<9x256x128xbf16, #tpu.memory_space<vmem>>, vector<1x256x128xbf16>
    %433 = vector.shape_cast %432 : vector<1x256x128xbf16> to vector<256x128xbf16>
    %cst_300 = arith.constant dense<0.000000e+00> : vector<72x128xf32>
    %434 = tpu.matmul %431, %433, %cst_300 {dimension_numbers = #tpu.dot_dimension_numbers<[1], [0], [0], [1], [0, 0, 1, 1], [], []>} : vector<72x256xbf16>, vector<256x128xbf16>, vector<72x128xf32> -> vector<72x128xf32>
    %435 = arith.addf %429, %434 : vector<72x128xf32>
    %c7_301 = arith.constant 7 : index
    %c0_302 = arith.constant 0 : index
    %436 = vector.load %arg20[%c7_301, %c0_302] : memref<88x256xf32, #tpu.memory_space<vmem>>, vector<72x256xf32>
    %437 = arith.truncf %436 : vector<72x256xf32> to vector<72x256xbf16>
    %c3_303 = arith.constant 3 : index
    %c0_304 = arith.constant 0 : index
    %c0_305 = arith.constant 0 : index
    %438 = vector.load %arg17[%c3_303, %c0_304, %c0_305] : memref<9x256x128xbf16, #tpu.memory_space<vmem>>, vector<1x256x128xbf16>
    %439 = vector.shape_cast %438 : vector<1x256x128xbf16> to vector<256x128xbf16>
    %cst_306 = arith.constant dense<0.000000e+00> : vector<72x128xf32>
    %440 = tpu.matmul %437, %439, %cst_306 {dimension_numbers = #tpu.dot_dimension_numbers<[1], [0], [0], [1], [0, 0, 1, 1], [], []>} : vector<72x256xbf16>, vector<256x128xbf16>, vector<72x128xf32> -> vector<72x128xf32>
    %441 = arith.addf %435, %440 : vector<72x128xf32>
    %c8_307 = arith.constant 8 : index
    %c0_308 = arith.constant 0 : index
    %442 = vector.load %arg20[%c8_307, %c0_308] : memref<88x256xf32, #tpu.memory_space<vmem>>, vector<72x256xf32>
    %443 = arith.truncf %442 : vector<72x256xf32> to vector<72x256xbf16>
    %c4_309 = arith.constant 4 : index
    %c0_310 = arith.constant 0 : index
    %c0_311 = arith.constant 0 : index
    %444 = vector.load %arg17[%c4_309, %c0_310, %c0_311] : memref<9x256x128xbf16, #tpu.memory_space<vmem>>, vector<1x256x128xbf16>
    %445 = vector.shape_cast %444 : vector<1x256x128xbf16> to vector<256x128xbf16>
    %cst_312 = arith.constant dense<0.000000e+00> : vector<72x128xf32>
    %446 = tpu.matmul %443, %445, %cst_312 {dimension_numbers = #tpu.dot_dimension_numbers<[1], [0], [0], [1], [0, 0, 1, 1], [], []>} : vector<72x256xbf16>, vector<256x128xbf16>, vector<72x128xf32> -> vector<72x128xf32>
    %447 = arith.addf %441, %446 : vector<72x128xf32>
    %c9_313 = arith.constant 9 : index
    %c0_314 = arith.constant 0 : index
    %448 = vector.load %arg20[%c9_313, %c0_314] : memref<88x256xf32, #tpu.memory_space<vmem>>, vector<72x256xf32>
    %449 = arith.truncf %448 : vector<72x256xf32> to vector<72x256xbf16>
    %c5_315 = arith.constant 5 : index
    %c0_316 = arith.constant 0 : index
    %c0_317 = arith.constant 0 : index
    %450 = vector.load %arg17[%c5_315, %c0_316, %c0_317] : memref<9x256x128xbf16, #tpu.memory_space<vmem>>, vector<1x256x128xbf16>
    %451 = vector.shape_cast %450 : vector<1x256x128xbf16> to vector<256x128xbf16>
    %cst_318 = arith.constant dense<0.000000e+00> : vector<72x128xf32>
    %452 = tpu.matmul %449, %451, %cst_318 {dimension_numbers = #tpu.dot_dimension_numbers<[1], [0], [0], [1], [0, 0, 1, 1], [], []>} : vector<72x256xbf16>, vector<256x128xbf16>, vector<72x128xf32> -> vector<72x128xf32>
    %453 = arith.addf %447, %452 : vector<72x128xf32>
    %c13_319 = arith.constant 13 : index
    %c0_320 = arith.constant 0 : index
    %454 = vector.load %arg20[%c13_319, %c0_320] : memref<88x256xf32, #tpu.memory_space<vmem>>, vector<72x256xf32>
    %455 = arith.truncf %454 : vector<72x256xf32> to vector<72x256xbf16>
    %c6_321 = arith.constant 6 : index
    %c0_322 = arith.constant 0 : index
    %c0_323 = arith.constant 0 : index
    %456 = vector.load %arg17[%c6_321, %c0_322, %c0_323] : memref<9x256x128xbf16, #tpu.memory_space<vmem>>, vector<1x256x128xbf16>
    %457 = vector.shape_cast %456 : vector<1x256x128xbf16> to vector<256x128xbf16>
    %cst_324 = arith.constant dense<0.000000e+00> : vector<72x128xf32>
    %458 = tpu.matmul %455, %457, %cst_324 {dimension_numbers = #tpu.dot_dimension_numbers<[1], [0], [0], [1], [0, 0, 1, 1], [], []>} : vector<72x256xbf16>, vector<256x128xbf16>, vector<72x128xf32> -> vector<72x128xf32>
    %459 = arith.addf %453, %458 : vector<72x128xf32>
    %c14_325 = arith.constant 14 : index
    %c0_326 = arith.constant 0 : index
    %460 = vector.load %arg20[%c14_325, %c0_326] : memref<88x256xf32, #tpu.memory_space<vmem>>, vector<72x256xf32>
    %461 = arith.truncf %460 : vector<72x256xf32> to vector<72x256xbf16>
    %c7_327 = arith.constant 7 : index
    %c0_328 = arith.constant 0 : index
    %c0_329 = arith.constant 0 : index
    %462 = vector.load %arg17[%c7_327, %c0_328, %c0_329] : memref<9x256x128xbf16, #tpu.memory_space<vmem>>, vector<1x256x128xbf16>
    %463 = vector.shape_cast %462 : vector<1x256x128xbf16> to vector<256x128xbf16>
    %cst_330 = arith.constant dense<0.000000e+00> : vector<72x128xf32>
    %464 = tpu.matmul %461, %463, %cst_330 {dimension_numbers = #tpu.dot_dimension_numbers<[1], [0], [0], [1], [0, 0, 1, 1], [], []>} : vector<72x256xbf16>, vector<256x128xbf16>, vector<72x128xf32> -> vector<72x128xf32>
    %465 = arith.addf %459, %464 : vector<72x128xf32>
    %c15_331 = arith.constant 15 : index
    %c0_332 = arith.constant 0 : index
    %466 = vector.load %arg20[%c15_331, %c0_332] : memref<88x256xf32, #tpu.memory_space<vmem>>, vector<72x256xf32>
    %467 = arith.truncf %466 : vector<72x256xf32> to vector<72x256xbf16>
    %c8_333 = arith.constant 8 : index
    %c0_334 = arith.constant 0 : index
    %c0_335 = arith.constant 0 : index
    %468 = vector.load %arg17[%c8_333, %c0_334, %c0_335] : memref<9x256x128xbf16, #tpu.memory_space<vmem>>, vector<1x256x128xbf16>
    %469 = vector.shape_cast %468 : vector<1x256x128xbf16> to vector<256x128xbf16>
    %cst_336 = arith.constant dense<0.000000e+00> : vector<72x128xf32>
    %470 = tpu.matmul %467, %469, %cst_336 {dimension_numbers = #tpu.dot_dimension_numbers<[1], [0], [0], [1], [0, 0, 1, 1], [], []>} : vector<72x256xbf16>, vector<256x128xbf16>, vector<72x128xf32> -> vector<72x128xf32>
    %471 = arith.addf %465, %470 : vector<72x128xf32>
    %c0_337 = arith.constant 0 : index
    %c0_338 = arith.constant 0 : index
    %472 = vector.load %arg18[%c0_337, %c0_338] : memref<1x128xf32, #tpu.memory_space<vmem>>, vector<1x128xf32>
    %473 = vector.broadcast %472 : vector<1x128xf32> to vector<72x128xf32>
    %474 = arith.addf %471, %473 : vector<72x128xf32>
    %475 = math.tanh %474 : vector<72x128xf32>
    %c0_339 = arith.constant 0 : index
    %c0_340 = arith.constant 0 : index
    %476 = vector.load %arg19[%c0_339, %c0_340] : memref<72x128xf32, #tpu.memory_space<vmem>>, vector<72x128xf32>
    tpu.vector_store %arg19[%c0_339, %c0_340], %475 {strides = array<i32>} : memref<72x128xf32, #tpu.memory_space<vmem>>, vector<72x128xf32>,
    return
  }
}

</mosaic_0001>

<bundles_post_ra>
// kernel: g12_forward.1
= control target key start
LH: loop header
LB: loop body
LE: loop exit
PB: predicated region body
PF: predicated region fallthrough
CT: control target
= control target key end

     0   :  { %s20156_s0 = inlined_call_operand.vmem [shape: bf16[72,64], index: 0, kind: input, shape index: {}]   ;;  %s20157_s1 = inlined_call_operand.vmem [shape: f32[72,1], index: 1, kind: input, shape index: {}]   ;;  %s20158_s2 = inlined_call_operand.hbm [shape: bf16[64,256], index: 2, kind: input, shape index: {}]   ;;  %s20159_s3 = inlined_call_operand.vmem [shape: f32[1,256], index: 3, kind: input, shape index: {}]   ;;  %s20160_s4 = inlined_call_operand.vmem [shape: f32[1,256], index: 4, kind: input, shape index: {}]   ;;  %s20161_s5 = inlined_call_operand.vmem [shape: bf16[9,256,128], index: 5, kind: input, shape index: {}]   ;;  %s20162_s6 = inlined_call_operand.vmem [shape: f32[1,128], index: 6, kind: input, shape index: {}]   ;;  %s20163_s7 = inlined_call_operand.vmem [shape: f32[1,128], index: 7, kind: input, shape index: {}]   ;;  %s20164_s8 = inlined_call_operand.vmem [shape: bf16[9,128,128], index: 8, kind: input, shape index: {}]   ;;  %s20165_s9 = inlined_call_operand.vmem [shape: f32[1,128], index: 9, kind: input, shape index: {}]   ;;  %s20166_s10 = inlined_call_operand.vmem [shape: f32[1,128], index: 10, kind: input, shape index: {}]   ;;  %s20167_s11 = inlined_call_operand.hbm [shape: bf16[9,128,128], index: 11, kind: input, shape index: {}]   ;;  %s20168_s12 = inlined_call_operand.vmem [shape: f32[1,128], index: 12, kind: input, shape index: {}]   ;;  %s20169_s13 = inlined_call_operand.vmem [shape: f32[1,128], index: 13, kind: input, shape index: {}]   ;;  %s20170_s14 = inlined_call_operand.vmem [shape: bf16[9,128,256], index: 14, kind: input, shape index: {}]   ;;  %s20171_s15 = inlined_call_operand.vmem [shape: f32[1,256], index: 15, kind: input, shape index: {}]   ;;  %s20172_s16 = inlined_call_operand.vmem [shape: f32[1,256], index: 16, kind: input, shape index: {}]   ;;  %s20173_s17 = inlined_call_operand.vmem [shape: bf16[9,256,128], index: 17, kind: input, shape index: {}]   ;;  %s20174_s18 = inlined_call_operand.vmem [shape: f32[1,128], index: 18, kind: input, shape index: {}]   ;;  %s20175_s19 = inlined_call_operand.vmem [shape: f32[72,128], index: 19, kind: output, shape index: {}]  }
   0x1   :  { %20219 = sst [smem:[#allocation43_spill]] %s20156_s0 }
   0x2   :  { %20220 = sst [smem:[#allocation44_spill]] %s20157_s1 }
   0x3   :  { %20221 = sst [smem:[#allocation45_spill]] %s20158_s2 }
   0x4   :  { %20222 = sst [smem:[#allocation46_spill]] %s20159_s3 }
   0x5   :  { %24 = vsyncpa [#allocation6], 0 }
   0x6   :  { %25 = vsyncpa [#allocation8], 0  ;;  %s15069_s0 = smov [#allocation5]  }
   0x7   :  { %s35_s30 = sshll.u32 %s15069_s0, 4  ;;  %s36_s30 = int_to_ptr.vmem [resolvable:$true] %s35_s30 }
   0x8   :  { %s15033_s20 = scalar_lea.vmem %s36_s30, 1024  ;;  %p15038_p1 = scmp.lt.s32.totalorder %s36_s30, %s36_s30 }
   0x9   :  { %p15034_p0 = scmp.ne.s32.totalorder %s36_s30, %s15033_s20  ;;  %p15039_p2 = scmp.lt.s32.totalorder %s15033_s20, %s15033_s20 }
   0xb   :  { %p15040_p3 = por %p15039_p2, %p15038_p1 }
   0xd   :  { %p15041_p4 = pnand %p15040_p3, %p15034_p0 }
   0xf   :  { %15044 = shalt.err (!%p15041_p4)
}
  0x10   :  { %s15070_s21 = smov 128   ;;  %s15071_s1 = smov 8  }
  0x11   :  { %s20223_s23 = sld [smem:[#allocation45_spill]]  ;;  %s15072_s24 = smov [#allocation7]  }
  0x12   :  { %s63_s25 = sshll.u32 %s15072_s24, 4  ;;  %s64_s25 = int_to_ptr.vmem [resolvable:$true] %s63_s25 }
  0x13   :  { %s15053_s3 = scalar_lea.vmem %s64_s25, 9216  ;;  %p15058_p6 = scmp.lt.s32.totalorder %s64_s25, %s64_s25 }
  0x14   :  { %p15054_p5 = scmp.ne.s32.totalorder %s64_s25, %s15053_s3  ;;  %p15059_p7 = scmp.lt.s32.totalorder %s15053_s3, %s15053_s3 }
  0x16   :  { %p15060_p8 = por %p15059_p7, %p15058_p6 }
  0x17   :  { %41 = dma.hbm_to_vmem [thread:$0]  %s20223_s23, 1024, %s36_s30, [#allocation6], %s15070_s21, %s15070_s21, %s15071_s1  }
  0x18   :  { %p15061_p9 = pnand %p15060_p8, %p15054_p5 }
  0x1a   :  { %15064 = shalt.err (!%p15061_p9)
}
  0x1b   :  { %s15073_s26 = smov 64   ;;  %s15074_s27 = smov 4  }
  0x1c   :  { %69 = dma.hbm_to_vmem [thread:$0]  %s20167_s11, 9216, %s64_s25, [#allocation8], %s15073_s26, %s15073_s26, %s15074_s27  }
  0x1d   :  { %15065 = dma.done.wait [#allocation6], 1024  }
  0x1e   :  { %15066 = vsyncadd [#allocation6], 4294966272 }
  0x1f   :  { %15067 = dma.done.wait [#allocation8], 9216  }
  0x20   :  { %15068 = vsyncadd [#allocation8], 4294958080  ;;  %v20178_v0 = vmov 0   ;;  %v14328_v1 = vld [vmem:[#allocation5 + $0x34] ss:$8 sps:$4 sm:$0xff]   ;;  %s20224_s30 = sld [smem:[#allocation44_spill]] }
  0x21   :  { %272 = vmatprep.mubr.bf16.mxu0 %v20178_v0  ;;  %14326 = vset.pattern.permute.xlu0 %v20178_v0  ;;  %v14330_v2 = vld [vmem:[#allocation5 + $0x30] ss:$8 sps:$4 sm:$0xff]   ;;  %v14331_v3 = vld [vmem:[#allocation5 + $0x24] ss:$8 sps:$4 sm:$0xff]   ;;  %v14333_v4 = vld [vmem:[#allocation5 + $0x20] ss:$8 sps:$4 sm:$0xff]  }
  0x22   :  { %14327 = vset.pattern.permute.xlu1 %v20178_v0  ;;  %248 = vmatprep.subr.bf16.mxu0 %v14328_v1  ;;  %v14334_v5 = vld [vmem:[#allocation5 + $0x14] ss:$8 sps:$4 sm:$0xff]   ;;  %v14336_v6 = vld [vmem:[#allocation5 + $0x10] ss:$8 sps:$4 sm:$0xff]   ;;  %v14337_v7 = vld [vmem:[#allocation5 + $0x4] ss:$8 sps:$4 sm:$0xff]  }
  0x23   :  { %249 = vmatpush1.bf16.msra.mxu0 %v14330_v2  ;;  %v14339_v10 = vld [vmem:[#allocation5] ss:$8 sps:$4 sm:$0xff]   ;;  %s20225_s2 = sld [smem:[#allocation43_spill]]  ;;  %vm224_vm0 = vcmask 523264   ;;  %vm807_vm1 = vcmask 1046528  }
  0x24   :  { %250 = vmatprep.subr.bf16.mxu0 %v14331_v3  ;;  %s20237_s29 = sld [smem:[#allocation46_spill]]  ;;  %vm1004_vm9 = vsmask.f32 7424 }
  0x26   :  { %v135_v8 = vld [vmem:[%s20224_s30] sm:$0xff]  ;;  %v137_v9 = vld [vmem:[%s20224_s30 + $0x10] sm:$0xff]  ;;  %v136_v12 = vld [vmem:[%s20224_s30 + $0x8] sm:$0xff] }
  0x27   :  { %251 = vmatpush1.bf16.msra.mxu0 %v14333_v4  ;;  %325 = vperm.xlu0 %14326, %v135_v8   ;;  %v138_v13 = vld [vmem:[%s20224_s30 + $0x18] sm:$0xff]  ;;  %v139_v14 = vld [vmem:[%s20224_s30 + $0x20] sm:$0xff]  ;;  %v140_v15 = vld [vmem:[%s20224_s30 + $0x28] sm:$0xff] }
  0x28   :  { %252 = vmatprep.subr.bf16.mxu0 %v14334_v5  ;;  %335 = vperm.xlu1 %14327, %v137_v9   ;;  %v141_v16 = vld [vmem:[%s20224_s30 + $0x30] sm:$0xff]  ;;  %v142_v17 = vld [vmem:[%s20224_s30 + $0x38] sm:$0xff]  ;;  %v143_v19 = vld [vmem:[%s20224_s30 + $0x40] sm:$0xff] }
  0x29   :  { %v14340_v11 = vld [vmem:[%s20225_s2] sm:$0xff]   ;;  %v14341_v18 = vld [vmem:[%s20225_s2 + $0x8] sm:$0xff]   ;;  %v14342_v20 = vld [vmem:[%s20225_s2 + $0x10] sm:$0xff]  }
  0x2a   :  { %v14343_v21 = vld [vmem:[%s20225_s2 + $0x18] sm:$0xff]   ;;  %v14344_v22 = vld [vmem:[%s20225_s2 + $0x20] ss:$0 sps:$4 sm:$0xff]  }
  0x2b   :  { %253 = vmatpush1.bf16.msra.mxu0 %v14336_v6  ;;  %330 = vperm.xlu0 %14326, %v136_v12  }
  0x2c   :  { %254 = vmatprep.subr.bf16.mxu0 %v14337_v7  ;;  %340 = vperm.xlu1 %14327, %v138_v13  }
  0x2f   :  { %255 = vmatpush1.bf16.msra.mxu0 %v14339_v10  ;;  %345 = vperm.xlu0 %14326, %v139_v14  }
  0x30   :  { %350 = vperm.xlu1 %14327, %v140_v15  }
  0x32   :  { %11238 = vmatmul.mubr.msk.bf16.vlgmr.msra.gmra.mxu0 %vm224_vm0, %v14340_v11 }
  0x33   :  { %282 = vmatprep.mubr.bf16.mxu0 %v20178_v0  ;;  %355 = vperm.xlu0 %14326, %v141_v16  }
  0x34   :  { %360 = vperm.xlu1 %14327, %v142_v17  }
  0x37   :  { %365 = vperm.xlu0 %14326, %v143_v19  }
  0x3a   :  { %11239 = vmatmul.mubr.msk.bf16.gmra.mxu0 %vm224_vm0, %v14341_v18 }
  0x3b   :  { %292 = vmatprep.mubr.bf16.mxu0 %v20178_v0 }
  0x42   :  { %11240 = vmatmul.mubr.msk.bf16.gmra.mxu0 %vm224_vm0, %v14342_v20 }
  0x43   :  { %302 = vmatprep.mubr.bf16.mxu0 %v20178_v0 }
  0x4a   :  { %11241 = vmatmul.mubr.msk.bf16.gmra.mxu0 %vm224_vm0, %v14343_v21 }
  0x4b   :  { %312 = vmatprep.mubr.bf16.mxu0 %v20178_v0 }
  0x52   :  { %11242 = vmatmul.mubr.msk.bf16.gmra.mxu0 %vm224_vm0, %v14344_v22 }
  0xa2   :  { %v15248_v27 = vpop.permute.xlu0 %325 }
  0xa3   :  { %20226 = vst [vmem:[#allocation11_spill] sm:$0xff] %v15248_v27  ;;  %v15252_v29 = vpop.permute.xlu1 %335 }
  0xa4   :  { %20227 = vst [vmem:[#allocation12_spill] sm:$0xff] %v15252_v29 }
  0xa6   :  { %v15258_v32 = vpop.permute.xlu0 %330 }
  0xa7   :  { %20228 = vst [vmem:[#allocation13_spill] sm:$0xff] %v15258_v32  ;;  %v15262_v34 = vpop.permute.xlu1 %340 }
  0xa8   :  { %20229 = vst [vmem:[#allocation14_spill] sm:$0xff] %v15262_v34 }
  0xaa   :  { %v15276_v41 = vpop.permute.xlu0 %345 }
  0xab   :  { %20230 = vst [vmem:[#allocation15_spill] sm:$0xff] %v15276_v41  ;;  %v15286_v47 = vpop.permute.xlu1 %350 }
  0xac   :  { %20231 = vst [vmem:[#allocation16_spill] sm:$0xff] %v15286_v47 }
  0xae   :  { %v15300_v58 = vpop.permute.xlu0 %355 }
  0xaf   :  { %20232 = vst [vmem:[#allocation17_spill] sm:$0xff] %v15300_v58  ;;  %v15308_v1 = vpop.permute.xlu1 %360 }
  0xb0   :  { %20233 = vst [vmem:[#allocation18_spill] sm:$0xff] %v15308_v1 }
  0xb2   :  { %v15320_v11 = vpop.permute.xlu0 %365 }
  0xb3   :  { %20234 = vst [vmem:[#allocation19_spill] sm:$0xff] %v15320_v11 }
  0xf2   :  { %v15240_v23 = vpop.f32.mrf.mxu0 }
  0xf3   :  { %v368_v38 = vmul.f32 %v15248_v27, %v15240_v23 }
  0xf4   :  { %v15242_v24 = vpop.f32.mrf.mxu0 }
  0xf5   :  { %v369_v43 = vmul.f32 %v15248_v27, %v15242_v24 }
  0xf6   :  { %v15244_v25 = vpop.f32.mrf.mxu0 }
  0xf7   :  { %v370_v36 = vmul.f32 %v15258_v32, %v15244_v25 }
  0xf8   :  { %v15246_v26 = vpop.f32.mrf.mxu0 }
  0xf9   :  { %v371_v39 = vmul.f32 %v15258_v32, %v15246_v26  ;;  %v386_v44 = vadd.f32 %v370_v36, %v368_v38 }
  0xfa   :  { %v15250_v28 = vpop.f32.mrf.mxu0 }
  0xfb   :  { %v372_v40 = vmul.f32 %v15252_v29, %v15250_v28  ;;  %v400_v49 = vadd.f32 %v371_v39, %v369_v43 }
  0xfc   :  { %v15254_v30 = vpop.f32.mrf.mxu0 }
  0xfd   :  { %v373_v45 = vmul.f32 %v15252_v29, %v15254_v30  ;;  %v387_v50 = vadd.f32 %v386_v44, %v372_v40 }
  0xfe   :  { %v15256_v31 = vpop.f32.mrf.mxu0 }
  0xff   :  { %v374_v46 = vmul.f32 %v15262_v34, %v15256_v31  ;;  %v401_v54 = vadd.f32 %v400_v49, %v373_v45 }
 0x100   :  { %v15260_v33 = vpop.f32.mrf.mxu0 }
 0x101   :  { %v375_v51 = vmul.f32 %v15262_v34, %v15260_v33  ;;  %v388_v55 = vadd.f32 %v387_v50, %v374_v46 }
 0x102   :  { %v15264_v35 = vpop.f32.mrf.mxu0 }
 0x103   :  { %v376_v52 = vmul.f32 %v15276_v41, %v15264_v35  ;;  %v402_v60 = vadd.f32 %v401_v54, %v375_v51 }
 0x104   :  { %v15268_v37 = vpop.f32.mrf.mxu0 }
 0x105   :  { %v377_v56 = vmul.f32 %v15276_v41, %v15268_v37  ;;  %v389_v61 = vadd.f32 %v388_v55, %v376_v52 }
 0x106   :  { %v15278_v42 = vpop.f32.mrf.mxu0 }
 0x107   :  { %v378_v57 = vmul.f32 %v15286_v47, %v15278_v42  ;;  %v403_v3 = vadd.f32 %v402_v60, %v377_v56 }
 0x108   :  { %v15288_v48 = vpop.f32.mrf.mxu0 }
 0x109   :  { %v379_v62 = vmul.f32 %v15286_v47, %v15288_v48  ;;  %v390_v4 = vadd.f32 %v389_v61, %v378_v57  ;;  %v431_v61 = vlaneseq }
 0x10a   :  { %v15294_v53 = vpop.f32.mrf.mxu0 }
 0x10b   :  { %v380_v63 = vmul.f32 %v15300_v58, %v15294_v53  ;;  %v404_v8 = vadd.f32 %v403_v3, %v379_v62  ;;  %v15333_v62 = vshrl.u32 %v431_v61, 7 }
 0x10c   :  { %v15302_v59 = vpop.f32.mrf.mxu0 }
 0x10d   :  { %v381_v5 = vmul.f32 %v15300_v58, %v15302_v59  ;;  %v391_v9 = vadd.f32 %v390_v4, %v380_v63  ;;  %v15337_v4 = vsub.s32 0, %v15333_v62 }
 0x10e   :  { %v15310_v2 = vpop.f32.mrf.mxu0 }
 0x10f   :  { %v382_v6 = vmul.f32 %v15308_v1, %v15310_v2  ;;  %v405_v13 = vadd.f32 %v404_v8, %v381_v5  ;;  %20235 = vst [vmem:[#allocation20_spill] sm:$0xff] %v15337_v4 }
 0x110   :  { %v15316_v7 = vpop.f32.mrf.mxu0 }
 0x111   :  { %v383_v10 = vmul.f32 %v15308_v1, %v15316_v7  ;;  %v392_v14 = vadd.f32 %v391_v9, %v382_v6 }
 0x112   :  { %v15322_v12 = vpop.f32.mrf.mxu0 }
 0x113   :  { %v384_v15 = vmul.f32 %v15320_v11, %v15322_v12  ;;  %v406_v17 = vadd.f32 %v405_v13, %v383_v10 }
 0x114   :  { %v15326_v16 = vpop.f32.mrf.mxu0 }
 0x115   :  { %v393_v18 = vadd.f32 %v392_v14, %v384_v15  ;;  %v385_v19 = vmul.f32 %v15320_v11, %v15326_v16 }
 0x116   :  { %v318_v20 = vpop.f32.mrf.mxu0 }
 0x117   :  { %v394_v21 = vrot.slane %v393_v18, 4  ;;  %v407_v22 = vadd.f32 %v406_v17, %v385_v19 }
 0x118   :  { %v319_v36 = vpop.f32.mrf.mxu0 }
 0x119   :  { %v408_v38 = vrot.slane %v407_v22, 4  ;;  %v395_v39 = vadd.f32 %v394_v21, %v393_v18 }
 0x11b   :  { %v396_v40 = vrot.slane %v395_v39, 2  ;;  %v409_v43 = vadd.f32 %v408_v38, %v407_v22 }
 0x11d   :  { %v397_v44 = vadd.f32 %v396_v40, %v395_v39  ;;  %v410_v45 = vrot.slane %v409_v43, 2 }
 0x11f   :  { %v398_v46 = vrot.slane %v397_v44, 1  ;;  %v411_v49 = vadd.f32 %v410_v45, %v409_v43 }
 0x121   :  { %v399_v50 = vadd.f32 %v398_v46, %v397_v44  ;;  %v412_v51 = vrot.slane %v411_v49, 1 }
 0x123   :  { %415 = vrot.lane.b32.xlu1 %v399_v50, %s15073_s26  ;;  %v413_v52 = vadd.f32 %v412_v51, %v411_v49 }
 0x125   :  { %421 = vrot.lane.b32.xlu0 %v413_v52, %s15073_s26 }
 0x195   :  { %v416_v54 = vpop.permute.xlu1 %415 }
 0x196   :  { %v418_v55 = vadd.f32 %v416_v54, %v399_v50 }
 0x197   :  { %v422_v57 = vpop.permute.xlu0 %421 }
 0x198   :  { %v419_v56 = vadd.f32 %v418_v55, %v413_v52 }
 0x19a   :  { %v424_v60 = vadd.f32 %v422_v57, %v419_v56 }
 0x19c   :  { %426 = vrot.lane.b32.xlu1 %v424_v60, %s15073_s26 }
 0x20e   :  { %v427_v63 = vpop.permute.xlu1 %426 }
 0x20f   :  { %v429_v3 = vsel %vm224_vm0, %v424_v60, %v427_v63 }
 0x210   :  { %v430_v5 = vmul.f32 0.0078125, %v429_v3 }
 0x212   :  { %v15340_v6 = vrot.slane %v430_v5, %v15337_v4 }
 0x214   :  { %v436_v8 = vsub.f32 %v15242_v24, %v15340_v6  ;;  %v438_v9 = vsub.f32 %v15246_v26, %v15340_v6  ;;  %v440_v10 = vsub.f32 %v15254_v30, %v15340_v6  ;;  %v442_v13 = vsub.f32 %v15260_v33, %v15340_v6 }
 0x215   :  { %v444_v14 = vsub.f32 %v15268_v37, %v15340_v6  ;;  %v446_v26 = vsub.f32 %v15288_v48, %v15340_v6  ;;  %v448_v18 = vsub.f32 %v15302_v59, %v15340_v6  ;;  %v450_v19 = vsub.f32 %v15316_v7, %v15340_v6 }
 0x216   :  { %v15353_v15 = vmul.f32 %v436_v8, %v15248_v27  ;;  %v15356_v17 = vmul.f32 %v438_v9, %v15258_v32  ;;  %v15359_v24 = vmul.f32 %v440_v10, %v15252_v29  ;;  %v15364_v30 = vmul.f32 %v442_v13, %v15262_v34 }
 0x217   :  { %v15375_v20 = vmul.f32 %v444_v14, %v15276_v41  ;;  %v15380_v22 = vmul.f32 %v446_v26, %v15286_v47  ;;  %v435_v36 = vsub.f32 %v15240_v23, %v15340_v6  ;;  %v437_v38 = vsub.f32 %v15244_v25, %v15340_v6 }
 0x218   :  { %v472_v33 = vmul.f32 %v15353_v15, %v15353_v15  ;;  %v474_v37 = vmul.f32 %v15356_v17, %v15356_v17  ;;  %v476_v48 = vmul.f32 %v15359_v24, %v15359_v24  ;;  %v439_v59 = vsub.f32 %v15250_v28, %v15340_v6 }
 0x219   :  { %v478_v7 = vmul.f32 %v15364_v30, %v15364_v30  ;;  %v441_v40 = vsub.f32 %v15256_v31, %v15340_v6  ;;  %v452_v43 = vsub.f32 %v15326_v16, %v15340_v6  ;;  %v15395_v44 = vmul.f32 %v448_v18, %v15300_v58 }
 0x21a   :  { %v503_v21 = vadd.f32 %v474_v37, %v472_v33  ;;  %v15398_v23 = vmul.f32 %v435_v36, %v15248_v27  ;;  %v15401_v25 = vmul.f32 %v437_v38, %v15258_v32  ;;  %v480_v28 = vmul.f32 %v15375_v20, %v15375_v20 }
 0x21b   :  { %v443_v46 = vsub.f32 %v15264_v35, %v15340_v6  ;;  %v15408_v31 = vmul.f32 %v439_v59, %v15252_v29  ;;  %v15411_v16 = vmul.f32 %v450_v19, %v15308_v1  ;;  %v482_v49 = vmul.f32 %v15380_v22, %v15380_v22 }
 0x21c   :  { %v504_v39 = vadd.f32 %v503_v21, %v476_v48  ;;  %v445_v50 = vsub.f32 %v15278_v42, %v15340_v6  ;;  %v15418_v52 = vmul.f32 %v441_v40, %v15262_v34  ;;  %v471_v54 = vmul.f32 %v15398_v23, %v15398_v23 }
 0x21d   :  { %v473_v35 = vmul.f32 %v15401_v25, %v15401_v25  ;;  %v15425_v55 = vmul.f32 %v452_v43, %v15320_v11  ;;  %v484_v56 = vmul.f32 %v15395_v44, %v15395_v44  ;;  %v447_v57 = vsub.f32 %v15294_v53, %v15340_v6 }
 0x21e   :  { %v505_v45 = vadd.f32 %v504_v39, %v478_v7  ;;  %v15432_v60 = vmul.f32 %v443_v46, %v15276_v41  ;;  %v475_v61 = vmul.f32 %v15408_v31, %v15408_v31  ;;  %v486_v3 = vmul.f32 %v15411_v16, %v15411_v16 }
 0x21f   :  { %v489_v63 = vadd.f32 %v473_v35, %v471_v54  ;;  %v449_v5 = vsub.f32 %v15310_v2, %v15340_v6  ;;  %v15441_v9 = vmul.f32 %v445_v50, %v15286_v47  ;;  %v477_v53 = vmul.f32 %v15418_v52, %v15418_v52 }
 0x220   :  { %v506_v51 = vadd.f32 %v505_v45, %v480_v28  ;;  %v488_v13 = vmul.f32 %v15425_v55, %v15425_v55  ;;  %v451_v14 = vsub.f32 %v15322_v12, %v15340_v6  ;;  %v15450_v33 = vmul.f32 %v447_v57, %v15300_v58 }
 0x221   :  { %v490_v10 = vadd.f32 %v489_v63, %v475_v61  ;;  %v479_v2 = vmul.f32 %v15432_v60, %v15432_v60  ;;  %v15455_v19 = vmul.f32 %v449_v5, %v15308_v1  ;;  %v481_v48 = vmul.f32 %v15441_v9, %v15441_v9  ;;  %v14345_v61 = vld [vmem:[%s20161_s5 + $0xf8] sm:$0xff]  }
 0x222   :  { %v507_v42 = vadd.f32 %v506_v51, %v482_v49  ;;  %v15460_v38 = vmul.f32 %v451_v14, %v15320_v11  ;;  %v483_v12 = vmul.f32 %v15450_v33, %v15450_v33  ;;  %v14346_v63 = vld [vmem:[%s20161_s5 + $0xb8] sm:$0xff]   ;;  %12591 = vmatprep.subr.bf16.mxu1 %v14345_v61  ;;  %v14372_v61 = vld [vmem:[%s20161_s5 + $0x80] sm:$0xff]  }
 0x223   :  { %v491_v37 = vadd.f32 %v490_v10, %v477_v53  ;;  %v485_v7 = vmul.f32 %v15455_v19, %v15455_v19  ;;  %12592 = vmatpush3.bf16.msra.mxu1 %v14346_v63  ;;  %v14349_v53 = vld [vmem:[%s20161_s5 + $0x78] sm:$0xff]   ;;  %v14374_v63 = vld [vmem:[%s20161_s5 + $0x8] sm:$0xff]  }
 0x224   :  { %v508_v8 = vadd.f32 %v507_v42, %v484_v56  ;;  %v487_v43 = vmul.f32 %v15460_v38, %v15460_v38  ;;  %v14350_v14 = vld [vmem:[%s20161_s5 + $0x38] sm:$0xff]   ;;  %12637 = vmatprep.subr.bf16.mxu0 %v14349_v53 }
 0x225   :  { %v492_v21 = vadd.f32 %v491_v37, %v479_v2  ;;  %12638 = vmatpush3.bf16.msra.mxu0 %v14350_v14  ;;  %v14351_v37 = vld [vmem:[%s20161_s5 + $0xe8] sm:$0xff]   ;;  %v14383_v53 = vld [vmem:[%s20161_s5 + $0x1f8] sm:$0xff]  }
 0x226   :  { %v509_v26 = vadd.f32 %v508_v8, %v486_v3  ;;  %v14347_v8 = vld [vmem:[%s20161_s5 + $0xf0] sm:$0xff]  }
 0x227   :  { %v493_v6 = vadd.f32 %v492_v21, %v481_v48  ;;  %12593 = vmatprep.subr.bf16.mxu1 %v14347_v8  ;;  %v14352_v48 = vld [vmem:[%s20161_s5 + $0xa8] sm:$0xff]   ;;  %v14354_v21 = vld [vmem:[%s20161_s5 + $0x30] sm:$0xff]   ;;  %v14378_v8 = vld [vmem:[%s20161_s5] sm:$0xff]  }
 0x228   :  { %v510_v18 = vadd.f32 %v509_v26, %v488_v13  ;;  %v14348_v13 = vld [vmem:[%s20161_s5 + $0xb0] sm:$0xff]  }
 0x229   :  { %v494_v39 = vadd.f32 %v493_v6, %v483_v12  ;;  %12594 = vmatpush3.bf16.msra.mxu1 %v14348_v13  ;;  %v14357_v12 = vld [vmem:[%s20161_s5 + $0x68] sm:$0xff]   ;;  %v14356_v6 = vld [vmem:[%s20161_s5 + $0xa0] sm:$0xff]  }
 0x22a   :  { %v511_v36 = vrot.slane %v510_v18, 4  ;;  %12595 = vmatprep.subr.bf16.mxu1 %v14351_v37  ;;  %v15579_v37 = vsub.s32 1, %v15333_v62 }
 0x22b   :  { %v495_v28 = vadd.f32 %v494_v39, %v485_v7  ;;  %v14359_v7 = vld [vmem:[%s20161_s5 + $0xd8] sm:$0xff]   ;;  %v14361_v39 = vld [vmem:[%s20161_s5 + $0x60] sm:$0xff]  }
 0x22c   :  { %v512_v59 = vadd.f32 %v511_v36, %v510_v18  ;;  %v14353_v18 = vld [vmem:[%s20161_s5 + $0x70] sm:$0xff]   ;;  %v14355_v36 = vld [vmem:[%s20161_s5 + $0xe0] sm:$0xff]   ;;  %20236 = vst [vmem:[#allocation21_spill] sm:$0xff] %v15579_v37 }
 0x22d   :  { %v496_v46 = vadd.f32 %v495_v28, %v487_v43  ;;  %12639 = vmatprep.subr.bf16.mxu0 %v14353_v18  ;;  %12596 = vmatpush3.bf16.msra.mxu1 %v14352_v48  ;;  %v14362_v43 = vld [vmem:[%s20161_s5 + $0x20] sm:$0xff]   ;;  %v14363_v28 = vld [vmem:[%s20161_s5 + $0xd0] sm:$0xff]  }
 0x22e   :  { %v513_v40 = vrot.slane %v512_v59, 2  ;;  %12640 = vmatpush3.bf16.msra.mxu0 %v14354_v21  ;;  %12597 = vmatprep.subr.bf16.mxu1 %v14355_v36  ;;  %v322_v18 = vld [vmem:[%s20160_s4] sm:$0x3] }
 0x22f   :  { %v497_v50 = vrot.slane %v496_v46, 4  ;;  %12641 = vmatprep.subr.bf16.mxu0 %v14357_v12  ;;  %v321_v48 = vld [vmem:[%s20237_s29] sm:$0x3]  ;;  %v15588_v21 = vrot.slane %v322_v18, %v15337_v4  ;;  %v15591_v36 = vrot.slane %v322_v18, %v15579_v37 }
 0x230   :  { %v514_v45 = vadd.f32 %v513_v40, %v512_v59  ;;  %v14358_v59 = vld [vmem:[%s20161_s5 + $0x28] sm:$0xff]   ;;  %v14360_v40 = vld [vmem:[%s20161_s5 + $0x98] sm:$0xff]   ;;  %v544_v12 = vrot.slane %v321_v48, %v15579_v37 }
 0x231   :  { %v498_v54 = vadd.f32 %v497_v50, %v496_v46  ;;  %12598 = vmatpush3.bf16.msra.mxu1 %v14356_v6  ;;  %v15076_v46 = vmov 0.0   ;;  %v14366_v50 = vld [vmem:[%s20161_s5 + $0x18] sm:$0xff]   ;;  %v587_v6 = vmul.f32 %v15591_v36, %v15248_v27 }
 0x232   :  { %v515_v49 = vrot.slane %v514_v45, 1  ;;  %12642 = vmatpush3.bf16.msra.mxu0 %v14358_v59  ;;  %12599 = vmatprep.subr.bf16.mxu1 %v14359_v7  ;;  %92 = vst [vmem:[#allocation2 + $0x8] sm:$0xff] %v15076_v46  ;;  %91 = vst [vmem:[#allocation2 + $0xa8] sm:$0xff] %v15076_v46  ;;  %v586_v59 = vmul.f32 %v15588_v21, %v15248_v27 }
 0x233   :  { %v499_v35 = vrot.slane %v498_v54, 2  ;;  %12643 = vmatprep.subr.bf16.mxu0 %v14361_v39  ;;  %111 = vst [vmem:[#allocation2 + $0x18] sm:$0xff] %v15076_v46  ;;  %112 = vst [vmem:[#allocation2] sm:$0xff] %v15076_v46 }
 0x234   :  { %v516_v51 = vadd.f32 %v515_v49, %v514_v45  ;;  %v14365_v45 = vld [vmem:[%s20161_s5 + $0x58] sm:$0xff]   ;;  %113 = vst [vmem:[#allocation3] sm:$0xff] %v15076_v46  ;;  %123 = vst [vmem:[#allocation3 + $0x50] sm:$0xff] %v15076_v46  ;;  %v14364_v49 = vld [vmem:[%s20161_s5 + $0x90] sm:$0xff]  }
 0x235   :  { %v500_v56 = vadd.f32 %v499_v35, %v498_v54  ;;  %124 = vst [vmem:[#allocation4] sm:$0xff] %v15076_v46  ;;  %134 = vst [vmem:[#allocation4 + $0x50] sm:$0xff] %v15076_v46  ;;  %12600 = vmatpush3.bf16.msra.mxu1 %v14360_v40  ;;  %v14369_v54 = vld [vmem:[%s20161_s5 + $0x50] sm:$0xff]   ;;  %v14368_v35 = vld [vmem:[%s20161_s5 + $0x88] sm:$0xff]   ;;  %v591_v40 = vmul.f32 %v15591_v36, %v15252_v29  ;;  %v593_v46 = vmul.f32 %v15591_v36, %v15262_v34 }
 0x236   :  { %524 = vrot.lane.b32.xlu1 %v516_v51, %s15073_s26  ;;  %12644 = vmatpush3.bf16.msra.mxu0 %v14362_v43  ;;  %v590_v43 = vmul.f32 %v15588_v21, %v15252_v29 }
 0x237   :  { %v501_v57 = vrot.slane %v500_v56, 1  ;;  %12601 = vmatprep.subr.bf16.mxu1 %v14363_v28  ;;  %12645 = vmatprep.subr.bf16.mxu0 %v14365_v45  ;;  %v589_v28 = vmul.f32 %v15591_v36, %v15258_v32  ;;  %v588_v45 = vmul.f32 %v15588_v21, %v15258_v32 }
 0x239   :  { %v502_v42 = vadd.f32 %v501_v57, %v500_v56  ;;  %12602 = vmatpush3.bf16.msra.mxu1 %v14364_v49  ;;  %v14370_v56 = vld [vmem:[%s20161_s5 + $0x10] sm:$0xff]   ;;  %v14371_v57 = vld [vmem:[%s20161_s5 + $0xc0] sm:$0xff]   ;;  %v15611_v49 = vmul.f32 %v15588_v21, %v15262_v34  ;;  %v757_v18 = vld [vmem:[#allocation2 + $0x8] sm:$0xfc] }
 0x23a   :  { %12646 = vmatpush3.bf16.msra.mxu0 %v14366_v50 }
 0x23b   :  { %518 = vrot.lane.b32.xlu0 %v502_v42, %s15073_s26  ;;  %12647 = vmatprep.subr.bf16.mxu0 %v14369_v54  ;;  %v595_v54 = vmul.f32 %v15591_v36, %v15276_v41 }
 0x23e   :  { %12648 = vmatpush3.bf16.msra.mxu0 %v14370_v56  ;;  %v15627_v56 = vmul.f32 %v15591_v36, %v15286_v47 }
 0x2a8   :  { %v525_v26 = vpop.permute.xlu1 %524 }
 0x2ad   :  { %v519_v3 = vpop.permute.xlu0 %518 }
 0x2ae   :  { %v521_v5 = vadd.f32 %v519_v3, %v502_v42  ;;  %v14373_v42 = vld [vmem:[%s20161_s5 + $0x48] sm:$0xff]   ;;  %v14375_v3 = vld [vmem:[%s20161_s5 + $0x178] sm:$0xff]  }
 0x2af   :  { %12649 = vmatprep.subr.bf16.mxu0 %v14373_v42  ;;  %v15635_v42 = vmul.f32 %v15588_v21, %v15286_v47 }
 0x2b0   :  { %v522_v10 = vadd.f32 %v521_v5, %v516_v51  ;;  %v14367_v51 = vld [vmem:[%s20161_s5 + $0xc8] sm:$0xff]   ;;  %12650 = vmatpush3.bf16.msra.mxu0 %v14374_v63  ;;  %v14376_v5 = vld [vmem:[%s20161_s5 + $0x40] sm:$0xff]  }
 0x2b1   :  { %12603 = vmatprep.subr.bf16.mxu1 %v14367_v51  ;;  %12651 = vmatprep.subr.bf16.mxu0 %v14376_v5 }
 0x2b2   :  { %v15488_v2 = vadd.f32 %v525_v26, %v522_v10  ;;  %12604 = vmatpush3.bf16.msra.mxu1 %v14368_v35  ;;  %v15623_v35 = vmul.f32 %v15588_v21, %v15276_v41 }
 0x2b3   :  { %12605 = vmatprep.subr.bf16.mxu1 %v14371_v57  ;;  %v15631_v57 = vmul.f32 %v15591_v36, %v15300_v58 }
 0x2b4   :  { %529 = vrot.lane.b32.xlu0 %v15488_v2, %s15073_s26  ;;  %12652 = vmatpush3.bf16.msra.mxu0 %v14378_v8 }
 0x2b5   :  { %12729 = vmatprep.subr.bf16.mxu0 %v14383_v53 }
 0x2b6   :  { %12606 = vmatpush3.bf16.msra.mxu1 %v14372_v61  ;;  %v15639_v61 = vmul.f32 %v15588_v21, %v15300_v58 }
 0x2b7   :  { %12683 = vmatprep.subr.bf16.mxu1 %v14375_v3 }
 0x326   :  { %v530_v10 = vpop.permute.xlu0 %529 }
 0x327   :  { %v532_v13 = vsel %vm224_vm0, %v15488_v2, %v530_v10  ;;  %v540_v2 = vrot.slane %v321_v48, %v15337_v4 }
 0x328   :  { %v533_v14 = vmul.f32 0.0078125, %v532_v13 }
 0x32a   :  { %v534_v26 = vadd.f32 1e-05, %v533_v14 }
 0x32c   :  { %14993 = vrsqrt.f32 %v534_v26 }
 0x339   :  { %v14994_v62 = vpop.eup %14993 }
 0x33a   :  { %v547_v7 = vmul.f32 %v14994_v62, %v540_v2  ;;  %v548_v39 = vmul.f32 %v14994_v62, %v544_v12 }
 0x33c   :  { %v15614_v50 = vrot.slane %v547_v7, %v15337_v4  ;;  %v15617_v51 = vrot.slane %v548_v39, %v15337_v4 }
 0x33e   :  { %v558_v63 = vmul.f32 %v15617_v51, %v15353_v15  ;;  %v560_v3 = vmul.f32 %v15617_v51, %v15356_v17  ;;  %v562_v5 = vmul.f32 %v15617_v51, %v15359_v24  ;;  %v557_v8 = vmul.f32 %v15614_v50, %v15398_v23 }
 0x33f   :  { %v559_v53 = vmul.f32 %v15614_v50, %v15401_v25  ;;  %v561_v10 = vmul.f32 %v15614_v50, %v15408_v31  ;;  %v564_v13 = vmul.f32 %v15617_v51, %v15364_v30  ;;  %v566_v15 = vmul.f32 %v15617_v51, %v15375_v20  ;;  %v756_v31 = vld [vmem:[#allocation2 + $0xa8] sm:$0xfc] }
 0x340   :  { %v605_v17 = vadd.f32 %v587_v6, %v558_v63  ;;  %v607_v14 = vadd.f32 %v589_v28, %v560_v3  ;;  %v609_v26 = vadd.f32 %v591_v40, %v562_v5  ;;  %v604_v24 = vadd.f32 %v586_v59, %v557_v8  ;;  %v694_v63 = vld [vmem:[#allocation2 + $0xa8] sm:$0xfe] }
 0x341   :  { %v606_v48 = vadd.f32 %v588_v45, %v559_v53  ;;  %v608_v23 = vadd.f32 %v590_v43, %v561_v10  ;;  %v611_v2 = vadd.f32 %v593_v46, %v564_v13  ;;  %v613_v12 = vadd.f32 %v595_v54, %v566_v15  ;;  %v695_v54 = vld [vmem:[#allocation2 + $0x8] sm:$0xfe] }
 0x342   :  { %vm623_vm2 = vcmp.ge.f32.partialorder %v605_v17, 0.0  ;;  %vm625_vm3 = vcmp.ge.f32.partialorder %v607_v14, 0.0  ;;  %vm627_vm4 = vcmp.ge.f32.partialorder %v609_v26, 0.0  ;;  %v641_v25 = vmul.f32 0.05, %v605_v17 }
 0x343   :  { %v643_v62 = vmul.f32 0.05, %v607_v14  ;;  %v645_v7 = vmul.f32 0.05, %v609_v26  ;;  %vm622_vm5 = vcmp.ge.f32.partialorder %v604_v24, 0.0  ;;  %vm624_vm6 = vcmp.ge.f32.partialorder %v606_v48, 0.0 }
 0x344   :  { %v15657_v30 = vsel %vm623_vm2, %v605_v17, %v641_v25  ;;  %vm626_vm7 = vcmp.ge.f32.partialorder %v608_v23, 0.0  ;;  %v640_v20 = vmul.f32 0.05, %v604_v24  ;;  %v642_v6 = vmul.f32 0.05, %v606_v48 }
 0x345   :  { %v15659_v59 = vsel %vm625_vm3, %v607_v14, %v643_v62  ;;  %v15661_v39 = vsel %vm627_vm4, %v609_v26, %v645_v7  ;;  %677 = vst [vmem:[#allocation2 + $0x58] sm:$0xff] %v15657_v30  ;;  %v761_v40 = vpack.c.bf16 %v15657_v30, %v757_v18  ;;  %v644_v43 = vmul.f32 0.05, %v608_v23 }
 0x346   :  { %679 = vst [vmem:[#allocation2 + $0x38] sm:$0xff] %v15659_v59  ;;  %681 = vst [vmem:[#allocation2 + $0x80] sm:$0xff] %v15661_v39  ;;  %v717_v28 = vpack.c.bf16 %v15661_v39, %v15659_v59  ;;  %v15669_v45 = vsel %vm622_vm5, %v604_v24, %v640_v20  ;;  %v15671_v46 = vsel %vm624_vm6, %v606_v48, %v642_v6  ;;  %vm629_vm8 = vcmp.ge.f32.partialorder %v611_v2, 0.0 }
 0x347   :  { %v811_v3 = vrot.slane %v761_v40, 1  ;;  %v15674_v5 = vsel %vm626_vm7, %v608_v23, %v644_v43  ;;  %676 = vst [vmem:[#allocation2 + $0x40] sm:$0xff] %v15669_v45  ;;  %678 = vst [vmem:[#allocation2 + $0x20] sm:$0xff] %v15671_v46  ;;  %v760_v8 = vpack.c.bf16 %v15669_v45, %v756_v31  ;;  %vm631_vm10 = vcmp.ge.f32.partialorder %v613_v12, 0.0  ;;  %v14377_v23 = vld [vmem:[%s20161_s5 + $0x138] sm:$0xff]  }
 0x348   :  { %v812_v53 = vrot.slane %v717_v28, 1  ;;  %680 = vst [vmem:[#allocation2 + $0x70] sm:$0xff] %v15674_v5  ;;  %v15682_v10 = vpack.c.bf16 %v15674_v5, %v15671_v46  ;;  %v647_v13 = vmul.f32 0.05, %v611_v2  ;;  %v649_v15 = vmul.f32 0.05, %v613_v12 }
 0x349   :  { %v808_v17 = vrot.slane %v760_v8, 1  ;;  %v715_v14 = vpack.c.bf16 %v15657_v30, %v695_v54  ;;  %v15685_v26 = vshll.u32 %v717_v28, 16  ;;  %v714_v24 = vpack.c.bf16 %v15669_v45, %v694_v63 }
 0x34a   :  { %v813_v18 = vsel %vm807_vm1, %v811_v3, %v812_v53  ;;  %v20180_v48 = vrot.slane %v15682_v10, 1  ;;  %v15694_v25 = vsel %vm629_vm8, %v611_v2, %v647_v13  ;;  %v15696_v31 = vsel %vm631_vm10, %v613_v12, %v649_v15  ;;  %v14379_v2 = vld [vmem:[%s20161_s5 + $0x170] sm:$0xff]  }
 0x34b   :  { %964 = vmatprep.mubr.bf16.mxu1 %v813_v18  ;;  %683 = vst [vmem:[#allocation2 + $0x10] sm:$0xff] %v15694_v25  ;;  %685 = vst [vmem:[#allocation2 + $0x30] sm:$0xff] %v15696_v31  ;;  %v15702_v62 = vpack.c.bf16 %v15696_v31, %v15694_v25  ;;  %v1018_v7 = vshrl.u32 %v715_v14, 16  ;;  %v1020_v20 = vshll.u32 %v715_v14, 16  ;;  %v1027_v6 = vrot.slane %v15685_v26, 1 }
 0x34c   :  { %v810_v12 = vsel %vm807_vm1, %v808_v17, %v20180_v48  ;;  %v1006_v40 = vshrl.u32 %v714_v24, 16  ;;  %v1008_v43 = vshll.u32 %v714_v24, 16  ;;  %v15712_v54 = vshll.u32 %v15682_v10, 16  ;;  %v14380_v17 = vld [vmem:[%s20161_s5 + $0x130] sm:$0xff]  }
 0x34d   :  { %965 = vmatmul.mubr.bf16.vlgmr.msra.gmra.mxu1 %v810_v12  ;;  %v816_v63 = vrot.slane %v15702_v62, 1  ;;  %v1022_v3 = vrot.slane %v1020_v20, 1  ;;  %v15715_v8 = vshrl.u32 %v717_v28, 16  ;;  %v15718_v13 = vshll.u32 %v15702_v62, 16 }
 0x34e   :  { %12684 = vmatpush3.bf16.msra.mxu1 %v14377_v23  ;;  %v1010_v15 = vrot.slane %v1008_v43, 1  ;;  %v1015_v14 = vrot.slane %v15712_v54, 1  ;;  %v563_v24 = vmul.f32 %v15614_v50, %v15418_v52  ;;  %v565_v18 = vmul.f32 %v15614_v50, %v15432_v60  ;;  %v14381_v43 = vld [vmem:[%s20161_s5 + $0x168] sm:$0xff]  }
 0x34f   :  { %v817_v28 = vsel %vm807_vm1, %v812_v53, %v816_v63  ;;  %v1023_v20 = vor.u32 %v1022_v3, %v1018_v7  ;;  %12685 = vmatprep.subr.bf16.mxu1 %v14379_v2  ;;  %v1039_v23 = vor.u32 %v15715_v8, %v1027_v6  ;;  %v1043_v12 = vrot.slane %v15718_v13, 1  ;;  %v14384_v53 = vld [vmem:[%s20161_s5 + $0x1b8] sm:$0xff]  }
 0x350   :  { %972 = vmatprep.mubr.bf16.mxu1 %v817_v28  ;;  %v1011_v0 = vor.u32 %v1010_v15, %v1006_v40  ;;  %v610_v52 = vadd.f32 %v15611_v49, %v563_v24  ;;  %v612_v60 = vadd.f32 %v15623_v35, %v565_v18  ;;  %v568_v48 = vmul.f32 %v15617_v51, %v15380_v22  ;;  %v14387_v49 = vld [vmem:[%s20161_s5 + $0x1f0] sm:$0xff]  }
 0x351   :  { %v1028_v7 = vsel %vm1004_vm9, %v1023_v20, %v1027_v6  ;;  %v1044_v2 = vsel %vm1004_vm9, %v1039_v23, %v1043_v12  ;;  %v570_v3 = vmul.f32 %v15617_v51, %v15395_v44  ;;  %v603_v35 = vmul.f32 %v15591_v36, %v15320_v11  ;;  %v14382_v6 = vld [vmem:[%s20161_s5 + $0x128] sm:$0xff]  }
 0x352   :  { %1221 = vmatprep.mubr.bf16.mxu0 %v1028_v7  ;;  %v1016_v22 = vsel %vm1004_vm9, %v1011_v0, %v1015_v14  ;;  %12686 = vmatpush3.bf16.msra.mxu1 %v14380_v17  ;;  %vm628_vm11 = vcmp.ge.f32.partialorder %v610_v52, 0.0  ;;  %vm630_vm12 = vcmp.ge.f32.partialorder %v612_v60, 0.0  ;;  %v646_v40 = vmul.f32 0.05, %v610_v52  ;;  %v14385_v0 = vld [vmem:[%s20161_s5 + $0x160] sm:$0xff]  }
 0x353   :  { %1222 = vmatmul.mubr.bf16.vlgmr.msra.gmra.mxu0 %v1016_v22  ;;  %v648_v44 = vmul.f32 0.05, %v612_v60  ;;  %v615_v15 = vadd.f32 %v15627_v56, %v568_v48  ;;  %v617_v24 = vadd.f32 %v15631_v57, %v570_v3  ;;  %12687 = vmatprep.subr.bf16.mxu1 %v14381_v43  ;;  %v15759_v18 = vshrl.u32 %v15682_v10, 16  ;;  %v14388_v48 = vld [vmem:[%s20161_s5 + $0x1b0] sm:$0xff]  }
 0x354   :  { %1229 = vmatprep.mubr.bf16.mxu0 %v1044_v2  ;;  %v15764_v17 = vsel %vm628_vm11, %v610_v52, %v646_v40  ;;  %v15767_v28 = vshrl.u32 %v15702_v62, 16  ;;  %12730 = vmatpush3.bf16.msra.mxu0 %v14384_v53  ;;  %v567_v56 = vmul.f32 %v15614_v50, %v15441_v9  ;;  %v569_v57 = vmul.f32 %v15614_v50, %v15450_v33  ;;  %v14391_v9 = vld [vmem:[%s20161_s5 + $0x1e8] sm:$0xff]  }
 0x355   :  { %v15777_v20 = vsel %vm630_vm12, %v612_v60, %v648_v44  ;;  %682 = vst [vmem:[#allocation2 + $0x88] sm:$0xff] %v15764_v17  ;;  %vm633_vm13 = vcmp.ge.f32.partialorder %v615_v15, 0.0  ;;  %vm635_vm14 = vcmp.ge.f32.partialorder %v617_v24, 0.0  ;;  %v651_v23 = vmul.f32 0.05, %v615_v15  ;;  %12731 = vmatprep.subr.bf16.mxu0 %v14387_v49  ;;  %v14386_v60 = vld [vmem:[%s20161_s5 + $0x120] sm:$0xff]  }
 0x356   :  { %684 = vst [vmem:[#allocation2 + $0x90] sm:$0xff] %v15777_v20  ;;  %v15786_v33 = vpack.c.bf16 %v15777_v20, %v15764_v17  ;;  %v653_v43 = vmul.f32 0.05, %v617_v24  ;;  %12688 = vmatpush3.bf16.msra.mxu1 %v14382_v6  ;;  %v1031_v52 = vor.u32 %v15759_v18, %v1015_v14  ;;  %v614_v53 = vadd.f32 %v15635_v42, %v567_v56  ;;  %v14389_v14 = vld [vmem:[%s20161_s5 + $0x158] sm:$0xff]   ;;  %v14394_v44 = vld [vmem:[%s20161_s5 + $0x1e0] sm:$0xff]  }
 0x357   :  { %v15793_v7 = vsel %vm633_vm13, %v615_v15, %v651_v23  ;;  %v1055_v2 = vor.u32 %v15767_v28, %v1043_v12  ;;  %12689 = vmatprep.subr.bf16.mxu1 %v14385_v0  ;;  %v616_v3 = vadd.f32 %v15639_v61, %v569_v57  ;;  %v574_v49 = vmul.f32 %v15617_v51, %v15425_v55  ;;  %v14392_v55 = vld [vmem:[%s20161_s5 + $0x1a8] sm:$0xff]  }
 0x358   :  { %v814_v22 = vrot.slane %v15786_v33, 1  ;;  %v15804_v40 = vsel %vm635_vm14, %v617_v24, %v653_v43  ;;  %687 = vst [vmem:[#allocation2 + $0x68] sm:$0xff] %v15793_v7  ;;  %v15808_v42 = vshll.u32 %v15786_v33, 16  ;;  %vm632_vm15 = vcmp.ge.f32.partialorder %v614_v53, 0.0  ;;  %12732 = vmatpush3.bf16.msra.mxu0 %v14388_v48  ;;  %v14390_v48 = vld [vmem:[%s20161_s5 + $0x118] sm:$0xff]  }
 0x359   :  { %689 = vst [vmem:[#allocation2 + $0xa0] sm:$0xff] %v15804_v40  ;;  %v15816_v61 = vpack.c.bf16 %v15804_v40, %v15793_v7  ;;  %vm634_vm2 = vcmp.ge.f32.partialorder %v616_v3, 0.0  ;;  %v650_v12 = vmul.f32 0.05, %v614_v53  ;;  %v652_v6 = vmul.f32 0.05, %v616_v3  ;;  %12733 = vmatprep.subr.bf16.mxu0 %v14391_v9 }
 0x35a   :  { %v20238_v15 = vrot.slane %v15682_v10, 1  ;;  %v1035_v0 = vrot.slane %v15808_v42, 1  ;;  %12690 = vmatpush3.bf16.msra.mxu1 %v14386_v60  ;;  %v572_v56 = vmul.f32 %v15617_v51, %v15411_v16  ;;  %v621_v57 = vadd.f32 %v603_v35, %v574_v49  ;;  %v14393_v16 = vld [vmem:[%s20161_s5 + $0x150] sm:$0xff]   ;;  %v14396_v60 = vld [vmem:[%s20161_s5 + $0x1a0] sm:$0xff]  }
 0x35b   :  { %v820_v23 = vrot.slane %v15816_v61, 1  ;;  %v15832_v9 = vshll.u32 %v15816_v61, 16  ;;  %v15835_v10 = vsel %vm632_vm15, %v614_v53, %v650_v12  ;;  %v15837_v43 = vsel %vm634_vm2, %v616_v3, %v652_v6  ;;  %12691 = vmatprep.subr.bf16.mxu1 %v14389_v14  ;;  %v14397_v14 = vld [vmem:[%s20161_s5 + $0x1d8] sm:$0xff]  }
 0x35c   :  { %v815_v24 = vsel %vm807_vm1, %v20238_v15, %v814_v22  ;;  %v1036_v51 = vsel %vm1004_vm9, %v1031_v52, %v1035_v0  ;;  %688 = vst [vmem:[#allocation2 + $0x98] sm:$0xff] %v15837_v43  ;;  %v15846_v35 = vpack.c.bf16 %v15837_v43, %v15835_v10  ;;  %vm639_vm3 = vcmp.ge.f32.partialorder %v621_v57, 0.0  ;;  %12734 = vmatpush3.bf16.msra.mxu0 %v14392_v55 }
 0x35d   :  { %973 = vmatmul.mubr.bf16.gmra.mxu1 %v815_v24  ;;  %v821_v53 = vsel %vm807_vm1, %v816_v63, %v820_v23  ;;  %1230 = vmatmul.mubr.bf16.gmra.mxu0 %v1036_v51  ;;  %v1059_v52 = vrot.slane %v15832_v9, 1  ;;  %v601_v3 = vmul.f32 %v15591_v36, %v15308_v1  ;;  %v657_v49 = vmul.f32 0.05, %v621_v57  ;;  %v14395_v36 = vld [vmem:[%s20161_s5 + $0x110] sm:$0xff]   ;;  %v14399_v24 = vld [vmem:[%s20161_s5 + $0x198] sm:$0xff]  }
 0x35e   :  { %12735 = vmatprep.subr.bf16.mxu0 %v14394_v44  ;;  %980 = vmatprep.mubr.bf16.mxu1 %v821_v53  ;;  %v818_v55 = vrot.slane %v15846_v35, 1  ;;  %v15864_v12 = vshrl.u32 %v15786_v33, 16  ;;  %v15867_v62 = vshll.u32 %v15846_v35, 16  ;;  %v14398_v33 = vld [vmem:[%s20161_s5 + $0x148] sm:$0xff]   ;;  %v571_v51 = vmul.f32 %v15614_v50, %v15455_v19  ;;  %v14403_v53 = vld [vmem:[%s20161_s5 + $0x140] sm:$0xff]  }
 0x35f   :  { %12692 = vmatpush3.bf16.msra.mxu1 %v14390_v48  ;;  %v1060_v63 = vsel %vm1004_vm9, %v1055_v2, %v1059_v52  ;;  %v619_v6 = vadd.f32 %v601_v3, %v572_v56  ;;  %v675_v44 = vsel %vm639_vm3, %v621_v57, %v657_v49  ;;  %v573_v2 = vmul.f32 %v15614_v50, %v15460_v38  ;;  %v14401_v57 = vld [vmem:[%s20161_s5 + $0x1d0] sm:$0xff]   ;;  %v14405_v49 = vld [vmem:[%s20161_s5 + $0x1c8] sm:$0xff]  }
 0x360   :  { %12693 = vmatprep.subr.bf16.mxu1 %v14393_v16  ;;  %1237 = vmatprep.mubr.bf16.mxu0 %v1060_v63  ;;  %693 = vst [vmem:[#allocation2 + $0x78] sm:$0xff] %v675_v44  ;;  %v1047_v15 = vor.u32 %v15864_v12, %v1035_v0  ;;  %v602_v56 = vmul.f32 %v15588_v21, %v15320_v11  ;;  %v1051_v48 = vrot.slane %v15867_v62, 1  ;;  %v14400_v16 = vld [vmem:[%s20161_s5 + $0x108] sm:$0xff]   ;;  %v14402_v3 = vld [vmem:[%s20161_s5 + $0x190] sm:$0xff]   ;;  %v1611_v4 = vrot.slane %v15685_v26, 4 }
 0x361   :  { %12736 = vmatpush3.bf16.msra.mxu0 %v14396_v60  ;;  %v819_v0 = vsel %vm807_vm1, %v814_v22, %v818_v55  ;;  %v655_v38 = vmul.f32 0.05, %v619_v6  ;;  %vm637_vm4 = vcmp.ge.f32.partialorder %v619_v6, 0.0  ;;  %v600_v19 = vmul.f32 %v15588_v21, %v15308_v1  ;;  %v14407_v21 = vld [vmem:[%s20161_s5 + $0x278] sm:$0xff]  }
 0x362   :  { %12737 = vmatprep.subr.bf16.mxu0 %v14397_v14  ;;  %v620_v60 = vadd.f32 %v602_v56, %v573_v2  ;;  %v1052_v22 = vsel %vm1004_vm9, %v1047_v15, %v1051_v48  ;;  %v14404_v14 = vld [vmem:[%s20161_s5 + $0x100] sm:$0xff]   ;;  %v1262_v56 = vld [vmem:[#allocation2 + $0x8] sm:$0xf8]  ;;  %vm1302_vm7 = vsmask.f32 6400  ;;  %vm2723_vm10 = vcmask 1044480  }
 0x363   :  { %12694 = vmatpush3.bf16.msra.mxu1 %v14395_v36  ;;  %v15916_v36 = vsel %vm637_vm4, %v619_v6, %v655_v38  ;;  %v14406_v6 = vld [vmem:[%s20161_s5 + $0x188] sm:$0xff]   ;;  %vm1589_vm8 = vsmask.f32 4352  ;;  %vm20197_vm11 = vsmask.f32 5376  ;;  %vm15077_vm12 = vmmov 0  }
 0x364   :  { %12695 = vmatprep.subr.bf16.mxu1 %v14398_v33  ;;  %vm638_vm5 = vcmp.ge.f32.partialorder %v620_v60, 0.0  ;;  %v656_v50 = vmul.f32 0.05, %v620_v60  ;;  %v618_v33 = vadd.f32 %v600_v19, %v571_v51 }
 0x365   :  { %981 = vmatmul.mubr.bf16.gmra.mxu1 %v819_v0  ;;  %12738 = vmatpush3.bf16.msra.mxu0 %v14399_v24  ;;  %v1549_v0 = vld [vmem:[#allocation2 + $0x8] sm:$0x80] }
 0x366   :  { %1238 = vmatmul.mubr.bf16.gmra.mxu0 %v1052_v22  ;;  %12739 = vmatprep.subr.bf16.mxu0 %v14401_v57  ;;  %v674_v15 = vsel %vm638_vm5, %v620_v60, %v656_v50  ;;  %v15927_v57 = vshrl.u32 %v15816_v61, 16  ;;  %v1266_v22 = vpack.c.bf16 %v15657_v30, %v1262_v56  ;;  %vm636_vm6 = vcmp.ge.f32.partialorder %v618_v33, 0.0  ;;  %v1261_v61 = vld [vmem:[#allocation2 + $0xa8] sm:$0xf8] }
 0x367   :  { %12696 = vmatpush3.bf16.msra.mxu1 %v14400_v16  ;;  %v759_v63 = vld [vmem:[#allocation2 + $0x78] sm:$0x3]  ;;  %692 = vst [vmem:[#allocation2 + $0x50] sm:$0xff] %v674_v15  ;;  %v14408_v16 = vld [vmem:[%s20161_s5 + $0x1c0] sm:$0xff]   ;;  %v1553_v50 = vpack.c.bf16 %v15657_v30, %v1549_v0  ;;  %v15952_v0 = vshrl.u32 %v15846_v35, 16 }
 0x368   :  { %v713_v44 = vld [vmem:[#allocation2 + $0x78] sm:$0x1]  ;;  %12697 = vmatprep.subr.bf16.mxu1 %v14403_v53  ;;  %v763_v24 = vpack.c.bf16 %v759_v63, %v15916_v36  ;;  %v1071_v60 = vor.u32 %v15927_v57, %v1059_v52  ;;  %v654_v53 = vmul.f32 0.05, %v618_v33  ;;  %v1316_v15 = vshrl.u32 %v1266_v22, 16 }
 0x369   :  { %v723_v2 = vpack.c.bf16 %v713_v44, %v15916_v36  ;;  %12740 = vmatpush3.bf16.msra.mxu0 %v14402_v3  ;;  %v14415_v52 = vld [vmem:[%s20161_s5 + $0x2f8] sm:$0xff]  }
 0x36a   :  { %12741 = vmatprep.subr.bf16.mxu0 %v14405_v49  ;;  %v824_v38 = vrot.slane %v763_v24, 1  ;;  %v14410_v49 = vld [vmem:[%s20161_s5 + $0x180] sm:$0xff]  }
 0x36b   :  { %v1073_v51 = vshll.u32 %v723_v2, 16  ;;  %12698 = vmatpush3.bf16.msra.mxu1 %v14404_v14 }
 0x36c   :  { %12775 = vmatprep.subr.bf16.mxu1 %v14407_v21  ;;  %v825_v3 = vsel %vm807_vm1, %v820_v23, %v824_v38  ;;  %v15947_v23 = vsel %vm636_vm6, %v618_v33, %v654_v53  ;;  %v1319_v21 = vshll.u32 %v1266_v22, 16  ;;  %v1323_v33 = vrot.slane %v15715_v8, 1 }
 0x36d   :  { %v1075_v19 = vrot.slane %v1073_v51, 1  ;;  %12742 = vmatpush3.bf16.msra.mxu0 %v14406_v6  ;;  %988 = vmatprep.mubr.bf16.mxu1 %v825_v3  ;;  %v1603_v6 = vshrl.u32 %v1553_v50, 16  ;;  %v1265_v53 = vpack.c.bf16 %v15669_v45, %v1261_v61  ;;  %v1548_v3 = vld [vmem:[#allocation2 + $0xa8] sm:$0x80]  ;;  %v1063_v22 = vor.u32 %v15952_v0, %v1051_v48 }
 0x36e   :  { %12743 = vmatprep.subr.bf16.mxu0 %v14408_v16  ;;  %v758_v63 = vld [vmem:[#allocation2 + $0x50] sm:$0x3]  ;;  %v1606_v16 = vshll.u32 %v1553_v50, 16  ;;  %v1610_v61 = vrot.slane %v15715_v8, 3  ;;  %v1552_v11 = vpack.c.bf16 %v15669_v45, %v1548_v3  ;;  %v1312_v3 = vrot.slane %v15712_v54, 2 }
 0x36f   :  { %v1076_v14 = vsel %vm1004_vm9, %v1071_v60, %v1075_v19  ;;  %v712_v44 = vld [vmem:[#allocation2 + $0x50] sm:$0x1]  ;;  %v762_v24 = vpack.c.bf16 %v758_v63, %v15947_v23  ;;  %v1321_v63 = vrot.slane %v1319_v21, 2  ;;  %v1304_v21 = vshrl.u32 %v1265_v53, 16 }
 0x370   :  { %1245 = vmatprep.mubr.bf16.mxu0 %v1076_v14  ;;  %v722_v56 = vpack.c.bf16 %v712_v44, %v15947_v23  ;;  %v1318_v14 = vrot.slane %v1316_v15, 1  ;;  %v1080_v44 = vshrl.u32 %v723_v2, 16  ;;  %v1608_v37 = vrot.slane %v1606_v16, 4 }
 0x371   :  { %12744 = vmatpush3.bf16.msra.mxu0 %v14410_v49  ;;  %v822_v51 = vrot.slane %v762_v24, 1  ;;  %v1324_v49 = vrot.slane %v15685_v26, 2  ;;  %v1605_v24 = vrot.slane %v1603_v6, 3  ;;  %v1307_v1 = vshll.u32 %v1265_v53, 16 }
 0x372   :  { %12821 = vmatprep.subr.bf16.mxu0 %v14415_v52  ;;  %v1065_v60 = vshll.u32 %v722_v56, 16  ;;  %v1082_v15 = vor.u32 %v1080_v44, %v1075_v19  ;;  %v1322_v35 = vor.u32 %v1321_v63, %v1318_v14  ;;  %v1591_v2 = vshrl.u32 %v1552_v11, 16 }
 0x373   :  { %v823_v50 = vsel %vm807_vm1, %v818_v55, %v822_v51  ;;  %v1325_v55 = vor.u32 %v1324_v49, %v1323_v33  ;;  %v1594_v6 = vshll.u32 %v1552_v11, 16  ;;  %v1609_v16 = vor.u32 %v1608_v37, %v1605_v24 }
 0x374   :  { %v1067_v52 = vrot.slane %v1065_v60, 1  ;;  %989 = vmatmul.mubr.bf16.gmra.mxu1 %v823_v50  ;;  %v1612_v60 = vor.u32 %v1611_v4, %v1610_v61  ;;  %v1306_v8 = vrot.slane %v1304_v21, 1  ;;  %v1309_v50 = vrot.slane %v1307_v1, 2 }
 0x375   :  { %996 = vmatprep.mubr.bf16.mxu1 %v824_v38  ;;  %v1077_v26 = vshrl.u32 %v722_v56, 16  ;;  %v1311_v38 = vrot.slane %v15759_v18, 1  ;;  %v1326_v19 = vsel %vm1302_vm7, %v1322_v35, %v1325_v55  ;;  %v1331_v53 = vrot.slane %v15767_v28, 1  ;;  %v14411_v35 = vld [vmem:[%s20161_s5 + $0x270] sm:$0xff]  }
 0x376   :  { %v1068_v48 = vsel %vm1004_vm9, %v1063_v22, %v1067_v52  ;;  %v1332_v22 = vrot.slane %v15718_v13, 2  ;;  %v1598_v33 = vrot.slane %v15759_v18, 3  ;;  %v1593_v37 = vrot.slane %v1591_v2, 3 }
 0x377   :  { %1246 = vmatmul.mubr.bf16.gmra.mxu0 %v1068_v48  ;;  %v1079_v11 = vor.u32 %v1077_v26, %v1067_v52  ;;  %v1596_v4 = vrot.slane %v1594_v6, 4  ;;  %v1599_v1 = vrot.slane %v15712_v54, 4  ;;  %v1613_v56 = vsel %vm1589_vm8, %v1609_v16, %v1612_v60  ;;  %v1551_v16 = vld [vmem:[#allocation2 + $0x78] sm:$0x7f] }
 0x378   :  { %1253 = vmatprep.mubr.bf16.mxu0 %v1082_v15  ;;  %v1310_v14 = vor.u32 %v1309_v50, %v1306_v8  ;;  %v1313_v63 = vor.u32 %v1312_v3, %v1311_v38  ;;  %v1618_v49 = vrot.slane %v15767_v28, 3  ;;  %v1619_v44 = vrot.slane %v15718_v13, 4  ;;  %v14409_v13 = vld [vmem:[%s20161_s5 + $0x238] sm:$0xff]  }
 0x379   :  { %v1838_v24 = vpack.c.bf16 %v15659_v59, %v15657_v30  ;;  %v15979_v18 = vor.u32 %v1332_v22, %v1331_v53  ;;  %v1328_v54 = vrot.slane %v15808_v42, 2  ;;  %v1597_v52 = vor.u32 %v1596_v4, %v1593_v37  ;;  %v1264_v15 = vld [vmem:[#allocation2 + $0x78] sm:$0x7] }
 0x37a   :  { %v15983_v61 = vor.u32 %v1599_v1, %v1598_v33  ;;  %v1314_v21 = vsel %vm1302_vm7, %v1310_v14, %v1313_v63  ;;  %v15996_v2 = vor.u32 %v1619_v44, %v1618_v49  ;;  %v1339_v6 = vrot.slane %v15927_v57, 1  ;;  %v14416_v3 = vld [vmem:[%s20161_s5 + $0x2b8] sm:$0xff]   ;;  %v14419_v33 = vld [vmem:[%s20161_s5 + $0x2f0] sm:$0xff]   ;;  %v14413_v14 = vld [vmem:[%s20161_s5 + $0x268] sm:$0xff]  }
 0x37b   :  { %v1340_v50 = vrot.slane %v15832_v9, 2  ;;  %v1614_v26 = vrot.slane %v15864_v12, 3  ;;  %v1615_v38 = vrot.slane %v15808_v42, 4  ;;  %v1334_v53 = vsel %vm1302_vm7, %v1325_v55, %v15979_v18 }
 0x37c   :  { %997 = vmatmul.mubr.bf16.gmra.mxu1 %v822_v51  ;;  %v1327_v51 = vrot.slane %v15864_v12, 1  ;;  %v1601_v22 = vsel %vm1589_vm8, %v1597_v52, %v15983_v61  ;;  %v1268_v12 = vpack.c.bf16 %v1264_v15, %v15916_v36  ;;  %v1626_v55 = vrot.slane %v15927_v57, 3  ;;  %v1263_v15 = vld [vmem:[#allocation2 + $0x50] sm:$0x7] }
 0x37d   :  { %1499 = vmatprep.mubr.bf16.mxu1 %v1326_v19  ;;  %v2065_v19 = vld [vmem:[#allocation2 + $0x90] sm:$0xff]  ;;  %v1627_v37 = vrot.slane %v15832_v9, 4  ;;  %v1555_v4 = vpack.c.bf16 %v1551_v16, %v15916_v36  ;;  %v16035_v57 = vor.u32 %v1340_v50, %v1339_v6  ;;  %v16037_v44 = vor.u32 %v1615_v38, %v1614_v26  ;;  %v14417_v38 = vld [vmem:[%s20161_s5 + $0x260] sm:$0xff]  }
 0x37e   :  { %v15999_v8 = vor.u32 %v1328_v54, %v1327_v51  ;;  %v16031_v49 = vpack.c.bf16 %v15835_v10, %v2065_v19  ;;  %v2069_v51 = vld [vmem:[#allocation2 + $0x98] sm:$0xff]  ;;  %v1353_v54 = vshrl.u32 %v1268_v12, 16  ;;  %v1356_v52 = vshll.u32 %v1268_v12, 16  ;;  %v1550_v19 = vld [vmem:[#allocation2 + $0x50] sm:$0x7f] }
 0x37f   :  { %1254 = vmatmul.mubr.bf16.gmra.mxu0 %v1079_v11  ;;  %v14412_v11 = vld [vmem:[%s20161_s5 + $0x230] sm:$0xff]   ;;  %v16053_v6 = vor.u32 %v1627_v37, %v1626_v55  ;;  %v1335_v16 = vrot.slane %v15952_v0, 1  ;;  %v1640_v50 = vshrl.u32 %v1555_v4, 16  ;;  %v1342_v12 = vsel %vm1302_vm7, %v15979_v18, %v16035_v57  ;;  %v14424_v55 = vld [vmem:[%s20161_s5 + $0x2a8] sm:$0xff]   ;;  %v14426_v18 = vld [vmem:[%s20161_s5 + $0x2e0] sm:$0xff]  }
 0x380   :  { %1786 = vmatprep.mubr.bf16.mxu0 %v1613_v56  ;;  %v1621_v56 = vsel %vm1589_vm8, %v1612_v60, %v15996_v2  ;;  %v1330_v9 = vsel %vm1302_vm7, %v1313_v63, %v15999_v8  ;;  %v14420_v60 = vld [vmem:[%s20161_s5 + $0x2b0] sm:$0xff]   ;;  %v16046_v63 = vshll.u32 %v16031_v49, 16  ;;  %v1267_v37 = vpack.c.bf16 %v1263_v15, %v15947_v23 }
 0x381   :  { %v1554_v15 = vpack.c.bf16 %v1550_v19, %v15947_v23  ;;  %v14428_v19 = vld [vmem:[%s20161_s5 + $0x2a0] sm:$0xff]  }
 0x382   :  { %v2995_v59 = vrot.slane %v16046_v63, 4 }
 0x384   :  { %1500 = vmatmul.mubr.bf16.vlgmr.msra.gmra.mxu1 %v1314_v21  ;;  %v1347_v21 = vshll.u32 %v1267_v37, 16 }
 0x385   :  { %12776 = vmatpush3.bf16.msra.mxu1 %v14409_v13  ;;  %1507 = vmatprep.mubr.bf16.mxu1 %v1334_v53  ;;  %v14423_v13 = vld [vmem:[%s20161_s5 + $0x2e8] sm:$0xff]   ;;  %v20190_v53 = vrot.slane %v16046_v63, 1 }
 0x386   :  { %12777 = vmatprep.subr.bf16.mxu1 %v14411_v35  ;;  %v14414_v35 = vld [vmem:[%s20161_s5 + $0x228] sm:$0xff]  }
 0x387   :  { %1787 = vmatmul.mubr.bf16.vlgmr.msra.gmra.mxu0 %v1601_v22  ;;  %v16063_v22 = vpack.c.bf16 %v15947_v23, %v2069_v51 }
 0x388   :  { %1794 = vmatprep.mubr.bf16.mxu0 %v1621_v56  ;;  %12822 = vmatpush3.bf16.msra.mxu0 %v14416_v3  ;;  %v1643_v3 = vshll.u32 %v1555_v4, 16  ;;  %v1355_v56 = vrot.slane %v1353_v54, 1  ;;  %v14418_v54 = vld [vmem:[%s20161_s5 + $0x220] sm:$0xff]  }
 0x389   :  { %12823 = vmatprep.subr.bf16.mxu0 %v14419_v33  ;;  %12778 = vmatpush3.bf16.msra.mxu1 %v14412_v11  ;;  %v16066_v33 = vshrl.u32 %v16031_v49, 16  ;;  %v1336_v11 = vrot.slane %v15867_v62, 2  ;;  %v16085_v51 = vshll.u32 %v16063_v22, 16 }
 0x38a   :  { %12779 = vmatprep.subr.bf16.mxu1 %v14413_v14  ;;  %v1358_v14 = vrot.slane %v1356_v52, 2  ;;  %v1622_v52 = vrot.slane %v15952_v0, 3  ;;  %v1645_v4 = vrot.slane %v1643_v3, 4  ;;  %v1631_v3 = vshrl.u32 %v1554_v15, 16 }
 0x38b   :  { %v20189_v26 = vrot.slane %v16085_v51, 1  ;;  %v1337_v0 = vor.u32 %v1336_v11, %v1335_v16  ;;  %v1634_v11 = vshll.u32 %v1554_v15, 16  ;;  %v2994_v28 = vrot.slane %v16066_v33, 3 }
 0x38c   :  { %12824 = vmatpush3.bf16.msra.mxu0 %v14420_v60  ;;  %1508 = vmatmul.mubr.bf16.gmra.mxu1 %v1330_v9  ;;  %v2162_v60 = vor.u32 %v16066_v33, %v20190_v53  ;;  %v1617_v9 = vsel %vm1589_vm8, %v15983_v61, %v16037_v44  ;;  %v14421_v61 = vld [vmem:[%s20161_s5 + $0x258] sm:$0xff]   ;;  %v1633_v15 = vrot.slane %v1631_v3, 3  ;;  %v2460_v53 = vrot.slane %v16085_v51, 3 }
 0x38d   :  { %12825 = vmatprep.subr.bf16.mxu0 %v14423_v13  ;;  %1515 = vmatprep.mubr.bf16.mxu1 %v1342_v12  ;;  %v1623_v13 = vrot.slane %v15867_v62, 4  ;;  %v1629_v12 = vsel %vm1589_vm8, %v15996_v2, %v16053_v6  ;;  %v1344_v62 = vshrl.u32 %v1267_v37, 16  ;;  %v14429_v2 = vld [vmem:[%s20161_s5 + $0x2d8] sm:$0xff]   ;;  %v14425_v37 = vld [vmem:[%s20161_s5 + $0x250] sm:$0xff]  }
 0x38e   :  { %12780 = vmatpush3.bf16.msra.mxu1 %v14414_v35  ;;  %v1642_v35 = vrot.slane %v1640_v50, 3  ;;  %v16114_v50 = vsel %vm1004_vm9, %v2162_v60, %v20189_v26  ;;  %v14431_v60 = vld [vmem:[%s20161_s5 + $0x298] sm:$0xff]  }
 0x38f   :  { %1795 = vmatmul.mubr.bf16.gmra.mxu0 %v1617_v9  ;;  %12781 = vmatprep.subr.bf16.mxu1 %v14417_v38  ;;  %v16106_v9 = vor.u32 %v1358_v14, %v1355_v56  ;;  %v16116_v16 = vor.u32 %v1623_v13, %v1622_v52  ;;  %v14422_v38 = vld [vmem:[%s20161_s5 + $0x218] sm:$0xff]   ;;  %v1338_v56 = vsel %vm1302_vm7, %v15999_v8, %v1337_v0  ;;  %v1346_v14 = vrot.slane %v1344_v62, 1  ;;  %v14433_v8 = vld [vmem:[%s20161_s5 + $0x2d0] sm:$0xff]   ;;  %v14430_v62 = vld [vmem:[%s20161_s5 + $0x248] sm:$0xff]  }
 0x390   :  { %1802 = vmatprep.mubr.bf16.mxu0 %v1629_v12  ;;  %12826 = vmatpush3.bf16.msra.mxu0 %v14424_v55  ;;  %v16121_v55 = vor.u32 %v1645_v4, %v1642_v35  ;;  %v16131_v52 = vld [vmem:[#allocation2 + $0x38] sm:$0xff]  ;;  %v14427_v13 = vld [vmem:[%s20161_s5 + $0x210] sm:$0xff]   ;;  %v1636_v12 = vrot.slane %v1634_v11, 4  ;;  %v2451_v11 = vrot.slane %v16066_v33, 2 }
 0x391   :  { %12827 = vmatprep.subr.bf16.mxu0 %v14426_v18  ;;  %v1349_v18 = vrot.slane %v1347_v21, 2  ;;  %v1360_v4 = vsel %vm1302_vm7, %v16035_v57, %v16106_v9  ;;  %v1625_v21 = vsel %vm1589_vm8, %v16037_v44, %v16116_v16  ;;  %v2064_v35 = vld [vmem:[#allocation2 + $0x10] sm:$0xff] }
 0x392   :  { %12782 = vmatpush3.bf16.msra.mxu1 %v14418_v54  ;;  %v2058_v54 = vld [vmem:[#allocation2 + $0x58] sm:$0xfe]  ;;  %v1647_v57 = vsel %vm1589_vm8, %v16053_v6, %v16121_v55  ;;  %v14437_v6 = vld [vmem:[%s20161_s5 + $0x2c8] sm:$0xff]   ;;  %v14443_v33 = vld [vmem:[%s20161_s5 + $0x370] sm:$0xff]  }
 0x393   :  { %12783 = vmatprep.subr.bf16.mxu1 %v14421_v61  ;;  %v2062_v61 = vld [vmem:[#allocation2 + $0x80] sm:$0xff]  ;;  %v16152_v44 = vpack.c.bf16 %v16131_v52, %v2058_v54 }
 0x394   :  { %12828 = vmatpush3.bf16.msra.mxu0 %v14428_v19  ;;  %1516 = vmatmul.mubr.bf16.gmra.mxu1 %v1338_v56  ;;  %v16154_v19 = vor.u32 %v1349_v18, %v1346_v14  ;;  %v16165_v3 = vpack.c.bf16 %v2064_v35, %v2062_v61  ;;  %v16169_v56 = vor.u32 %v1636_v12, %v1633_v15  ;;  %v14432_v14 = vld [vmem:[%s20161_s5 + $0x208] sm:$0xff]   ;;  %v2061_v18 = vld [vmem:[#allocation2 + $0x70] sm:$0xff]  ;;  %v14435_v54 = vld [vmem:[%s20161_s5 + $0x240] sm:$0xff]   ;;  %v20192_v35 = vrot.slane %v16031_v49, 3 }
 0x395   :  { %12829 = vmatprep.subr.bf16.mxu0 %v14429_v2  ;;  %1523 = vmatprep.mubr.bf16.mxu1 %v1360_v4  ;;  %v14434_v2 = vld [vmem:[%s20161_s5 + $0x290] sm:$0xff]   ;;  %v2135_v4 = vshll.u32 %v16152_v44, 16  ;;  %v14438_v15 = vld [vmem:[%s20161_s5 + $0x288] sm:$0xff]  }
 0x396   :  { %12784 = vmatpush3.bf16.msra.mxu1 %v14422_v38  ;;  %v16160_v38 = vshrl.u32 %v16063_v22, 16  ;;  %v2066_v12 = vld [vmem:[#allocation2 + $0x30] sm:$0xff]  ;;  %v2068_v61 = vld [vmem:[#allocation2 + $0x68] sm:$0xff] }
 0x397   :  { %1803 = vmatmul.mubr.bf16.gmra.mxu0 %v1625_v21  ;;  %12785 = vmatprep.subr.bf16.mxu1 %v14425_v37  ;;  %v2452_v37 = vrot.slane %v16046_v63, 3  ;;  %v16178_v21 = vld [vmem:[#allocation2 + $0x20] sm:$0xff] }
 0x398   :  { %1810 = vmatprep.mubr.bf16.mxu0 %v1647_v57  ;;  %12830 = vmatpush3.bf16.msra.mxu0 %v14431_v60  ;;  %v2063_v60 = vld [vmem:[#allocation2 + $0x88] sm:$0xff]  ;;  %v2459_v57 = vrot.slane %v16160_v38, 2 }
 0x399   :  { %12831 = vmatprep.subr.bf16.mxu0 %v14433_v8  ;;  %v2057_v8 = vld [vmem:[#allocation2 + $0x40] sm:$0xfe]  ;;  %v16190_v26 = vpack.c.bf16 %v2063_v60, %v2061_v18 }
 0x39a   :  { %12786 = vmatpush3.bf16.msra.mxu1 %v14427_v13  ;;  %v1351_v13 = vsel %vm1302_vm7, %v1337_v0, %v16154_v19  ;;  %v16193_v0 = vshrl.u32 %v16165_v3, 16  ;;  %v2077_v18 = vpack.c.bf16 %v16178_v21, %v2057_v8  ;;  %v2070_v60 = vld [vmem:[#allocation2 + $0xa0] sm:$0xff]  ;;  %v16215_v1 = vor.u32 %v2460_v53, %v2459_v57 }
 0x39b   :  { %12787 = vmatprep.subr.bf16.mxu1 %v14430_v62  ;;  %v14440_v62 = vld [vmem:[%s20161_s5 + $0x2c0] sm:$0xff]   ;;  %v2133_v8 = vshrl.u32 %v16152_v44, 16  ;;  %v16230_v53 = vshrl.u32 %v16190_v26, 16  ;;  %v16236_v44 = vpack.c.bf16 %v15916_v36, %v2070_v60 }
 0x39c   :  { %12832 = vmatpush3.bf16.msra.mxu0 %v14434_v2  ;;  %1524 = vmatmul.mubr.bf16.gmra.mxu1 %v1351_v13  ;;  %v16195_v2 = vor.u32 %v2452_v37, %v2451_v11  ;;  %v1638_v13 = vsel %vm1589_vm8, %v16116_v16, %v16169_v56  ;;  %v20191_v11 = vrot.slane %v16063_v22, 3  ;;  %v2137_v37 = vrot.slane %v2135_v4, 1  ;;  %v14439_v16 = vld [vmem:[%s20161_s5 + $0x378] sm:$0xff]  }
 0x39d   :  { %12833 = vmatprep.subr.bf16.mxu0 %v14437_v6  ;;  %1531 = vmatprep.mubr.bf16.mxu1 %v16106_v9  ;;  %v14436_v6 = vld [vmem:[%s20161_s5 + $0x200] sm:$0xff]   ;;  %v16208_v9 = vshll.u32 %v16165_v3, 16 }
 0x39e   :  { %12788 = vmatpush3.bf16.msra.mxu1 %v14432_v14  ;;  %v16213_v14 = vpack.c.bf16 %v2068_v61, %v2066_v12  ;;  %v16227_v4 = vsel %vm2723_vm10, %v20192_v35, %v20191_v11  ;;  %v2990_v12 = vrot.slane %v16193_v0, 3  ;;  %v2123_v61 = vshll.u32 %v2077_v18, 16 }
 0x39f   :  { %1811 = vmatmul.mubr.bf16.gmra.mxu0 %v1638_v13  ;;  %12789 = vmatprep.subr.bf16.mxu1 %v14435_v54  ;;  %v14442_v54 = vld [vmem:[%s20161_s5 + $0x280] sm:$0xff]   ;;  %v2138_v57 = vor.u32 %v2137_v37, %v2133_v8  ;;  %v2991_v60 = vrot.slane %v16208_v9, 4  ;;  %v2142_v35 = vrot.slane %v16208_v9, 1 }
 0x3a0   :  { %1818 = vmatprep.mubr.bf16.mxu0 %v16121_v55  ;;  %12834 = vmatpush3.bf16.msra.mxu0 %v14438_v15  ;;  %v14447_v55 = vld [vmem:[%s20161_s5 + $0x3f8] sm:$0xff]   ;;  %v16241_v15 = vsel %vm20197_vm11, %v16195_v2, %v16215_v1  ;;  %v16248_v13 = vshrl.u32 %v16213_v14, 16  ;;  %v16252_v11 = vshll.u32 %v16213_v14, 16  ;;  %v2125_v8 = vrot.slane %v2123_v61, 1 }
 0x3a1   :  { %12835 = vmatprep.subr.bf16.mxu0 %v14440_v62  ;;  %v16245_v62 = vshll.u32 %v16190_v26, 16  ;;  %v16259_v37 = vor.u32 %v2991_v60, %v2990_v12  ;;  %v2121_v12 = vshrl.u32 %v2077_v18, 16  ;;  %v3002_v18 = vrot.slane %v16160_v38, 3 }
 0x3a2   :  { %12790 = vmatpush3.bf16.msra.mxu1 %v14436_v6  ;;  %v16257_v6 = vshrl.u32 %v16236_v44, 16  ;;  %v2998_v42 = vrot.slane %v16248_v13, 3  ;;  %v2999_v60 = vrot.slane %v16252_v11, 4 }
 0x3a3   :  { %12867 = vmatprep.subr.bf16.mxu1 %v14439_v16  ;;  %v2978_v16 = vrot.slane %v16230_v53, 3  ;;  %v2126_v61 = vor.u32 %v2125_v8, %v2121_v12  ;;  %v2130_v58 = vrot.slane %v16245_v62, 1  ;;  %v14448_v8 = vld [vmem:[%s20161_s5 + $0x3b8] sm:$0xff]  }
 0x3a4   :  { %12836 = vmatpush3.bf16.msra.mxu0 %v14442_v54  ;;  %1532 = vmatmul.mubr.bf16.gmra.mxu1 %v16154_v19  ;;  %v16266_v54 = vshll.u32 %v16236_v44, 16  ;;  %v2143_v19 = vsel %vm1004_vm9, %v2138_v57, %v2142_v35  ;;  %v3000_v57 = vor.u32 %v2999_v60, %v2998_v42  ;;  %v20239_v60 = vpack.c.bf16 %v15671_v46, %v15669_v45  ;;  %v14444_v46 = vld [vmem:[%s20161_s5 + $0x330] sm:$0xff]  }
 0x3a5   :  { %12913 = vmatprep.subr.bf16.mxu0 %v14447_v55  ;;  %2008 = vmatprep.mubr.bf16.mxu1 %v1838_v24  ;;  %v2979_v55 = vrot.slane %v16245_v62, 4  ;;  %v3006_v24 = vrot.slane %v16257_v6, 3  ;;  %v2131_v45 = vsel %vm1004_vm9, %v2126_v61, %v2130_v58  ;;  %v14455_v61 = vld [vmem:[%s20161_s5 + $0x3e8] sm:$0xff]  }
 0x3a6   :  { %v3007_v48 = vrot.slane %v16266_v54, 4  ;;  %v16294_v42 = vsel %vm1589_vm8, %v16259_v37, %v3000_v57 }
 0x3a7   :  { %1819 = vmatmul.mubr.bf16.gmra.mxu0 %v16169_v56  ;;  %v16274_v30 = vor.u32 %v2979_v55, %v2978_v16  ;;  %v14441_v56 = vld [vmem:[%s20161_s5 + $0x338] sm:$0xff]   ;;  %v2154_v16 = vor.u32 %v16193_v0, %v2142_v35  ;;  %v3003_v55 = vrot.slane %v16085_v51, 4  ;;  %v14451_v35 = vld [vmem:[%s20161_s5 + $0x3f0] sm:$0xff]  }
 0x3a8   :  { %2336 = vmatprep.mubr.bf16.mxu0 %v2143_v19  ;;  %v2996_v19 = vor.u32 %v2995_v59, %v2994_v28  ;;  %v16296_v12 = vor.u32 %v3007_v48, %v3006_v24  ;;  %v2158_v28 = vrot.slane %v16252_v11, 1  ;;  %v20240_v48 = vpack.c.bf16 %v15694_v25, %v15661_v39  ;;  %v14452_v25 = vld [vmem:[%s20161_s5 + $0x3b0] sm:$0xff]  }
 0x3a9   :  { %v16309_v47 = vor.u32 %v3003_v55, %v3002_v18 }
 0x3aa   :  { %v16307_v59 = vsel %vm1589_vm8, %v16274_v30, %v2996_v19  ;;  %v16320_v24 = vsel %vm1589_vm8, %v3000_v57, %v16296_v12  ;;  %v2159_v18 = vsel %vm1004_vm9, %v2154_v16, %v2158_v28  ;;  %v14446_v57 = vld [vmem:[%s20161_s5 + $0x328] sm:$0xff]   ;;  %v16340_v16 = vld [vmem:[#allocation2 + $0x78] sm:$0xff]  ;;  %v2170_v55 = vor.u32 %v16248_v13, %v2158_v28  ;;  %v14458_v28 = vld [vmem:[%s20161_s5 + $0x3e0] sm:$0xff]  }
 0x3ab   :  { %v16328_v39 = vsel %vm1589_vm8, %v2996_v19, %v16309_v47  ;;  %v2076_v19 = vld [vmem:[#allocation2] sm:$0x1] }
 0x3ac   :  { %2009 = vmatmul.mubr.bf16.vlgmr.msra.gmra.mxu1 %v20239_v60  ;;  %v14456_v60 = vld [vmem:[%s20161_s5 + $0x3a8] sm:$0xff]  }
 0x3ad   :  { %12868 = vmatpush3.bf16.msra.mxu1 %v14441_v56  ;;  %2016 = vmatprep.mubr.bf16.mxu1 %v20240_v48  ;;  %v14445_v56 = vld [vmem:[%s20161_s5 + $0x368] sm:$0xff]   ;;  %v16354_v48 = vpack.c.bf16 %v2076_v19, %v16340_v16 }
 0x3ae   :  { %12869 = vmatprep.subr.bf16.mxu1 %v14443_v33  ;;  %v2146_v33 = vor.u32 %v16230_v53, %v2130_v58  ;;  %v2174_v58 = vrot.slane %v16266_v54, 1 }
 0x3af   :  { %2337 = vmatmul.mubr.bf16.vlgmr.msra.gmra.mxu0 %v2131_v45  ;;  %v20242_v45 = vpack.c.bf16 %v15793_v7, %v15696_v31  ;;  %v14460_v31 = vld [vmem:[%s20161_s5 + $0x3a0] sm:$0xff]   ;;  %v2188_v7 = vshll.u32 %v16354_v48, 16 }
 0x3b0   :  { %2344 = vmatprep.mubr.bf16.mxu0 %v2159_v18  ;;  %12914 = vmatpush3.bf16.msra.mxu0 %v14448_v8  ;;  %v14449_v8 = vld [vmem:[%s20161_s5 + $0x360] sm:$0xff]   ;;  %v2175_v18 = vsel %vm1004_vm9, %v2170_v55, %v2174_v58  ;;  %v2186_v19 = vor.u32 %v16257_v6, %v2174_v58  ;;  %v14457_v55 = vld [vmem:[%s20161_s5 + $0x350] sm:$0xff]  }
 0x3b1   :  { %12915 = vmatprep.subr.bf16.mxu0 %v14451_v35  ;;  %12870 = vmatpush3.bf16.msra.mxu1 %v14444_v46  ;;  %v20241_v35 = vpack.c.bf16 %v15764_v17, %v15674_v5  ;;  %v20243_v46 = vrot.slane %v16046_v63, 1  ;;  %v14450_v17 = vld [vmem:[%s20161_s5 + $0x320] sm:$0xff]   ;;  %v16376_v63 = vld [vmem:[#allocation2 + $0x50] sm:$0xff] }
 0x3b2   :  { %12871 = vmatprep.subr.bf16.mxu1 %v14445_v56  ;;  %v14453_v56 = vld [vmem:[%s20161_s5 + $0x358] sm:$0xff]   ;;  %v14465_v58 = vld [vmem:[%s20161_s5 + $0x3d0] sm:$0xff]  }
 0x3b3   :  { %v2151_v5 = vsel %vm1004_vm9, %v2146_v33, %v20243_v46  ;;  %v2386_v33 = vld [vmem:[#allocation2 + $0x58] sm:$0xe0]  ;;  %v20245_v46 = vpack.c.bf16 %v15916_v36, %v15804_v40  ;;  %v14466_v40 = vld [vmem:[%s20161_s5 + $0x390] sm:$0xff]  }
 0x3b4   :  { %12916 = vmatpush3.bf16.msra.mxu0 %v14452_v25  ;;  %2017 = vmatmul.mubr.bf16.gmra.mxu1 %v20241_v35  ;;  %v2075_v25 = vld [vmem:[#allocation2 + $0x18] sm:$0x1]  ;;  %v20244_v35 = vpack.c.bf16 %v15835_v10, %v15777_v20  ;;  %v14462_v10 = vld [vmem:[%s20161_s5 + $0x348] sm:$0xff]  }
 0x3b5   :  { %12917 = vmatprep.subr.bf16.mxu0 %v14455_v61  ;;  %2024 = vmatprep.mubr.bf16.mxu1 %v20242_v45  ;;  %v14461_v61 = vld [vmem:[%s20161_s5 + $0x3d8] sm:$0xff]   ;;  %v2390_v45 = vpack.c.bf16 %v16131_v52, %v2386_v33 }
 0x3b6   :  { %12872 = vmatpush3.bf16.msra.mxu1 %v14446_v57  ;;  %v14454_v57 = vld [vmem:[%s20161_s5 + $0x318] sm:$0xff]  }
 0x3b7   :  { %2345 = vmatmul.mubr.bf16.gmra.mxu0 %v2151_v5  ;;  %12873 = vmatprep.subr.bf16.mxu1 %v14449_v8  ;;  %v16389_v8 = vpack.c.bf16 %v2075_v25, %v16376_v63  ;;  %v14459_v5 = vld [vmem:[%s20161_s5 + $0x310] sm:$0xff]   ;;  %v2440_v36 = vshrl.u32 %v2390_v45, 16  ;;  %v14464_v25 = vld [vmem:[%s20161_s5 + $0x308] sm:$0xff]  }
 0x3b8   :  { %2352 = vmatprep.mubr.bf16.mxu0 %v2175_v18  ;;  %12918 = vmatpush3.bf16.msra.mxu0 %v14456_v60  ;;  %v14463_v60 = vld [vmem:[%s20161_s5 + $0x398] sm:$0xff]   ;;  %v2443_v18 = vshll.u32 %v2390_v45, 16  ;;  %v2447_v45 = vrot.slane %v16193_v0, 2 }
 0x3b9   :  { %12919 = vmatprep.subr.bf16.mxu0 %v14458_v28  ;;  %v2190_v28 = vrot.slane %v2188_v7, 1  ;;  %v14471_v0 = vld [vmem:[%s20161_s5 + $0x478] sm:$0xff]  }
 0x3ba   :  { %12874 = vmatpush3.bf16.msra.mxu1 %v14450_v17  ;;  %v2180_v17 = vshll.u32 %v16389_v8, 16 }
 0x3bb   :  { %12875 = vmatprep.subr.bf16.mxu1 %v14453_v56  ;;  %v2191_v20 = vsel %vm1004_vm9, %v2186_v19, %v2190_v28  ;;  %v2385_v56 = vld [vmem:[#allocation2 + $0x40] sm:$0xe0]  ;;  %v2195_v19 = vshrl.u32 %v16354_v48, 16 }
 0x3bc   :  { %12920 = vmatpush3.bf16.msra.mxu0 %v14460_v31  ;;  %2025 = vmatmul.mubr.bf16.gmra.mxu1 %v20244_v35  ;;  %v20246_v31 = vrot.slane %v16085_v51, 1  ;;  %v2182_v33 = vrot.slane %v2180_v17, 1  ;;  %v14470_v51 = vld [vmem:[%s20161_s5 + $0x388] sm:$0xff]   ;;  %v2442_v35 = vrot.slane %v2440_v36, 2  ;;  %v14472_v48 = vld [vmem:[%s20161_s5 + $0x3c0] sm:$0xff]   ;;  %v1845_v36 = vpack.c.bf16 %v16376_v63, %v16376_v63 }
 0x3bd   :  { %12921 = vmatprep.subr.bf16.mxu0 %v14461_v61  ;;  %2032 = vmatprep.mubr.bf16.mxu1 %v20245_v46  ;;  %v14467_v61 = vld [vmem:[%s20161_s5 + $0x340] sm:$0xff]   ;;  %v2448_v46 = vrot.slane %v16208_v9, 3 }
 0x3be   :  { %12876 = vmatpush3.bf16.msra.mxu1 %v14454_v57  ;;  %v2178_v7 = vor.u32 %v16160_v38, %v20246_v31  ;;  %v1846_v57 = vpack.c.bf16 %v16340_v16, %v16340_v16  ;;  %v2673_v38 = vld [vmem:[#allocation2 + $0x58] sm:$0xc0]  ;;  %v2672_v31 = vld [vmem:[#allocation2 + $0x40] sm:$0xc0] }
 0x3bf   :  { %2353 = vmatmul.mubr.bf16.gmra.mxu0 %v16114_v50  ;;  %12877 = vmatprep.subr.bf16.mxu1 %v14457_v55  ;;  %v14469_v50 = vld [vmem:[%s20161_s5 + $0x3c8] sm:$0xff]   ;;  %v2389_v55 = vpack.c.bf16 %v16178_v21, %v2385_v56  ;;  %v2728_v56 = vrot.slane %v16165_v3, 3  ;;  %v2676_v3 = vpack.c.bf16 %v16178_v21, %v2672_v31 }
 0x3c0   :  { %2360 = vmatprep.mubr.bf16.mxu0 %v2191_v20  ;;  %12922 = vmatpush3.bf16.msra.mxu0 %v14463_v60  ;;  %v20247_v60 = vpack.c.bf16 %v15947_v23, %v15837_v43  ;;  %v2197_v20 = vor.u32 %v2195_v19, %v2190_v28  ;;  %v14468_v43 = vld [vmem:[%s20161_s5 + $0x300] sm:$0xff]   ;;  %v2677_v23 = vpack.c.bf16 %v16131_v52, %v2673_v38  ;;  %v2455_v38 = vrot.slane %v16248_v13, 2  ;;  %v14473_v13 = vld [vmem:[%s20161_s5 + $0x438] sm:$0xff]  }
 0x3c1   :  { %12923 = vmatprep.subr.bf16.mxu0 %v14465_v58  ;;  %v2445_v58 = vrot.slane %v2443_v18, 3  ;;  %v2428_v9 = vshrl.u32 %v2389_v55, 16  ;;  %v14474_v28 = vld [vmem:[%s20161_s5 + $0x380] sm:$0xff]   ;;  %v2192_v18 = vshrl.u32 %v16389_v8, 16  ;;  %v2456_v8 = vrot.slane %v16252_v11, 3 }
 0x3c2   :  { %12878 = vmatpush3.bf16.msra.mxu1 %v14459_v5  ;;  %v2183_v5 = vsel %vm1004_vm9, %v2178_v7, %v2182_v33  ;;  %v2725_v11 = vrot.slane %v16190_v26, 3 }
 0x3c3   :  { %12879 = vmatprep.subr.bf16.mxu1 %v14462_v10  ;;  %v2431_v10 = vshll.u32 %v2389_v55, 16  ;;  %v2446_v17 = vor.u32 %v2445_v58, %v2442_v35  ;;  %v2430_v7 = vrot.slane %v2428_v9, 2  ;;  %v16463_v55 = vld [vmem:[#allocation2 + $0x8] sm:$0xff]  ;;  %v2457_v35 = vor.u32 %v2456_v8, %v2455_v38  ;;  %v2388_v58 = vld [vmem:[#allocation2] sm:$0x1f] }
 0x3c4   :  { %12924 = vmatpush3.bf16.msra.mxu0 %v14466_v40  ;;  %2033 = vmatmul.mubr.bf16.gmra.mxu1 %v20247_v60  ;;  %v2449_v40 = vor.u32 %v2448_v46, %v2447_v45  ;;  %v14475_v45 = vld [vmem:[%s20161_s5 + $0x470] sm:$0xff]   ;;  %v2732_v46 = vrot.slane %v16213_v14, 3 }
 0x3c5   :  { %12925 = vmatprep.subr.bf16.mxu0 %v14469_v50  ;;  %2040 = vmatprep.mubr.bf16.mxu1 %v1846_v57  ;;  %v2727_v50 = vrot.slane %v2677_v23, 3  ;;  %v2436_v57 = vrot.slane %v16245_v62, 3  ;;  %v2392_v23 = vpack.c.bf16 %v2388_v58, %v16340_v16 }
 0x3c6   :  { %12880 = vmatpush3.bf16.msra.mxu1 %v14464_v25  ;;  %v2433_v25 = vrot.slane %v2431_v10, 3  ;;  %v2450_v19 = vsel %vm20197_vm11, %v2446_v17, %v2449_v40  ;;  %v2733_v14 = vsel %vm2723_vm10, %v2728_v56, %v2732_v46  ;;  %v14478_v17 = vld [vmem:[%s20161_s5 + $0x428] sm:$0xff]  }
 0x3c7   :  { %2361 = vmatmul.mubr.bf16.gmra.mxu0 %v2183_v5  ;;  %12881 = vmatprep.subr.bf16.mxu1 %v14467_v61  ;;  %v2435_v61 = vrot.slane %v16230_v53, 2  ;;  %v2729_v53 = vsel %vm2723_vm10, %v2727_v50, %v2728_v56  ;;  %v2458_v5 = vsel %vm20197_vm11, %v2449_v40, %v2457_v35  ;;  %v2477_v9 = vshrl.u32 %v2392_v23, 16  ;;  %v2675_v50 = vld [vmem:[#allocation2] sm:$0x3f] }
 0x3c8   :  { %2368 = vmatprep.mubr.bf16.mxu0 %v2197_v20  ;;  %12926 = vmatpush3.bf16.msra.mxu0 %v14470_v51  ;;  %v2194_v51 = vor.u32 %v2192_v18, %v2182_v33  ;;  %v2434_v62 = vor.u32 %v2433_v25, %v2430_v7  ;;  %v2724_v33 = vrot.slane %v2676_v3, 3  ;;  %v2463_v20 = vrot.slane %v16257_v6, 2  ;;  %v14477_v6 = vld [vmem:[%s20161_s5 + $0x468] sm:$0xff]   ;;  %v14482_v3 = vld [vmem:[%s20161_s5 + $0x418] sm:$0xff]  }
 0x3c9   :  { %12927 = vmatprep.subr.bf16.mxu0 %v14472_v48  ;;  %v2437_v60 = vor.u32 %v2436_v57, %v2435_v61  ;;  %v2480_v10 = vshll.u32 %v2392_v23, 16  ;;  %v2736_v40 = vrot.slane %v16236_v44, 3  ;;  %v2479_v7 = vrot.slane %v2477_v9, 2  ;;  %v14480_v57 = vld [vmem:[%s20161_s5 + $0x420] sm:$0xff]  }
 0x3ca   :  { %12882 = vmatpush3.bf16.msra.mxu1 %v14468_v43  ;;  %v2464_v43 = vrot.slane %v16266_v54, 3  ;;  %v2726_v26 = vsel %vm2723_vm10, %v2724_v33, %v2725_v11  ;;  %v20248_v61 = vrot.slane %v16031_v49, 3  ;;  %v20249_v9 = vrot.slane %v16063_v22, 3 }
 0x3cb   :  { %12959 = vmatprep.subr.bf16.mxu1 %v14471_v0  ;;  %v2438_v48 = vsel %vm20197_vm11, %v2434_v62, %v2437_v60  ;;  %v14476_v0 = vld [vmem:[%s20161_s5 + $0x430] sm:$0xff]   ;;  %v2454_v18 = vsel %vm20197_vm11, %v2437_v60, %v16195_v2  ;;  %v2482_v25 = vrot.slane %v2480_v10, 3  ;;  %v2737_v2 = vsel %vm2723_vm10, %v2732_v46, %v2736_v40 }
 0x3cc   :  { %12928 = vmatpush3.bf16.msra.mxu0 %v14474_v28  ;;  %2041 = vmatmul.mubr.bf16.gmra.mxu1 %v1845_v36  ;;  %v2465_v54 = vor.u32 %v2464_v43, %v2463_v20  ;;  %v2387_v28 = vld [vmem:[#allocation2 + $0x18] sm:$0x1f]  ;;  %v14479_v36 = vld [vmem:[%s20161_s5 + $0x460] sm:$0xff]   ;;  %v2731_v44 = vsel %vm2723_vm10, %v2725_v11, %v20248_v61  ;;  %v14483_v60 = vld [vmem:[%s20161_s5 + $0x450] sm:$0xff]  }
 0x3cd   :  { %13653 = vmatprep.subr.bf16.mxu0 %v16463_v55  ;;  %2623 = vmatprep.mubr.bf16.mxu1 %v2450_v19  ;;  %v2391_v56 = vpack.c.bf16 %v2387_v28, %v16376_v63  ;;  %v14481_v19 = vld [vmem:[%s20161_s5 + $0x458] sm:$0xff]   ;;  %v2483_v49 = vor.u32 %v2482_v25, %v2479_v7  ;;  %v2929_v43 = vld [vmem:[#allocation2 + $0x40] sm:$0x80] }
 0x3ce   :  { %v2466_v31 = vsel %vm20197_vm11, %v2457_v35, %v2465_v54  ;;  %v2674_v35 = vld [vmem:[#allocation2 + $0x18] sm:$0x3f]  ;;  %v14488_v28 = vld [vmem:[%s20161_s5 + $0x400] sm:$0xff]  }
 0x3cf   :  { %2369 = vmatmul.mubr.bf16.gmra.mxu0 %v2194_v51  ;;  %v2679_v51 = vpack.c.bf16 %v2675_v50, %v16340_v16  ;;  %v2468_v38 = vshrl.u32 %v2391_v56, 16  ;;  %v2471_v8 = vshll.u32 %v2391_v56, 16  ;;  %v2484_v11 = vsel %vm20197_vm11, %v2465_v54, %v2483_v49  ;;  %v2932_v50 = vld [vmem:[#allocation2] sm:$0x7f]  ;;  %v2931_v61 = vld [vmem:[#allocation2 + $0x18] sm:$0x7f] }
 0x3d0   :  { %2880 = vmatprep.mubr.bf16.mxu0 %v2729_v53  ;;  %v2930_v53 = vld [vmem:[#allocation2 + $0x58] sm:$0x80]  ;;  %v2678_v46 = vpack.c.bf16 %v2674_v35, %v16376_v63 }
 0x3d1   :  { %v2740_v62 = vrot.slane %v2679_v51, 3  ;;  %v2473_v33 = vrot.slane %v2471_v8, 3  ;;  %v2934_v58 = vpack.c.bf16 %v16131_v52, %v2930_v53 }
 0x3d2   :  { %v2738_v23 = vrot.slane %v2678_v46, 3 }
 0x3d3   :  { %v2983_v52 = vshrl.u32 %v2934_v58, 16  ;;  %v2986_v20 = vshll.u32 %v2934_v58, 16 }
 0x3d4   :  { %2624 = vmatmul.mubr.bf16.vlgmr.msra.gmra.mxu1 %v2438_v48  ;;  %v2741_v48 = vsel %vm2723_vm10, %v2736_v40, %v2740_v62  ;;  %v2739_v10 = vsel %vm2723_vm10, %v20249_v9, %v2738_v23 }
 0x3d5   :  { %12960 = vmatpush3.bf16.msra.mxu1 %v14473_v13  ;;  %2631 = vmatprep.mubr.bf16.mxu1 %v2458_v5  ;;  %v2470_v13 = vrot.slane %v2468_v38, 2  ;;  %v2988_v54 = vrot.slane %v2986_v20, 4 }
 0x3d6   :  { %12961 = vmatprep.subr.bf16.mxu1 %v14475_v45  ;;  %v14484_v45 = vld [vmem:[%s20161_s5 + $0x410] sm:$0xff]  }
 0x3d7   :  { %2881 = vmatmul.mubr.bf16.vlgmr.msra.gmra.mxu0 %v2726_v26  ;;  %v2474_v5 = vor.u32 %v2473_v33, %v2470_v13  ;;  %v14486_v26 = vld [vmem:[%s20161_s5 + $0x408] sm:$0xff]  }
 0x3d8   :  { %2888 = vmatprep.mubr.bf16.mxu0 %v2733_v14  ;;  %v2933_v14 = vpack.c.bf16 %v16178_v21, %v2929_v43 }
 0x3d9   :  { %12962 = vmatpush3.bf16.msra.mxu1 %v14476_v0  ;;  %v2475_v0 = vsel %vm20197_vm11, %v16215_v1, %v2474_v5 }
 0x3da   :  { %12963 = vmatprep.subr.bf16.mxu1 %v14477_v6  ;;  %v2985_v6 = vrot.slane %v2983_v52, 3  ;;  %v2974_v1 = vshll.u32 %v2933_v14, 16 }
 0x3dc   :  { %2632 = vmatmul.mubr.bf16.gmra.mxu1 %v2454_v18  ;;  %v2989_v40 = vor.u32 %v2988_v54, %v2985_v6 }
 0x3dd   :  { %2639 = vmatprep.mubr.bf16.mxu1 %v2466_v31  ;;  %12964 = vmatpush3.bf16.msra.mxu1 %v14478_v17  ;;  %v2971_v17 = vshrl.u32 %v2933_v14, 16  ;;  %v2936_v31 = vpack.c.bf16 %v2932_v50, %v16340_v16 }
 0x3de   :  { %12965 = vmatprep.subr.bf16.mxu1 %v14479_v36  ;;  %v2976_v36 = vrot.slane %v2974_v1, 4  ;;  %v2993_v22 = vsel %vm1589_vm8, %v2989_v40, %v16259_v37 }
 0x3df   :  { %2889 = vmatmul.mubr.bf16.gmra.mxu0 %v2731_v44  ;;  %v2973_v21 = vrot.slane %v2971_v17, 3  ;;  %v3020_v7 = vshrl.u32 %v2936_v31, 16  ;;  %v3023_v25 = vshll.u32 %v2936_v31, 16  ;;  %v2935_v44 = vpack.c.bf16 %v2931_v61, %v16376_v63 }
 0x3e0   :  { %2896 = vmatprep.mubr.bf16.mxu0 %v2737_v2 }
 0x3e1   :  { %12966 = vmatpush3.bf16.msra.mxu1 %v14480_v57  ;;  %v2977_v18 = vor.u32 %v2976_v36, %v2973_v21  ;;  %v3022_v37 = vrot.slane %v3020_v7, 3  ;;  %v3025_v57 = vrot.slane %v3023_v25, 4  ;;  %v3011_v2 = vshrl.u32 %v2935_v44, 16 }
 0x3e2   :  { %12967 = vmatprep.subr.bf16.mxu1 %v14481_v19  ;;  %v3014_v19 = vshll.u32 %v2935_v44, 16 }
 0x3e3   :  { %v2981_v56 = vsel %vm1589_vm8, %v2977_v18, %v16274_v30  ;;  %v3026_v51 = vor.u32 %v3025_v57, %v3022_v37  ;;  %v3013_v30 = vrot.slane %v3011_v2, 3 }
 0x3e4   :  { %2640 = vmatmul.mubr.bf16.gmra.mxu1 %v16241_v15  ;;  %v14485_v15 = vld [vmem:[%s20161_s5 + $0x448] sm:$0xff]   ;;  %v3016_v38 = vrot.slane %v3014_v19, 4 }
 0x3e5   :  { %2647 = vmatprep.mubr.bf16.mxu1 %v2484_v11  ;;  %12968 = vmatpush3.bf16.msra.mxu1 %v14482_v3 }
 0x3e6   :  { %12969 = vmatprep.subr.bf16.mxu1 %v14483_v60  ;;  %v3017_v63 = vor.u32 %v3016_v38, %v3013_v30 }
 0x3e7   :  { %2897 = vmatmul.mubr.bf16.gmra.mxu0 %v16227_v4  ;;  %v14487_v4 = vld [vmem:[%s20161_s5 + $0x440] sm:$0xff]  }
 0x3e8   :  { %2904 = vmatprep.mubr.bf16.mxu0 %v2741_v48 }
 0x3e9   :  { %12970 = vmatpush3.bf16.msra.mxu1 %v14484_v45 }
 0x3ea   :  { %12971 = vmatprep.subr.bf16.mxu1 %v14485_v15 }
 0x3ec   :  { %2648 = vmatmul.mubr.bf16.gmra.mxu1 %v2475_v0 }
 0x3ed   :  { %2655 = vmatprep.mubr.bf16.mxu1 %v2483_v49  ;;  %12972 = vmatpush3.bf16.msra.mxu1 %v14486_v26 }
 0x3ee   :  { %12973 = vmatprep.subr.bf16.mxu1 %v14487_v4 }
 0x3ef   :  { %2905 = vmatmul.mubr.bf16.gmra.mxu0 %v2739_v10 }
 0x3f0   :  { %2912 = vmatprep.mubr.bf16.mxu0 %v2740_v62 }
 0x3f1   :  { %12974 = vmatpush3.bf16.msra.mxu1 %v14488_v28 }
 0x3f2   :  { %13689 = vmatprep.subr.bf16.mxu1 %v16463_v55 }
 0x3f4   :  { %2656 = vmatmul.mubr.bf16.gmra.mxu1 %v2474_v5 }
 0x3f5   :  { %3166 = vmatprep.mubr.bf16.mxu1 %v2993_v22 }
 0x3f7   :  { %2913 = vmatmul.mubr.bf16.gmra.mxu0 %v2738_v23 }
 0x3f8   :  { %13669 = vmatprep.mubr.msk.bf16.mxu0 %vm15077_vm12, %v16463_v55 }
 0x3fc   :  { %3167 = vmatmul.mubr.bf16.vlgmr.msra.gmra.mxu1 %v2981_v56 }
 0x3fd   :  { %3174 = vmatprep.mubr.bf16.mxu1 %v16294_v42  ;;  %v3027_v42 = vsel %vm1589_vm8, %v16296_v12, %v3026_v51 }
 0x404   :  { %3175 = vmatmul.mubr.bf16.gmra.mxu1 %v16307_v59 }
 0x405   :  { %3182 = vmatprep.mubr.bf16.mxu1 %v16320_v24  ;;  %v3018_v24 = vsel %vm1589_vm8, %v16309_v47, %v3017_v63 }
 0x40c   :  { %3183 = vmatmul.mubr.bf16.gmra.mxu1 %v16328_v39 }
 0x40d   :  { %v12607_v16 = vpop.f32.mrf.mxu1  ;;  %3190 = vmatprep.mubr.bf16.mxu1 %v3027_v42 }
 0x40f   :  { %v12608_v8 = vpop.f32.mrf.mxu1 }
 0x410   :  { %v12609_v49 = vadd.f32 %v12608_v8, %v12607_v16 }
 0x411   :  { %v12610_v59 = vpop.f32.mrf.mxu1 }
 0x413   :  { %v12653_v3 = vpop.f32.mrf.mxu0  ;;  %v12611_v60 = vpop.f32.mrf.mxu1 }
 0x414   :  { %3191 = vmatmul.mubr.bf16.gmra.mxu1 %v3018_v24  ;;  %v12612_v12 = vadd.f32 %v12611_v60, %v12610_v59 }
 0x415   :  { %v12654_v53 = vpop.f32.mrf.mxu0  ;;  %3198 = vmatprep.mubr.bf16.mxu1 %v3026_v51 }
 0x416   :  { %v12655_v62 = vadd.f32 %v12654_v53, %v12653_v3 }
 0x417   :  { %v12656_v35 = vpop.f32.mrf.mxu0 }
 0x418   :  { %v16559_v39 = vadd.f32 %v12655_v62, %v12609_v49 }
 0x419   :  { %v12657_v13 = vpop.f32.mrf.mxu0 }
 0x41a   :  { %v12658_v33 = vadd.f32 %v12657_v13, %v12656_v35 }
 0x41c   :  { %v16561_v58 = vadd.f32 %v12658_v33, %v12612_v12  ;;  %3199 = vmatmul.mubr.bf16.gmra.mxu1 %v3017_v63 }
 0x41d   :  { %v12613_v11 = vpop.f32.mrf.mxu1  ;;  %v12659_v46 = vpop.f32.mrf.mxu0  ;;  %13705 = vmatprep.mubr.msk.bf16.mxu1 %vm15077_vm12, %v16463_v55 }
 0x41f   :  { %v12614_v45 = vpop.f32.mrf.mxu1  ;;  %v12660_v47 = vpop.f32.mrf.mxu0 }
 0x420   :  { %v12615_v48 = vadd.f32 %v12614_v45, %v12613_v11  ;;  %v12661_v5 = vadd.f32 %v12660_v47, %v12659_v46 }
 0x421   :  { %v12616_v15 = vpop.f32.mrf.mxu1  ;;  %v12662_v20 = vpop.f32.mrf.mxu0 }
 0x422   :  { %v16563_v43 = vadd.f32 %v12661_v5, %v12615_v48 }
 0x423   :  { %v12617_v52 = vpop.f32.mrf.mxu1  ;;  %v12663_v26 = vpop.f32.mrf.mxu0 }
 0x424   :  { %v12618_v4 = vadd.f32 %v12617_v52, %v12616_v15  ;;  %v12664_v0 = vadd.f32 %v12663_v26, %v12662_v20 }
 0x425   :  { %v12619_v23 = vpop.f32.mrf.mxu1 }
 0x426   :  { %v12665_v6 = vpop.f32.mrf.mxu0  ;;  %v16565_v9 = vadd.f32 %v12664_v0, %v12618_v4 }
 0x427   :  { %v12620_v14 = vpop.f32.mrf.mxu1 }
 0x428   :  { %v12621_v54 = vadd.f32 %v12620_v14, %v12619_v23  ;;  %v12666_v28 = vpop.f32.mrf.mxu0 }
 0x429   :  { %v12622_v10 = vpop.f32.mrf.mxu1  ;;  %v12667_v17 = vadd.f32 %v12666_v28, %v12665_v6 }
 0x42a   :  { %v12668_v40 = vpop.f32.mrf.mxu0 }
 0x42b   :  { %v12623_v1 = vpop.f32.mrf.mxu1  ;;  %v16567_v21 = vadd.f32 %v12667_v17, %v12621_v54 }
 0x42c   :  { %v12669_v36 = vpop.f32.mrf.mxu0  ;;  %v12624_v22 = vadd.f32 %v12623_v1, %v12622_v10 }
 0x42d   :  { %v12670_v18 = vadd.f32 %v12669_v36, %v12668_v40 }
 0x42f   :  { %v16569_v50 = vadd.f32 %v12670_v18, %v12624_v22 }
 0x434   :  { %v12625_v56 = vpop.f32.mrf.mxu1 }
 0x436   :  { %v12626_v31 = vpop.f32.mrf.mxu1 }
 0x437   :  { %v12671_v7 = vpop.f32.mrf.mxu0  ;;  %v12627_v25 = vadd.f32 %v12626_v31, %v12625_v56 }
 0x438   :  { %v12628_v61 = vpop.f32.mrf.mxu1 }
 0x439   :  { %v12672_v44 = vpop.f32.mrf.mxu0 }
 0x43a   :  { %v12673_v37 = vadd.f32 %v12672_v44, %v12671_v7  ;;  %v12629_v57 = vpop.f32.mrf.mxu1 }
 0x43b   :  { %v12674_v2 = vpop.f32.mrf.mxu0  ;;  %v12630_v38 = vadd.f32 %v12629_v57, %v12628_v61 }
 0x43c   :  { %v16571_v19 = vadd.f32 %v12673_v37, %v12627_v25  ;;  %v12631_v51 = vpop.f32.mrf.mxu1 }
 0x43d   :  { %v12675_v30 = vpop.f32.mrf.mxu0 }
 0x43e   :  { %v12676_v42 = vadd.f32 %v12675_v30, %v12674_v2  ;;  %v12632_v16 = vpop.f32.mrf.mxu1 }
 0x43f   :  { %v12677_v8 = vpop.f32.mrf.mxu0  ;;  %v12633_v63 = vadd.f32 %v12632_v16, %v12631_v51 }
 0x440   :  { %v16573_v49 = vadd.f32 %v12676_v42, %v12630_v38  ;;  %v12634_v59 = vpop.f32.mrf.mxu1 }
 0x441   :  { %v12678_v3 = vpop.f32.mrf.mxu0 }
 0x442   :  { %v12679_v24 = vadd.f32 %v12678_v3, %v12677_v8  ;;  %v12635_v53 = vpop.f32.mrf.mxu1 }
 0x443   :  { %v12680_v62 = vpop.f32.mrf.mxu0 }
 0x444   :  { %v16575_v60 = vadd.f32 %v12679_v24, %v12633_v63  ;;  %v12699_v35 = vpop.f32.mrf.mxu1 }
 0x445   :  { %v12681_v13 = vpop.f32.mrf.mxu0 }
 0x446   :  { %v12700_v12 = vpop.f32.mrf.mxu1 }
 0x447   :  { %v12745_v33 = vpop.f32.mrf.mxu0  ;;  %v12701_v11 = vadd.f32 %v12700_v12, %v12699_v35 }
 0x448   :  { %v12702_v45 = vpop.f32.mrf.mxu1 }
 0x449   :  { %v12746_v46 = vpop.f32.mrf.mxu0  ;;  %v1539_v48 = vadd.f32 %v12701_v11, %v16559_v39 }
 0x44a   :  { %v12747_v15 = vadd.f32 %v12746_v46, %v12745_v33  ;;  %v12703_v47 = vpop.f32.mrf.mxu1 }
 0x44b   :  { %v12748_v5 = vpop.f32.mrf.mxu0  ;;  %v12704_v52 = vadd.f32 %v12703_v47, %v12702_v45 }
 0x44c   :  { %v16578_v20 = vadd.f32 %v12747_v15, %v1539_v48  ;;  %v12705_v23 = vpop.f32.mrf.mxu1 }
 0x44d   :  { %v12749_v26 = vpop.f32.mrf.mxu0  ;;  %v1540_v4 = vadd.f32 %v12704_v52, %v16561_v58 }
 0x44e   :  { %v12750_v0 = vadd.f32 %v12749_v26, %v12748_v5  ;;  %v12706_v14 = vpop.f32.mrf.mxu1 }
 0x44f   :  { %v12751_v6 = vpop.f32.mrf.mxu0  ;;  %v12707_v54 = vadd.f32 %v12706_v14, %v12705_v23 }
 0x450   :  { %v16581_v10 = vadd.f32 %v12750_v0, %v1540_v4  ;;  %v12708_v28 = vpop.f32.mrf.mxu1 }
 0x451   :  { %v12752_v17 = vpop.f32.mrf.mxu0  ;;  %v1541_v39 = vadd.f32 %v12707_v54, %v16563_v43 }
 0x452   :  { %v12753_v1 = vadd.f32 %v12752_v17, %v12751_v6  ;;  %v12709_v40 = vpop.f32.mrf.mxu1 }
 0x453   :  { %v12754_v36 = vpop.f32.mrf.mxu0  ;;  %v12710_v22 = vadd.f32 %v12709_v40, %v12708_v28 }
 0x454   :  { %v16584_v18 = vadd.f32 %v12753_v1, %v1541_v39  ;;  %v12711_v56 = vpop.f32.mrf.mxu1 }
 0x455   :  { %v12755_v31 = vpop.f32.mrf.mxu0  ;;  %v1542_v58 = vadd.f32 %v12710_v22, %v16565_v9 }
 0x456   :  { %v12756_v7 = vadd.f32 %v12755_v31, %v12754_v36  ;;  %v12712_v25 = vpop.f32.mrf.mxu1 }
 0x457   :  { %v12757_v61 = vpop.f32.mrf.mxu0  ;;  %v12713_v44 = vadd.f32 %v12712_v25, %v12711_v56 }
 0x458   :  { %v16587_v37 = vadd.f32 %v12756_v7, %v1542_v58  ;;  %v12714_v57 = vpop.f32.mrf.mxu1 }
 0x459   :  { %v12758_v2 = vpop.f32.mrf.mxu0  ;;  %v1543_v43 = vadd.f32 %v12713_v44, %v16567_v21 }
 0x45a   :  { %v12759_v51 = vadd.f32 %v12758_v2, %v12757_v61  ;;  %v12715_v30 = vpop.f32.mrf.mxu1 }
 0x45b   :  { %v12760_v38 = vpop.f32.mrf.mxu0  ;;  %v12716_v42 = vadd.f32 %v12715_v30, %v12714_v57 }
 0x45c   :  { %v16590_v16 = vadd.f32 %v12759_v51, %v1543_v43  ;;  %v12717_v8 = vpop.f32.mrf.mxu1 }
 0x45d   :  { %v12761_v63 = vpop.f32.mrf.mxu0  ;;  %v1544_v9 = vadd.f32 %v12716_v42, %v16569_v50 }
 0x45e   :  { %v12762_v59 = vadd.f32 %v12761_v63, %v12760_v38  ;;  %v12718_v3 = vpop.f32.mrf.mxu1 }
 0x45f   :  { %v12763_v24 = vpop.f32.mrf.mxu0  ;;  %v12719_v53 = vadd.f32 %v12718_v3, %v12717_v8 }
 0x460   :  { %v16593_v62 = vadd.f32 %v12762_v59, %v1544_v9  ;;  %v12720_v35 = vpop.f32.mrf.mxu1 }
 0x461   :  { %v12764_v13 = vpop.f32.mrf.mxu0  ;;  %v1545_v21 = vadd.f32 %v12719_v53, %v16571_v19 }
 0x462   :  { %v12765_v12 = vadd.f32 %v12764_v13, %v12763_v24  ;;  %v12721_v33 = vpop.f32.mrf.mxu1 }
 0x463   :  { %v12766_v11 = vpop.f32.mrf.mxu0  ;;  %v12722_v45 = vadd.f32 %v12721_v33, %v12720_v35 }
 0x464   :  { %v16596_v46 = vadd.f32 %v12765_v12, %v1545_v21  ;;  %v12723_v48 = vpop.f32.mrf.mxu1 }
 0x465   :  { %v12767_v15 = vpop.f32.mrf.mxu0  ;;  %v1546_v50 = vadd.f32 %v12722_v45, %v16573_v49 }
 0x466   :  { %v12768_v47 = vadd.f32 %v12767_v15, %v12766_v11  ;;  %v12724_v5 = vpop.f32.mrf.mxu1 }
 0x467   :  { %v12769_v52 = vpop.f32.mrf.mxu0  ;;  %v12725_v23 = vadd.f32 %v12724_v5, %v12723_v48 }
 0x468   :  { %v16599_v26 = vadd.f32 %v12768_v47, %v1546_v50  ;;  %v12726_v4 = vpop.f32.mrf.mxu1 }
 0x469   :  { %v12770_v0 = vpop.f32.mrf.mxu0  ;;  %v1547_v19 = vadd.f32 %v12725_v23, %v16575_v60 }
 0x46a   :  { %v12771_v14 = vadd.f32 %v12770_v0, %v12769_v52  ;;  %v12727_v6 = vpop.f32.mrf.mxu1 }
 0x46b   :  { %v12772_v54 = vpop.f32.mrf.mxu0 }
 0x46c   :  { %v16602_v28 = vadd.f32 %v12771_v14, %v1547_v19  ;;  %v12791_v17 = vpop.f32.mrf.mxu1 }
 0x46d   :  { %v12773_v39 = vpop.f32.mrf.mxu0 }
 0x46e   :  { %v12792_v1 = vpop.f32.mrf.mxu1 }
 0x46f   :  { %v12837_v40 = vpop.f32.mrf.mxu0  ;;  %v12793_v49 = vadd.f32 %v12792_v1, %v12791_v17 }
 0x470   :  { %v12794_v36 = vpop.f32.mrf.mxu1 }
 0x471   :  { %v12838_v22 = vpop.f32.mrf.mxu0  ;;  %v2048_v56 = vadd.f32 %v12793_v49, %v16578_v20 }
 0x472   :  { %v12839_v31 = vadd.f32 %v12838_v22, %v12837_v40  ;;  %v12795_v58 = vpop.f32.mrf.mxu1 }
 0x473   :  { %v12840_v7 = vpop.f32.mrf.mxu0  ;;  %v12796_v25 = vadd.f32 %v12795_v58, %v12794_v36 }
 0x474   :  { %v16605_v61 = vadd.f32 %v12839_v31, %v2048_v56  ;;  %v12797_v60 = vpop.f32.mrf.mxu1 }
 0x475   :  { %v12841_v44 = vpop.f32.mrf.mxu0  ;;  %v2049_v57 = vadd.f32 %v12796_v25, %v16581_v10 }
 0x476   :  { %v12842_v2 = vadd.f32 %v12841_v44, %v12840_v7  ;;  %v12798_v43 = vpop.f32.mrf.mxu1 }
 0x477   :  { %v12843_v51 = vpop.f32.mrf.mxu0  ;;  %v12799_v30 = vadd.f32 %v12798_v43, %v12797_v60 }
 0x478   :  { %v16608_v38 = vadd.f32 %v12842_v2, %v2049_v57  ;;  %v12800_v42 = vpop.f32.mrf.mxu1 }
 0x479   :  { %v12844_v8 = vpop.f32.mrf.mxu0  ;;  %v2050_v20 = vadd.f32 %v12799_v30, %v16584_v18 }
 0x47a   :  { %v12845_v63 = vadd.f32 %v12844_v8, %v12843_v51  ;;  %v12801_v9 = vpop.f32.mrf.mxu1 }
 0x47b   :  { %v12846_v59 = vpop.f32.mrf.mxu0  ;;  %v12802_v3 = vadd.f32 %v12801_v9, %v12800_v42 }
 0x47c   :  { %v16611_v24 = vadd.f32 %v12845_v63, %v2050_v20  ;;  %v12803_v53 = vpop.f32.mrf.mxu1 }
 0x47d   :  { %v12847_v35 = vpop.f32.mrf.mxu0  ;;  %v2051_v10 = vadd.f32 %v12802_v3, %v16587_v37 }
 0x47e   :  { %v12848_v13 = vadd.f32 %v12847_v35, %v12846_v59  ;;  %v12804_v21 = vpop.f32.mrf.mxu1 }
 0x47f   :  { %v12849_v12 = vpop.f32.mrf.mxu0  ;;  %v12805_v33 = vadd.f32 %v12804_v21, %v12803_v53 }
 0x480   :  { %v16614_v11 = vadd.f32 %v12848_v13, %v2051_v10  ;;  %v12806_v45 = vpop.f32.mrf.mxu1 }
 0x481   :  { %v12850_v48 = vpop.f32.mrf.mxu0  ;;  %v2052_v18 = vadd.f32 %v12805_v33, %v16590_v16 }
 0x482   :  { %v12851_v15 = vadd.f32 %v12850_v48, %v12849_v12  ;;  %v12807_v50 = vpop.f32.mrf.mxu1 }
 0x483   :  { %v12852_v47 = vpop.f32.mrf.mxu0  ;;  %v12808_v5 = vadd.f32 %v12807_v50, %v12806_v45 }
 0x484   :  { %v16617_v52 = vadd.f32 %v12851_v15, %v2052_v18  ;;  %v12809_v23 = vpop.f32.mrf.mxu1 }
 0x485   :  { %v12853_v4 = vpop.f32.mrf.mxu0  ;;  %v2053_v37 = vadd.f32 %v12808_v5, %v16593_v62 }
 0x486   :  { %v12854_v0 = vadd.f32 %v12853_v4, %v12852_v47  ;;  %v12810_v19 = vpop.f32.mrf.mxu1 }
 0x487   :  { %v12855_v14 = vpop.f32.mrf.mxu0  ;;  %v12811_v6 = vadd.f32 %v12810_v19, %v12809_v23 }
 0x488   :  { %v16620_v54 = vadd.f32 %v12854_v0, %v2053_v37  ;;  %v12812_v17 = vpop.f32.mrf.mxu1 }
 0x489   :  { %v12856_v39 = vpop.f32.mrf.mxu0  ;;  %v2054_v16 = vadd.f32 %v12811_v6, %v16596_v46 }
 0x48a   :  { %v12857_v1 = vadd.f32 %v12856_v39, %v12855_v14  ;;  %v12813_v40 = vpop.f32.mrf.mxu1 }
 0x48b   :  { %v12858_v49 = vpop.f32.mrf.mxu0  ;;  %v12814_v36 = vadd.f32 %v12813_v40, %v12812_v17 }
 0x48c   :  { %v16623_v22 = vadd.f32 %v12857_v1, %v2054_v16  ;;  %v12815_v56 = vpop.f32.mrf.mxu1 }
 0x48d   :  { %v12859_v31 = vpop.f32.mrf.mxu0  ;;  %v2055_v62 = vadd.f32 %v12814_v36, %v16599_v26 }
 0x48e   :  { %v12860_v58 = vadd.f32 %v12859_v31, %v12858_v49  ;;  %v12816_v7 = vpop.f32.mrf.mxu1 }
 0x48f   :  { %v12861_v25 = vpop.f32.mrf.mxu0  ;;  %v12817_v60 = vadd.f32 %v12816_v7, %v12815_v56 }
 0x490   :  { %v16626_v44 = vadd.f32 %v12860_v58, %v2055_v62  ;;  %v12818_v57 = vpop.f32.mrf.mxu1  ;;  %v14489_v62 = vld [vmem:[%s20164_s8 + $0x78] sm:$0xff]  }
 0x491   :  { %v12862_v2 = vpop.f32.mrf.mxu0  ;;  %v2056_v46 = vadd.f32 %v12817_v60, %v16602_v28  ;;  %v14491_v58 = vld [vmem:[%s20164_s8 + $0x38] sm:$0xff]   ;;  %13654 = vmatpush3.bf16.msra.mxu0 %v14489_v62  ;;  %v14490_v57 = vld [vmem:[%s20164_s8 + $0x70] sm:$0xff]   ;;  %v14492_v62 = vld [vmem:[%s20164_s8 + $0x68] sm:$0xff]  }
 0x492   :  { %v12863_v43 = vadd.f32 %v12862_v2, %v12861_v25  ;;  %v12819_v51 = vpop.f32.mrf.mxu1  ;;  %13690 = vmatpush3.bf16.msra.mxu1 %v14491_v58  ;;  %v14493_v2 = vld [vmem:[%s20164_s8 + $0x30] sm:$0xff]   ;;  %13655 = vmatprep.subr.bf16.mxu0 %v16463_v55  ;;  %v14495_v58 = vld [vmem:[%s20164_s8 + $0x28] sm:$0xff]  }
 0x493   :  { %v12864_v30 = vpop.f32.mrf.mxu0  ;;  %13691 = vmatprep.subr.bf16.mxu1 %v16463_v55 }
 0x494   :  { %v16629_v42 = vadd.f32 %v12863_v43, %v2056_v46  ;;  %v12883_v8 = vpop.f32.mrf.mxu1 }
 0x495   :  { %v12865_v20 = vpop.f32.mrf.mxu0  ;;  %13656 = vmatpush3.bf16.msra.mxu0 %v14490_v57 }
 0x496   :  { %v12884_v63 = vpop.f32.mrf.mxu1  ;;  %13692 = vmatpush3.bf16.msra.mxu1 %v14493_v2  ;;  %13657 = vmatprep.subr.bf16.mxu0 %v16463_v55 }
 0x497   :  { %v12929_v9 = vpop.f32.mrf.mxu0  ;;  %v12885_v60 = vadd.f32 %v12884_v63, %v12883_v8  ;;  %13693 = vmatprep.subr.bf16.mxu1 %v16463_v55 }
 0x498   :  { %v12886_v26 = vpop.f32.mrf.mxu1 }
 0x499   :  { %v12930_v59 = vpop.f32.mrf.mxu0  ;;  %v2663_v8 = vadd.f32 %v12885_v60, %v16605_v61  ;;  %13658 = vmatpush3.bf16.msra.mxu0 %v14492_v62  ;;  %v14494_v60 = vld [vmem:[%s20164_s8 + $0x60] sm:$0xff]  }
 0x49a   :  { %v12887_v3 = vpop.f32.mrf.mxu1  ;;  %v12931_v30 = vadd.f32 %v12930_v59, %v12929_v9  ;;  %13694 = vmatpush3.bf16.msra.mxu1 %v14495_v58  ;;  %13659 = vmatprep.subr.bf16.mxu0 %v16463_v55 }
 0x49b   :  { %v12932_v53 = vpop.f32.mrf.mxu0  ;;  %v12888_v51 = vadd.f32 %v12887_v3, %v12886_v26  ;;  %13695 = vmatprep.subr.bf16.mxu1 %v16463_v55 }
 0x49c   :  { %v12889_v35 = vpop.f32.mrf.mxu1  ;;  %v2920_v9 = vadd.f32 %v12931_v30, %v2663_v8  ;;  %v14496_v30 = vld [vmem:[%s20164_s8 + $0x58] sm:$0xff]  }
 0x49d   :  { %v12933_v10 = vpop.f32.mrf.mxu0  ;;  %v2664_v61 = vadd.f32 %v12888_v51, %v16608_v38  ;;  %13660 = vmatpush3.bf16.msra.mxu0 %v14494_v60 }
 0x49e   :  { %v12890_v13 = vpop.f32.mrf.mxu1  ;;  %v12934_v63 = vadd.f32 %v12933_v10, %v12932_v53  ;;  %13661 = vmatprep.subr.bf16.mxu0 %v16463_v55 }
 0x49f   :  { %v12935_v21 = vpop.f32.mrf.mxu0 }
 0x4a0   :  { %v16631_v12 = vpop.f32.mrf.mxu1  ;;  %v2921_v3 = vadd.f32 %v12934_v63, %v2664_v61 }
 0x4a1   :  { %v12936_v28 = vpop.f32.mrf.mxu0  ;;  %13662 = vmatpush3.bf16.msra.mxu0 %v14496_v30 }
 0x4a2   :  { %v16633_v33 = vpop.f32.mrf.mxu1  ;;  %v12937_v26 = vadd.f32 %v12936_v28, %v12935_v21  ;;  %13663 = vmatprep.subr.bf16.mxu0 %v16463_v55 }
 0x4a3   :  { %v16635_v45 = vpop.f32.mrf.mxu0  ;;  %v12894_v21 = vadd.f32 %v16633_v33, %v16631_v12  ;;  %v14499_v12 = vld [vmem:[%s20164_s8 + $0x18] sm:$0xff]  }
 0x4a4   :  { %v16637_v48 = vpop.f32.mrf.mxu1 }
 0x4a5   :  { %v16639_v18 = vpop.f32.mrf.mxu0 }
 0x4a6   :  { %v16641_v15 = vpop.f32.mrf.mxu1  ;;  %v12940_v2 = vadd.f32 %v16639_v18, %v16635_v45  ;;  %v2666_v18 = vadd.f32 %v12894_v21, %v16614_v11  ;;  %v14500_v11 = vld [vmem:[%s20164_s8 + $0x10] sm:$0xff]  }
 0x4a7   :  { %v16643_v50 = vpop.f32.mrf.mxu0  ;;  %v12897_v33 = vadd.f32 %v16641_v15, %v16637_v48  ;;  %v14498_v48 = vld [vmem:[%s20164_s8 + $0x50] sm:$0xff]  }
 0x4a8   :  { %v16645_v47 = vpop.f32.mrf.mxu1  ;;  %v2923_v62 = vadd.f32 %v12940_v2, %v2666_v18  ;;  %13664 = vmatpush3.bf16.msra.mxu0 %v14498_v48  ;;  %v16793_v18 = vld [vmem:[#allocation2 + $0x8] sm:$0xff] }
 0x4a9   :  { %v16647_v5 = vpop.f32.mrf.mxu0  ;;  %v2667_v15 = vadd.f32 %v12897_v33, %v16617_v52  ;;  %13665 = vmatprep.subr.bf16.mxu0 %v16463_v55 }
 0x4aa   :  { %v16649_v23 = vpop.f32.mrf.mxu1  ;;  %v12943_v63 = vadd.f32 %v16647_v5, %v16643_v50 }
 0x4ab   :  { %v16651_v4 = vpop.f32.mrf.mxu0  ;;  %v12900_v50 = vadd.f32 %v16649_v23, %v16645_v47  ;;  %v14502_v47 = vld [vmem:[%s20164_s8 + $0x8] sm:$0xff]  }
 0x4ac   :  { %v16653_v37 = vpop.f32.mrf.mxu1 }
 0x4ad   :  { %v16655_v0 = vpop.f32.mrf.mxu0 }
 0x4ae   :  { %v16657_v19 = vpop.f32.mrf.mxu1 }
 0x4af   :  { %v16659_v14 = vpop.f32.mrf.mxu0  ;;  %v12903_v23 = vadd.f32 %v16657_v19, %v16653_v37  ;;  %v14503_v37 = vld [vmem:[%s20164_s8 + $0x40] sm:$0xff]  }
 0x4b0   :  { %v16661_v6 = vpop.f32.mrf.mxu1 }
 0x4b1   :  { %v16663_v17 = vpop.f32.mrf.mxu0  ;;  %v2669_v19 = vadd.f32 %v12903_v23, %v16623_v22 }
 0x4b2   :  { %v16665_v39 = vpop.f32.mrf.mxu1 }
 0x4b3   :  { %v16667_v16 = vpop.f32.mrf.mxu0 }
 0x4b4   :  { %v16669_v1 = vpop.f32.mrf.mxu1 }
 0x4b5   :  { %v16671_v40 = vpop.f32.mrf.mxu0 }
 0x4b6   :  { %v16673_v49 = vpop.f32.mrf.mxu1  ;;  %v12952_v30 = vadd.f32 %v16671_v40, %v16667_v16 }
 0x4b7   :  { %v16675_v36 = vpop.f32.mrf.mxu0 }
 0x4b8   :  { %v12910_v56 = vpop.f32.mrf.mxu1 }
 0x4b9   :  { %v16677_v31 = vpop.f32.mrf.mxu0 }
 0x4ba   :  { %v12911_v7 = vpop.f32.mrf.mxu1 }
 0x4bb   :  { %v12956_v25 = vpop.f32.mrf.mxu0  ;;  %v12891_v7 = vadd.f32 %v12890_v13, %v12889_v35  ;;  %v14497_v35 = vld [vmem:[%s20164_s8 + $0x20] sm:$0xff]  }
 0x4bc   :  { %v12975_v46 = vpop.f32.mrf.mxu1  ;;  %13696 = vmatpush3.bf16.msra.mxu1 %v14497_v35 }
 0x4bd   :  { %v12957_v43 = vpop.f32.mrf.mxu0  ;;  %v2665_v13 = vadd.f32 %v12891_v7, %v16611_v24  ;;  %13697 = vmatprep.subr.bf16.mxu1 %v16463_v55 }
 0x4be   :  { %v12976_v20 = vpop.f32.mrf.mxu1 }
 0x4bf   :  { %v12977_v56 = vadd.f32 %v12976_v20, %v12975_v46  ;;  %v2922_v57 = vadd.f32 %v12937_v26, %v2665_v13  ;;  %v12949_v13 = vadd.f32 %v16663_v17, %v16659_v14  ;;  %v12906_v14 = vadd.f32 %v16665_v39, %v16661_v6 }
 0x4c0   :  { %v12978_v25 = vpop.f32.mrf.mxu1  ;;  %13698 = vmatpush3.bf16.msra.mxu1 %v14499_v12  ;;  %v20250_v12 = vld [vmem:[#allocation16_spill] sm:$0xff]  ;;  %v12909_v6 = vadd.f32 %v16673_v49, %v16669_v1 }
 0x4c1   :  { %v16707_v53 = vadd.f32 %v12977_v56, %v2920_v9  ;;  %13699 = vmatprep.subr.bf16.mxu1 %v16463_v55  ;;  %v2924_v9 = vadd.f32 %v12943_v63, %v2667_v15  ;;  %v12955_v63 = vadd.f32 %v16677_v31, %v16675_v36 }
 0x4c2   :  { %v12979_v59 = vpop.f32.mrf.mxu1  ;;  %v2671_v48 = vadd.f32 %v12909_v6, %v16629_v42 }
 0x4c3   :  { %v12980_v10 = vadd.f32 %v12979_v59, %v12978_v25  ;;  %v3217_v43 = vmul.f32 %v16707_v53, %v15248_v27  ;;  %v12946_v59 = vadd.f32 %v16655_v0, %v16651_v4  ;;  %v2668_v4 = vadd.f32 %v12900_v50, %v16620_v54  ;;  %v14504_v54 = vld [vmem:[%s20164_s8] sm:$0xff]   ;;  %v20252_v50 = vld [vmem:[#allocation18_spill] sm:$0xff] }
 0x4c4   :  { %v12981_v38 = vpop.f32.mrf.mxu1  ;;  %13700 = vmatpush3.bf16.msra.mxu1 %v14500_v11 }
 0x4c5   :  { %v16720_v28 = vadd.f32 %v12980_v10, %v2921_v3  ;;  %v14501_v10 = vld [vmem:[%s20164_s8 + $0x48] sm:$0xff]   ;;  %13701 = vmatprep.subr.bf16.mxu1 %v16463_v55  ;;  %v2925_v21 = vadd.f32 %v12946_v59, %v2668_v4 }
 0x4c6   :  { %v12982_v46 = vpop.f32.mrf.mxu1  ;;  %13666 = vmatpush3.bf16.msra.mxu0 %v14501_v10 }
 0x4c7   :  { %v3218_v24 = vmul.f32 %v16720_v28, %v15258_v32  ;;  %v12983_v51 = vadd.f32 %v12982_v46, %v12981_v38  ;;  %13667 = vmatprep.subr.bf16.mxu0 %v16463_v55 }
 0x4c8   :  { %v12984_v45 = vpop.f32.mrf.mxu1  ;;  %13702 = vmatpush3.bf16.msra.mxu1 %v14502_v47 }
 0x4c9   :  { %v3226_v20 = vadd.f32 %v3218_v24, %v3217_v43  ;;  %v16739_v8 = vadd.f32 %v12983_v51, %v2922_v57  ;;  %13703 = vmatprep.subr.bf16.mxu1 %v16463_v55  ;;  %v2926_v24 = vadd.f32 %v12949_v13, %v2669_v19  ;;  %v2670_v55 = vadd.f32 %v12906_v14, %v16626_v44 }
 0x4ca   :  { %v12985_v56 = vpop.f32.mrf.mxu1  ;;  %13668 = vmatpush3.bf16.msra.mxu0 %v14503_v37  ;;  %v2928_v44 = vadd.f32 %v12955_v63, %v2671_v48 }
 0x4cb   :  { %v3219_v58 = vmul.f32 %v16739_v8, %v15252_v29  ;;  %v12986_v7 = vadd.f32 %v12985_v56, %v12984_v45  ;;  %13725 = vmatprep.subr.bf16.mxu0 %v16793_v18  ;;  %v2927_v40 = vadd.f32 %v12952_v30, %v2670_v55  ;;  %v20251_v56 = vld [vmem:[#allocation17_spill] sm:$0xff] }
 0x4cc   :  { %v12987_v25 = vpop.f32.mrf.mxu1  ;;  %13704 = vmatpush3.bf16.msra.mxu1 %v14504_v54 }
 0x4cd   :  { %v3227_v5 = vadd.f32 %v3226_v20, %v3219_v58  ;;  %v16756_v61 = vadd.f32 %v12986_v7, %v2923_v62  ;;  %13761 = vmatprep.subr.bf16.mxu1 %v16793_v18 }
 0x4ce   :  { %v12988_v26 = vpop.f32.mrf.mxu1 }
 0x4cf   :  { %v3220_v3 = vmul.f32 %v16756_v61, %v15262_v34  ;;  %v12989_v52 = vadd.f32 %v12988_v26, %v12987_v25 }
 0x4d0   :  { %v12990_v60 = vpop.f32.mrf.mxu1 }
 0x4d1   :  { %v3228_v0 = vadd.f32 %v3227_v5, %v3220_v3  ;;  %v16773_v35 = vadd.f32 %v12989_v52, %v2924_v9  ;;  %v20253_v3 = vld [vmem:[#allocation19_spill] sm:$0xff] }
 0x4d2   :  { %v12991_v38 = vpop.f32.mrf.mxu1 }
 0x4d3   :  { %v3221_v57 = vmul.f32 %v16773_v35, %v15276_v41  ;;  %v12992_v2 = vadd.f32 %v12991_v38, %v12990_v60 }
 0x4d4   :  { %v12993_v46 = vpop.f32.mrf.mxu1 }
 0x4d5   :  { %v3229_v17 = vadd.f32 %v3228_v0, %v3221_v57  ;;  %v3211_v43 = vadd.f32 %v12992_v2, %v2925_v21 }
 0x4d6   :  { %v12994_v51 = vpop.f32.mrf.mxu1 }
 0x4d7   :  { %v3222_v33 = vmul.f32 %v3211_v43, %v20250_v12  ;;  %v12995_v45 = vadd.f32 %v12994_v51, %v12993_v46 }
 0x4d8   :  { %v12996_v22 = vpop.f32.mrf.mxu1 }
 0x4d9   :  { %v3230_v39 = vadd.f32 %v3229_v17, %v3222_v33  ;;  %v3212_v20 = vadd.f32 %v12995_v45, %v2926_v24 }
 0x4da   :  { %v12997_v16 = vpop.f32.mrf.mxu1 }
 0x4db   :  { %v3223_v62 = vmul.f32 %v3212_v20, %v20251_v56  ;;  %v12998_v58 = vadd.f32 %v12997_v16, %v12996_v22 }
 0x4dc   :  { %v12999_v7 = vpop.f32.mrf.mxu1 }
 0x4dd   :  { %v3231_v11 = vadd.f32 %v3230_v39, %v3223_v62  ;;  %v3213_v15 = vadd.f32 %v12998_v58, %v2927_v40 }
 0x4de   :  { %v13000_v25 = vpop.f32.mrf.mxu1 }
 0x4df   :  { %v3224_v5 = vmul.f32 %v3213_v15, %v20252_v50  ;;  %v13001_v1 = vadd.f32 %v13000_v25, %v12999_v7 }
 0x4e0   :  { %v13002_v49 = vpop.f32.mrf.mxu1 }
 0x4e1   :  { %v3232_v9 = vadd.f32 %v3231_v11, %v3224_v5  ;;  %v3214_v26 = vadd.f32 %v13001_v1, %v2928_v44 }
 0x4e2   :  { %v13003_v59 = vpop.f32.mrf.mxu1 }
 0x4e3   :  { %v3225_v52 = vmul.f32 %v3214_v26, %v20253_v3  ;;  %v11643_v59 = vld [vmem:[%s20163_s7] ss:$0 sm:$0xff] }
 0x4e5   :  { %v3233_v36 = vadd.f32 %v3232_v9, %v3225_v52 }
 0x4e7   :  { %v3234_v31 = vrot.slane %v3233_v36, 4 }
 0x4e9   :  { %v3235_v10 = vadd.f32 %v3234_v31, %v3233_v36  ;;  %v3305_v31 = vmul.f32 %v11643_v59, %v15248_v27 }
 0x4eb   :  { %v3236_v47 = vrot.slane %v3235_v10, 2 }
 0x4ed   :  { %v3237_v23 = vadd.f32 %v3236_v47, %v3235_v10  ;;  %v3306_v10 = vmul.f32 %v11643_v59, %v15258_v32  ;;  %v20254_v47 = vld [vmem:[#allocation20_spill] sm:$0xff] }
 0x4ef   :  { %v3238_v60 = vrot.slane %v3237_v23, 1 }
 0x4f1   :  { %v3239_v42 = vadd.f32 %v3238_v60, %v3237_v23  ;;  %v3309_v60 = vmul.f32 %v11643_v59, %v15276_v41 }
 0x4f3   :  { %v3240_v4 = vmul.f32 0.03125, %v3239_v42  ;;  %v3311_v42 = vmul.f32 %v11643_v59, %v20251_v56 }
 0x4f5   :  { %v3241_v0 = vsub.f32 %v16707_v53, %v3240_v4  ;;  %v3242_v13 = vsub.f32 %v16720_v28, %v3240_v4  ;;  %v3243_v38 = vsub.f32 %v16739_v8, %v3240_v4  ;;  %v3244_v21 = vsub.f32 %v16756_v61, %v3240_v4 }
 0x4f6   :  { %v3245_v57 = vsub.f32 %v16773_v35, %v3240_v4  ;;  %v3246_v2 = vsub.f32 %v3211_v43, %v3240_v4  ;;  %v3247_v37 = vsub.f32 %v3212_v20, %v3240_v4  ;;  %v3248_v54 = vsub.f32 %v3213_v15, %v3240_v4 }
 0x4f7   :  { %v3249_v19 = vsub.f32 %v3214_v26, %v3240_v4  ;;  %v3250_v46 = vmul.f32 %v3241_v0, %v15248_v27  ;;  %v3251_v14 = vmul.f32 %v3242_v13, %v15258_v32  ;;  %v3252_v17 = vmul.f32 %v3243_v38, %v15252_v29  ;;  %v3215_v26 = vld [vmem:[%s20162_s6] sm:$0x1] }
 0x4f8   :  { %v3253_v53 = vmul.f32 %v3244_v21, %v15262_v34  ;;  %v3254_v8 = vmul.f32 %v3245_v57, %v15276_v41  ;;  %v3255_v35 = vmul.f32 %v3246_v2, %v20250_v12  ;;  %v3256_v33 = vmul.f32 %v3247_v37, %v20251_v56 }
 0x4f9   :  { %v3259_v24 = vmul.f32 %v3250_v46, %v3250_v46  ;;  %v3260_v28 = vmul.f32 %v3251_v14, %v3251_v14  ;;  %v3261_v51 = vmul.f32 %v3252_v17, %v3252_v17  ;;  %v3257_v55 = vmul.f32 %v3248_v54, %v20252_v50 }
 0x4fa   :  { %v3262_v43 = vmul.f32 %v3253_v53, %v3253_v53  ;;  %v3263_v45 = vmul.f32 %v3254_v8, %v3254_v8  ;;  %v3264_v6 = vmul.f32 %v3255_v35, %v3255_v35  ;;  %v3258_v20 = vmul.f32 %v3249_v19, %v20253_v3 }
 0x4fb   :  { %v3268_v61 = vadd.f32 %v3260_v28, %v3259_v24  ;;  %v3265_v16 = vmul.f32 %v3256_v33, %v3256_v33  ;;  %v3266_v63 = vmul.f32 %v3257_v55, %v3257_v55  ;;  %v3313_v4 = vmul.f32 %v11643_v59, %v20253_v3 }
 0x4fc   :  { %v3267_v58 = vmul.f32 %v3258_v20, %v3258_v20  ;;  %v3307_v0 = vmul.f32 %v11643_v59, %v15252_v29  ;;  %v3308_v13 = vmul.f32 %v11643_v59, %v15262_v34  ;;  %v3310_v38 = vmul.f32 %v11643_v59, %v20250_v12 }
 0x4fd   :  { %v3269_v30 = vadd.f32 %v3268_v61, %v3261_v51  ;;  %v3312_v21 = vmul.f32 %v11643_v59, %v20252_v50 }
 0x4ff   :  { %v3270_v22 = vadd.f32 %v3269_v30, %v3262_v43 }
 0x501   :  { %v3271_v39 = vadd.f32 %v3270_v22, %v3263_v45 }
 0x503   :  { %v3272_v40 = vadd.f32 %v3271_v39, %v3264_v6 }
 0x505   :  { %v3273_v62 = vadd.f32 %v3272_v40, %v3265_v16 }
 0x507   :  { %v3274_v7 = vadd.f32 %v3273_v62, %v3266_v63 }
 0x509   :  { %v3275_v48 = vadd.f32 %v3274_v7, %v3267_v58 }
 0x50b   :  { %v3276_v11 = vrot.slane %v3275_v48, 4 }
 0x50d   :  { %v3277_v15 = vadd.f32 %v3276_v11, %v3275_v48 }
 0x50f   :  { %v3278_v25 = vrot.slane %v3277_v15, 2 }
 0x511   :  { %v3279_v44 = vadd.f32 %v3278_v25, %v3277_v15 }
 0x513   :  { %v3280_v5 = vrot.slane %v3279_v44, 1 }
 0x515   :  { %v3281_v1 = vadd.f32 %v3280_v5, %v3279_v44 }
 0x517   :  { %v3282_v49 = vmul.f32 0.03125, %v3281_v1 }
 0x519   :  { %v3283_v9 = vadd.f32 1e-05, %v3282_v49 }
 0x51b   :  { %14995 = vrsqrt.f32 %v3283_v9 }
 0x528   :  { %v14996_v52 = vpop.eup %14995 }
 0x529   :  { %v3285_v36 = vmul.f32 %v14996_v52, %v3215_v26 }
 0x52b   :  { %v3289_v23 = vrot.slane %v3285_v36, %v20254_v47 }
 0x52d   :  { %v3290_v57 = vmul.f32 %v3289_v23, %v3250_v46  ;;  %v3291_v2 = vmul.f32 %v3289_v23, %v3251_v14  ;;  %v3292_v37 = vmul.f32 %v3289_v23, %v3252_v17  ;;  %v3293_v54 = vmul.f32 %v3289_v23, %v3253_v53 }
 0x52e   :  { %v3294_v19 = vmul.f32 %v3289_v23, %v3254_v8  ;;  %v3295_v24 = vmul.f32 %v3289_v23, %v3255_v35  ;;  %v3296_v28 = vmul.f32 %v3289_v23, %v3256_v33  ;;  %v3297_v51 = vmul.f32 %v3289_v23, %v3257_v55 }
 0x52f   :  { %v3298_v61 = vmul.f32 %v3289_v23, %v3258_v20  ;;  %v3314_v43 = vadd.f32 %v3305_v31, %v3290_v57  ;;  %v3315_v30 = vadd.f32 %v3306_v10, %v3291_v2  ;;  %v3316_v45 = vadd.f32 %v3307_v0, %v3292_v37  ;;  %v14505_v10 = vld [vmem:[%s20164_s8 + $0xb8] sm:$0xff]   ;;  %v14508_v2 = vld [vmem:[%s20164_s8 + $0xa8] sm:$0xff]  }
 0x530   :  { %v3317_v22 = vadd.f32 %v3308_v13, %v3293_v54  ;;  %v3318_v6 = vadd.f32 %v3309_v60, %v3294_v19  ;;  %v3319_v39 = vadd.f32 %v3310_v38, %v3295_v24  ;;  %v3320_v16 = vadd.f32 %v3311_v42, %v3296_v28  ;;  %v14507_v42 = vld [vmem:[%s20164_s8 + $0xf8] sm:$0xff]   ;;  %v14509_v13 = vld [vmem:[%s20164_s8 + $0xf0] sm:$0xff]   ;;  %v14511_v19 = vld [vmem:[%s20164_s8 + $0xe8] sm:$0xff]  }
 0x531   :  { %v3321_v40 = vadd.f32 %v3312_v21, %v3297_v51  ;;  %v3322_v63 = vadd.f32 %v3313_v4, %v3298_v61  ;;  %vm3323_vm13 = vcmp.ge.f32.partialorder %v3314_v43, 0.0  ;;  %vm3324_vm14 = vcmp.ge.f32.partialorder %v3315_v30, 0.0  ;;  %v14506_v4 = vld [vmem:[%s20164_s8 + $0xb0] sm:$0xff]   ;;  %v14510_v24 = vld [vmem:[%s20164_s8 + $0xa0] sm:$0xff]  }
 0x532   :  { %vm3325_vm15 = vcmp.ge.f32.partialorder %v3316_v45, 0.0  ;;  %vm3326_vm2 = vcmp.ge.f32.partialorder %v3317_v22, 0.0  ;;  %vm3327_vm3 = vcmp.ge.f32.partialorder %v3318_v6, 0.0  ;;  %vm3328_vm4 = vcmp.ge.f32.partialorder %v3319_v39, 0.0 }
 0x533   :  { %vm3329_vm5 = vcmp.ge.f32.partialorder %v3320_v16, 0.0  ;;  %vm3330_vm6 = vcmp.ge.f32.partialorder %v3321_v40, 0.0  ;;  %vm3331_vm11 = vcmp.ge.f32.partialorder %v3322_v63, 0.0  ;;  %v3332_v46 = vmul.f32 0.05, %v3314_v43 }
 0x534   :  { %v3333_v14 = vmul.f32 0.05, %v3315_v30  ;;  %v3334_v17 = vmul.f32 0.05, %v3316_v45  ;;  %v3335_v53 = vmul.f32 0.05, %v3317_v22 }
 0x535   :  { %v3336_v8 = vmul.f32 0.05, %v3318_v6  ;;  %v3337_v35 = vmul.f32 0.05, %v3319_v39  ;;  %v3338_v33 = vmul.f32 0.05, %v3320_v16  ;;  %v16837_v55 = vsel %vm3323_vm13, %v3314_v43, %v3332_v46 }
 0x536   :  { %v3339_v20 = vmul.f32 0.05, %v3321_v40  ;;  %v3340_v62 = vmul.f32 0.05, %v3322_v63  ;;  %v16840_v58 = vsel %vm3324_vm14, %v3315_v30, %v3333_v14  ;;  %v16843_v7 = vsel %vm3325_vm15, %v3316_v45, %v3334_v17  ;;  %3350 = vst [vmem:[#allocation3 + $0x8] sm:$0xff] %v16837_v55  ;;  %v14512_v30 = vld [vmem:[%s20164_s8 + $0x98] sm:$0xff]  }
 0x537   :  { %v16847_v48 = vsel %vm3326_vm2, %v3317_v22, %v3335_v53  ;;  %v16850_v11 = vsel %vm3327_vm3, %v3318_v6, %v3336_v8  ;;  %v16853_v15 = vsel %vm3328_vm4, %v3319_v39, %v3337_v35  ;;  %v16856_v25 = vsel %vm3329_vm5, %v3320_v16, %v3338_v33  ;;  %3351 = vst [vmem:[#allocation3 + $0x10] sm:$0xff] %v16840_v58  ;;  %v14513_v45 = vld [vmem:[%s20164_s8 + $0xe0] sm:$0xff]   ;;  %v14514_v39 = vld [vmem:[%s20164_s8 + $0x90] sm:$0xff]   ;;  %v14515_v16 = vld [vmem:[%s20164_s8 + $0xd8] sm:$0xff]  }
 0x538   :  { %3352 = vst [vmem:[#allocation3 + $0x18] sm:$0xff] %v16843_v7  ;;  %v16861_v44 = vsel %vm3330_vm6, %v3321_v40, %v3339_v20  ;;  %v16864_v5 = vsel %vm3331_vm11, %v3322_v63, %v3340_v62  ;;  %3353 = vst [vmem:[#allocation3 + $0x20] sm:$0xff] %v16847_v48  ;;  %v3989_v1 = vpack.c.bf16 %v16840_v58, %v16837_v55  ;;  %v14516_v17 = vld [vmem:[%s20164_s8 + $0xd0] sm:$0xff]   ;;  %v14517_v53 = vld [vmem:[%s20164_s8 + $0x88] sm:$0xff]  }
 0x539   :  { %3354 = vst [vmem:[#allocation3 + $0x28] sm:$0xff] %v16850_v11  ;;  %3355 = vst [vmem:[#allocation3 + $0x30] sm:$0xff] %v16853_v15  ;;  %v3990_v49 = vpack.c.bf16 %v16847_v48, %v16843_v7  ;;  %v3991_v9 = vpack.c.bf16 %v16853_v15, %v16850_v11  ;;  %v3992_v26 = vpack.c.bf16 %v16861_v44, %v16856_v25  ;;  %v14518_v33 = vld [vmem:[%s20164_s8 + $0xc8] sm:$0xff]   ;;  %v14519_v20 = vld [vmem:[%s20164_s8 + $0x80] sm:$0xff]  }
 0x53a   :  { %3356 = vst [vmem:[#allocation3 + $0x38] sm:$0xff] %v16856_v25  ;;  %3357 = vst [vmem:[#allocation3 + $0x40] sm:$0xff] %v16861_v44  ;;  %v14541_v55 = vld [vmem:[%s20164_s8 + $0x1f0] sm:$0xff]   ;;  %v14540_v58 = vld [vmem:[%s20164_s8 + $0x1a8] sm:$0xff]   ;;  %v3993_v44 = vpack.c.bf16 %v16864_v5, %v16864_v5 }
 0x53b   :  { %3358 = vst [vmem:[#allocation3 + $0x48] sm:$0xff] %v16864_v5  ;;  %v14544_v7 = vld [vmem:[%s20164_s8 + $0x198] sm:$0xff]   ;;  %v14545_v48 = vld [vmem:[%s20164_s8 + $0x1e0] sm:$0xff]   ;;  %v14548_v11 = vld [vmem:[%s20164_s8 + $0x1d0] sm:$0xff]  }
 0x53c   :  { %v14549_v15 = vld [vmem:[%s20164_s8 + $0x188] sm:$0xff]   ;;  %v14552_v25 = vld [vmem:[%s20164_s8 + $0x1c0] sm:$0xff]  }
 0x53d   :  { %v3389_v59 = vld [vmem:[#allocation3 + $0x2] sm:$0xff] }
 0x53e   :  { %v3359_v52 = vld [vmem:[#allocation3 + $0x1] sm:$0xff]  ;;  %v3390_v36 = vld [vmem:[#allocation3 + $0xa] sm:$0xff] }
 0x53f   :  { %v16880_v31 = vld [vmem:[#allocation3 + $0x9] sm:$0xff]  ;;  %v3398_v23 = vpack.c.bf16 %v3390_v36, %v3389_v59  ;;  %v3391_v0 = vld [vmem:[#allocation3 + $0x12] sm:$0xff]  ;;  %v3392_v38 = vld [vmem:[#allocation3 + $0x1a] sm:$0xff] }
 0x540   :  { %v3368_v60 = vpack.c.bf16 %v16880_v31, %v3359_v52  ;;  %v16900_v21 = vld [vmem:[#allocation3 + $0x11] sm:$0xff]  ;;  %v16902_v57 = vld [vmem:[#allocation3 + $0x19] sm:$0xff]  ;;  %v3399_v37 = vpack.c.bf16 %v3392_v38, %v3391_v0  ;;  %v3393_v28 = vld [vmem:[#allocation3 + $0x22] sm:$0xff] }
 0x541   :  { %13670 = vmatmul.mubr.bf16.vlgmr.msra.gmra.mxu0 %v3398_v23  ;;  %v3369_v54 = vpack.c.bf16 %v16902_v57, %v16900_v21  ;;  %v3394_v51 = vld [vmem:[#allocation3 + $0x2a] sm:$0xff]  ;;  %v16922_v61 = vld [vmem:[#allocation3 + $0x21] sm:$0xff]  ;;  %v3395_v40 = vld [vmem:[#allocation3 + $0x32] sm:$0xff] }
 0x542   :  { %13706 = vmatmul.mubr.bf16.vlgmr.msra.gmra.mxu1 %v3368_v60  ;;  %13726 = vmatpush3.bf16.msra.mxu0 %v14505_v10  ;;  %v16924_v43 = vld [vmem:[#allocation3 + $0x29] sm:$0xff]  ;;  %v3400_v22 = vpack.c.bf16 %v3394_v51, %v3393_v28  ;;  %v3396_v63 = vld [vmem:[#allocation3 + $0x3a] sm:$0xff]  ;;  %v16947_v46 = vld [vmem:[#allocation3 + $0x31] sm:$0xff] }
 0x543   :  { %13673 = vmatprep.mubr.msk.bf16.mxu0 %vm15077_vm12, %v16793_v18  ;;  %13727 = vmatprep.subr.bf16.mxu0 %v16793_v18  ;;  %v3370_v6 = vpack.c.bf16 %v16924_v43, %v16922_v61  ;;  %v16949_v14 = vld [vmem:[#allocation3 + $0x39] sm:$0xff]  ;;  %v3401_v8 = vpack.c.bf16 %v3396_v63, %v3395_v40  ;;  %v3397_v62 = vld [vmem:[#allocation3 + $0x42] sm:$0xff]  ;;  %v14520_v52 = vld [vmem:[%s20164_s8 + $0xc0] sm:$0xff]  }
 0x544   :  { %13709 = vmatprep.mubr.msk.bf16.mxu1 %vm15077_vm12, %v16793_v18  ;;  %13762 = vmatpush3.bf16.msra.mxu1 %v14507_v42  ;;  %v3371_v35 = vpack.c.bf16 %v16949_v14, %v16947_v46  ;;  %v16973_v59 = vld [vmem:[#allocation3 + $0x41] sm:$0xff]  ;;  %v3402_v36 = vpack.c.bf16 %v3397_v62, %v3397_v62  ;;  %v3661_v60 = vld [vmem:[#allocation3 + $0xb] sm:$0xff]  ;;  %v17009_v28 = vld [vmem:[#allocation3 + $0x17] sm:$0xff] }
 0x545   :  { %13763 = vmatprep.subr.bf16.mxu1 %v16793_v18  ;;  %v3372_v10 = vpack.c.bf16 %v16973_v59, %v16973_v59  ;;  %v3660_v23 = vld [vmem:[#allocation3 + $0x3] sm:$0xff]  ;;  %v3665_v40 = vld [vmem:[#allocation3 + $0x2b] sm:$0xff]  ;;  %v4461_v5 = vld [vmem:[#allocation3 + $0x16] sm:$0xff] }
 0x546   :  { %13728 = vmatpush3.bf16.msra.mxu0 %v14506_v4  ;;  %v3820_v42 = vld [vmem:[#allocation3 + $0x7] sm:$0xff]  ;;  %v16989_v4 = vld [vmem:[#allocation3 + $0xf] sm:$0xff]  ;;  %v17011_v51 = vld [vmem:[#allocation3 + $0x1f] sm:$0xff] }
 0x547   :  { %13729 = vmatprep.subr.bf16.mxu0 %v16793_v18  ;;  %v14521_v0 = vld [vmem:[%s20164_s8 + $0x138] sm:$0xff]   ;;  %v3829_v38 = vpack.c.bf16 %v16989_v4, %v3820_v42  ;;  %v14533_v42 = vld [vmem:[%s20164_s8 + $0x108] sm:$0xff]  }
 0x548   :  { %13764 = vmatpush3.bf16.msra.mxu1 %v14509_v13  ;;  %v3669_v13 = vpack.c.bf16 %v3661_v60, %v3660_v23  ;;  %v17031_v63 = vld [vmem:[#allocation3 + $0x27] sm:$0xff]  ;;  %v17058_v23 = vld [vmem:[#allocation3 + $0x3f] sm:$0xff] }
 0x549   :  { %13674 = vmatmul.mubr.bf16.gmra.mxu0 %v3399_v37  ;;  %13765 = vmatprep.subr.bf16.mxu1 %v16793_v18  ;;  %v14522_v37 = vld [vmem:[%s20164_s8 + $0x130] sm:$0xff]   ;;  %v14531_v62 = vld [vmem:[%s20164_s8 + $0x158] sm:$0xff]  }
 0x54a   :  { %13710 = vmatmul.mubr.bf16.gmra.mxu1 %v3369_v54  ;;  %13730 = vmatpush3.bf16.msra.mxu0 %v14508_v2  ;;  %v14523_v2 = vld [vmem:[%s20164_s8 + $0x178] sm:$0xff]   ;;  %v3662_v54 = vld [vmem:[#allocation3 + $0x13] sm:$0xff]  ;;  %v14532_v60 = vld [vmem:[%s20164_s8 + $0x150] sm:$0xff]  }
 0x54b   :  { %13677 = vmatprep.mubr.msk.bf16.mxu0 %vm15077_vm12, %v16793_v18  ;;  %13731 = vmatprep.subr.bf16.mxu0 %v16793_v18 }
 0x54c   :  { %13713 = vmatprep.mubr.msk.bf16.mxu1 %vm15077_vm12, %v16793_v18  ;;  %13766 = vmatpush3.bf16.msra.mxu1 %v14511_v19  ;;  %v14525_v19 = vld [vmem:[%s20164_s8 + $0x170] sm:$0xff]  }
 0x54d   :  { %13767 = vmatprep.subr.bf16.mxu1 %v16793_v18 }
 0x54e   :  { %13732 = vmatpush3.bf16.msra.mxu0 %v14510_v24  ;;  %v3663_v24 = vld [vmem:[#allocation3 + $0x1b] sm:$0xff] }
 0x54f   :  { %13733 = vmatprep.subr.bf16.mxu0 %v16793_v18 }
 0x550   :  { %13768 = vmatpush3.bf16.msra.mxu1 %v14513_v45  ;;  %v3670_v45 = vpack.c.bf16 %v3663_v24, %v3662_v54  ;;  %v17082_v54 = vld [vmem:[#allocation3 + $0x47] sm:$0xff] }
 0x551   :  { %13678 = vmatmul.mubr.bf16.gmra.mxu0 %v3400_v22  ;;  %13769 = vmatprep.subr.bf16.mxu1 %v16793_v18  ;;  %v3830_v22 = vpack.c.bf16 %v17011_v51, %v17009_v28 }
 0x552   :  { %13714 = vmatmul.mubr.bf16.gmra.mxu1 %v3370_v6  ;;  %13734 = vmatpush3.bf16.msra.mxu0 %v14512_v30  ;;  %v14524_v30 = vld [vmem:[%s20164_s8 + $0x128] sm:$0xff]  }
 0x553   :  { %13681 = vmatprep.mubr.msk.bf16.mxu0 %vm15077_vm12, %v16793_v18  ;;  %13717 = vmatprep.mubr.msk.bf16.mxu1 %vm15077_vm12, %v16793_v18  ;;  %v14527_v6 = vld [vmem:[%s20164_s8 + $0x168] sm:$0xff]  }
 0x554   :  { %13735 = vmatprep.subr.bf16.mxu0 %v16793_v18  ;;  %13770 = vmatpush3.bf16.msra.mxu1 %v14515_v16  ;;  %v3664_v16 = vld [vmem:[#allocation3 + $0x23] sm:$0xff] }
 0x555   :  { %13771 = vmatprep.subr.bf16.mxu1 %v16793_v18 }
 0x556   :  { %13736 = vmatpush3.bf16.msra.mxu0 %v14514_v39  ;;  %v14526_v39 = vld [vmem:[%s20164_s8 + $0x120] sm:$0xff]  }
 0x557   :  { %13737 = vmatprep.subr.bf16.mxu0 %v16793_v18 }
 0x558   :  { %13772 = vmatpush3.bf16.msra.mxu1 %v14516_v17  ;;  %v17033_v17 = vld [vmem:[#allocation3 + $0x2f] sm:$0xff] }
 0x559   :  { %13682 = vmatmul.mubr.bf16.gmra.mxu0 %v3401_v8  ;;  %13773 = vmatprep.subr.bf16.mxu1 %v16793_v18  ;;  %v14529_v8 = vld [vmem:[%s20164_s8 + $0x160] sm:$0xff]  }
 0x55a   :  { %13718 = vmatmul.mubr.bf16.gmra.mxu1 %v3371_v35  ;;  %13738 = vmatpush3.bf16.msra.mxu0 %v14517_v53  ;;  %v14528_v53 = vld [vmem:[%s20164_s8 + $0x118] sm:$0xff]   ;;  %v3671_v35 = vpack.c.bf16 %v3665_v40, %v3664_v16  ;;  %v4301_v16 = vld [vmem:[#allocation3 + $0x15] sm:$0xff] }
 0x55b   :  { %13685 = vmatprep.mubr.msk.bf16.mxu0 %vm15077_vm12, %v16793_v18  ;;  %13721 = vmatprep.mubr.msk.bf16.mxu1 %vm15077_vm12, %v16793_v18  ;;  %v4460_v40 = vld [vmem:[#allocation3 + $0xe] sm:$0xff] }
 0x55c   :  { %13739 = vmatprep.subr.bf16.mxu0 %v16793_v18  ;;  %13774 = vmatpush3.bf16.msra.mxu1 %v14518_v33  ;;  %v3831_v33 = vpack.c.bf16 %v17033_v17, %v17031_v63 }
 0x55d   :  { %13775 = vmatprep.subr.bf16.mxu1 %v16793_v18 }
 0x55e   :  { %13740 = vmatpush3.bf16.msra.mxu0 %v14519_v20  ;;  %v14530_v20 = vld [vmem:[%s20164_s8 + $0x110] sm:$0xff]  }
 0x55f   :  { %13797 = vmatprep.subr.bf16.mxu0 %v16793_v18 }
 0x560   :  { %13776 = vmatpush3.bf16.msra.mxu1 %v14520_v52  ;;  %v3666_v52 = vld [vmem:[#allocation3 + $0x33] sm:$0xff] }
 0x561   :  { %13686 = vmatmul.mubr.bf16.gmra.mxu0 %v3402_v36  ;;  %13833 = vmatprep.subr.bf16.mxu1 %v16793_v18  ;;  %v3667_v36 = vld [vmem:[#allocation3 + $0x3b] sm:$0xff] }
 0x562   :  { %13722 = vmatmul.mubr.bf16.gmra.mxu1 %v3372_v10  ;;  %13741 = vmatprep.mubr.msk.bf16.mxu0 %vm15077_vm12, %v16793_v18  ;;  %v17056_v10 = vld [vmem:[#allocation3 + $0x37] sm:$0xff] }
 0x563   :  { %13777 = vmatprep.mubr.msk.bf16.mxu1 %vm15077_vm12, %v16793_v18 }
 0x569   :  { %13742 = vmatmul.mubr.bf16.vlgmr.msra.gmra.mxu0 %v3669_v13  ;;  %v3832_v13 = vpack.c.bf16 %v17058_v23, %v17056_v10 }
 0x56a   :  { %13778 = vmatmul.mubr.bf16.vlgmr.msra.gmra.mxu1 %v3829_v38  ;;  %13798 = vmatpush3.bf16.msra.mxu0 %v14521_v0  ;;  %v3672_v0 = vpack.c.bf16 %v3667_v36, %v3666_v52  ;;  %v14534_v38 = vld [vmem:[%s20164_s8 + $0x148] sm:$0xff]   ;;  %v4463_v36 = vld [vmem:[#allocation3 + $0x26] sm:$0xff] }
 0x56b   :  { %13745 = vmatprep.mubr.msk.bf16.mxu0 %vm15077_vm12, %v16793_v18  ;;  %13799 = vmatprep.subr.bf16.mxu0 %v16793_v18  ;;  %v4462_v52 = vld [vmem:[#allocation3 + $0x1e] sm:$0xff] }
 0x56c   :  { %13781 = vmatprep.mubr.msk.bf16.mxu1 %vm15077_vm12, %v16793_v18  ;;  %13834 = vmatpush3.bf16.msra.mxu1 %v14523_v2  ;;  %v14535_v2 = vld [vmem:[%s20164_s8 + $0x100] sm:$0xff]  }
 0x56d   :  { %13835 = vmatprep.subr.bf16.mxu1 %v16793_v18 }
 0x56e   :  { %13800 = vmatpush3.bf16.msra.mxu0 %v14522_v37  ;;  %v3668_v37 = vld [vmem:[#allocation3 + $0x43] sm:$0xff] }
 0x56f   :  { %13801 = vmatprep.subr.bf16.mxu0 %v16793_v18  ;;  %v3673_v24 = vpack.c.bf16 %v3668_v37, %v3668_v37  ;;  %v4464_v37 = vld [vmem:[#allocation3 + $0x2e] sm:$0xff] }
 0x570   :  { %13836 = vmatpush3.bf16.msra.mxu1 %v14525_v19  ;;  %v14536_v19 = vld [vmem:[%s20164_s8 + $0x140] sm:$0xff]  }
 0x571   :  { %13746 = vmatmul.mubr.bf16.gmra.mxu0 %v3670_v45  ;;  %13837 = vmatprep.subr.bf16.mxu1 %v16793_v18  ;;  %v14537_v45 = vld [vmem:[%s20164_s8 + $0x1b8] sm:$0xff]  }
 0x572   :  { %13782 = vmatmul.mubr.bf16.gmra.mxu1 %v3830_v22  ;;  %13802 = vmatpush3.bf16.msra.mxu0 %v14524_v30  ;;  %v3833_v30 = vpack.c.bf16 %v17082_v54, %v17082_v54  ;;  %v4149_v22 = vpack.c.bf16 %v16900_v21, %v16880_v31  ;;  %v14543_v31 = vld [vmem:[%s20164_s8 + $0x1e8] sm:$0xff]   ;;  %v14542_v21 = vld [vmem:[%s20164_s8 + $0x1a0] sm:$0xff]  }
 0x573   :  { %13749 = vmatprep.mubr.msk.bf16.mxu0 %vm15077_vm12, %v16793_v18  ;;  %13803 = vmatprep.subr.bf16.mxu0 %v16793_v18 }
 0x574   :  { %13785 = vmatprep.mubr.msk.bf16.mxu1 %vm15077_vm12, %v16793_v18  ;;  %13838 = vmatpush3.bf16.msra.mxu1 %v14527_v6  ;;  %v14539_v6 = vld [vmem:[%s20164_s8 + $0x1f8] sm:$0xff]  }
 0x575   :  { %13839 = vmatprep.subr.bf16.mxu1 %v16793_v18 }
 0x576   :  { %13804 = vmatpush3.bf16.msra.mxu0 %v14526_v39  ;;  %v14538_v39 = vld [vmem:[%s20164_s8 + $0x1b0] sm:$0xff]  }
 0x577   :  { %13805 = vmatprep.subr.bf16.mxu0 %v16793_v18 }
 0x578   :  { %13840 = vmatpush3.bf16.msra.mxu1 %v14529_v8 }
 0x579   :  { %13750 = vmatmul.mubr.bf16.gmra.mxu0 %v3671_v35  ;;  %13841 = vmatprep.subr.bf16.mxu1 %v16793_v18  ;;  %v4469_v35 = vpack.c.bf16 %v4461_v5, %v4460_v40 }
 0x57a   :  { %13786 = vmatmul.mubr.bf16.gmra.mxu1 %v3831_v33  ;;  %13806 = vmatpush3.bf16.msra.mxu0 %v14528_v53  ;;  %v14553_v53 = vld [vmem:[%s20164_s8 + $0x238] sm:$0xff]   ;;  %v14554_v33 = vld [vmem:[%s20164_s8 + $0x230] sm:$0xff]  }
 0x57b   :  { %13753 = vmatprep.mubr.msk.bf16.mxu0 %vm15077_vm12, %v16793_v18  ;;  %13789 = vmatprep.mubr.msk.bf16.mxu1 %vm15077_vm12, %v16793_v18 }
 0x57c   :  { %13807 = vmatprep.subr.bf16.mxu0 %v16793_v18  ;;  %13842 = vmatpush3.bf16.msra.mxu1 %v14531_v62  ;;  %v4303_v62 = vld [vmem:[#allocation3 + $0x25] sm:$0xff] }
 0x57d   :  { %13843 = vmatprep.subr.bf16.mxu1 %v16793_v18 }
 0x57e   :  { %13808 = vmatpush3.bf16.msra.mxu0 %v14530_v20  ;;  %v4302_v20 = vld [vmem:[#allocation3 + $0x1d] sm:$0xff] }
 0x57f   :  { %13809 = vmatprep.subr.bf16.mxu0 %v16793_v18 }
 0x580   :  { %13844 = vmatpush3.bf16.msra.mxu1 %v14532_v60  ;;  %v14555_v60 = vld [vmem:[%s20164_s8 + $0x228] sm:$0xff]  }
 0x581   :  { %13754 = vmatmul.mubr.bf16.gmra.mxu0 %v3672_v0  ;;  %13845 = vmatprep.subr.bf16.mxu1 %v16793_v18  ;;  %v4470_v0 = vpack.c.bf16 %v4463_v36, %v4462_v52 }
 0x582   :  { %13790 = vmatmul.mubr.bf16.gmra.mxu1 %v3832_v13  ;;  %13810 = vmatpush3.bf16.msra.mxu0 %v14533_v42  ;;  %v4310_v42 = vpack.c.bf16 %v4303_v62, %v4302_v20  ;;  %v14556_v13 = vld [vmem:[%s20164_s8 + $0x220] sm:$0xff]  }
 0x583   :  { %13757 = vmatprep.mubr.msk.bf16.mxu0 %vm15077_vm12, %v16793_v18  ;;  %13793 = vmatprep.mubr.msk.bf16.mxu1 %vm15077_vm12, %v16793_v18 }
 0x584   :  { %13811 = vmatprep.subr.bf16.mxu0 %v16793_v18  ;;  %13846 = vmatpush3.bf16.msra.mxu1 %v14534_v38  ;;  %v4304_v38 = vld [vmem:[#allocation3 + $0x2d] sm:$0xff] }
 0x585   :  { %13847 = vmatprep.subr.bf16.mxu1 %v16793_v18 }
 0x586   :  { %13812 = vmatpush3.bf16.msra.mxu0 %v14535_v2  ;;  %v4305_v2 = vld [vmem:[#allocation3 + $0x35] sm:$0xff] }
 0x587   :  { %13869 = vmatprep.subr.bf16.mxu0 %v16793_v18 }
 0x588   :  { %13848 = vmatpush3.bf16.msra.mxu1 %v14536_v19  ;;  %v4465_v19 = vld [vmem:[#allocation3 + $0x36] sm:$0xff] }
 0x589   :  { %13758 = vmatmul.mubr.bf16.gmra.mxu0 %v3673_v24  ;;  %13905 = vmatprep.subr.bf16.mxu1 %v16793_v18  ;;  %v14557_v24 = vld [vmem:[%s20164_s8 + $0x218] sm:$0xff]  }
 0x58a   :  { %13794 = vmatmul.mubr.bf16.gmra.mxu1 %v3833_v30  ;;  %13813 = vmatprep.mubr.msk.bf16.mxu0 %vm15077_vm12, %v16793_v18  ;;  %v4311_v30 = vpack.c.bf16 %v4305_v2, %v4304_v38 }
 0x58b   :  { %13849 = vmatprep.mubr.msk.bf16.mxu1 %vm15077_vm12, %v16793_v18 }
 0x591   :  { %13814 = vmatmul.mubr.bf16.vlgmr.msra.gmra.mxu0 %v3989_v1  ;;  %v4150_v1 = vpack.c.bf16 %v16922_v61, %v16902_v57  ;;  %v14546_v57 = vld [vmem:[%s20164_s8 + $0x190] sm:$0xff]   ;;  %v14547_v61 = vld [vmem:[%s20164_s8 + $0x1d8] sm:$0xff]  }
 0x592   :  { %13850 = vmatmul.mubr.bf16.vlgmr.msra.gmra.mxu1 %v4149_v22  ;;  %13870 = vmatpush3.bf16.msra.mxu0 %v14537_v45  ;;  %v4471_v45 = vpack.c.bf16 %v4465_v19, %v4464_v37  ;;  %v14558_v22 = vld [vmem:[%s20164_s8 + $0x210] sm:$0xff]  }
 0x593   :  { %13817 = vmatprep.mubr.msk.bf16.mxu0 %vm15077_vm12, %v16793_v18  ;;  %13871 = vmatprep.subr.bf16.mxu0 %v16793_v18 }
 0x594   :  { %13853 = vmatprep.mubr.msk.bf16.mxu1 %vm15077_vm12, %v16793_v18  ;;  %13906 = vmatpush3.bf16.msra.mxu1 %v14539_v6  ;;  %v4306_v6 = vld [vmem:[#allocation3 + $0x3d] sm:$0xff] }
 0x595   :  { %13907 = vmatprep.subr.bf16.mxu1 %v16793_v18 }
 0x596   :  { %13872 = vmatpush3.bf16.msra.mxu0 %v14538_v39  ;;  %v4307_v39 = vld [vmem:[#allocation3 + $0x45] sm:$0xff] }
 0x597   :  { %13873 = vmatprep.subr.bf16.mxu0 %v16793_v18 }
 0x598   :  { %13908 = vmatpush3.bf16.msra.mxu1 %v14541_v55  ;;  %v4466_v55 = vld [vmem:[#allocation3 + $0x3e] sm:$0xff] }
 0x599   :  { %13818 = vmatmul.mubr.bf16.gmra.mxu0 %v3990_v49  ;;  %13909 = vmatprep.subr.bf16.mxu1 %v16793_v18  ;;  %v4151_v49 = vpack.c.bf16 %v16947_v46, %v16924_v43  ;;  %v14550_v43 = vld [vmem:[%s20164_s8 + $0x1c8] sm:$0xff]   ;;  %v14551_v46 = vld [vmem:[%s20164_s8 + $0x180] sm:$0xff]  }
 0x59a   :  { %13854 = vmatmul.mubr.bf16.gmra.mxu1 %v4150_v1  ;;  %13874 = vmatpush3.bf16.msra.mxu0 %v14540_v58  ;;  %v4467_v58 = vld [vmem:[#allocation3 + $0x46] sm:$0xff]  ;;  %v14559_v1 = vld [vmem:[%s20164_s8 + $0x208] sm:$0xff]  }
 0x59b   :  { %13821 = vmatprep.mubr.msk.bf16.mxu0 %vm15077_vm12, %v16793_v18  ;;  %13875 = vmatprep.subr.bf16.mxu0 %v16793_v18 }
 0x59c   :  { %13857 = vmatprep.mubr.msk.bf16.mxu1 %vm15077_vm12, %v16793_v18  ;;  %13910 = vmatpush3.bf16.msra.mxu1 %v14543_v31  ;;  %v4312_v31 = vpack.c.bf16 %v4307_v39, %v4306_v6 }
 0x59d   :  { %13911 = vmatprep.subr.bf16.mxu1 %v16793_v18 }
 0x59e   :  { %13876 = vmatpush3.bf16.msra.mxu0 %v14542_v21  ;;  %v4472_v21 = vpack.c.bf16 %v4467_v58, %v4466_v55 }
 0x59f   :  { %13877 = vmatprep.subr.bf16.mxu0 %v16793_v18 }
 0x5a0   :  { %13912 = vmatpush3.bf16.msra.mxu1 %v14545_v48  ;;  %v4308_v48 = vld [vmem:[#allocation3 + $0x4d] sm:$0xff] }
 0x5a1   :  { %13822 = vmatmul.mubr.bf16.gmra.mxu0 %v3991_v9  ;;  %13913 = vmatprep.subr.bf16.mxu1 %v16793_v18  ;;  %v4152_v9 = vpack.c.bf16 %v16973_v59, %v16949_v14  ;;  %v4148_v14 = vld [vmem:[#allocation3 + $0x49] sm:$0xff] }
 0x5a2   :  { %13858 = vmatmul.mubr.bf16.gmra.mxu1 %v4151_v49  ;;  %13878 = vmatpush3.bf16.msra.mxu0 %v14544_v7  ;;  %v4300_v59 = vld [vmem:[#allocation3 + $0xd] sm:$0xff] }
 0x5a3   :  { %13825 = vmatprep.mubr.msk.bf16.mxu0 %vm15077_vm12, %v16793_v18  ;;  %13861 = vmatprep.mubr.msk.bf16.mxu1 %vm15077_vm12, %v16793_v18  ;;  %v4309_v8 = vpack.c.bf16 %v4301_v16, %v4300_v59  ;;  %v14560_v7 = vld [vmem:[%s20164_s8 + $0x200] sm:$0xff]  }
 0x5a4   :  { %13879 = vmatprep.subr.bf16.mxu0 %v16793_v18  ;;  %13914 = vmatpush3.bf16.msra.mxu1 %v14547_v61  ;;  %v4468_v49 = vld [vmem:[#allocation3 + $0x4e] sm:$0xff] }
 0x5a5   :  { %13915 = vmatprep.subr.bf16.mxu1 %v16793_v18  ;;  %v4473_v61 = vpack.c.bf16 %v4468_v49, %v4468_v49 }
 0x5a6   :  { %13880 = vmatpush3.bf16.msra.mxu0 %v14546_v57  ;;  %v4313_v57 = vpack.c.bf16 %v4308_v48, %v4308_v48 }
 0x5a7   :  { %13881 = vmatprep.subr.bf16.mxu0 %v16793_v18 }
 0x5a8   :  { %13916 = vmatpush3.bf16.msra.mxu1 %v14548_v11  ;;  %v4629_v11 = vpack.c.bf16 %v17009_v28, %v16989_v4  ;;  %v4632_v4 = vpack.c.bf16 %v17082_v54, %v17058_v23  ;;  %v4628_v28 = vld [vmem:[#allocation3 + $0x4f] sm:$0xff] }
 0x5a9   :  { %13826 = vmatmul.mubr.bf16.gmra.mxu0 %v3992_v26  ;;  %13917 = vmatprep.subr.bf16.mxu1 %v16793_v18  ;;  %v4153_v26 = vpack.c.bf16 %v4148_v14, %v4148_v14 }
 0x5aa   :  { %13862 = vmatmul.mubr.bf16.gmra.mxu1 %v4152_v9  ;;  %13882 = vmatpush3.bf16.msra.mxu0 %v14549_v15  ;;  %v4630_v15 = vpack.c.bf16 %v17031_v63, %v17011_v51  ;;  %v4631_v9 = vpack.c.bf16 %v17056_v10, %v17033_v17  ;;  %v4633_v51 = vpack.c.bf16 %v4628_v28, %v4628_v28 }
 0x5ab   :  { %13829 = vmatprep.mubr.msk.bf16.mxu0 %vm15077_vm12, %v16793_v18  ;;  %13865 = vmatprep.mubr.msk.bf16.mxu1 %vm15077_vm12, %v16793_v18 }
 0x5ac   :  { %13883 = vmatprep.subr.bf16.mxu0 %v16793_v18  ;;  %13918 = vmatpush3.bf16.msra.mxu1 %v14550_v43 }
 0x5ad   :  { %13919 = vmatprep.subr.bf16.mxu1 %v16793_v18 }
 0x5ae   :  { %13884 = vmatpush3.bf16.msra.mxu0 %v14551_v46 }
 0x5af   :  { %13941 = vmatprep.subr.bf16.mxu0 %v16793_v18 }
 0x5b0   :  { %13920 = vmatpush3.bf16.msra.mxu1 %v14552_v25 }
 0x5b1   :  { %13830 = vmatmul.mubr.bf16.gmra.mxu0 %v3993_v44  ;;  %13977 = vmatprep.subr.bf16.mxu1 %v16793_v18 }
 0x5b2   :  { %13866 = vmatmul.mubr.bf16.gmra.mxu1 %v4153_v26  ;;  %13885 = vmatprep.mubr.msk.bf16.mxu0 %vm15077_vm12, %v16793_v18 }
 0x5b3   :  { %13921 = vmatprep.mubr.msk.bf16.mxu1 %vm15077_vm12, %v16793_v18 }
 0x5b9   :  { %13886 = vmatmul.mubr.bf16.vlgmr.msra.gmra.mxu0 %v4309_v8 }
 0x5ba   :  { %13922 = vmatmul.mubr.bf16.vlgmr.msra.gmra.mxu1 %v4469_v35  ;;  %13942 = vmatpush3.bf16.msra.mxu0 %v14553_v53 }
 0x5bb   :  { %13889 = vmatprep.mubr.msk.bf16.mxu0 %vm15077_vm12, %v16793_v18  ;;  %13943 = vmatprep.subr.bf16.mxu0 %v16793_v18 }
 0x5bc   :  { %13925 = vmatprep.mubr.msk.bf16.mxu1 %vm15077_vm12, %v16793_v18 }
 0x5be   :  { %13944 = vmatpush3.bf16.msra.mxu0 %v14554_v33 }
 0x5bf   :  { %13945 = vmatprep.subr.bf16.mxu0 %v16793_v18 }
 0x5c1   :  { %13890 = vmatmul.mubr.bf16.gmra.mxu0 %v4310_v42 }
 0x5c2   :  { %13926 = vmatmul.mubr.bf16.gmra.mxu1 %v4470_v0  ;;  %13946 = vmatpush3.bf16.msra.mxu0 %v14555_v60 }
 0x5c3   :  { %13893 = vmatprep.mubr.msk.bf16.mxu0 %vm15077_vm12, %v16793_v18  ;;  %13947 = vmatprep.subr.bf16.mxu0 %v16793_v18 }
 0x5c4   :  { %13929 = vmatprep.mubr.msk.bf16.mxu1 %vm15077_vm12, %v16793_v18 }
 0x5c6   :  { %13948 = vmatpush3.bf16.msra.mxu0 %v14556_v13 }
 0x5c7   :  { %13949 = vmatprep.subr.bf16.mxu0 %v16793_v18 }
 0x5c9   :  { %13894 = vmatmul.mubr.bf16.gmra.mxu0 %v4311_v30 }
 0x5ca   :  { %13930 = vmatmul.mubr.bf16.gmra.mxu1 %v4471_v45  ;;  %13950 = vmatpush3.bf16.msra.mxu0 %v14557_v24 }
 0x5cb   :  { %13897 = vmatprep.mubr.msk.bf16.mxu0 %vm15077_vm12, %v16793_v18  ;;  %13933 = vmatprep.mubr.msk.bf16.mxu1 %vm15077_vm12, %v16793_v18 }
 0x5cc   :  { %13951 = vmatprep.subr.bf16.mxu0 %v16793_v18 }
 0x5ce   :  { %13952 = vmatpush3.bf16.msra.mxu0 %v14558_v22 }
 0x5cf   :  { %13953 = vmatprep.subr.bf16.mxu0 %v16793_v18 }
 0x5d1   :  { %13898 = vmatmul.mubr.bf16.gmra.mxu0 %v4312_v31 }
 0x5d2   :  { %13934 = vmatmul.mubr.bf16.gmra.mxu1 %v4472_v21  ;;  %13954 = vmatpush3.bf16.msra.mxu0 %v14559_v1 }
 0x5d3   :  { %13901 = vmatprep.mubr.msk.bf16.mxu0 %vm15077_vm12, %v16793_v18  ;;  %13937 = vmatprep.mubr.msk.bf16.mxu1 %vm15077_vm12, %v16793_v18 }
 0x5d4   :  { %13955 = vmatprep.subr.bf16.mxu0 %v16793_v18 }
 0x5d6   :  { %13956 = vmatpush3.bf16.msra.mxu0 %v14560_v7 }
 0x5d7   :  { %14013 = vmatprep.subr.bf16.mxu0 %v16793_v18 }
 0x5d9   :  { %13902 = vmatmul.mubr.bf16.gmra.mxu0 %v4313_v57 }
 0x5da   :  { %13938 = vmatmul.mubr.bf16.gmra.mxu1 %v4473_v61  ;;  %13957 = vmatprep.mubr.msk.bf16.mxu0 %vm15077_vm12, %v16793_v18 }
 0x5db   :  { %13993 = vmatprep.mubr.msk.bf16.mxu1 %vm15077_vm12, %v16793_v18 }
 0x5e1   :  { %13958 = vmatmul.mubr.bf16.vlgmr.msra.gmra.mxu0 %v4629_v11 }
 0x5e2   :  { %13961 = vmatprep.mubr.msk.bf16.mxu0 %vm15077_vm12, %v16793_v18 }
 0x5e9   :  { %13962 = vmatmul.mubr.bf16.gmra.mxu0 %v4630_v15 }
 0x5ea   :  { %13965 = vmatprep.mubr.msk.bf16.mxu0 %vm15077_vm12, %v16793_v18 }
 0x5f1   :  { %13966 = vmatmul.mubr.bf16.gmra.mxu0 %v4631_v9 }
 0x5f2   :  { %13969 = vmatprep.mubr.msk.bf16.mxu0 %vm15077_vm12, %v16793_v18 }
 0x5f9   :  { %13970 = vmatmul.mubr.bf16.gmra.mxu0 %v4632_v4 }
 0x5fa   :  { %13973 = vmatprep.mubr.msk.bf16.mxu0 %vm15077_vm12, %v16793_v18 }
 0x601   :  { %v3502_v63 = vpop.f32.mrf.mxu0  ;;  %13974 = vmatmul.mubr.bf16.gmra.mxu0 %v4633_v51 }
 0x602   :  { %v3622_v43 = vpop.f32.mrf.mxu1  ;;  %14029 = vmatprep.mubr.msk.bf16.mxu0 %vm15077_vm12, %v16793_v18 }
 0x603   :  { %v3623_v46 = vadd.f32 %v3622_v43, %v3502_v63  ;;  %v13671_v17 = vpop.f32.mrf.mxu0 }
 0x604   :  { %v13707_v10 = vpop.f32.mrf.mxu1 }
 0x605   :  { %v3505_v14 = vpop.f32.mrf.mxu0 }
 0x606   :  { %v3625_v25 = vpop.f32.mrf.mxu1 }
 0x607   :  { %v3626_v44 = vadd.f32 %v3625_v25, %v3505_v14  ;;  %v13672_v26 = vpop.f32.mrf.mxu0 }
 0x608   :  { %v13708_v23 = vpop.f32.mrf.mxu1 }
 0x609   :  { %v3510_v54 = vpop.f32.mrf.mxu0 }
 0x60a   :  { %v3630_v59 = vpop.f32.mrf.mxu1 }
 0x60b   :  { %v3631_v16 = vadd.f32 %v3630_v59, %v3510_v54  ;;  %v13675_v40 = vpop.f32.mrf.mxu0 }
 0x60c   :  { %v13711_v5 = vpop.f32.mrf.mxu1 }
 0x60d   :  { %v3513_v53 = vpop.f32.mrf.mxu0 }
 0x60e   :  { %v3633_v8 = vpop.f32.mrf.mxu1 }
 0x60f   :  { %v3634_v35 = vadd.f32 %v3633_v8, %v3513_v53  ;;  %v13676_v33 = vpop.f32.mrf.mxu0 }
 0x610   :  { %v13712_v20 = vpop.f32.mrf.mxu1 }
 0x611   :  { %v3518_v62 = vpop.f32.mrf.mxu0 }
 0x612   :  { %v3638_v52 = vpop.f32.mrf.mxu1 }
 0x613   :  { %v3639_v18 = vadd.f32 %v3638_v52, %v3518_v62  ;;  %v13679_v36 = vpop.f32.mrf.mxu0 }
 0x614   :  { %v13715_v60 = vpop.f32.mrf.mxu1 }
 0x615   :  { %v3521_v42 = vpop.f32.mrf.mxu0 }
 0x616   :  { %v3641_v0 = vpop.f32.mrf.mxu1 }
 0x617   :  { %v3642_v13 = vadd.f32 %v3641_v0, %v3521_v42  ;;  %v13680_v38 = vpop.f32.mrf.mxu0 }
 0x618   :  { %v13716_v2 = vpop.f32.mrf.mxu1 }
 0x619   :  { %v3526_v37 = vpop.f32.mrf.mxu0 }
 0x61a   :  { %v3646_v19 = vpop.f32.mrf.mxu1 }
 0x61b   :  { %v3647_v24 = vadd.f32 %v3646_v19, %v3526_v37  ;;  %v13683_v30 = vpop.f32.mrf.mxu0 }
 0x61c   :  { %v13719_v45 = vpop.f32.mrf.mxu1 }
 0x61d   :  { %v3529_v22 = vpop.f32.mrf.mxu0 }
 0x61e   :  { %v3649_v6 = vpop.f32.mrf.mxu1 }
 0x61f   :  { %v3650_v39 = vadd.f32 %v3649_v6, %v3529_v22  ;;  %v13684_v55 = vpop.f32.mrf.mxu0 }
 0x620   :  { %v13720_v58 = vpop.f32.mrf.mxu1 }
 0x621   :  { %v3534_v1 = vpop.f32.mrf.mxu0 }
 0x622   :  { %v3654_v31 = vpop.f32.mrf.mxu1 }
 0x623   :  { %v3655_v21 = vadd.f32 %v3654_v31, %v3534_v1  ;;  %v13687_v7 = vpop.f32.mrf.mxu0 }
 0x624   :  { %v13723_v48 = vpop.f32.mrf.mxu1 }
 0x625   :  { %v3537_v49 = vpop.f32.mrf.mxu0 }
 0x626   :  { %v3657_v57 = vpop.f32.mrf.mxu1 }
 0x627   :  { %v13688_v61 = vpop.f32.mrf.mxu0 }
 0x628   :  { %v13724_v11 = vpop.f32.mrf.mxu1 }
 0x629   :  { %v3773_v15 = vpop.f32.mrf.mxu0 }
 0x62a   :  { %v3933_v9 = vpop.f32.mrf.mxu1  ;;  %v3811_v4 = vadd.f32 %v3773_v15, %v3623_v46 }
 0x62b   :  { %v13743_v28 = vpop.f32.mrf.mxu0 }
 0x62c   :  { %v13779_v51 = vpop.f32.mrf.mxu1  ;;  %v3971_v63 = vadd.f32 %v3933_v9, %v3811_v4 }
 0x62d   :  { %v3776_v43 = vpop.f32.mrf.mxu0 }
 0x62e   :  { %v3936_v17 = vpop.f32.mrf.mxu1  ;;  %v3812_v10 = vadd.f32 %v3776_v43, %v3626_v44 }
 0x62f   :  { %v13744_v14 = vpop.f32.mrf.mxu0 }
 0x630   :  { %v13780_v25 = vpop.f32.mrf.mxu1  ;;  %v3972_v26 = vadd.f32 %v3936_v17, %v3812_v10 }
 0x631   :  { %v3781_v23 = vpop.f32.mrf.mxu0 }
 0x632   :  { %v3941_v54 = vpop.f32.mrf.mxu1  ;;  %v3813_v59 = vadd.f32 %v3781_v23, %v3631_v16 }
 0x633   :  { %v13747_v40 = vpop.f32.mrf.mxu0 }
 0x634   :  { %v13783_v5 = vpop.f32.mrf.mxu1  ;;  %v3973_v53 = vadd.f32 %v3941_v54, %v3813_v59 }
 0x635   :  { %v3784_v8 = vpop.f32.mrf.mxu0 }
 0x636   :  { %v3944_v33 = vpop.f32.mrf.mxu1  ;;  %v3814_v20 = vadd.f32 %v3784_v8, %v3634_v35 }
 0x637   :  { %v13748_v62 = vpop.f32.mrf.mxu0 }
 0x638   :  { %v13784_v46 = vpop.f32.mrf.mxu1  ;;  %v3974_v52 = vadd.f32 %v3944_v33, %v3814_v20 }
 0x639   :  { %v3789_v36 = vpop.f32.mrf.mxu0 }
 0x63a   :  { %v3949_v60 = vpop.f32.mrf.mxu1  ;;  %v3815_v42 = vadd.f32 %v3789_v36, %v3639_v18 }
 0x63b   :  { %v13751_v0 = vpop.f32.mrf.mxu0 }
 0x63c   :  { %v13787_v44 = vpop.f32.mrf.mxu1  ;;  %v3975_v38 = vadd.f32 %v3949_v60, %v3815_v42 }
 0x63d   :  { %v3792_v2 = vpop.f32.mrf.mxu0 }
 0x63e   :  { %v3952_v37 = vpop.f32.mrf.mxu1  ;;  %v3816_v19 = vadd.f32 %v3792_v2, %v3642_v13 }
 0x63f   :  { %v13752_v30 = vpop.f32.mrf.mxu0 }
 0x640   :  { %v13788_v16 = vpop.f32.mrf.mxu1  ;;  %v3976_v45 = vadd.f32 %v3952_v37, %v3816_v19 }
 0x641   :  { %v3797_v22 = vpop.f32.mrf.mxu0 }
 0x642   :  { %v3957_v6 = vpop.f32.mrf.mxu1  ;;  %v3817_v55 = vadd.f32 %v3797_v22, %v3647_v24 }
 0x643   :  { %v13755_v58 = vpop.f32.mrf.mxu0 }
 0x644   :  { %v13791_v35 = vpop.f32.mrf.mxu1  ;;  %v3977_v1 = vadd.f32 %v3957_v6, %v3817_v55 }
 0x645   :  { %v3800_v31 = vpop.f32.mrf.mxu0 }
 0x646   :  { %v3960_v7 = vpop.f32.mrf.mxu1  ;;  %v3818_v48 = vadd.f32 %v3800_v31, %v3650_v39 }
 0x647   :  { %v13756_v49 = vpop.f32.mrf.mxu0 }
 0x648   :  { %v13792_v18 = vpop.f32.mrf.mxu1  ;;  %v3978_v57 = vadd.f32 %v3960_v7, %v3818_v48 }
 0x649   :  { %v3805_v61 = vpop.f32.mrf.mxu0 }
 0x64a   :  { %v3965_v11 = vpop.f32.mrf.mxu1  ;;  %v3819_v15 = vadd.f32 %v3805_v61, %v3655_v21 }
 0x64b   :  { %v13759_v9 = vpop.f32.mrf.mxu0 }
 0x64c   :  { %v13795_v13 = vpop.f32.mrf.mxu1  ;;  %v3979_v4 = vadd.f32 %v3965_v11, %v3819_v15 }
 0x64d   :  { %v3808_v28 = vpop.f32.mrf.mxu0 }
 0x64e   :  { %v3968_v51 = vpop.f32.mrf.mxu1 }
 0x64f   :  { %v13760_v43 = vpop.f32.mrf.mxu0 }
 0x650   :  { %v13796_v17 = vpop.f32.mrf.mxu1 }
 0x651   :  { %v4093_v24 = vpop.f32.mrf.mxu0 }
 0x652   :  { %v4253_v10 = vpop.f32.mrf.mxu1  ;;  %v4131_v14 = vadd.f32 %v4093_v24, %v3971_v63 }
 0x653   :  { %v13815_v25 = vpop.f32.mrf.mxu0 }
 0x654   :  { %v13851_v23 = vpop.f32.mrf.mxu1  ;;  %v17274_v54 = vadd.f32 %v4253_v10, %v4131_v14 }
 0x655   :  { %v4096_v39 = vpop.f32.mrf.mxu0 }
 0x656   :  { %v4256_v59 = vpop.f32.mrf.mxu1  ;;  %v4132_v40 = vadd.f32 %v4096_v39, %v3972_v26 }
 0x657   :  { %v13816_v5 = vpop.f32.mrf.mxu0 }
 0x658   :  { %v13852_v8 = vpop.f32.mrf.mxu1  ;;  %v17276_v21 = vadd.f32 %v4256_v59, %v4132_v40 }
 0x659   :  { %v4101_v33 = vpop.f32.mrf.mxu0 }
 0x65a   :  { %v4261_v20 = vpop.f32.mrf.mxu1  ;;  %v4133_v62 = vadd.f32 %v4101_v33, %v3973_v53 }
 0x65b   :  { %v13819_v46 = vpop.f32.mrf.mxu0 }
 0x65c   :  { %v13855_v36 = vpop.f32.mrf.mxu1  ;;  %v17278_v60 = vadd.f32 %v4261_v20, %v4133_v62 }
 0x65d   :  { %v4104_v42 = vpop.f32.mrf.mxu0 }
 0x65e   :  { %v4264_v63 = vpop.f32.mrf.mxu1  ;;  %v4134_v0 = vadd.f32 %v4104_v42, %v3974_v52 }
 0x65f   :  { %v13820_v44 = vpop.f32.mrf.mxu0 }
 0x660   :  { %v13856_v2 = vpop.f32.mrf.mxu1  ;;  %v17280_v37 = vadd.f32 %v4264_v63, %v4134_v0 }
 0x661   :  { %v4109_v19 = vpop.f32.mrf.mxu0 }
 0x662   :  { %v4269_v26 = vpop.f32.mrf.mxu1  ;;  %v4135_v30 = vadd.f32 %v4109_v19, %v3975_v38 }
 0x663   :  { %v13823_v16 = vpop.f32.mrf.mxu0 }
 0x664   :  { %v13859_v22 = vpop.f32.mrf.mxu1  ;;  %v17282_v6 = vadd.f32 %v4269_v26, %v4135_v30 }
 0x665   :  { %v4112_v55 = vpop.f32.mrf.mxu0 }
 0x666   :  { %v4272_v53 = vpop.f32.mrf.mxu1  ;;  %v4136_v58 = vadd.f32 %v4112_v55, %v3976_v45 }
 0x667   :  { %v13824_v35 = vpop.f32.mrf.mxu0 }
 0x668   :  { %v13860_v31 = vpop.f32.mrf.mxu1  ;;  %v17284_v7 = vadd.f32 %v4272_v53, %v4136_v58 }
 0x669   :  { %v4117_v48 = vpop.f32.mrf.mxu0 }
 0x66a   :  { %v4277_v52 = vpop.f32.mrf.mxu1  ;;  %v4137_v49 = vadd.f32 %v4117_v48, %v3977_v1 }
 0x66b   :  { %v13827_v18 = vpop.f32.mrf.mxu0 }
 0x66c   :  { %v13863_v61 = vpop.f32.mrf.mxu1  ;;  %v17286_v11 = vadd.f32 %v4277_v52, %v4137_v49 }
 0x66d   :  { %v4120_v15 = vpop.f32.mrf.mxu0 }
 0x66e   :  { %v4280_v38 = vpop.f32.mrf.mxu1  ;;  %v4138_v9 = vadd.f32 %v4120_v15, %v3978_v57 }
 0x66f   :  { %v13828_v13 = vpop.f32.mrf.mxu0 }
 0x670   :  { %v13864_v28 = vpop.f32.mrf.mxu1  ;;  %v17288_v51 = vadd.f32 %v4280_v38, %v4138_v9  ;;  %v14561_v13 = vld [vmem:[#allocation7 + $0x78] sm:$0xff]  }
 0x671   :  { %v4125_v43 = vpop.f32.mrf.mxu0  ;;  %v14563_v28 = vld [vmem:[#allocation7 + $0x38] sm:$0xff]   ;;  %13978 = vmatpush3.bf16.msra.mxu1 %v14561_v13 }
 0x672   :  { %v4285_v45 = vpop.f32.mrf.mxu1  ;;  %v4139_v17 = vadd.f32 %v4125_v43, %v3979_v4  ;;  %14014 = vmatpush3.bf16.msra.mxu0 %v14563_v28  ;;  %v14570_v28 = vld [vmem:[#allocation7 + $0x50] sm:$0xff]  }
 0x673   :  { %v13831_v24 = vpop.f32.mrf.mxu0 }
 0x674   :  { %v13867_v10 = vpop.f32.mrf.mxu1  ;;  %v17290_v14 = vadd.f32 %v4285_v45, %v4139_v17  ;;  %v14562_v17 = vld [vmem:[#allocation7 + $0x70] sm:$0xff]  }
 0x675   :  { %v4128_v25 = vpop.f32.mrf.mxu0  ;;  %v14565_v24 = vld [vmem:[#allocation7 + $0x30] sm:$0xff]  }
 0x676   :  { %v4288_v1 = vpop.f32.mrf.mxu1 }
 0x677   :  { %v13832_v23 = vpop.f32.mrf.mxu0  ;;  %v17314_v1 = vld [vmem:[#allocation2 + $0x8] sm:$0xff] }
 0x678   :  { %v13868_v39 = vpop.f32.mrf.mxu1  ;;  %13979 = vmatprep.subr.bf16.mxu1 %v17314_v1  ;;  %14015 = vmatprep.subr.bf16.mxu0 %v17314_v1 }
 0x679   :  { %v4413_v59 = vpop.f32.mrf.mxu0  ;;  %13980 = vmatpush3.bf16.msra.mxu1 %v14562_v17  ;;  %14016 = vmatpush3.bf16.msra.mxu0 %v14565_v24 }
 0x67a   :  { %v4573_v40 = vpop.f32.mrf.mxu1  ;;  %v4451_v23 = vadd.f32 %v4413_v59, %v17274_v54  ;;  %13981 = vmatprep.subr.bf16.mxu1 %v17314_v1  ;;  %14017 = vmatprep.subr.bf16.mxu0 %v17314_v1  ;;  %v14566_v54 = vld [vmem:[#allocation7 + $0x60] sm:$0xff]  }
 0x67b   :  { %v13887_v5 = vpop.f32.mrf.mxu0 }
 0x67c   :  { %v13923_v8 = vpop.f32.mrf.mxu1 }
 0x67d   :  { %v4416_v57 = vpop.f32.mrf.mxu0 }
 0x67e   :  { %v4576_v33 = vpop.f32.mrf.mxu1  ;;  %v4452_v8 = vadd.f32 %v4416_v57, %v17276_v21  ;;  %v14569_v21 = vld [vmem:[#allocation7 + $0x20] sm:$0xff]  }
 0x67f   :  { %v13888_v20 = vpop.f32.mrf.mxu0 }
 0x680   :  { %v13924_v62 = vpop.f32.mrf.mxu1  ;;  %v14564_v20 = vld [vmem:[#allocation7 + $0x68] sm:$0xff]  }
 0x681   :  { %v4421_v46 = vpop.f32.mrf.mxu0  ;;  %v14567_v62 = vld [vmem:[#allocation7 + $0x28] sm:$0xff]   ;;  %13982 = vmatpush3.bf16.msra.mxu1 %v14564_v20 }
 0x682   :  { %v4581_v36 = vpop.f32.mrf.mxu1  ;;  %14018 = vmatpush3.bf16.msra.mxu0 %v14567_v62  ;;  %13983 = vmatprep.subr.bf16.mxu1 %v17314_v1  ;;  %v14575_v62 = vld [vmem:[#allocation7 + $0x40] sm:$0xff]  }
 0x683   :  { %v13891_v42 = vpop.f32.mrf.mxu0  ;;  %14019 = vmatprep.subr.bf16.mxu0 %v17314_v1 }
 0x684   :  { %v13927_v4 = vpop.f32.mrf.mxu1 }
 0x685   :  { %v4424_v63 = vpop.f32.mrf.mxu0  ;;  %v4611_v4 = vadd.f32 %v4573_v40, %v4451_v23  ;;  %13984 = vmatpush3.bf16.msra.mxu1 %v14566_v54  ;;  %v14574_v23 = vld [vmem:[#allocation7 + $0x8] sm:$0xff]  }
 0x686   :  { %v17292_v0 = vpop.f32.mrf.mxu1  ;;  %v4454_v40 = vadd.f32 %v4424_v63, %v17280_v37  ;;  %14020 = vmatpush3.bf16.msra.mxu0 %v14569_v21  ;;  %13985 = vmatprep.subr.bf16.mxu1 %v17314_v1 }
 0x687   :  { %v13892_v44 = vpop.f32.mrf.mxu0  ;;  %14021 = vmatprep.subr.bf16.mxu0 %v17314_v1 }
 0x688   :  { %v13928_v2 = vpop.f32.mrf.mxu1  ;;  %v4453_v44 = vadd.f32 %v4421_v46, %v17278_v60  ;;  %v14568_v46 = vld [vmem:[#allocation7 + $0x58] sm:$0xff]   ;;  %v4614_v37 = vadd.f32 %v17292_v0, %v4454_v40 }
 0x689   :  { %v17294_v19 = vpop.f32.mrf.mxu0  ;;  %13986 = vmatpush3.bf16.msra.mxu1 %v14568_v46 }
 0x68a   :  { %v17296_v26 = vpop.f32.mrf.mxu1  ;;  %v4455_v63 = vadd.f32 %v17294_v19, %v17282_v6  ;;  %13987 = vmatprep.subr.bf16.mxu1 %v17314_v1 }
 0x68b   :  { %v13895_v30 = vpop.f32.mrf.mxu0 }
 0x68c   :  { %v13931_v16 = vpop.f32.mrf.mxu1  ;;  %v4612_v30 = vadd.f32 %v4576_v33, %v4452_v8  ;;  %v4615_v0 = vadd.f32 %v17296_v26, %v4455_v63 }
 0x68d   :  { %v17298_v22 = vpop.f32.mrf.mxu0  ;;  %13988 = vmatpush3.bf16.msra.mxu1 %v14570_v28 }
 0x68e   :  { %v17300_v55 = vpop.f32.mrf.mxu1  ;;  %v4456_v6 = vadd.f32 %v17298_v22, %v17284_v7  ;;  %13989 = vmatprep.subr.bf16.mxu1 %v17314_v1 }
 0x68f   :  { %v13896_v53 = vpop.f32.mrf.mxu0 }
 0x690   :  { %v13932_v58 = vpop.f32.mrf.mxu1  ;;  %v4613_v53 = vadd.f32 %v4581_v36, %v4453_v44  ;;  %v4616_v26 = vadd.f32 %v17300_v55, %v4456_v6 }
 0x691   :  { %v17302_v35 = vpop.f32.mrf.mxu0 }
 0x692   :  { %v17304_v31 = vpop.f32.mrf.mxu1  ;;  %v4457_v7 = vadd.f32 %v17302_v35, %v17286_v11 }
 0x693   :  { %v13899_v48 = vpop.f32.mrf.mxu0 }
 0x694   :  { %v13935_v52 = vpop.f32.mrf.mxu1  ;;  %v14571_v48 = vld [vmem:[#allocation7 + $0x18] sm:$0xff]   ;;  %v4617_v55 = vadd.f32 %v17304_v31, %v4457_v7 }
 0x695   :  { %v17306_v49 = vpop.f32.mrf.mxu0  ;;  %14022 = vmatpush3.bf16.msra.mxu0 %v14571_v48 }
 0x696   :  { %v17308_v18 = vpop.f32.mrf.mxu1  ;;  %14023 = vmatprep.subr.bf16.mxu0 %v17314_v1  ;;  %v4458_v11 = vadd.f32 %v17306_v49, %v17288_v51 }
 0x697   :  { %v13900_v61 = vpop.f32.mrf.mxu0 }
 0x698   :  { %v13936_v15 = vpop.f32.mrf.mxu1 }
 0x699   :  { %v17310_v38 = vpop.f32.mrf.mxu0 }
 0x69a   :  { %v17312_v9 = vpop.f32.mrf.mxu1  ;;  %v4459_v31 = vadd.f32 %v17310_v38, %v17290_v14 }
 0x69b   :  { %v13903_v43 = vpop.f32.mrf.mxu0 }
 0x69c   :  { %v13939_v45 = vpop.f32.mrf.mxu1  ;;  %v14572_v43 = vld [vmem:[#allocation7 + $0x10] sm:$0xff]   ;;  %v4619_v46 = vadd.f32 %v17312_v9, %v4459_v31 }
 0x69d   :  { %v4448_v10 = vpop.f32.mrf.mxu0  ;;  %14024 = vmatpush3.bf16.msra.mxu0 %v14572_v43 }
 0x69e   :  { %v4608_v25 = vpop.f32.mrf.mxu1  ;;  %14025 = vmatprep.subr.bf16.mxu0 %v17314_v1 }
 0x69f   :  { %v13904_v39 = vpop.f32.mrf.mxu0  ;;  %v14573_v25 = vld [vmem:[#allocation7 + $0x48] sm:$0xff]  }
 0x6a0   :  { %v13940_v5 = vpop.f32.mrf.mxu1  ;;  %13990 = vmatpush3.bf16.msra.mxu1 %v14573_v25 }
 0x6a1   :  { %v4733_v42 = vpop.f32.mrf.mxu0  ;;  %14026 = vmatpush3.bf16.msra.mxu0 %v14574_v23  ;;  %13991 = vmatprep.subr.bf16.mxu1 %v17314_v1 }
 0x6a2   :  { %v17323_v16 = vadd.f32 %v4733_v42, %v4611_v4  ;;  %v14576_v42 = vld [vmem:[#allocation7] sm:$0xff]   ;;  %14027 = vmatprep.subr.bf16.mxu0 %v17314_v1 }
 0x6a3   :  { %v13959_v2 = vpop.f32.mrf.mxu0 }
 0x6a4   :  { %v4782_v60 = vmul.f32 %v17323_v16, %v15248_v27  ;;  %13992 = vmatpush3.bf16.msra.mxu1 %v14575_v62 }
 0x6a5   :  { %v4736_v59 = vpop.f32.mrf.mxu0  ;;  %14028 = vmatpush3.bf16.msra.mxu0 %v14576_v42  ;;  %14049 = vmatprep.subr.bf16.mxu1 %v17314_v1 }
 0x6a6   :  { %v17327_v57 = vadd.f32 %v4736_v59, %v4612_v30  ;;  %14085 = vmatprep.subr.bf16.mxu0 %v17314_v1 }
 0x6a7   :  { %v13960_v58 = vpop.f32.mrf.mxu0 }
 0x6a8   :  { %v4783_v33 = vmul.f32 %v17327_v57, %v15258_v32  ;;  %v4618_v58 = vadd.f32 %v17308_v18, %v4458_v11 }
 0x6a9   :  { %v4741_v52 = vpop.f32.mrf.mxu0 }
 0x6aa   :  { %v4791_v61 = vadd.f32 %v4783_v33, %v4782_v60  ;;  %v17336_v36 = vadd.f32 %v4741_v52, %v4613_v53 }
 0x6ab   :  { %v13963_v15 = vpop.f32.mrf.mxu0 }
 0x6ac   :  { %v4784_v13 = vmul.f32 %v17336_v36, %v15252_v29 }
 0x6ad   :  { %v4744_v45 = vpop.f32.mrf.mxu0 }
 0x6ae   :  { %v4792_v17 = vadd.f32 %v4791_v61, %v4784_v13  ;;  %v17345_v24 = vadd.f32 %v4744_v45, %v4614_v37 }
 0x6af   :  { %v13964_v10 = vpop.f32.mrf.mxu0 }
 0x6b0   :  { %v4785_v19 = vmul.f32 %v17345_v24, %v15262_v34 }
 0x6b1   :  { %v4749_v39 = vpop.f32.mrf.mxu0 }
 0x6b2   :  { %v4793_v5 = vadd.f32 %v4792_v17, %v4785_v19  ;;  %v17354_v8 = vadd.f32 %v4749_v39, %v4615_v0 }
 0x6b3   :  { %v13967_v20 = vpop.f32.mrf.mxu0 }
 0x6b4   :  { %v4786_v22 = vmul.f32 %v17354_v8, %v15276_v41 }
 0x6b5   :  { %v4752_v4 = vpop.f32.mrf.mxu0 }
 0x6b6   :  { %v4794_v44 = vadd.f32 %v4793_v5, %v4786_v22  ;;  %v4776_v2 = vadd.f32 %v4752_v4, %v4616_v26 }
 0x6b7   :  { %v13968_v30 = vpop.f32.mrf.mxu0 }
 0x6b8   :  { %v4787_v35 = vmul.f32 %v4776_v2, %v20250_v12 }
 0x6b9   :  { %v4757_v54 = vpop.f32.mrf.mxu0 }
 0x6ba   :  { %v4795_v21 = vadd.f32 %v4794_v44, %v4787_v35  ;;  %v4777_v59 = vadd.f32 %v4757_v54, %v4617_v55 }
 0x6bb   :  { %v13971_v53 = vpop.f32.mrf.mxu0 }
 0x6bc   :  { %v4788_v40 = vmul.f32 %v4777_v59, %v20251_v56 }
 0x6bd   :  { %v4760_v51 = vpop.f32.mrf.mxu0 }
 0x6be   :  { %v4796_v49 = vadd.f32 %v4795_v21, %v4788_v40  ;;  %v4778_v60 = vadd.f32 %v4760_v51, %v4618_v58 }
 0x6bf   :  { %v13972_v33 = vpop.f32.mrf.mxu0 }
 0x6c0   :  { %v4789_v48 = vmul.f32 %v4778_v60, %v20252_v50 }
 0x6c1   :  { %v4765_v52 = vpop.f32.mrf.mxu0 }
 0x6c2   :  { %v4797_v61 = vadd.f32 %v4796_v49, %v4789_v48  ;;  %v4779_v15 = vadd.f32 %v4765_v52, %v4619_v46 }
 0x6c3   :  { %v13975_v37 = vpop.f32.mrf.mxu0 }
 0x6c4   :  { %v4790_v63 = vmul.f32 %v4779_v15, %v20253_v3 }
 0x6c5   :  { %v4768_v18 = vpop.f32.mrf.mxu0 }
 0x6c6   :  { %v4798_v13 = vadd.f32 %v4797_v61, %v4790_v63  ;;  %v4780_v18 = vld [vmem:[%s20165_s9] sm:$0x1] }
 0x6c7   :  { %v13976_v28 = vpop.f32.mrf.mxu0 }
 0x6c8   :  { %v4799_v14 = vrot.slane %v4798_v13, 4 }
 0x6ca   :  { %v4800_v38 = vadd.f32 %v4799_v14, %v4798_v13  ;;  %v11844_v13 = vld [vmem:[%s20166_s10] ss:$0 sm:$0xff] }
 0x6cc   :  { %v4801_v43 = vrot.slane %v4800_v38, 2 }
 0x6ce   :  { %v4802_v45 = vadd.f32 %v4801_v43, %v4800_v38  ;;  %v4870_v38 = vmul.f32 %v11844_v13, %v15248_v27  ;;  %v4871_v43 = vmul.f32 %v11844_v13, %v15258_v32 }
 0x6d0   :  { %v4803_v17 = vrot.slane %v4802_v45, 1 }
 0x6d2   :  { %v4804_v10 = vadd.f32 %v4803_v17, %v4802_v45  ;;  %v4874_v17 = vmul.f32 %v11844_v13, %v15276_v41 }
 0x6d4   :  { %v4805_v0 = vmul.f32 0.03125, %v4804_v10  ;;  %v4876_v10 = vmul.f32 %v11844_v13, %v20251_v56 }
 0x6d6   :  { %v4806_v9 = vsub.f32 %v17323_v16, %v4805_v0  ;;  %v4807_v6 = vsub.f32 %v17327_v57, %v4805_v0  ;;  %v4808_v19 = vsub.f32 %v17336_v36, %v4805_v0  ;;  %v4809_v25 = vsub.f32 %v17345_v24, %v4805_v0 }
 0x6d7   :  { %v4810_v23 = vsub.f32 %v17354_v8, %v4805_v0  ;;  %v4811_v39 = vsub.f32 %v4776_v2, %v4805_v0  ;;  %v4812_v5 = vsub.f32 %v4777_v59, %v4805_v0  ;;  %v4813_v20 = vsub.f32 %v4778_v60, %v4805_v0 }
 0x6d8   :  { %v4814_v26 = vsub.f32 %v4779_v15, %v4805_v0  ;;  %v4815_v7 = vmul.f32 %v4806_v9, %v15248_v27  ;;  %v4816_v22 = vmul.f32 %v4807_v6, %v15258_v32  ;;  %v4817_v62 = vmul.f32 %v4808_v19, %v15252_v29 }
 0x6d9   :  { %v4818_v16 = vmul.f32 %v4809_v25, %v15262_v34  ;;  %v4819_v36 = vmul.f32 %v4810_v23, %v15276_v41  ;;  %v4820_v8 = vmul.f32 %v4811_v39, %v20250_v12  ;;  %v4821_v30 = vmul.f32 %v4812_v5, %v20251_v56 }
 0x6da   :  { %v4824_v42 = vmul.f32 %v4815_v7, %v4815_v7  ;;  %v4825_v57 = vmul.f32 %v4816_v22, %v4816_v22  ;;  %v4826_v4 = vmul.f32 %v4817_v62, %v4817_v62  ;;  %v4822_v35 = vmul.f32 %v4813_v20, %v20252_v50 }
 0x6db   :  { %v4827_v44 = vmul.f32 %v4818_v16, %v4818_v16  ;;  %v4828_v55 = vmul.f32 %v4819_v36, %v4819_v36  ;;  %v4829_v54 = vmul.f32 %v4820_v8, %v4820_v8  ;;  %v4823_v59 = vmul.f32 %v4814_v26, %v20253_v3 }
 0x6dc   :  { %v4833_v24 = vadd.f32 %v4825_v57, %v4824_v42  ;;  %v4830_v53 = vmul.f32 %v4821_v30, %v4821_v30  ;;  %v4831_v31 = vmul.f32 %v4822_v35, %v4822_v35  ;;  %v4878_v0 = vmul.f32 %v11844_v13, %v20253_v3 }
 0x6dd   :  { %v4832_v51 = vmul.f32 %v4823_v59, %v4823_v59  ;;  %v4872_v9 = vmul.f32 %v11844_v13, %v15252_v29  ;;  %v4873_v6 = vmul.f32 %v11844_v13, %v15262_v34  ;;  %v4875_v19 = vmul.f32 %v11844_v13, %v20250_v12 }
 0x6de   :  { %v4834_v2 = vadd.f32 %v4833_v24, %v4826_v4  ;;  %v4877_v25 = vmul.f32 %v11844_v13, %v20252_v50 }
 0x6e0   :  { %v4835_v11 = vadd.f32 %v4834_v2, %v4827_v44 }
 0x6e2   :  { %v4836_v21 = vadd.f32 %v4835_v11, %v4828_v55 }
 0x6e4   :  { %v4837_v58 = vadd.f32 %v4836_v21, %v4829_v54 }
 0x6e6   :  { %v4838_v40 = vadd.f32 %v4837_v58, %v4830_v53 }
 0x6e8   :  { %v4839_v49 = vadd.f32 %v4838_v40, %v4831_v31 }
 0x6ea   :  { %v4840_v60 = vadd.f32 %v4839_v49, %v4832_v51 }
 0x6ec   :  { %v4841_v33 = vrot.slane %v4840_v60, 4 }
 0x6ee   :  { %v4842_v46 = vadd.f32 %v4841_v33, %v4840_v60 }
 0x6f0   :  { %v4843_v48 = vrot.slane %v4842_v46, 2 }
 0x6f2   :  { %v4844_v52 = vadd.f32 %v4843_v48, %v4842_v46 }
 0x6f4   :  { %v4845_v61 = vrot.slane %v4844_v52, 1 }
 0x6f6   :  { %v4846_v15 = vadd.f32 %v4845_v61, %v4844_v52 }
 0x6f8   :  { %v4847_v37 = vmul.f32 0.03125, %v4846_v15 }
 0x6fa   :  { %v4848_v63 = vadd.f32 1e-05, %v4847_v37 }
 0x6fc   :  { %14997 = vrsqrt.f32 %v4848_v63 }
 0x709   :  { %v14998_v28 = vpop.eup %14997 }
 0x70a   :  { %v4850_v14 = vmul.f32 %v14998_v28, %v4780_v18 }
 0x70c   :  { %v4854_v45 = vrot.slane %v4850_v14, %v20254_v47 }
 0x70e   :  { %v4855_v23 = vmul.f32 %v4854_v45, %v4815_v7  ;;  %v4856_v39 = vmul.f32 %v4854_v45, %v4816_v22  ;;  %v4857_v5 = vmul.f32 %v4854_v45, %v4817_v62  ;;  %v4858_v20 = vmul.f32 %v4854_v45, %v4818_v16 }
 0x70f   :  { %v4859_v26 = vmul.f32 %v4854_v45, %v4819_v36  ;;  %v4860_v42 = vmul.f32 %v4854_v45, %v4820_v8  ;;  %v4861_v57 = vmul.f32 %v4854_v45, %v4821_v30  ;;  %v4862_v4 = vmul.f32 %v4854_v45, %v4822_v35 }
 0x710   :  { %v4863_v24 = vmul.f32 %v4854_v45, %v4823_v59  ;;  %v4879_v44 = vadd.f32 %v4870_v38, %v4855_v23  ;;  %v4880_v2 = vadd.f32 %v4871_v43, %v4856_v39  ;;  %v4881_v55 = vadd.f32 %v4872_v9, %v4857_v5  ;;  %v14577_v43 = vld [vmem:[#allocation7 + $0xb8] sm:$0xff]   ;;  %v14578_v39 = vld [vmem:[#allocation7 + $0xb0] sm:$0xff]  }
 0x711   :  { %v4882_v11 = vadd.f32 %v4873_v6, %v4858_v20  ;;  %v4883_v54 = vadd.f32 %v4874_v17, %v4859_v26  ;;  %v4884_v21 = vadd.f32 %v4875_v19, %v4860_v42  ;;  %v4885_v53 = vadd.f32 %v4876_v10, %v4861_v57  ;;  %v14579_v9 = vld [vmem:[#allocation7 + $0xf8] sm:$0xff]   ;;  %v14581_v26 = vld [vmem:[#allocation7 + $0xf0] sm:$0xff]  }
 0x712   :  { %v4886_v58 = vadd.f32 %v4877_v25, %v4862_v4  ;;  %v4887_v31 = vadd.f32 %v4878_v0, %v4863_v24  ;;  %vm4888_vm11 = vcmp.ge.f32.partialorder %v4879_v44, 0.0  ;;  %vm4889_vm13 = vcmp.ge.f32.partialorder %v4880_v2, 0.0 }
 0x713   :  { %vm4890_vm14 = vcmp.ge.f32.partialorder %v4881_v55, 0.0  ;;  %vm4891_vm15 = vcmp.ge.f32.partialorder %v4882_v11, 0.0  ;;  %vm4892_vm2 = vcmp.ge.f32.partialorder %v4883_v54, 0.0  ;;  %vm4893_vm3 = vcmp.ge.f32.partialorder %v4884_v21, 0.0 }
 0x714   :  { %vm4894_vm4 = vcmp.ge.f32.partialorder %v4885_v53, 0.0  ;;  %vm4895_vm5 = vcmp.ge.f32.partialorder %v4886_v58, 0.0  ;;  %vm4896_vm6 = vcmp.ge.f32.partialorder %v4887_v31, 0.0  ;;  %v4897_v7 = vmul.f32 0.05, %v4879_v44 }
 0x715   :  { %v4898_v22 = vmul.f32 0.05, %v4880_v2  ;;  %v4899_v62 = vmul.f32 0.05, %v4881_v55  ;;  %v4900_v16 = vmul.f32 0.05, %v4882_v11 }
 0x716   :  { %v4901_v36 = vmul.f32 0.05, %v4883_v54  ;;  %v4902_v8 = vmul.f32 0.05, %v4884_v21  ;;  %v4903_v30 = vmul.f32 0.05, %v4885_v53  ;;  %v17407_v35 = vsel %vm4888_vm11, %v4879_v44, %v4897_v7 }
 0x717   :  { %v4904_v59 = vmul.f32 0.05, %v4886_v58  ;;  %v4905_v40 = vmul.f32 0.05, %v4887_v31  ;;  %v17410_v51 = vsel %vm4889_vm13, %v4880_v2, %v4898_v22  ;;  %v17413_v49 = vsel %vm4890_vm14, %v4881_v55, %v4899_v62  ;;  %4915 = vst [vmem:[#allocation4 + $0x8] sm:$0xff] %v17407_v35 }
 0x718   :  { %v17417_v60 = vsel %vm4891_vm15, %v4882_v11, %v4900_v16  ;;  %v17420_v33 = vsel %vm4892_vm2, %v4883_v54, %v4901_v36  ;;  %v17423_v46 = vsel %vm4893_vm3, %v4884_v21, %v4902_v8  ;;  %v17426_v48 = vsel %vm4894_vm4, %v4885_v53, %v4903_v30  ;;  %4916 = vst [vmem:[#allocation4 + $0x10] sm:$0xff] %v17410_v51  ;;  %v14580_v54 = vld [vmem:[#allocation7 + $0xa8] sm:$0xff]  }
 0x719   :  { %4917 = vst [vmem:[#allocation4 + $0x18] sm:$0xff] %v17413_v49  ;;  %v17431_v52 = vsel %vm4895_vm5, %v4886_v58, %v4904_v59  ;;  %v17434_v61 = vsel %vm4896_vm6, %v4887_v31, %v4905_v40  ;;  %4918 = vst [vmem:[#allocation4 + $0x20] sm:$0xff] %v17417_v60  ;;  %v5554_v15 = vpack.c.bf16 %v17410_v51, %v17407_v35  ;;  %v14583_v30 = vld [vmem:[#allocation7 + $0xe8] sm:$0xff]   ;;  %v14582_v59 = vld [vmem:[#allocation7 + $0xa0] sm:$0xff]  }
 0x71a   :  { %4919 = vst [vmem:[#allocation4 + $0x28] sm:$0xff] %v17420_v33  ;;  %4920 = vst [vmem:[#allocation4 + $0x30] sm:$0xff] %v17423_v46  ;;  %v5555_v37 = vpack.c.bf16 %v17417_v60, %v17413_v49  ;;  %v5556_v63 = vpack.c.bf16 %v17423_v46, %v17420_v33  ;;  %v5557_v18 = vpack.c.bf16 %v17431_v52, %v17426_v48  ;;  %v14612_v35 = vld [vmem:[#allocation7 + $0x1a8] sm:$0xff]   ;;  %v14616_v49 = vld [vmem:[#allocation7 + $0x198] sm:$0xff]  }
 0x71b   :  { %4921 = vst [vmem:[#allocation4 + $0x38] sm:$0xff] %v17426_v48  ;;  %4922 = vst [vmem:[#allocation4 + $0x40] sm:$0xff] %v17431_v52  ;;  %v14615_v51 = vld [vmem:[#allocation7 + $0x1e8] sm:$0xff]   ;;  %v14617_v60 = vld [vmem:[#allocation7 + $0x1e0] sm:$0xff]   ;;  %v5558_v52 = vpack.c.bf16 %v17434_v61, %v17434_v61 }
 0x71c   :  { %4923 = vst [vmem:[#allocation4 + $0x48] sm:$0xff] %v17434_v61  ;;  %v14620_v33 = vld [vmem:[#allocation7 + $0x1d0] sm:$0xff]   ;;  %v14621_v46 = vld [vmem:[#allocation7 + $0x188] sm:$0xff]   ;;  %v14624_v48 = vld [vmem:[#allocation7 + $0x1c0] sm:$0xff]  }
 0x71e   :  { %v4954_v13 = vld [vmem:[#allocation4 + $0x2] sm:$0xff] }
 0x71f   :  { %v4924_v28 = vld [vmem:[#allocation4 + $0x1] sm:$0xff]  ;;  %v4955_v14 = vld [vmem:[#allocation4 + $0xa] sm:$0xff] }
 0x720   :  { %v17450_v38 = vld [vmem:[#allocation4 + $0x9] sm:$0xff]  ;;  %v4963_v45 = vpack.c.bf16 %v4955_v14, %v4954_v13  ;;  %v17453_v10 = vld [vmem:[#allocation4 + $0x11] sm:$0xff]  ;;  %v17455_v0 = vld [vmem:[#allocation4 + $0x19] sm:$0xff] }
 0x721   :  { %v4933_v17 = vpack.c.bf16 %v17450_v38, %v4924_v28  ;;  %v17457_v6 = vld [vmem:[#allocation4 + $0x21] sm:$0xff]  ;;  %v5714_v19 = vpack.c.bf16 %v17453_v10, %v17450_v38  ;;  %v17461_v25 = vld [vmem:[#allocation4 + $0x29] sm:$0xff]  ;;  %v4956_v4 = vld [vmem:[#allocation4 + $0x12] sm:$0xff]  ;;  %v4934_v7 = vpack.c.bf16 %v17455_v0, %v17453_v10 }
 0x722   :  { %13994 = vmatmul.mubr.bf16.vlgmr.msra.gmra.mxu1 %v4963_v45  ;;  %v5715_v23 = vpack.c.bf16 %v17457_v6, %v17455_v0  ;;  %v17467_v5 = vld [vmem:[#allocation4 + $0x31] sm:$0xff]  ;;  %v17469_v20 = vld [vmem:[#allocation4 + $0x39] sm:$0xff]  ;;  %v17487_v21 = vld [vmem:[#allocation4 + $0x27] sm:$0xff] }
 0x723   :  { %14030 = vmatmul.mubr.bf16.vlgmr.msra.gmra.mxu0 %v4933_v17  ;;  %14050 = vmatpush3.bf16.msra.mxu1 %v14577_v43  ;;  %v17474_v42 = vld [vmem:[#allocation4 + $0x41] sm:$0xff]  ;;  %v5716_v57 = vpack.c.bf16 %v17467_v5, %v17461_v25  ;;  %v17478_v44 = vld [vmem:[#allocation4 + $0xf] sm:$0xff]  ;;  %v17483_v55 = vld [vmem:[#allocation4 + $0x17] sm:$0xff]  ;;  %v4935_v17 = vpack.c.bf16 %v17461_v25, %v17457_v6 }
 0x724   :  { %13997 = vmatprep.mubr.msk.bf16.mxu1 %vm15077_vm12, %v17314_v1  ;;  %14051 = vmatprep.subr.bf16.mxu1 %v17314_v1  ;;  %v4957_v24 = vld [vmem:[#allocation4 + $0x1a] sm:$0xff]  ;;  %v5717_v2 = vpack.c.bf16 %v17474_v42, %v17469_v20  ;;  %v17489_v53 = vld [vmem:[#allocation4 + $0x2f] sm:$0xff]  ;;  %v6194_v58 = vpack.c.bf16 %v17483_v55, %v17478_v44  ;;  %v17502_v36 = vld [vmem:[#allocation4 + $0x47] sm:$0xff] }
 0x725   :  { %14033 = vmatprep.mubr.msk.bf16.mxu0 %vm15077_vm12, %v17314_v1  ;;  %14086 = vmatpush3.bf16.msra.mxu0 %v14579_v9  ;;  %v17485_v11 = vld [vmem:[#allocation4 + $0x1f] sm:$0xff]  ;;  %v4964_v31 = vpack.c.bf16 %v4957_v24, %v4956_v4  ;;  %v17496_v22 = vld [vmem:[#allocation4 + $0x37] sm:$0xff]  ;;  %v4959_v28 = vld [vmem:[#allocation4 + $0x2a] sm:$0xff] }
 0x726   :  { %14087 = vmatprep.subr.bf16.mxu0 %v17314_v1  ;;  %v6195_v62 = vpack.c.bf16 %v17487_v21, %v17485_v11  ;;  %v17500_v16 = vld [vmem:[#allocation4 + $0x3f] sm:$0xff]  ;;  %v6196_v8 = vpack.c.bf16 %v17496_v22, %v17489_v53  ;;  %v14584_v14 = vld [vmem:[#allocation7 + $0x98] sm:$0xff]   ;;  %v14586_v9 = vld [vmem:[#allocation7 + $0x90] sm:$0xff]  }
 0x727   :  { %14052 = vmatpush3.bf16.msra.mxu1 %v14578_v39  ;;  %v6197_v40 = vpack.c.bf16 %v17502_v36, %v17500_v16  ;;  %v4958_v13 = vld [vmem:[#allocation4 + $0x22] sm:$0xff]  ;;  %v14585_v43 = vld [vmem:[#allocation7 + $0xe0] sm:$0xff]   ;;  %v14587_v39 = vld [vmem:[#allocation7 + $0xd8] sm:$0xff]  }
 0x728   :  { %14053 = vmatprep.subr.bf16.mxu1 %v17314_v1  ;;  %v4965_v45 = vpack.c.bf16 %v4959_v28, %v4958_v13  ;;  %v4961_v4 = vld [vmem:[#allocation4 + $0x3a] sm:$0xff]  ;;  %v14588_v24 = vld [vmem:[#allocation7 + $0xd0] sm:$0xff]   ;;  %v14619_v38 = vld [vmem:[#allocation7 + $0x1d8] sm:$0xff]  }
 0x729   :  { %14088 = vmatpush3.bf16.msra.mxu0 %v14581_v26  ;;  %v4960_v26 = vld [vmem:[#allocation4 + $0x32] sm:$0xff]  ;;  %v4962_v13 = vld [vmem:[#allocation4 + $0x42] sm:$0xff] }
 0x72a   :  { %13998 = vmatmul.mubr.bf16.gmra.mxu1 %v4964_v31  ;;  %14089 = vmatprep.subr.bf16.mxu0 %v17314_v1  ;;  %v4966_v31 = vpack.c.bf16 %v4961_v4, %v4960_v26  ;;  %v14592_v28 = vld [vmem:[#allocation7 + $0xc0] sm:$0xff]   ;;  %v5713_v0 = vld [vmem:[#allocation4 + $0x49] sm:$0xff] }
 0x72b   :  { %14034 = vmatmul.mubr.bf16.gmra.mxu0 %v4934_v7  ;;  %14054 = vmatpush3.bf16.msra.mxu1 %v14580_v54  ;;  %v14589_v54 = vld [vmem:[#allocation7 + $0x88] sm:$0xff]   ;;  %v4936_v7 = vpack.c.bf16 %v17469_v20, %v17467_v5  ;;  %v14623_v10 = vld [vmem:[#allocation7 + $0x180] sm:$0xff]   ;;  %v5865_v6 = vld [vmem:[#allocation4 + $0xd] sm:$0xff] }
 0x72c   :  { %14001 = vmatprep.mubr.msk.bf16.mxu1 %vm15077_vm12, %v17314_v1  ;;  %14055 = vmatprep.subr.bf16.mxu1 %v17314_v1  ;;  %v6025_v25 = vld [vmem:[#allocation4 + $0xe] sm:$0xff] }
 0x72d   :  { %14037 = vmatprep.mubr.msk.bf16.mxu0 %vm15077_vm12, %v17314_v1  ;;  %14090 = vmatpush3.bf16.msra.mxu0 %v14583_v30  ;;  %v14590_v30 = vld [vmem:[#allocation7 + $0xc8] sm:$0xff]   ;;  %v14625_v5 = vld [vmem:[#allocation7 + $0x238] sm:$0xff]  }
 0x72e   :  { %14091 = vmatprep.subr.bf16.mxu0 %v17314_v1 }
 0x72f   :  { %14056 = vmatpush3.bf16.msra.mxu1 %v14582_v59  ;;  %v14591_v59 = vld [vmem:[#allocation7 + $0x80] sm:$0xff]  }
 0x730   :  { %14057 = vmatprep.subr.bf16.mxu1 %v17314_v1 }
 0x731   :  { %14092 = vmatpush3.bf16.msra.mxu0 %v14585_v43  ;;  %v4937_v43 = vpack.c.bf16 %v17474_v42, %v17474_v42  ;;  %v14626_v42 = vld [vmem:[#allocation7 + $0x230] sm:$0xff]  }
 0x732   :  { %14002 = vmatmul.mubr.bf16.gmra.mxu1 %v4965_v45  ;;  %14093 = vmatprep.subr.bf16.mxu0 %v17314_v1  ;;  %v5225_v45 = vld [vmem:[#allocation4 + $0x3] sm:$0xff] }
 0x733   :  { %14038 = vmatmul.mubr.bf16.gmra.mxu0 %v4935_v17  ;;  %14058 = vmatpush3.bf16.msra.mxu1 %v14584_v14  ;;  %v4967_v14 = vpack.c.bf16 %v4962_v13, %v4962_v13  ;;  %v5226_v17 = vld [vmem:[#allocation4 + $0xb] sm:$0xff] }
 0x734   :  { %14005 = vmatprep.mubr.msk.bf16.mxu1 %vm15077_vm12, %v17314_v1  ;;  %14041 = vmatprep.mubr.msk.bf16.mxu0 %vm15077_vm12, %v17314_v1  ;;  %v5234_v26 = vpack.c.bf16 %v5226_v17, %v5225_v45  ;;  %v5229_v45 = vld [vmem:[#allocation4 + $0x23] sm:$0xff]  ;;  %v5230_v17 = vld [vmem:[#allocation4 + $0x2b] sm:$0xff] }
 0x735   :  { %14059 = vmatprep.subr.bf16.mxu1 %v17314_v1  ;;  %14094 = vmatpush3.bf16.msra.mxu0 %v14587_v39  ;;  %v14593_v39 = vld [vmem:[#allocation7 + $0x138] sm:$0xff]  }
 0x736   :  { %14095 = vmatprep.subr.bf16.mxu0 %v17314_v1 }
 0x737   :  { %14060 = vmatpush3.bf16.msra.mxu1 %v14586_v9  ;;  %v5385_v9 = vld [vmem:[#allocation4 + $0x7] sm:$0xff] }
 0x738   :  { %14061 = vmatprep.subr.bf16.mxu1 %v17314_v1  ;;  %v5394_v4 = vpack.c.bf16 %v17478_v44, %v5385_v9  ;;  %v14600_v9 = vld [vmem:[#allocation7 + $0x118] sm:$0xff]  }
 0x739   :  { %14096 = vmatpush3.bf16.msra.mxu0 %v14588_v24  ;;  %v14595_v24 = vld [vmem:[#allocation7 + $0x178] sm:$0xff]  }
 0x73a   :  { %14006 = vmatmul.mubr.bf16.gmra.mxu1 %v4966_v31  ;;  %14097 = vmatprep.subr.bf16.mxu0 %v17314_v1  ;;  %v5227_v31 = vld [vmem:[#allocation4 + $0x13] sm:$0xff] }
 0x73b   :  { %14042 = vmatmul.mubr.bf16.gmra.mxu0 %v4936_v7  ;;  %14062 = vmatpush3.bf16.msra.mxu1 %v14589_v54  ;;  %v14594_v54 = vld [vmem:[#allocation7 + $0x130] sm:$0xff]   ;;  %v5228_v7 = vld [vmem:[#allocation4 + $0x1b] sm:$0xff] }
 0x73c   :  { %14009 = vmatprep.mubr.msk.bf16.mxu1 %vm15077_vm12, %v17314_v1  ;;  %14045 = vmatprep.mubr.msk.bf16.mxu0 %vm15077_vm12, %v17314_v1  ;;  %v5235_v13 = vpack.c.bf16 %v5228_v7, %v5227_v31  ;;  %v5231_v31 = vld [vmem:[#allocation4 + $0x33] sm:$0xff]  ;;  %v5232_v7 = vld [vmem:[#allocation4 + $0x3b] sm:$0xff] }
 0x73d   :  { %14063 = vmatprep.subr.bf16.mxu1 %v17314_v1  ;;  %14098 = vmatpush3.bf16.msra.mxu0 %v14590_v30  ;;  %v14597_v30 = vld [vmem:[#allocation7 + $0x170] sm:$0xff]  }
 0x73e   :  { %14099 = vmatprep.subr.bf16.mxu0 %v17314_v1  ;;  %v6193_v44 = vld [vmem:[#allocation4 + $0x4f] sm:$0xff] }
 0x73f   :  { %14064 = vmatpush3.bf16.msra.mxu1 %v14591_v59  ;;  %v14596_v59 = vld [vmem:[#allocation7 + $0x128] sm:$0xff]  }
 0x740   :  { %14121 = vmatprep.subr.bf16.mxu1 %v17314_v1 }
 0x741   :  { %14100 = vmatpush3.bf16.msra.mxu0 %v14592_v28  ;;  %v5395_v28 = vpack.c.bf16 %v17485_v11, %v17483_v55  ;;  %v6198_v55 = vpack.c.bf16 %v6193_v44, %v6193_v44 }
 0x742   :  { %14010 = vmatmul.mubr.bf16.gmra.mxu1 %v4967_v14  ;;  %14157 = vmatprep.subr.bf16.mxu0 %v17314_v1  ;;  %v14599_v14 = vld [vmem:[#allocation7 + $0x168] sm:$0xff]  }
 0x743   :  { %14046 = vmatmul.mubr.bf16.gmra.mxu0 %v4937_v43  ;;  %14065 = vmatprep.mubr.msk.bf16.mxu1 %vm15077_vm12, %v17314_v1  ;;  %v14598_v43 = vld [vmem:[#allocation7 + $0x120] sm:$0xff]  }
 0x744   :  { %14101 = vmatprep.mubr.msk.bf16.mxu0 %vm15077_vm12, %v17314_v1 }
 0x74a   :  { %14066 = vmatmul.mubr.bf16.vlgmr.msra.gmra.mxu1 %v5234_v26  ;;  %v5236_v26 = vpack.c.bf16 %v5230_v17, %v5229_v45  ;;  %v5233_v45 = vld [vmem:[#allocation4 + $0x43] sm:$0xff]  ;;  %v14608_v17 = vld [vmem:[#allocation7 + $0x140] sm:$0xff]  }
 0x74b   :  { %14102 = vmatmul.mubr.bf16.vlgmr.msra.gmra.mxu0 %v5394_v4  ;;  %14122 = vmatpush3.bf16.msra.mxu1 %v14593_v39  ;;  %v14601_v39 = vld [vmem:[#allocation7 + $0x160] sm:$0xff]   ;;  %v5396_v4 = vpack.c.bf16 %v17489_v53, %v17487_v21 }
 0x74c   :  { %14069 = vmatprep.mubr.msk.bf16.mxu1 %vm15077_vm12, %v17314_v1  ;;  %14123 = vmatprep.subr.bf16.mxu1 %v17314_v1 }
 0x74d   :  { %14105 = vmatprep.mubr.msk.bf16.mxu0 %vm15077_vm12, %v17314_v1  ;;  %14158 = vmatpush3.bf16.msra.mxu0 %v14595_v24  ;;  %v14602_v24 = vld [vmem:[#allocation7 + $0x110] sm:$0xff]  }
 0x74e   :  { %14159 = vmatprep.subr.bf16.mxu0 %v17314_v1 }
 0x74f   :  { %14124 = vmatpush3.bf16.msra.mxu1 %v14594_v54  ;;  %v14603_v54 = vld [vmem:[#allocation7 + $0x158] sm:$0xff]  }
 0x750   :  { %14125 = vmatprep.subr.bf16.mxu1 %v17314_v1 }
 0x751   :  { %14160 = vmatpush3.bf16.msra.mxu0 %v14597_v30  ;;  %v14604_v30 = vld [vmem:[#allocation7 + $0x150] sm:$0xff]  }
 0x752   :  { %14070 = vmatmul.mubr.bf16.gmra.mxu1 %v5235_v13  ;;  %14161 = vmatprep.subr.bf16.mxu0 %v17314_v1  ;;  %v5237_v13 = vpack.c.bf16 %v5232_v7, %v5231_v31  ;;  %v6027_v31 = vld [vmem:[#allocation4 + $0x1e] sm:$0xff]  ;;  %v6028_v7 = vld [vmem:[#allocation4 + $0x26] sm:$0xff] }
 0x753   :  { %14106 = vmatmul.mubr.bf16.gmra.mxu0 %v5395_v28  ;;  %14126 = vmatpush3.bf16.msra.mxu1 %v14596_v59  ;;  %v14605_v59 = vld [vmem:[#allocation7 + $0x108] sm:$0xff]   ;;  %v5397_v28 = vpack.c.bf16 %v17500_v16, %v17496_v22 }
 0x754   :  { %14073 = vmatprep.mubr.msk.bf16.mxu1 %vm15077_vm12, %v17314_v1  ;;  %14127 = vmatprep.subr.bf16.mxu1 %v17314_v1 }
 0x755   :  { %14109 = vmatprep.mubr.msk.bf16.mxu0 %vm15077_vm12, %v17314_v1  ;;  %14162 = vmatpush3.bf16.msra.mxu0 %v14599_v14  ;;  %v14606_v14 = vld [vmem:[#allocation7 + $0x148] sm:$0xff]  }
 0x756   :  { %14163 = vmatprep.subr.bf16.mxu0 %v17314_v1 }
 0x757   :  { %14128 = vmatpush3.bf16.msra.mxu1 %v14598_v43  ;;  %v14607_v43 = vld [vmem:[#allocation7 + $0x100] sm:$0xff]  }
 0x758   :  { %14129 = vmatprep.subr.bf16.mxu1 %v17314_v1 }
 0x759   :  { %14164 = vmatpush3.bf16.msra.mxu0 %v14601_v39  ;;  %v5398_v39 = vpack.c.bf16 %v17502_v36, %v17502_v36 }
 0x75a   :  { %14074 = vmatmul.mubr.bf16.gmra.mxu1 %v5236_v26  ;;  %14165 = vmatprep.subr.bf16.mxu0 %v17314_v1  ;;  %v14609_v26 = vld [vmem:[#allocation7 + $0x1b8] sm:$0xff]  }
 0x75b   :  { %14110 = vmatmul.mubr.bf16.gmra.mxu0 %v5396_v4  ;;  %14130 = vmatpush3.bf16.msra.mxu1 %v14600_v9  ;;  %v5238_v9 = vpack.c.bf16 %v5233_v45, %v5233_v45  ;;  %v14611_v4 = vld [vmem:[#allocation7 + $0x1f8] sm:$0xff]  }
 0x75c   :  { %14077 = vmatprep.mubr.msk.bf16.mxu1 %vm15077_vm12, %v17314_v1  ;;  %14113 = vmatprep.mubr.msk.bf16.mxu0 %vm15077_vm12, %v17314_v1  ;;  %v6029_v45 = vld [vmem:[#allocation4 + $0x2e] sm:$0xff] }
 0x75d   :  { %14131 = vmatprep.subr.bf16.mxu1 %v17314_v1  ;;  %14166 = vmatpush3.bf16.msra.mxu0 %v14603_v54  ;;  %v14613_v54 = vld [vmem:[#allocation7 + $0x1f0] sm:$0xff]  }
 0x75e   :  { %14167 = vmatprep.subr.bf16.mxu0 %v17314_v1 }
 0x75f   :  { %14132 = vmatpush3.bf16.msra.mxu1 %v14602_v24  ;;  %v14610_v24 = vld [vmem:[#allocation7 + $0x1b0] sm:$0xff]  }
 0x760   :  { %14133 = vmatprep.subr.bf16.mxu1 %v17314_v1 }
 0x761   :  { %14168 = vmatpush3.bf16.msra.mxu0 %v14604_v30  ;;  %v14627_v30 = vld [vmem:[#allocation7 + $0x228] sm:$0xff]  }
 0x762   :  { %14078 = vmatmul.mubr.bf16.gmra.mxu1 %v5237_v13  ;;  %14169 = vmatprep.subr.bf16.mxu0 %v17314_v1  ;;  %v6035_v13 = vpack.c.bf16 %v6028_v7, %v6027_v31 }
 0x763   :  { %14114 = vmatmul.mubr.bf16.gmra.mxu0 %v5397_v28  ;;  %14134 = vmatpush3.bf16.msra.mxu1 %v14605_v59  ;;  %v14628_v28 = vld [vmem:[#allocation7 + $0x220] sm:$0xff]  }
 0x764   :  { %14081 = vmatprep.mubr.msk.bf16.mxu1 %vm15077_vm12, %v17314_v1  ;;  %14117 = vmatprep.mubr.msk.bf16.mxu0 %vm15077_vm12, %v17314_v1 }
 0x765   :  { %14135 = vmatprep.subr.bf16.mxu1 %v17314_v1  ;;  %14170 = vmatpush3.bf16.msra.mxu0 %v14606_v14  ;;  %v5869_v14 = vld [vmem:[#allocation4 + $0x2d] sm:$0xff] }
 0x766   :  { %14171 = vmatprep.subr.bf16.mxu0 %v17314_v1 }
 0x767   :  { %14136 = vmatpush3.bf16.msra.mxu1 %v14607_v43  ;;  %v5870_v43 = vld [vmem:[#allocation4 + $0x35] sm:$0xff] }
 0x768   :  { %14193 = vmatprep.subr.bf16.mxu1 %v17314_v1 }
 0x769   :  { %14172 = vmatpush3.bf16.msra.mxu0 %v14608_v17  ;;  %v6030_v17 = vld [vmem:[#allocation4 + $0x36] sm:$0xff] }
 0x76a   :  { %14082 = vmatmul.mubr.bf16.gmra.mxu1 %v5238_v9  ;;  %14229 = vmatprep.subr.bf16.mxu0 %v17314_v1  ;;  %v14629_v9 = vld [vmem:[#allocation7 + $0x218] sm:$0xff]  }
 0x76b   :  { %14118 = vmatmul.mubr.bf16.gmra.mxu0 %v5398_v39  ;;  %14137 = vmatprep.mubr.msk.bf16.mxu1 %vm15077_vm12, %v17314_v1  ;;  %v5876_v39 = vpack.c.bf16 %v5870_v43, %v5869_v14 }
 0x76c   :  { %14173 = vmatprep.mubr.msk.bf16.mxu0 %vm15077_vm12, %v17314_v1 }
 0x772   :  { %14138 = vmatmul.mubr.bf16.vlgmr.msra.gmra.mxu1 %v5554_v15  ;;  %v14614_v15 = vld [vmem:[#allocation7 + $0x1a0] sm:$0xff]  }
 0x773   :  { %14174 = vmatmul.mubr.bf16.vlgmr.msra.gmra.mxu0 %v5714_v19  ;;  %14194 = vmatpush3.bf16.msra.mxu1 %v14609_v26  ;;  %v5866_v19 = vld [vmem:[#allocation4 + $0x15] sm:$0xff]  ;;  %v6036_v26 = vpack.c.bf16 %v6030_v17, %v6029_v45 }
 0x774   :  { %14141 = vmatprep.mubr.msk.bf16.mxu1 %vm15077_vm12, %v17314_v1  ;;  %14195 = vmatprep.subr.bf16.mxu1 %v17314_v1  ;;  %v5874_v61 = vpack.c.bf16 %v5866_v19, %v5865_v6 }
 0x775   :  { %14177 = vmatprep.mubr.msk.bf16.mxu0 %vm15077_vm12, %v17314_v1  ;;  %14230 = vmatpush3.bf16.msra.mxu0 %v14611_v4  ;;  %v14630_v4 = vld [vmem:[#allocation7 + $0x210] sm:$0xff]  }
 0x776   :  { %14231 = vmatprep.subr.bf16.mxu0 %v17314_v1 }
 0x777   :  { %14196 = vmatpush3.bf16.msra.mxu1 %v14610_v24  ;;  %v5871_v24 = vld [vmem:[#allocation4 + $0x3d] sm:$0xff] }
 0x778   :  { %14197 = vmatprep.subr.bf16.mxu1 %v17314_v1 }
 0x779   :  { %14232 = vmatpush3.bf16.msra.mxu0 %v14613_v54  ;;  %v5872_v54 = vld [vmem:[#allocation4 + $0x45] sm:$0xff] }
 0x77a   :  { %14142 = vmatmul.mubr.bf16.gmra.mxu1 %v5555_v37  ;;  %14233 = vmatprep.subr.bf16.mxu0 %v17314_v1  ;;  %v14618_v37 = vld [vmem:[#allocation7 + $0x190] sm:$0xff]  }
 0x77b   :  { %14178 = vmatmul.mubr.bf16.gmra.mxu0 %v5715_v23  ;;  %14198 = vmatpush3.bf16.msra.mxu1 %v14612_v35  ;;  %v6026_v23 = vld [vmem:[#allocation4 + $0x16] sm:$0xff]  ;;  %v6031_v35 = vld [vmem:[#allocation4 + $0x3e] sm:$0xff] }
 0x77c   :  { %14145 = vmatprep.mubr.msk.bf16.mxu1 %vm15077_vm12, %v17314_v1  ;;  %14199 = vmatprep.subr.bf16.mxu1 %v17314_v1  ;;  %v6034_v20 = vpack.c.bf16 %v6026_v23, %v6025_v25 }
 0x77d   :  { %14181 = vmatprep.mubr.msk.bf16.mxu0 %vm15077_vm12, %v17314_v1  ;;  %14234 = vmatpush3.bf16.msra.mxu0 %v14615_v51  ;;  %v6032_v51 = vld [vmem:[#allocation4 + $0x46] sm:$0xff] }
 0x77e   :  { %14235 = vmatprep.subr.bf16.mxu0 %v17314_v1 }
 0x77f   :  { %14200 = vmatpush3.bf16.msra.mxu1 %v14614_v15  ;;  %v14631_v15 = vld [vmem:[#allocation7 + $0x208] sm:$0xff]  }
 0x780   :  { %14201 = vmatprep.subr.bf16.mxu1 %v17314_v1 }
 0x781   :  { %14236 = vmatpush3.bf16.msra.mxu0 %v14617_v60  ;;  %v6037_v60 = vpack.c.bf16 %v6032_v51, %v6031_v35 }
 0x782   :  { %14146 = vmatmul.mubr.bf16.gmra.mxu1 %v5556_v63  ;;  %14237 = vmatprep.subr.bf16.mxu0 %v17314_v1  ;;  %v14622_v63 = vld [vmem:[#allocation7 + $0x1c8] sm:$0xff]  }
 0x783   :  { %14182 = vmatmul.mubr.bf16.gmra.mxu0 %v5716_v57  ;;  %14202 = vmatpush3.bf16.msra.mxu1 %v14616_v49  ;;  %v17649_v57 = vld [vmem:[#allocation2 + $0x8] sm:$0xff]  ;;  %v5877_v49 = vpack.c.bf16 %v5872_v54, %v5871_v24 }
 0x784   :  { %14149 = vmatprep.mubr.msk.bf16.mxu1 %vm15077_vm12, %v17314_v1  ;;  %14185 = vmatprep.mubr.msk.bf16.mxu0 %vm15077_vm12, %v17314_v1 }
 0x785   :  { %14203 = vmatprep.subr.bf16.mxu1 %v17314_v1  ;;  %14238 = vmatpush3.bf16.msra.mxu0 %v14619_v38  ;;  %v5873_v38 = vld [vmem:[#allocation4 + $0x4d] sm:$0xff] }
 0x786   :  { %14239 = vmatprep.subr.bf16.mxu0 %v17314_v1 }
 0x787   :  { %14204 = vmatpush3.bf16.msra.mxu1 %v14618_v37  ;;  %v14632_v37 = vld [vmem:[#allocation7 + $0x200] sm:$0xff]  }
 0x788   :  { %14205 = vmatprep.subr.bf16.mxu1 %v17314_v1 }
 0x789   :  { %14240 = vmatpush3.bf16.msra.mxu0 %v14620_v33  ;;  %v6033_v33 = vld [vmem:[#allocation4 + $0x4e] sm:$0xff] }
 0x78a   :  { %14150 = vmatmul.mubr.bf16.gmra.mxu1 %v5557_v18  ;;  %14241 = vmatprep.subr.bf16.mxu0 %v17314_v1  ;;  %v5718_v18 = vpack.c.bf16 %v5713_v0, %v5713_v0 }
 0x78b   :  { %14186 = vmatmul.mubr.bf16.gmra.mxu0 %v5717_v2  ;;  %14206 = vmatpush3.bf16.msra.mxu1 %v14621_v46  ;;  %v5868_v2 = vld [vmem:[#allocation4 + $0x25] sm:$0xff]  ;;  %v5878_v46 = vpack.c.bf16 %v5873_v38, %v5873_v38 }
 0x78c   :  { %14153 = vmatprep.mubr.msk.bf16.mxu1 %vm15077_vm12, %v17314_v1  ;;  %14189 = vmatprep.mubr.msk.bf16.mxu0 %vm15077_vm12, %v17314_v1 }
 0x78d   :  { %14207 = vmatprep.subr.bf16.mxu1 %v17314_v1  ;;  %14242 = vmatpush3.bf16.msra.mxu0 %v14622_v63  ;;  %v6038_v63 = vpack.c.bf16 %v6033_v33, %v6033_v33 }
 0x78e   :  { %14243 = vmatprep.subr.bf16.mxu0 %v17314_v1 }
 0x78f   :  { %14208 = vmatpush3.bf16.msra.mxu1 %v14623_v10  ;;  %v20255_v10 = vmov 0  }
 0x790   :  { %14265 = vmatprep.subr.bf16.mxu1 %v17314_v1 }
 0x791   :  { %14244 = vmatpush3.bf16.msra.mxu0 %v14624_v48 }
 0x792   :  { %14154 = vmatmul.mubr.bf16.gmra.mxu1 %v5558_v52 }
 0x793   :  { %14190 = vmatmul.mubr.bf16.gmra.mxu0 %v5718_v18  ;;  %14209 = vmatprep.mubr.msk.bf16.mxu1 %vm15077_vm12, %v17314_v1 }
 0x794   :  { %14245 = vmatprep.mubr.msk.bf16.mxu0 %vm15077_vm12, %v17314_v1  ;;  %v5867_v1 = vld [vmem:[#allocation4 + $0x1d] sm:$0xff] }
 0x795   :  { %v5875_v59 = vpack.c.bf16 %v5868_v2, %v5867_v1 }
 0x79a   :  { %14210 = vmatmul.mubr.bf16.vlgmr.msra.gmra.mxu1 %v5874_v61 }
 0x79b   :  { %14246 = vmatmul.mubr.bf16.vlgmr.msra.gmra.mxu0 %v6034_v20  ;;  %14266 = vmatpush3.bf16.msra.mxu1 %v14625_v5 }
 0x79c   :  { %14213 = vmatprep.mubr.msk.bf16.mxu1 %vm15077_vm12, %v17649_v57  ;;  %14267 = vmatprep.subr.bf16.mxu1 %v17649_v57 }
 0x79d   :  { %14249 = vmatprep.mubr.msk.bf16.mxu0 %vm15077_vm12, %v17649_v57 }
 0x79f   :  { %14268 = vmatpush3.bf16.msra.mxu1 %v14626_v42 }
 0x7a0   :  { %14269 = vmatprep.subr.bf16.mxu1 %v17649_v57 }
 0x7a2   :  { %14214 = vmatmul.mubr.bf16.gmra.mxu1 %v5875_v59 }
 0x7a3   :  { %14250 = vmatmul.mubr.bf16.gmra.mxu0 %v6035_v13  ;;  %14270 = vmatpush3.bf16.msra.mxu1 %v14627_v30 }
 0x7a4   :  { %14217 = vmatprep.mubr.msk.bf16.mxu1 %vm15077_vm12, %v17649_v57  ;;  %14271 = vmatprep.subr.bf16.mxu1 %v17649_v57 }
 0x7a5   :  { %14253 = vmatprep.mubr.msk.bf16.mxu0 %vm15077_vm12, %v17649_v57 }
 0x7a7   :  { %14272 = vmatpush3.bf16.msra.mxu1 %v14628_v28 }
 0x7a8   :  { %14273 = vmatprep.subr.bf16.mxu1 %v17649_v57 }
 0x7aa   :  { %14218 = vmatmul.mubr.bf16.gmra.mxu1 %v5876_v39 }
 0x7ab   :  { %14254 = vmatmul.mubr.bf16.gmra.mxu0 %v6036_v26  ;;  %14274 = vmatpush3.bf16.msra.mxu1 %v14629_v9 }
 0x7ac   :  { %14221 = vmatprep.mubr.msk.bf16.mxu1 %vm15077_vm12, %v17649_v57  ;;  %14257 = vmatprep.mubr.msk.bf16.mxu0 %vm15077_vm12, %v17649_v57 }
 0x7ad   :  { %14275 = vmatprep.subr.bf16.mxu1 %v17649_v57 }
 0x7af   :  { %14276 = vmatpush3.bf16.msra.mxu1 %v14630_v4 }
 0x7b0   :  { %14277 = vmatprep.subr.bf16.mxu1 %v17649_v57 }
 0x7b2   :  { %14222 = vmatmul.mubr.bf16.gmra.mxu1 %v5877_v49 }
 0x7b3   :  { %14258 = vmatmul.mubr.bf16.gmra.mxu0 %v6037_v60  ;;  %14278 = vmatpush3.bf16.msra.mxu1 %v14631_v15 }
 0x7b4   :  { %14225 = vmatprep.mubr.msk.bf16.mxu1 %vm15077_vm12, %v17649_v57  ;;  %14261 = vmatprep.mubr.msk.bf16.mxu0 %vm15077_vm12, %v17649_v57 }
 0x7b5   :  { %14279 = vmatprep.subr.bf16.mxu1 %v17649_v57 }
 0x7b7   :  { %14280 = vmatpush3.bf16.msra.mxu1 %v14632_v37 }
 0x7ba   :  { %14226 = vmatmul.mubr.bf16.gmra.mxu1 %v5878_v46 }
 0x7bb   :  { %14262 = vmatmul.mubr.bf16.gmra.mxu0 %v6038_v63  ;;  %14281 = vmatprep.mubr.msk.bf16.mxu1 %vm15077_vm12, %v17649_v57 }
 0x7bc   :  { %6662 = vmatprep.mubr.bf16.mxu0 %v20255_v10 }
 0x7c2   :  { %14282 = vmatmul.mubr.bf16.vlgmr.msra.gmra.mxu1 %v6194_v58 }
 0x7c3   :  { %14285 = vmatprep.mubr.msk.bf16.mxu1 %vm15077_vm12, %v17649_v57 }
 0x7ca   :  { %14286 = vmatmul.mubr.bf16.gmra.mxu1 %v6195_v62 }
 0x7cb   :  { %14289 = vmatprep.mubr.msk.bf16.mxu1 %vm15077_vm12, %v17649_v57 }
 0x7d2   :  { %14290 = vmatmul.mubr.bf16.gmra.mxu1 %v6196_v8 }
 0x7d3   :  { %14293 = vmatprep.mubr.msk.bf16.mxu1 %vm15077_vm12, %v17649_v57 }
 0x7da   :  { %14294 = vmatmul.mubr.bf16.gmra.mxu1 %v6197_v40 }
 0x7db   :  { %14297 = vmatprep.mubr.msk.bf16.mxu1 %vm15077_vm12, %v17649_v57 }
 0x7e2   :  { %v5067_v11 = vpop.f32.mrf.mxu1  ;;  %14298 = vmatmul.mubr.bf16.gmra.mxu1 %v6198_v55 }
 0x7e3   :  { %v5187_v21 = vpop.f32.mrf.mxu0  ;;  %6823 = vmatprep.mubr.bf16.mxu1 %v20255_v10 }
 0x7e4   :  { %v5188_v58 = vadd.f32 %v5187_v21, %v5067_v11  ;;  %v13995_v53 = vpop.f32.mrf.mxu1 }
 0x7e5   :  { %v14031_v22 = vpop.f32.mrf.mxu0 }
 0x7e6   :  { %v5070_v62 = vpop.f32.mrf.mxu1 }
 0x7e7   :  { %v5190_v8 = vpop.f32.mrf.mxu0 }
 0x7e8   :  { %v5191_v0 = vadd.f32 %v5190_v8, %v5070_v62  ;;  %v13996_v48 = vpop.f32.mrf.mxu1 }
 0x7e9   :  { %v14032_v52 = vpop.f32.mrf.mxu0 }
 0x7ea   :  { %v5075_v16 = vpop.f32.mrf.mxu1 }
 0x7eb   :  { %v5195_v36 = vpop.f32.mrf.mxu0 }
 0x7ec   :  { %v5196_v40 = vadd.f32 %v5195_v36, %v5075_v16  ;;  %v13999_v18 = vpop.f32.mrf.mxu1 }
 0x7ed   :  { %v14035_v6 = vpop.f32.mrf.mxu0 }
 0x7ee   :  { %v5078_v19 = vpop.f32.mrf.mxu1 }
 0x7ef   :  { %v5198_v25 = vpop.f32.mrf.mxu0 }
 0x7f0   :  { %v5199_v23 = vadd.f32 %v5198_v25, %v5078_v19  ;;  %v14000_v5 = vpop.f32.mrf.mxu1 }
 0x7f1   :  { %v14036_v61 = vpop.f32.mrf.mxu0 }
 0x7f2   :  { %v5083_v20 = vpop.f32.mrf.mxu1 }
 0x7f3   :  { %v5203_v42 = vpop.f32.mrf.mxu0 }
 0x7f4   :  { %v5204_v57 = vadd.f32 %v5203_v42, %v5083_v20  ;;  %v14003_v1 = vpop.f32.mrf.mxu1 }
 0x7f5   :  { %v14039_v2 = vpop.f32.mrf.mxu0 }
 0x7f6   :  { %v5086_v31 = vpop.f32.mrf.mxu1 }
 0x7f7   :  { %v5206_v7 = vpop.f32.mrf.mxu0 }
 0x7f8   :  { %v5207_v30 = vadd.f32 %v5206_v7, %v5086_v31  ;;  %v14004_v59 = vpop.f32.mrf.mxu1 }
 0x7f9   :  { %v14040_v13 = vpop.f32.mrf.mxu0 }
 0x7fa   :  { %v5091_v28 = vpop.f32.mrf.mxu1 }
 0x7fb   :  { %v5211_v14 = vpop.f32.mrf.mxu0 }
 0x7fc   :  { %v5212_v43 = vadd.f32 %v5211_v14, %v5091_v28  ;;  %v14007_v45 = vpop.f32.mrf.mxu1 }
 0x7fd   :  { %v14043_v17 = vpop.f32.mrf.mxu0 }
 0x7fe   :  { %v5094_v9 = vpop.f32.mrf.mxu1 }
 0x7ff   :  { %v5214_v39 = vpop.f32.mrf.mxu0 }
 0x800   :  { %v5215_v26 = vadd.f32 %v5214_v39, %v5094_v9  ;;  %v14008_v4 = vpop.f32.mrf.mxu1 }
 0x801   :  { %v14044_v24 = vpop.f32.mrf.mxu0 }
 0x802   :  { %v5099_v54 = vpop.f32.mrf.mxu1 }
 0x803   :  { %v5219_v35 = vpop.f32.mrf.mxu0 }
 0x804   :  { %v5220_v51 = vadd.f32 %v5219_v35, %v5099_v54  ;;  %v14011_v15 = vpop.f32.mrf.mxu1 }
 0x805   :  { %v14047_v49 = vpop.f32.mrf.mxu0 }
 0x806   :  { %v5102_v60 = vpop.f32.mrf.mxu1 }
 0x807   :  { %v5222_v37 = vpop.f32.mrf.mxu0 }
 0x808   :  { %v14012_v38 = vpop.f32.mrf.mxu1 }
 0x809   :  { %v14048_v33 = vpop.f32.mrf.mxu0 }
 0x80a   :  { %v5338_v46 = vpop.f32.mrf.mxu1 }
 0x80b   :  { %v5498_v63 = vpop.f32.mrf.mxu0  ;;  %v5376_v44 = vadd.f32 %v5338_v46, %v5188_v58 }
 0x80c   :  { %v14067_v55 = vpop.f32.mrf.mxu1 }
 0x80d   :  { %v14103_v11 = vpop.f32.mrf.mxu0  ;;  %v5536_v21 = vadd.f32 %v5498_v63, %v5376_v44 }
 0x80e   :  { %v5341_v53 = vpop.f32.mrf.mxu1 }
 0x80f   :  { %v5501_v22 = vpop.f32.mrf.mxu0  ;;  %v5377_v62 = vadd.f32 %v5341_v53, %v5191_v0 }
 0x810   :  { %v14068_v8 = vpop.f32.mrf.mxu1 }
 0x811   :  { %v14104_v48 = vpop.f32.mrf.mxu0  ;;  %v5537_v52 = vadd.f32 %v5501_v22, %v5377_v62 }
 0x812   :  { %v5346_v16 = vpop.f32.mrf.mxu1 }
 0x813   :  { %v5506_v36 = vpop.f32.mrf.mxu0  ;;  %v5378_v18 = vadd.f32 %v5346_v16, %v5196_v40 }
 0x814   :  { %v14071_v6 = vpop.f32.mrf.mxu1 }
 0x815   :  { %v14107_v19 = vpop.f32.mrf.mxu0  ;;  %v5538_v25 = vadd.f32 %v5506_v36, %v5378_v18 }
 0x816   :  { %v5349_v5 = vpop.f32.mrf.mxu1 }
 0x817   :  { %v5509_v61 = vpop.f32.mrf.mxu0  ;;  %v5379_v20 = vadd.f32 %v5349_v5, %v5199_v23 }
 0x818   :  { %v14072_v42 = vpop.f32.mrf.mxu1 }
 0x819   :  { %v14108_v58 = vpop.f32.mrf.mxu0  ;;  %v5539_v1 = vadd.f32 %v5509_v61, %v5379_v20 }
 0x81a   :  { %v5354_v2 = vpop.f32.mrf.mxu1 }
 0x81b   :  { %v5514_v31 = vpop.f32.mrf.mxu0  ;;  %v5380_v7 = vadd.f32 %v5354_v2, %v5204_v57 }
 0x81c   :  { %v14075_v59 = vpop.f32.mrf.mxu1 }
 0x81d   :  { %v14111_v0 = vpop.f32.mrf.mxu0  ;;  %v5540_v13 = vadd.f32 %v5514_v31, %v5380_v7 }
 0x81e   :  { %v5357_v28 = vpop.f32.mrf.mxu1 }
 0x81f   :  { %v5517_v14 = vpop.f32.mrf.mxu0  ;;  %v5381_v45 = vadd.f32 %v5357_v28, %v5207_v30 }
 0x820   :  { %v14076_v17 = vpop.f32.mrf.mxu1 }
 0x821   :  { %v14112_v40 = vpop.f32.mrf.mxu0  ;;  %v5541_v9 = vadd.f32 %v5517_v14, %v5381_v45 }
 0x822   :  { %v5362_v39 = vpop.f32.mrf.mxu1 }
 0x823   :  { %v5522_v4 = vpop.f32.mrf.mxu0  ;;  %v5382_v24 = vadd.f32 %v5362_v39, %v5212_v43 }
 0x824   :  { %v14079_v54 = vpop.f32.mrf.mxu1 }
 0x825   :  { %v14115_v23 = vpop.f32.mrf.mxu0  ;;  %v5542_v35 = vadd.f32 %v5522_v4, %v5382_v24 }
 0x826   :  { %v5365_v15 = vpop.f32.mrf.mxu1 }
 0x827   :  { %v5525_v49 = vpop.f32.mrf.mxu0  ;;  %v5383_v60 = vadd.f32 %v5365_v15, %v5215_v26 }
 0x828   :  { %v14080_v37 = vpop.f32.mrf.mxu1 }
 0x829   :  { %v14116_v57 = vpop.f32.mrf.mxu0  ;;  %v5543_v38 = vadd.f32 %v5525_v49, %v5383_v60 }
 0x82a   :  { %v5370_v33 = vpop.f32.mrf.mxu1 }
 0x82b   :  { %v5530_v46 = vpop.f32.mrf.mxu0  ;;  %v5384_v63 = vadd.f32 %v5370_v33, %v5220_v51 }
 0x82c   :  { %v14083_v44 = vpop.f32.mrf.mxu1 }
 0x82d   :  { %v14119_v30 = vpop.f32.mrf.mxu0  ;;  %v5544_v55 = vadd.f32 %v5530_v46, %v5384_v63 }
 0x82e   :  { %v5373_v11 = vpop.f32.mrf.mxu1 }
 0x82f   :  { %v5533_v53 = vpop.f32.mrf.mxu0 }
 0x830   :  { %v14084_v22 = vpop.f32.mrf.mxu1 }
 0x831   :  { %v14120_v62 = vpop.f32.mrf.mxu0 }
 0x832   :  { %v5658_v43 = vpop.f32.mrf.mxu1 }
 0x833   :  { %v5818_v8 = vpop.f32.mrf.mxu0  ;;  %v5696_v48 = vadd.f32 %v5658_v43, %v5536_v21 }
 0x834   :  { %v14139_v16 = vpop.f32.mrf.mxu1 }
 0x835   :  { %v14175_v36 = vpop.f32.mrf.mxu0  ;;  %v17698_v18 = vadd.f32 %v5818_v8, %v5696_v48 }
 0x836   :  { %v5661_v26 = vpop.f32.mrf.mxu1 }
 0x837   :  { %v5821_v6 = vpop.f32.mrf.mxu0  ;;  %v5697_v19 = vadd.f32 %v5661_v26, %v5537_v52 }
 0x838   :  { %v14140_v5 = vpop.f32.mrf.mxu1 }
 0x839   :  { %v14176_v61 = vpop.f32.mrf.mxu0  ;;  %v17700_v51 = vadd.f32 %v5821_v6, %v5697_v19 }
 0x83a   :  { %v5666_v20 = vpop.f32.mrf.mxu1 }
 0x83b   :  { %v5826_v42 = vpop.f32.mrf.mxu0  ;;  %v5698_v58 = vadd.f32 %v5666_v20, %v5538_v25 }
 0x83c   :  { %v14143_v2 = vpop.f32.mrf.mxu1 }
 0x83d   :  { %v14179_v31 = vpop.f32.mrf.mxu0  ;;  %v17702_v7 = vadd.f32 %v5826_v42, %v5698_v58 }
 0x83e   :  { %v5669_v59 = vpop.f32.mrf.mxu1 }
 0x83f   :  { %v5829_v21 = vpop.f32.mrf.mxu0  ;;  %v5699_v0 = vadd.f32 %v5669_v59, %v5539_v1 }
 0x840   :  { %v14144_v28 = vpop.f32.mrf.mxu1 }
 0x841   :  { %v14180_v14 = vpop.f32.mrf.mxu0  ;;  %v17704_v45 = vadd.f32 %v5829_v21, %v5699_v0 }
 0x842   :  { %v5674_v17 = vpop.f32.mrf.mxu1 }
 0x843   :  { %v5834_v52 = vpop.f32.mrf.mxu0  ;;  %v5700_v40 = vadd.f32 %v5674_v17, %v5540_v13 }
 0x844   :  { %v14147_v39 = vpop.f32.mrf.mxu1 }
 0x845   :  { %v14183_v4 = vpop.f32.mrf.mxu0  ;;  %v17706_v24 = vadd.f32 %v5834_v52, %v5700_v40 }
 0x846   :  { %v5677_v54 = vpop.f32.mrf.mxu1 }
 0x847   :  { %v5837_v25 = vpop.f32.mrf.mxu0  ;;  %v5701_v23 = vadd.f32 %v5677_v54, %v5541_v9 }
 0x848   :  { %v14148_v15 = vpop.f32.mrf.mxu1 }
 0x849   :  { %v14184_v49 = vpop.f32.mrf.mxu0  ;;  %v17708_v60 = vadd.f32 %v5837_v25, %v5701_v23 }
 0x84a   :  { %v5682_v37 = vpop.f32.mrf.mxu1 }
 0x84b   :  { %v5842_v1 = vpop.f32.mrf.mxu0  ;;  %v5702_v57 = vadd.f32 %v5682_v37, %v5542_v35 }
 0x84c   :  { %v14151_v33 = vpop.f32.mrf.mxu1 }
 0x84d   :  { %v14187_v46 = vpop.f32.mrf.mxu0  ;;  %v17710_v63 = vadd.f32 %v5842_v1, %v5702_v57 }
 0x84e   :  { %v5685_v44 = vpop.f32.mrf.mxu1 }
 0x84f   :  { %v5845_v13 = vpop.f32.mrf.mxu0  ;;  %v5703_v30 = vadd.f32 %v5685_v44, %v5543_v38 }
 0x850   :  { %v14152_v11 = vpop.f32.mrf.mxu1 }
 0x851   :  { %v14188_v53 = vpop.f32.mrf.mxu0  ;;  %v17712_v22 = vadd.f32 %v5845_v13, %v5703_v30 }
 0x852   :  { %v5690_v62 = vpop.f32.mrf.mxu1  ;;  %v14633_v53 = vld [vmem:[%s20170_s14 + $0xf0] ss:$8 sps:$4 sm:$0xff]  }
 0x853   :  { %v5850_v9 = vpop.f32.mrf.mxu0  ;;  %v5704_v43 = vadd.f32 %v5690_v62, %v5544_v55  ;;  %v14635_v62 = vld [vmem:[%s20170_s14 + $0xf4] ss:$8 sps:$4 sm:$0xff]  }
 0x854   :  { %v14155_v8 = vpop.f32.mrf.mxu1  ;;  %6630 = vmatprep.subr.bf16.mxu0 %v14635_v62 }
 0x855   :  { %v14191_v48 = vpop.f32.mrf.mxu0  ;;  %v17714_v16 = vadd.f32 %v5850_v9, %v5704_v43  ;;  %v14638_v8 = vld [vmem:[%s20170_s14 + $0xe4] ss:$8 sps:$4 sm:$0xff]   ;;  %6631 = vmatpush1.bf16.msra.mxu0 %v14633_v53  ;;  %v14656_v53 = vld [vmem:[%s20170_s14 + $0xb4] ss:$8 sps:$4 sm:$0xff]  }
 0x856   :  { %v5693_v36 = vpop.f32.mrf.mxu1  ;;  %v14639_v48 = vld [vmem:[%s20170_s14 + $0x70] ss:$8 sps:$4 sm:$0xff]   ;;  %6632 = vmatprep.subr.bf16.mxu0 %v14638_v8 }
 0x857   :  { %v5853_v35 = vpop.f32.mrf.mxu0  ;;  %v14641_v36 = vld [vmem:[%s20170_s14 + $0x74] ss:$8 sps:$4 sm:$0xff]  }
 0x858   :  { %v14156_v26 = vpop.f32.mrf.mxu1  ;;  %6791 = vmatprep.subr.bf16.mxu1 %v14641_v36  ;;  %v14654_v36 = vld [vmem:[%s20170_s14 + $0xb0] ss:$8 sps:$4 sm:$0xff]  }
 0x859   :  { %v14192_v6 = vpop.f32.mrf.mxu0  ;;  %6792 = vmatpush1.bf16.msra.mxu1 %v14639_v48 }
 0x85a   :  { %v5978_v19 = vpop.f32.mrf.mxu1  ;;  %v14636_v6 = vld [vmem:[%s20170_s14 + $0xe0] ss:$8 sps:$4 sm:$0xff]  }
 0x85b   :  { %v6138_v5 = vpop.f32.mrf.mxu0  ;;  %6633 = vmatpush1.bf16.msra.mxu0 %v14636_v6  ;;  %v14668_v6 = vld [vmem:[%s20170_s14 + $0x24] ss:$8 sps:$4 sm:$0xff]  }
 0x85c   :  { %v14211_v61 = vpop.f32.mrf.mxu1 }
 0x85d   :  { %v14247_v20 = vpop.f32.mrf.mxu0  ;;  %v14647_v61 = vld [vmem:[%s20170_s14 + $0x64] ss:$8 sps:$4 sm:$0xff]  }
 0x85e   :  { %v5981_v38 = vpop.f32.mrf.mxu1  ;;  %v6016_v20 = vadd.f32 %v5978_v19, %v17698_v18  ;;  %6793 = vmatprep.subr.bf16.mxu1 %v14647_v61  ;;  %v14642_v19 = vld [vmem:[%s20170_s14 + $0xd0] ss:$8 sps:$4 sm:$0xff]  }
 0x85f   :  { %v17716_v42 = vpop.f32.mrf.mxu0 }
 0x860   :  { %v14212_v58 = vpop.f32.mrf.mxu1 }
 0x861   :  { %v14248_v2 = vpop.f32.mrf.mxu0  ;;  %v14644_v58 = vld [vmem:[%s20170_s14 + $0xd4] ss:$8 sps:$4 sm:$0xff]  }
 0x862   :  { %v5986_v31 = vpop.f32.mrf.mxu1  ;;  %v14645_v2 = vld [vmem:[%s20170_s14 + $0x60] ss:$8 sps:$4 sm:$0xff]   ;;  %6634 = vmatprep.subr.bf16.mxu0 %v14644_v58 }
 0x863   :  { %v17718_v59 = vpop.f32.mrf.mxu0  ;;  %6794 = vmatpush1.bf16.msra.mxu1 %v14645_v2  ;;  %6635 = vmatpush1.bf16.msra.mxu0 %v14642_v19 }
 0x864   :  { %v14215_v55 = vpop.f32.mrf.mxu1 }
 0x865   :  { %v14251_v21 = vpop.f32.mrf.mxu0 }
 0x866   :  { %v17720_v0 = vpop.f32.mrf.mxu1 }
 0x867   :  { %v17722_v28 = vpop.f32.mrf.mxu0 }
 0x868   :  { %v14216_v14 = vpop.f32.mrf.mxu1 }
 0x869   :  { %v14252_v17 = vpop.f32.mrf.mxu0  ;;  %v14653_v14 = vld [vmem:[%s20170_s14 + $0x54] ss:$8 sps:$4 sm:$0xff]  }
 0x86a   :  { %v17724_v52 = vpop.f32.mrf.mxu1  ;;  %v6017_v17 = vadd.f32 %v5981_v38, %v17700_v51  ;;  %6795 = vmatprep.subr.bf16.mxu1 %v14653_v14  ;;  %v14659_v51 = vld [vmem:[%s20170_s14 + $0x44] ss:$8 sps:$4 sm:$0xff]  }
 0x86b   :  { %v17726_v40 = vpop.f32.mrf.mxu0 }
 0x86c   :  { %v14219_v39 = vpop.f32.mrf.mxu1  ;;  %v6177_v38 = vadd.f32 %v17716_v42, %v6017_v17  ;;  %v14674_v17 = vld [vmem:[%s20170_s14 + $0x14] ss:$8 sps:$4 sm:$0xff]  }
 0x86d   :  { %v14255_v4 = vpop.f32.mrf.mxu0  ;;  %v6176_v39 = vadd.f32 %v6138_v5, %v6016_v20  ;;  %v6018_v5 = vadd.f32 %v5986_v31, %v17702_v7  ;;  %v14657_v7 = vld [vmem:[%s20170_s14 + $0x40] ss:$8 sps:$4 sm:$0xff]   ;;  %v14665_v31 = vld [vmem:[%s20170_s14 + $0x34] ss:$8 sps:$4 sm:$0xff]   ;;  %v6020_v20 = vadd.f32 %v17724_v52, %v17706_v24 }
 0x86e   :  { %v17728_v54 = vpop.f32.mrf.mxu1  ;;  %v14650_v4 = vld [vmem:[%s20170_s14 + $0xc4] ss:$8 sps:$4 sm:$0xff]   ;;  %v14671_v24 = vld [vmem:[%s20170_s14 + $0x94] ss:$8 sps:$4 sm:$0xff]  }
 0x86f   :  { %v17730_v25 = vpop.f32.mrf.mxu0  ;;  %6636 = vmatprep.subr.bf16.mxu0 %v14650_v4  ;;  %v6178_v62 = vadd.f32 %v17718_v59, %v6018_v5  ;;  %v14663_v59 = vld [vmem:[%s20170_s14 + $0x30] ss:$8 sps:$4 sm:$0xff]   ;;  %v6021_v19 = vadd.f32 %v17728_v54, %v17708_v60  ;;  %v14677_v60 = vld [vmem:[%s20170_s14 + $0x84] ss:$8 sps:$4 sm:$0xff]  }
 0x870   :  { %v14220_v23 = vpop.f32.mrf.mxu1 }
 0x871   :  { %v14256_v15 = vpop.f32.mrf.mxu0  ;;  %v14651_v23 = vld [vmem:[%s20170_s14 + $0x50] ss:$8 sps:$4 sm:$0xff]   ;;  %v6181_v5 = vadd.f32 %v17730_v25, %v6021_v19  ;;  %v14678_v25 = vld [vmem:[%s20170_s14] ss:$8 sps:$4 sm:$0xff]  }
 0x872   :  { %v17732_v49 = vpop.f32.mrf.mxu1  ;;  %6796 = vmatpush1.bf16.msra.mxu1 %v14651_v23  ;;  %v14669_v23 = vld [vmem:[%s20170_s14 + $0x90] ss:$8 sps:$4 sm:$0xff]  }
 0x873   :  { %v17734_v37 = vpop.f32.mrf.mxu0  ;;  %6797 = vmatprep.subr.bf16.mxu1 %v14659_v51 }
 0x874   :  { %v14223_v1 = vpop.f32.mrf.mxu1 }
 0x875   :  { %v14259_v57 = vpop.f32.mrf.mxu0 }
 0x876   :  { %v17736_v33 = vpop.f32.mrf.mxu1  ;;  %6798 = vmatpush1.bf16.msra.mxu1 %v14657_v7  ;;  %v14675_v7 = vld [vmem:[%s20170_s14 + $0x80] ss:$8 sps:$4 sm:$0xff]  }
 0x877   :  { %v17738_v46 = vpop.f32.mrf.mxu0  ;;  %6799 = vmatprep.subr.bf16.mxu1 %v14665_v31 }
 0x878   :  { %v14224_v44 = vpop.f32.mrf.mxu1 }
 0x879   :  { %v14260_v13 = vpop.f32.mrf.mxu0  ;;  %v14648_v44 = vld [vmem:[%s20170_s14 + $0xc0] ss:$8 sps:$4 sm:$0xff]  }
 0x87a   :  { %v17740_v30 = vpop.f32.mrf.mxu1  ;;  %6637 = vmatpush1.bf16.msra.mxu0 %v14648_v44  ;;  %6800 = vmatpush1.bf16.msra.mxu1 %v14663_v59 }
 0x87b   :  { %v17742_v11 = vpop.f32.mrf.mxu0  ;;  %6638 = vmatprep.subr.bf16.mxu0 %v14656_v53  ;;  %6801 = vmatprep.subr.bf16.mxu1 %v14668_v6 }
 0x87c   :  { %v14227_v9 = vpop.f32.mrf.mxu1 }
 0x87d   :  { %v14263_v43 = vpop.f32.mrf.mxu0  ;;  %v6019_v9 = vadd.f32 %v17720_v0, %v17704_v45  ;;  %v14662_v45 = vld [vmem:[%s20170_s14 + $0xa4] ss:$8 sps:$4 sm:$0xff]  }
 0x87e   :  { %v6013_v35 = vpop.f32.mrf.mxu1  ;;  %6639 = vmatpush1.bf16.msra.mxu0 %v14654_v36 }
 0x87f   :  { %v6173_v26 = vpop.f32.mrf.mxu0  ;;  %v6179_v61 = vadd.f32 %v17722_v28, %v6019_v9  ;;  %6640 = vmatprep.subr.bf16.mxu0 %v14662_v45  ;;  %v14666_v28 = vld [vmem:[%s20170_s14 + $0x20] ss:$8 sps:$4 sm:$0xff]  }
 0x880   :  { %v14228_v55 = vpop.f32.mrf.mxu1  ;;  %6802 = vmatpush1.bf16.msra.mxu1 %v14666_v28 }
 0x881   :  { %v14264_v21 = vpop.f32.mrf.mxu0  ;;  %v14660_v55 = vld [vmem:[%s20170_s14 + $0xa0] ss:$8 sps:$4 sm:$0xff]   ;;  %6803 = vmatprep.subr.bf16.mxu1 %v14674_v17 }
 0x882   :  { %v6298_v18 = vpop.f32.mrf.mxu1  ;;  %6641 = vmatpush1.bf16.msra.mxu0 %v14660_v55 }
 0x883   :  { %v17790_v1 = vadd.f32 %v6298_v18, %v6176_v39  ;;  %v6180_v18 = vadd.f32 %v17726_v40, %v6020_v20  ;;  %6642 = vmatprep.subr.bf16.mxu0 %v14671_v24  ;;  %v14672_v40 = vld [vmem:[%s20170_s14 + $0x10] ss:$8 sps:$4 sm:$0xff]  }
 0x884   :  { %v14283_v15 = vpop.f32.mrf.mxu1  ;;  %6804 = vmatpush1.bf16.msra.mxu1 %v14672_v40 }
 0x885   :  { %v6347_v43 = vmul.f32 %v17790_v1, %v15248_v27 }
 0x886   :  { %v6301_v57 = vpop.f32.mrf.mxu1  ;;  %6643 = vmatpush1.bf16.msra.mxu0 %v14669_v23 }
 0x887   :  { %v17795_v13 = vadd.f32 %v6301_v57, %v6177_v38  ;;  %v14680_v38 = vld [vmem:[%s20170_s14 + $0x4] ss:$8 sps:$4 sm:$0xff]   ;;  %v6022_v57 = vadd.f32 %v17732_v49, %v17710_v63  ;;  %6644 = vmatprep.subr.bf16.mxu0 %v14677_v60  ;;  %v14683_v63 = vld [vmem:[%s20170_s14 + $0x174] ss:$8 sps:$4 sm:$0xff]  }
 0x888   :  { %v14284_v42 = vpop.f32.mrf.mxu1  ;;  %6805 = vmatprep.subr.bf16.mxu1 %v14680_v38 }
 0x889   :  { %v6348_v8 = vmul.f32 %v17795_v13, %v15258_v32  ;;  %v6182_v9 = vadd.f32 %v17734_v37, %v6022_v57  ;;  %6806 = vmatpush1.bf16.msra.mxu1 %v14678_v25 }
 0x88a   :  { %v6306_v48 = vpop.f32.mrf.mxu1  ;;  %6645 = vmatpush1.bf16.msra.mxu0 %v14675_v7 }
 0x88b   :  { %v6356_v35 = vadd.f32 %v6348_v8, %v6347_v43  ;;  %v17816_v26 = vadd.f32 %v6306_v48, %v6178_v62  ;;  %v14689_v62 = vld [vmem:[%s20170_s14 + $0x1f4] ss:$8 sps:$4 sm:$0xff]   ;;  %v6023_v43 = vadd.f32 %v17736_v33, %v17712_v22  ;;  %6983 = vmatprep.subr.bf16.mxu0 %v14683_v63 }
 0x88c   :  { %v14287_v0 = vpop.f32.mrf.mxu1  ;;  %7193 = vmatprep.subr.bf16.mxu1 %v14689_v62 }
 0x88d   :  { %v6349_v58 = vmul.f32 %v17816_v26, %v15252_v29  ;;  %v6183_v59 = vadd.f32 %v17738_v46, %v6023_v43  ;;  %v6024_v0 = vadd.f32 %v17740_v30, %v17714_v16 }
 0x88e   :  { %v6309_v2 = vpop.f32.mrf.mxu1 }
 0x88f   :  { %v6357_v21 = vadd.f32 %v6356_v35, %v6349_v58  ;;  %v17835_v14 = vadd.f32 %v6309_v2, %v6179_v61  ;;  %v6184_v20 = vadd.f32 %v17742_v11, %v6024_v0 }
 0x890   :  { %v14288_v52 = vpop.f32.mrf.mxu1 }
 0x891   :  { %v6350_v39 = vmul.f32 %v17835_v14, %v15262_v34 }
 0x892   :  { %v6314_v4 = vpop.f32.mrf.mxu1 }
 0x893   :  { %v6358_v15 = vadd.f32 %v6357_v21, %v6350_v39  ;;  %v17854_v51 = vadd.f32 %v6314_v4, %v6180_v18 }
 0x894   :  { %v14291_v54 = vpop.f32.mrf.mxu1 }
 0x895   :  { %v6351_v44 = vmul.f32 %v17854_v51, %v15276_v41 }
 0x896   :  { %v6317_v53 = vpop.f32.mrf.mxu1 }
 0x897   :  { %v6359_v42 = vadd.f32 %v6358_v15, %v6351_v44  ;;  %v6341_v31 = vadd.f32 %v6317_v53, %v6181_v5 }
 0x898   :  { %v14292_v49 = vpop.f32.mrf.mxu1 }
 0x899   :  { %v6352_v8 = vmul.f32 %v6341_v31, %v20250_v12 }
 0x89a   :  { %v6322_v48 = vpop.f32.mrf.mxu1 }
 0x89b   :  { %v6360_v36 = vadd.f32 %v6359_v42, %v6352_v8  ;;  %v6342_v35 = vadd.f32 %v6322_v48, %v6182_v9 }
 0x89c   :  { %v14295_v45 = vpop.f32.mrf.mxu1 }
 0x89d   :  { %v6353_v37 = vmul.f32 %v6342_v35, %v20251_v56 }
 0x89e   :  { %v6325_v6 = vpop.f32.mrf.mxu1 }
 0x89f   :  { %v6361_v61 = vadd.f32 %v6360_v36, %v6353_v37  ;;  %v6343_v22 = vadd.f32 %v6325_v6, %v6183_v59 }
 0x8a0   :  { %v14296_v33 = vpop.f32.mrf.mxu1 }
 0x8a1   :  { %v6354_v58 = vmul.f32 %v6343_v22, %v20252_v50 }
 0x8a2   :  { %v6330_v2 = vpop.f32.mrf.mxu1 }
 0x8a3   :  { %v6362_v55 = vadd.f32 %v6361_v61, %v6354_v58  ;;  %v6344_v21 = vadd.f32 %v6330_v2, %v6184_v20 }
 0x8a4   :  { %v14299_v28 = vpop.f32.mrf.mxu1 }
 0x8a5   :  { %v6355_v24 = vmul.f32 %v6344_v21, %v20253_v3 }
 0x8a6   :  { %v6333_v46 = vpop.f32.mrf.mxu1 }
 0x8a7   :  { %v6363_v52 = vadd.f32 %v6362_v55, %v6355_v24  ;;  %v6345_v46 = vld [vmem:[%s20168_s12] sm:$0x1] }
 0x8a8   :  { %v14300_v17 = vpop.f32.mrf.mxu1 }
 0x8a9   :  { %v6364_v16 = vrot.slane %v6363_v52, 4 }
 0x8ab   :  { %v6365_v30 = vadd.f32 %v6364_v16, %v6363_v52  ;;  %v11917_v52 = vld [vmem:[%s20169_s13] ss:$0 sm:$0xff] }
 0x8ad   :  { %v6366_v18 = vrot.slane %v6365_v30, 2 }
 0x8af   :  { %v6367_v19 = vadd.f32 %v6366_v18, %v6365_v30  ;;  %v6435_v30 = vmul.f32 %v11917_v52, %v15248_v27  ;;  %v6436_v18 = vmul.f32 %v11917_v52, %v15258_v32 }
 0x8b1   :  { %v6368_v39 = vrot.slane %v6367_v19, 1 }
 0x8b3   :  { %v6369_v4 = vadd.f32 %v6368_v39, %v6367_v19  ;;  %v6437_v39 = vmul.f32 %v11917_v52, %v15252_v29 }
 0x8b5   :  { %v6370_v23 = vmul.f32 0.03125, %v6369_v4  ;;  %v6438_v4 = vmul.f32 %v11917_v52, %v15262_v34 }
 0x8b7   :  { %v6371_v11 = vsub.f32 %v17790_v1, %v6370_v23  ;;  %v6372_v15 = vsub.f32 %v17795_v13, %v6370_v23  ;;  %v6373_v40 = vsub.f32 %v17816_v26, %v6370_v23  ;;  %v6374_v60 = vsub.f32 %v17835_v14, %v6370_v23 }
 0x8b8   :  { %v6375_v54 = vsub.f32 %v17854_v51, %v6370_v23  ;;  %v6376_v38 = vsub.f32 %v6341_v31, %v6370_v23  ;;  %v6377_v5 = vsub.f32 %v6342_v35, %v6370_v23  ;;  %v6378_v57 = vsub.f32 %v6343_v22, %v6370_v23 }
 0x8b9   :  { %v6379_v44 = vsub.f32 %v6344_v21, %v6370_v23  ;;  %v6380_v53 = vmul.f32 %v6371_v11, %v15248_v27  ;;  %v6381_v7 = vmul.f32 %v6372_v15, %v15258_v32  ;;  %v6382_v42 = vmul.f32 %v6373_v40, %v15252_v29 }
 0x8ba   :  { %v6383_v1 = vmul.f32 %v6374_v60, %v15262_v34  ;;  %v6384_v26 = vmul.f32 %v6375_v54, %v15276_v41  ;;  %v6385_v51 = vmul.f32 %v6376_v38, %v20250_v12  ;;  %v6386_v62 = vmul.f32 %v6377_v5, %v20251_v56 }
 0x8bb   :  { %v6389_v25 = vmul.f32 %v6380_v53, %v6380_v53  ;;  %v6390_v13 = vmul.f32 %v6381_v7, %v6381_v7  ;;  %v6391_v63 = vmul.f32 %v6382_v42, %v6382_v42  ;;  %v6387_v8 = vmul.f32 %v6378_v57, %v20252_v50 }
 0x8bc   :  { %v6392_v31 = vmul.f32 %v6383_v1, %v6383_v1  ;;  %v6393_v9 = vmul.f32 %v6384_v26, %v6384_v26  ;;  %v6394_v48 = vmul.f32 %v6385_v51, %v6385_v51  ;;  %v6388_v35 = vmul.f32 %v6379_v44, %v20253_v3 }
 0x8bd   :  { %v6398_v14 = vadd.f32 %v6390_v13, %v6389_v25  ;;  %v6395_v45 = vmul.f32 %v6386_v62, %v6386_v62  ;;  %v6396_v0 = vmul.f32 %v6387_v8, %v6387_v8  ;;  %v6439_v23 = vmul.f32 %v11917_v52, %v15276_v41 }
 0x8be   :  { %v6397_v6 = vmul.f32 %v6388_v35, %v6388_v35  ;;  %v6440_v11 = vmul.f32 %v11917_v52, %v20250_v12  ;;  %v6441_v15 = vmul.f32 %v11917_v52, %v20251_v56  ;;  %v6442_v40 = vmul.f32 %v11917_v52, %v20252_v50 }
 0x8bf   :  { %v6399_v49 = vadd.f32 %v6398_v14, %v6391_v63  ;;  %v6443_v60 = vmul.f32 %v11917_v52, %v20253_v3 }
 0x8c1   :  { %v6400_v43 = vadd.f32 %v6399_v49, %v6392_v31 }
 0x8c3   :  { %v6401_v36 = vadd.f32 %v6400_v43, %v6393_v9 }
 0x8c5   :  { %v6402_v59 = vadd.f32 %v6401_v36, %v6394_v48 }
 0x8c7   :  { %v6403_v37 = vadd.f32 %v6402_v59, %v6395_v45 }
 0x8c9   :  { %v6404_v61 = vadd.f32 %v6403_v37, %v6396_v0 }
 0x8cb   :  { %v6405_v22 = vadd.f32 %v6404_v61, %v6397_v6 }
 0x8cd   :  { %v6406_v33 = vrot.slane %v6405_v22, 4 }
 0x8cf   :  { %v6407_v20 = vadd.f32 %v6406_v33, %v6405_v22 }
 0x8d1   :  { %v6408_v58 = vrot.slane %v6407_v20, 2 }
 0x8d3   :  { %v6409_v2 = vadd.f32 %v6408_v58, %v6407_v20 }
 0x8d5   :  { %v6410_v55 = vrot.slane %v6409_v2, 1 }
 0x8d7   :  { %v6411_v21 = vadd.f32 %v6410_v55, %v6409_v2 }
 0x8d9   :  { %v6412_v28 = vmul.f32 0.03125, %v6411_v21 }
 0x8db   :  { %v6413_v24 = vadd.f32 1e-05, %v6412_v28 }
 0x8dd   :  { %14999 = vrsqrt.f32 %v6413_v24 }
 0x8ea   :  { %v15000_v17 = vpop.eup %14999 }
 0x8eb   :  { %v6415_v16 = vmul.f32 %v15000_v17, %v6345_v46 }
 0x8ed   :  { %v6419_v19 = vrot.slane %v6415_v16, %v20254_v47  ;;  %v14681_v16 = vld [vmem:[%s20170_s14 + $0x170] ss:$8 sps:$4 sm:$0xff]  }
 0x8ef   :  { %v6420_v54 = vmul.f32 %v6419_v19, %v6380_v53  ;;  %v6421_v38 = vmul.f32 %v6419_v19, %v6381_v7  ;;  %v6422_v5 = vmul.f32 %v6419_v19, %v6382_v42  ;;  %v6423_v57 = vmul.f32 %v6419_v19, %v6383_v1 }
 0x8f0   :  { %v6424_v44 = vmul.f32 %v6419_v19, %v6384_v26  ;;  %v6425_v25 = vmul.f32 %v6419_v19, %v6385_v51  ;;  %v6426_v13 = vmul.f32 %v6419_v19, %v6386_v62  ;;  %v6427_v63 = vmul.f32 %v6419_v19, %v6387_v8 }
 0x8f1   :  { %v6428_v14 = vmul.f32 %v6419_v19, %v6388_v35  ;;  %v6444_v31 = vadd.f32 %v6435_v30, %v6420_v54  ;;  %v6445_v49 = vadd.f32 %v6436_v18, %v6421_v38  ;;  %v6446_v9 = vadd.f32 %v6437_v39, %v6422_v5  ;;  %v14695_v54 = vld [vmem:[%s20170_s14 + $0x1e4] ss:$8 sps:$4 sm:$0xff]  }
 0x8f2   :  { %v6447_v43 = vadd.f32 %v6438_v4, %v6423_v57  ;;  %v6448_v48 = vadd.f32 %v6439_v23, %v6424_v44  ;;  %v6449_v36 = vadd.f32 %v6440_v11, %v6425_v25  ;;  %v6450_v45 = vadd.f32 %v6441_v15, %v6426_v13  ;;  %v14686_v4 = vld [vmem:[%s20170_s14 + $0x164] ss:$8 sps:$4 sm:$0xff]   ;;  %v14687_v15 = vld [vmem:[%s20170_s14 + $0x1f0] ss:$8 sps:$4 sm:$0xff]   ;;  %v14684_v57 = vld [vmem:[%s20170_s14 + $0x160] ss:$8 sps:$4 sm:$0xff]  }
 0x8f3   :  { %v6451_v59 = vadd.f32 %v6442_v40, %v6427_v63  ;;  %v6452_v0 = vadd.f32 %v6443_v60, %v6428_v14  ;;  %vm6453_vm12 = vcmp.ge.f32.partialorder %v6444_v31, 0.0  ;;  %vm6454_vm11 = vcmp.ge.f32.partialorder %v6445_v49, 0.0  ;;  %v14692_v13 = vld [vmem:[%s20170_s14 + $0x154] ss:$8 sps:$4 sm:$0xff]   ;;  %v14693_v63 = vld [vmem:[%s20170_s14 + $0x1e0] ss:$8 sps:$4 sm:$0xff]  }
 0x8f4   :  { %vm6455_vm13 = vcmp.ge.f32.partialorder %v6446_v9, 0.0  ;;  %vm6456_vm14 = vcmp.ge.f32.partialorder %v6447_v43, 0.0  ;;  %vm6457_vm15 = vcmp.ge.f32.partialorder %v6448_v48, 0.0  ;;  %vm6458_vm2 = vcmp.ge.f32.partialorder %v6449_v36, 0.0 }
 0x8f5   :  { %vm6459_vm3 = vcmp.ge.f32.partialorder %v6450_v45, 0.0  ;;  %vm6460_vm4 = vcmp.ge.f32.partialorder %v6451_v59, 0.0  ;;  %vm6461_vm5 = vcmp.ge.f32.partialorder %v6452_v0, 0.0  ;;  %v6462_v53 = vmul.f32 0.05, %v6444_v31 }
 0x8f6   :  { %v6463_v7 = vmul.f32 0.05, %v6445_v49  ;;  %v6464_v42 = vmul.f32 0.05, %v6446_v9  ;;  %v6465_v1 = vmul.f32 0.05, %v6447_v43 }
 0x8f7   :  { %v6466_v26 = vmul.f32 0.05, %v6448_v48  ;;  %v6467_v51 = vmul.f32 0.05, %v6449_v36  ;;  %v6468_v62 = vmul.f32 0.05, %v6450_v45  ;;  %v17924_v8 = vsel %vm6453_vm12, %v6444_v31, %v6462_v53 }
 0x8f8   :  { %v6469_v35 = vmul.f32 0.05, %v6451_v59  ;;  %v6470_v37 = vmul.f32 0.05, %v6452_v0  ;;  %v17927_v6 = vsel %vm6454_vm11, %v6445_v49, %v6463_v7  ;;  %v17930_v61 = vsel %vm6455_vm13, %v6446_v9, %v6464_v42  ;;  %6480 = vst [vmem:[#allocation3 + $0x8] sm:$0xff] %v17924_v8 }
 0x8f9   :  { %v17934_v22 = vsel %vm6456_vm14, %v6447_v43, %v6465_v1  ;;  %v17937_v33 = vsel %vm6457_vm15, %v6448_v48, %v6466_v26  ;;  %v17940_v20 = vsel %vm6458_vm2, %v6449_v36, %v6467_v51  ;;  %v17943_v58 = vsel %vm6459_vm3, %v6450_v45, %v6468_v62  ;;  %6481 = vst [vmem:[#allocation3 + $0x10] sm:$0xff] %v17927_v6  ;;  %v14698_v26 = vld [vmem:[%s20170_s14 + $0x144] ss:$8 sps:$4 sm:$0xff]  }
 0x8fa   :  { %6482 = vst [vmem:[#allocation3 + $0x18] sm:$0xff] %v17930_v61  ;;  %v17948_v2 = vsel %vm6460_vm4, %v6451_v59, %v6469_v35  ;;  %v17951_v55 = vsel %vm6461_vm5, %v6452_v0, %v6470_v37  ;;  %6483 = vst [vmem:[#allocation3 + $0x20] sm:$0xff] %v17934_v22  ;;  %v7301_v21 = vpack.c.bf16 %v17927_v6, %v17924_v8  ;;  %v14690_v59 = vld [vmem:[%s20170_s14 + $0x150] ss:$8 sps:$4 sm:$0xff]   ;;  %v14701_v35 = vld [vmem:[%s20170_s14 + $0x1d4] ss:$8 sps:$4 sm:$0xff]  }
 0x8fb   :  { %6484 = vst [vmem:[#allocation3 + $0x28] sm:$0xff] %v17937_v33  ;;  %6485 = vst [vmem:[#allocation3 + $0x30] sm:$0xff] %v17940_v20  ;;  %v7302_v28 = vpack.c.bf16 %v17934_v22, %v17930_v61  ;;  %v7303_v24 = vpack.c.bf16 %v17940_v20, %v17937_v33  ;;  %v7304_v46 = vpack.c.bf16 %v17948_v2, %v17943_v58  ;;  %v14788_v8 = vld [vmem:[%s20170_s14 + $0x354] ss:$8 sps:$4 sm:$0xff]   ;;  %v14789_v6 = vld [vmem:[%s20170_s14 + $0x3e0] ss:$8 sps:$4 sm:$0xff]  }
 0x8fc   :  { %6486 = vst [vmem:[#allocation3 + $0x38] sm:$0xff] %v17943_v58  ;;  %6487 = vst [vmem:[#allocation3 + $0x40] sm:$0xff] %v17948_v2  ;;  %v14803_v61 = vld [vmem:[%s20170_s14 + $0x3c4] ss:$8 sps:$4 sm:$0xff]   ;;  %v14800_v22 = vld [vmem:[%s20170_s14 + $0x334] ss:$8 sps:$4 sm:$0xff]  }
 0x8fd   :  { %6488 = vst [vmem:[#allocation3 + $0x48] sm:$0xff] %v17951_v55  ;;  %v14812_v33 = vld [vmem:[%s20170_s14 + $0x3a4] ss:$8 sps:$4 sm:$0xff]   ;;  %v14815_v20 = vld [vmem:[%s20170_s14 + $0x314] ss:$8 sps:$4 sm:$0xff]  }
 0x8fe   :  { %v14824_v58 = vld [vmem:[%s20170_s14 + $0x384] ss:$8 sps:$4 sm:$0xff]   ;;  %v14827_v2 = vld [vmem:[%s20170_s14 + $0x474] ss:$8 sps:$4 sm:$0xff]  }
 0x8ff   :  { %v6519_v52 = vld [vmem:[#allocation3 + $0x2] sm:$0xff] }
 0x900   :  { %v6489_v17 = vld [vmem:[#allocation3 + $0x1] sm:$0xff]  ;;  %v6520_v30 = vld [vmem:[#allocation3 + $0xa] sm:$0xff] }
 0x901   :  { %v17970_v18 = vld [vmem:[#allocation3 + $0x9] sm:$0xff]  ;;  %v6528_v19 = vpack.c.bf16 %v6520_v30, %v6519_v52  ;;  %v17976_v23 = vld [vmem:[#allocation3 + $0x11] sm:$0xff]  ;;  %v17978_v11 = vld [vmem:[#allocation3 + $0x19] sm:$0xff] }
 0x902   :  { %v6498_v39 = vpack.c.bf16 %v17970_v18, %v6489_v17  ;;  %v17983_v40 = vld [vmem:[#allocation3 + $0x21] sm:$0xff]  ;;  %v7511_v60 = vpack.c.bf16 %v17976_v23, %v17970_v18  ;;  %v17990_v38 = vld [vmem:[#allocation3 + $0x29] sm:$0xff]  ;;  %v6521_v49 = vld [vmem:[#allocation3 + $0x12] sm:$0xff]  ;;  %v6499_v1 = vpack.c.bf16 %v17978_v11, %v17976_v23 }
 0x903   :  { %6663 = vmatmul.mubr.bf16.vlgmr.msra.gmra.mxu0 %v6528_v19  ;;  %v7512_v5 = vpack.c.bf16 %v17983_v40, %v17978_v11  ;;  %v17998_v44 = vld [vmem:[#allocation3 + $0x31] sm:$0xff]  ;;  %v18000_v25 = vld [vmem:[#allocation3 + $0x39] sm:$0xff]  ;;  %v18024_v0 = vld [vmem:[#allocation3 + $0x27] sm:$0xff] }
 0x904   :  { %6824 = vmatmul.mubr.bf16.vlgmr.msra.gmra.mxu1 %v6498_v39  ;;  %6984 = vmatpush1.bf16.msra.mxu0 %v14681_v16  ;;  %v18009_v14 = vld [vmem:[#allocation3 + $0x41] sm:$0xff]  ;;  %v7513_v31 = vpack.c.bf16 %v17998_v44, %v17990_v38  ;;  %v18013_v43 = vld [vmem:[#allocation3 + $0xf] sm:$0xff]  ;;  %v18017_v36 = vld [vmem:[#allocation3 + $0x17] sm:$0xff] }
 0x905   :  { %6672 = vmatprep.mubr.bf16.mxu0 %v20255_v10  ;;  %6985 = vmatprep.subr.bf16.mxu0 %v14686_v4  ;;  %v6522_v9 = vld [vmem:[#allocation3 + $0x1a] sm:$0xff]  ;;  %v7514_v48 = vpack.c.bf16 %v18009_v14, %v18000_v25  ;;  %v18026_v53 = vld [vmem:[#allocation3 + $0x2f] sm:$0xff]  ;;  %v8141_v7 = vpack.c.bf16 %v18017_v36, %v18013_v43  ;;  %v18044_v52 = vld [vmem:[#allocation3 + $0x47] sm:$0xff] }
 0x906   :  { %6833 = vmatprep.mubr.bf16.mxu1 %v20255_v10  ;;  %7194 = vmatpush1.bf16.msra.mxu1 %v14687_v15  ;;  %v18019_v45 = vld [vmem:[#allocation3 + $0x1f] sm:$0xff]  ;;  %v6529_v42 = vpack.c.bf16 %v6522_v9, %v6521_v49  ;;  %v18035_v51 = vld [vmem:[#allocation3 + $0x37] sm:$0xff]  ;;  %v6500_v49 = vpack.c.bf16 %v17990_v38, %v17983_v40 }
 0x907   :  { %7195 = vmatprep.subr.bf16.mxu1 %v14695_v54  ;;  %v8142_v62 = vpack.c.bf16 %v18024_v0, %v18019_v45  ;;  %v18042_v37 = vld [vmem:[#allocation3 + $0x3f] sm:$0xff]  ;;  %v8143_v17 = vpack.c.bf16 %v18035_v51, %v18026_v53  ;;  %v14696_v30 = vld [vmem:[%s20170_s14 + $0x140] ss:$8 sps:$4 sm:$0xff]  }
 0x908   :  { %6986 = vmatpush1.bf16.msra.mxu0 %v14684_v57  ;;  %v14699_v16 = vld [vmem:[%s20170_s14 + $0x1d0] ss:$8 sps:$4 sm:$0xff]   ;;  %v14707_v19 = vld [vmem:[%s20170_s14 + $0x1c4] ss:$8 sps:$4 sm:$0xff]   ;;  %v8144_v39 = vpack.c.bf16 %v18044_v52, %v18042_v37  ;;  %v14704_v4 = vld [vmem:[%s20170_s14 + $0x134] ss:$8 sps:$4 sm:$0xff]  }
 0x909   :  { %6987 = vmatprep.subr.bf16.mxu0 %v14692_v13  ;;  %v6523_v15 = vld [vmem:[#allocation3 + $0x22] sm:$0xff]  ;;  %v6524_v54 = vld [vmem:[#allocation3 + $0x2a] sm:$0xff]  ;;  %v14710_v9 = vld [vmem:[%s20170_s14 + $0x124] ss:$8 sps:$4 sm:$0xff]  }
 0x90a   :  { %7196 = vmatpush1.bf16.msra.mxu1 %v14693_v63  ;;  %v14702_v57 = vld [vmem:[%s20170_s14 + $0x130] ss:$8 sps:$4 sm:$0xff]   ;;  %v14705_v13 = vld [vmem:[%s20170_s14 + $0x1c0] ss:$8 sps:$4 sm:$0xff]   ;;  %v6530_v63 = vpack.c.bf16 %v6524_v54, %v6523_v15  ;;  %v6501_v54 = vpack.c.bf16 %v18000_v25, %v17998_v44  ;;  %v14794_v18 = vld [vmem:[%s20170_s14 + $0x344] ss:$8 sps:$4 sm:$0xff]  }
 0x90b   :  { %6673 = vmatmul.mubr.bf16.gmra.mxu0 %v6529_v42  ;;  %7197 = vmatprep.subr.bf16.mxu1 %v14701_v35  ;;  %v14708_v42 = vld [vmem:[%s20170_s14 + $0x120] ss:$8 sps:$4 sm:$0xff]   ;;  %v14719_v35 = vld [vmem:[%s20170_s14 + $0x114] ss:$8 sps:$4 sm:$0xff]   ;;  %v14806_v40 = vld [vmem:[%s20170_s14 + $0x324] ss:$8 sps:$4 sm:$0xff]  }
 0x90c   :  { %6834 = vmatmul.mubr.bf16.gmra.mxu1 %v6499_v1  ;;  %6988 = vmatpush1.bf16.msra.mxu0 %v14690_v59  ;;  %v14713_v59 = vld [vmem:[%s20170_s14 + $0x1b4] ss:$8 sps:$4 sm:$0xff]   ;;  %v14711_v1 = vld [vmem:[%s20170_s14 + $0x1b0] ss:$8 sps:$4 sm:$0xff]   ;;  %v14801_v11 = vld [vmem:[%s20170_s14 + $0x3c0] ss:$8 sps:$4 sm:$0xff]  }
 0x90d   :  { %6682 = vmatprep.mubr.bf16.mxu0 %v20255_v10  ;;  %6989 = vmatprep.subr.bf16.mxu0 %v14698_v26  ;;  %v14716_v26 = vld [vmem:[%s20170_s14 + $0x1a4] ss:$8 sps:$4 sm:$0xff]   ;;  %v14797_v23 = vld [vmem:[%s20170_s14 + $0x3d4] ss:$8 sps:$4 sm:$0xff]   ;;  %v14813_v38 = vld [vmem:[%s20170_s14 + $0x310] ss:$8 sps:$4 sm:$0xff]  }
 0x90e   :  { %6843 = vmatprep.mubr.bf16.mxu1 %v20255_v10  ;;  %7198 = vmatpush1.bf16.msra.mxu1 %v14699_v16  ;;  %v6525_v16 = vld [vmem:[#allocation3 + $0x32] sm:$0xff]  ;;  %v14818_v44 = vld [vmem:[%s20170_s14 + $0x394] ss:$8 sps:$4 sm:$0xff]  }
 0x90f   :  { %7199 = vmatprep.subr.bf16.mxu1 %v14707_v19  ;;  %v14714_v19 = vld [vmem:[%s20170_s14 + $0x1a0] ss:$8 sps:$4 sm:$0xff]  }
 0x910   :  { %6990 = vmatpush1.bf16.msra.mxu0 %v14696_v30  ;;  %v6526_v30 = vld [vmem:[#allocation3 + $0x3a] sm:$0xff] }
 0x911   :  { %6991 = vmatprep.subr.bf16.mxu0 %v14704_v4  ;;  %v14717_v4 = vld [vmem:[%s20170_s14 + $0x110] ss:$8 sps:$4 sm:$0xff]   ;;  %v6531_v15 = vpack.c.bf16 %v6526_v30, %v6525_v16  ;;  %v14737_v16 = vld [vmem:[%s20170_s14 + $0x2f4] ss:$8 sps:$4 sm:$0xff]   ;;  %v14822_v25 = vld [vmem:[%s20170_s14 + $0x380] ss:$8 sps:$4 sm:$0xff]  }
 0x912   :  { %7200 = vmatpush1.bf16.msra.mxu1 %v14705_v13  ;;  %v14725_v13 = vld [vmem:[%s20170_s14 + $0x104] ss:$8 sps:$4 sm:$0xff]   ;;  %v6872_v30 = vld [vmem:[#allocation3 + $0x3] sm:$0xff] }
 0x913   :  { %6683 = vmatmul.mubr.bf16.gmra.mxu0 %v6530_v63  ;;  %7201 = vmatprep.subr.bf16.mxu1 %v14713_v59  ;;  %v14720_v63 = vld [vmem:[%s20170_s14 + $0x190] ss:$8 sps:$4 sm:$0xff]   ;;  %v14731_v59 = vld [vmem:[%s20170_s14 + $0x274] ss:$8 sps:$4 sm:$0xff]  }
 0x914   :  { %6844 = vmatmul.mubr.bf16.gmra.mxu1 %v6500_v49  ;;  %6992 = vmatpush1.bf16.msra.mxu0 %v14702_v57  ;;  %v14722_v57 = vld [vmem:[%s20170_s14 + $0x194] ss:$8 sps:$4 sm:$0xff]   ;;  %v14723_v49 = vld [vmem:[%s20170_s14 + $0x100] ss:$8 sps:$4 sm:$0xff]  }
 0x915   :  { %6692 = vmatprep.mubr.bf16.mxu0 %v20255_v10  ;;  %6853 = vmatprep.mubr.bf16.mxu1 %v20255_v10 }
 0x916   :  { %6993 = vmatprep.subr.bf16.mxu0 %v14710_v9  ;;  %7202 = vmatpush1.bf16.msra.mxu1 %v14711_v1  ;;  %v14728_v9 = vld [vmem:[%s20170_s14 + $0x184] ss:$8 sps:$4 sm:$0xff]   ;;  %v14726_v1 = vld [vmem:[%s20170_s14 + $0x180] ss:$8 sps:$4 sm:$0xff]  }
 0x917   :  { %7203 = vmatprep.subr.bf16.mxu1 %v14716_v26 }
 0x918   :  { %6994 = vmatpush1.bf16.msra.mxu0 %v14708_v42  ;;  %v6527_v42 = vld [vmem:[#allocation3 + $0x42] sm:$0xff] }
 0x919   :  { %6995 = vmatprep.subr.bf16.mxu0 %v14719_v35  ;;  %v6532_v26 = vpack.c.bf16 %v6527_v42, %v6527_v42  ;;  %v6502_v35 = vpack.c.bf16 %v18009_v14, %v18009_v14  ;;  %v6874_v42 = vld [vmem:[#allocation3 + $0x13] sm:$0xff]  ;;  %v7305_v14 = vpack.c.bf16 %v17951_v55, %v17951_v55 }
 0x91a   :  { %7204 = vmatpush1.bf16.msra.mxu1 %v14714_v19  ;;  %v6873_v19 = vld [vmem:[#allocation3 + $0xb] sm:$0xff] }
 0x91b   :  { %6693 = vmatmul.mubr.bf16.gmra.mxu0 %v6531_v15  ;;  %7205 = vmatprep.subr.bf16.mxu1 %v14722_v57  ;;  %v14729_v15 = vld [vmem:[%s20170_s14 + $0x270] ss:$8 sps:$4 sm:$0xff]  }
 0x91c   :  { %6854 = vmatmul.mubr.bf16.gmra.mxu1 %v6501_v54  ;;  %6996 = vmatpush1.bf16.msra.mxu0 %v14717_v4  ;;  %v7082_v4 = vld [vmem:[#allocation3 + $0x7] sm:$0xff]  ;;  %v6881_v54 = vpack.c.bf16 %v6873_v19, %v6872_v30  ;;  %v7092_v30 = vpack.c.bf16 %v18019_v45, %v18017_v36  ;;  %v14746_v19 = vld [vmem:[%s20170_s14 + $0x244] ss:$8 sps:$4 sm:$0xff]  }
 0x91d   :  { %6702 = vmatprep.mubr.bf16.mxu0 %v20255_v10  ;;  %6863 = vmatprep.mubr.bf16.mxu1 %v20255_v10  ;;  %v7091_v57 = vpack.c.bf16 %v18013_v43, %v7082_v4  ;;  %v14749_v4 = vld [vmem:[%s20170_s14 + $0x2d4] ss:$8 sps:$4 sm:$0xff]  }
 0x91e   :  { %6997 = vmatprep.subr.bf16.mxu0 %v14725_v13  ;;  %7206 = vmatpush1.bf16.msra.mxu1 %v14720_v63  ;;  %v14734_v13 = vld [vmem:[%s20170_s14 + $0x264] ss:$8 sps:$4 sm:$0xff]   ;;  %v14735_v63 = vld [vmem:[%s20170_s14 + $0x2f0] ss:$8 sps:$4 sm:$0xff]  }
 0x91f   :  { %7207 = vmatprep.subr.bf16.mxu1 %v14728_v9  ;;  %v14732_v9 = vld [vmem:[%s20170_s14 + $0x260] ss:$8 sps:$4 sm:$0xff]  }
 0x920   :  { %6998 = vmatpush1.bf16.msra.mxu0 %v14723_v49  ;;  %v14743_v49 = vld [vmem:[%s20170_s14 + $0x2e4] ss:$8 sps:$4 sm:$0xff]  }
 0x921   :  { %7403 = vmatprep.subr.bf16.mxu0 %v14731_v59  ;;  %v14740_v59 = vld [vmem:[%s20170_s14 + $0x254] ss:$8 sps:$4 sm:$0xff]  }
 0x922   :  { %7208 = vmatpush1.bf16.msra.mxu1 %v14726_v1  ;;  %v6875_v1 = vld [vmem:[#allocation3 + $0x1b] sm:$0xff]  ;;  %v8140_v43 = vld [vmem:[#allocation3 + $0x4f] sm:$0xff] }
 0x923   :  { %6703 = vmatmul.mubr.bf16.gmra.mxu0 %v6532_v26  ;;  %7613 = vmatprep.subr.bf16.mxu1 %v14737_v16  ;;  %v14741_v26 = vld [vmem:[%s20170_s14 + $0x2e0] ss:$8 sps:$4 sm:$0xff]   ;;  %v6882_v16 = vpack.c.bf16 %v6875_v1, %v6874_v42  ;;  %v7093_v1 = vpack.c.bf16 %v18026_v53, %v18024_v0  ;;  %v8145_v36 = vpack.c.bf16 %v8140_v43, %v8140_v43 }
 0x924   :  { %6864 = vmatmul.mubr.bf16.gmra.mxu1 %v6502_v35  ;;  %7015 = vmatprep.mubr.bf16.mxu0 %v20255_v10  ;;  %v14738_v35 = vld [vmem:[%s20170_s14 + $0x250] ss:$8 sps:$4 sm:$0xff]  }
 0x925   :  { %7225 = vmatprep.mubr.bf16.mxu1 %v20255_v10 }
 0x92b   :  { %7016 = vmatmul.mubr.bf16.vlgmr.msra.gmra.mxu0 %v6881_v54  ;;  %v14744_v54 = vld [vmem:[%s20170_s14 + $0x240] ss:$8 sps:$4 sm:$0xff]  }
 0x92c   :  { %7226 = vmatmul.mubr.bf16.vlgmr.msra.gmra.mxu1 %v7091_v57  ;;  %7404 = vmatpush1.bf16.msra.mxu0 %v14729_v15  ;;  %v14747_v15 = vld [vmem:[%s20170_s14 + $0x2d0] ss:$8 sps:$4 sm:$0xff]   ;;  %v14755_v57 = vld [vmem:[%s20170_s14 + $0x2c4] ss:$8 sps:$4 sm:$0xff]  }
 0x92d   :  { %7025 = vmatprep.mubr.bf16.mxu0 %v20255_v10  ;;  %7405 = vmatprep.subr.bf16.mxu0 %v14734_v13  ;;  %v14752_v13 = vld [vmem:[%s20170_s14 + $0x234] ss:$8 sps:$4 sm:$0xff]  }
 0x92e   :  { %7235 = vmatprep.mubr.bf16.mxu1 %v20255_v10  ;;  %7614 = vmatpush1.bf16.msra.mxu1 %v14735_v63  ;;  %v6876_v63 = vld [vmem:[#allocation3 + $0x23] sm:$0xff] }
 0x92f   :  { %7615 = vmatprep.subr.bf16.mxu1 %v14743_v49  ;;  %v6877_v49 = vld [vmem:[#allocation3 + $0x2b] sm:$0xff] }
 0x930   :  { %7406 = vmatpush1.bf16.msra.mxu0 %v14732_v9  ;;  %v14750_v9 = vld [vmem:[%s20170_s14 + $0x230] ss:$8 sps:$4 sm:$0xff]   ;;  %v6883_v42 = vpack.c.bf16 %v6877_v49, %v6876_v63  ;;  %v7094_v49 = vpack.c.bf16 %v18042_v37, %v18035_v51 }
 0x931   :  { %7407 = vmatprep.subr.bf16.mxu0 %v14740_v59  ;;  %v14753_v59 = vld [vmem:[%s20170_s14 + $0x2c0] ss:$8 sps:$4 sm:$0xff]  }
 0x932   :  { %7616 = vmatpush1.bf16.msra.mxu1 %v14741_v26  ;;  %v14758_v26 = vld [vmem:[%s20170_s14 + $0x224] ss:$8 sps:$4 sm:$0xff]  }
 0x933   :  { %7026 = vmatmul.mubr.bf16.gmra.mxu0 %v6882_v16  ;;  %7617 = vmatprep.subr.bf16.mxu1 %v14749_v4  ;;  %v14756_v16 = vld [vmem:[%s20170_s14 + $0x220] ss:$8 sps:$4 sm:$0xff]   ;;  %v14767_v4 = vld [vmem:[%s20170_s14 + $0x214] ss:$8 sps:$4 sm:$0xff]  }
 0x934   :  { %7236 = vmatmul.mubr.bf16.gmra.mxu1 %v7092_v30  ;;  %7408 = vmatpush1.bf16.msra.mxu0 %v14738_v35  ;;  %v14761_v35 = vld [vmem:[%s20170_s14 + $0x2b4] ss:$8 sps:$4 sm:$0xff]   ;;  %v14759_v30 = vld [vmem:[%s20170_s14 + $0x2b0] ss:$8 sps:$4 sm:$0xff]  }
 0x935   :  { %7035 = vmatprep.mubr.bf16.mxu0 %v20255_v10  ;;  %7409 = vmatprep.subr.bf16.mxu0 %v14746_v19  ;;  %v14764_v19 = vld [vmem:[%s20170_s14 + $0x2a4] ss:$8 sps:$4 sm:$0xff]  }
 0x936   :  { %7245 = vmatprep.mubr.bf16.mxu1 %v20255_v10  ;;  %7618 = vmatpush1.bf16.msra.mxu1 %v14747_v15  ;;  %v6878_v15 = vld [vmem:[#allocation3 + $0x33] sm:$0xff] }
 0x937   :  { %7619 = vmatprep.subr.bf16.mxu1 %v14755_v57  ;;  %v14762_v57 = vld [vmem:[%s20170_s14 + $0x2a0] ss:$8 sps:$4 sm:$0xff]  }
 0x938   :  { %7410 = vmatpush1.bf16.msra.mxu0 %v14744_v54  ;;  %v6879_v54 = vld [vmem:[#allocation3 + $0x3b] sm:$0xff] }
 0x939   :  { %7411 = vmatprep.subr.bf16.mxu0 %v14752_v13  ;;  %v14765_v13 = vld [vmem:[%s20170_s14 + $0x210] ss:$8 sps:$4 sm:$0xff]   ;;  %v6884_v63 = vpack.c.bf16 %v6879_v54, %v6878_v15  ;;  %v14785_v15 = vld [vmem:[%s20170_s14 + $0x3f4] ss:$8 sps:$4 sm:$0xff]  }
 0x93a   :  { %7620 = vmatpush1.bf16.msra.mxu1 %v14753_v59  ;;  %v14773_v59 = vld [vmem:[%s20170_s14 + $0x204] ss:$8 sps:$4 sm:$0xff]   ;;  %v14777_v54 = vld [vmem:[%s20170_s14 + $0x370] ss:$8 sps:$4 sm:$0xff]  }
 0x93b   :  { %7036 = vmatmul.mubr.bf16.gmra.mxu0 %v6883_v42  ;;  %7621 = vmatprep.subr.bf16.mxu1 %v14761_v35  ;;  %v14768_v42 = vld [vmem:[%s20170_s14 + $0x290] ss:$8 sps:$4 sm:$0xff]   ;;  %v14779_v35 = vld [vmem:[%s20170_s14 + $0x374] ss:$8 sps:$4 sm:$0xff]  }
 0x93c   :  { %7246 = vmatmul.mubr.bf16.gmra.mxu1 %v7093_v1  ;;  %7412 = vmatpush1.bf16.msra.mxu0 %v14750_v9  ;;  %v14770_v9 = vld [vmem:[%s20170_s14 + $0x294] ss:$8 sps:$4 sm:$0xff]   ;;  %v14771_v1 = vld [vmem:[%s20170_s14 + $0x200] ss:$8 sps:$4 sm:$0xff]  }
 0x93d   :  { %7045 = vmatprep.mubr.bf16.mxu0 %v20255_v10  ;;  %7255 = vmatprep.mubr.bf16.mxu1 %v20255_v10 }
 0x93e   :  { %7413 = vmatprep.subr.bf16.mxu0 %v14758_v26  ;;  %7622 = vmatpush1.bf16.msra.mxu1 %v14759_v30  ;;  %v14776_v26 = vld [vmem:[%s20170_s14 + $0x284] ss:$8 sps:$4 sm:$0xff]   ;;  %v14774_v30 = vld [vmem:[%s20170_s14 + $0x280] ss:$8 sps:$4 sm:$0xff]  }
 0x93f   :  { %7623 = vmatprep.subr.bf16.mxu1 %v14764_v19 }
 0x940   :  { %7414 = vmatpush1.bf16.msra.mxu0 %v14756_v16  ;;  %v6880_v16 = vld [vmem:[#allocation3 + $0x43] sm:$0xff] }
 0x941   :  { %7415 = vmatprep.subr.bf16.mxu0 %v14767_v4  ;;  %v6885_v19 = vpack.c.bf16 %v6880_v16, %v6880_v16  ;;  %v7095_v4 = vpack.c.bf16 %v18044_v52, %v18044_v52  ;;  %v7713_v16 = vld [vmem:[#allocation3 + $0x15] sm:$0xff] }
 0x942   :  { %7624 = vmatpush1.bf16.msra.mxu1 %v14762_v57  ;;  %v14782_v57 = vld [vmem:[%s20170_s14 + $0x364] ss:$8 sps:$4 sm:$0xff]  }
 0x943   :  { %7046 = vmatmul.mubr.bf16.gmra.mxu0 %v6884_v63  ;;  %7625 = vmatprep.subr.bf16.mxu1 %v14770_v9  ;;  %v14791_v63 = vld [vmem:[%s20170_s14 + $0x3e4] ss:$8 sps:$4 sm:$0xff]   ;;  %v14792_v9 = vld [vmem:[%s20170_s14 + $0x340] ss:$8 sps:$4 sm:$0xff]  }
 0x944   :  { %7256 = vmatmul.mubr.bf16.gmra.mxu1 %v7094_v49  ;;  %7416 = vmatpush1.bf16.msra.mxu0 %v14765_v13  ;;  %v14783_v13 = vld [vmem:[%s20170_s14 + $0x3f0] ss:$8 sps:$4 sm:$0xff]   ;;  %v14780_v49 = vld [vmem:[%s20170_s14 + $0x360] ss:$8 sps:$4 sm:$0xff]  }
 0x945   :  { %7055 = vmatprep.mubr.bf16.mxu0 %v20255_v10  ;;  %7265 = vmatprep.mubr.bf16.mxu1 %v20255_v10 }
 0x946   :  { %7417 = vmatprep.subr.bf16.mxu0 %v14773_v59  ;;  %7626 = vmatpush1.bf16.msra.mxu1 %v14768_v42  ;;  %v14804_v59 = vld [vmem:[%s20170_s14 + $0x320] ss:$8 sps:$4 sm:$0xff]   ;;  %v14807_v42 = vld [vmem:[%s20170_s14 + $0x3b0] ss:$8 sps:$4 sm:$0xff]  }
 0x947   :  { %7627 = vmatprep.subr.bf16.mxu1 %v14776_v26  ;;  %v14819_v26 = vld [vmem:[%s20170_s14 + $0x300] ss:$8 sps:$4 sm:$0xff]  }
 0x948   :  { %7418 = vmatpush1.bf16.msra.mxu0 %v14771_v1  ;;  %v14816_v1 = vld [vmem:[%s20170_s14 + $0x390] ss:$8 sps:$4 sm:$0xff]  }
 0x949   :  { %7823 = vmatprep.subr.bf16.mxu0 %v14779_v35  ;;  %v7712_v35 = vld [vmem:[#allocation3 + $0xd] sm:$0xff] }
 0x94a   :  { %7628 = vmatpush1.bf16.msra.mxu1 %v14774_v30  ;;  %v7922_v30 = vld [vmem:[#allocation3 + $0xe] sm:$0xff] }
 0x94b   :  { %7056 = vmatmul.mubr.bf16.gmra.mxu0 %v6885_v19  ;;  %8033 = vmatprep.subr.bf16.mxu1 %v14785_v15  ;;  %v7923_v19 = vld [vmem:[#allocation3 + $0x16] sm:$0xff]  ;;  %v7721_v15 = vpack.c.bf16 %v7713_v16, %v7712_v35 }
 0x94c   :  { %7266 = vmatmul.mubr.bf16.gmra.mxu1 %v7095_v4  ;;  %7435 = vmatprep.mubr.bf16.mxu0 %v20255_v10  ;;  %v14825_v4 = vld [vmem:[%s20170_s14 + $0x470] ss:$8 sps:$4 sm:$0xff]   ;;  %v7931_v55 = vpack.c.bf16 %v7923_v19, %v7922_v30 }
 0x94d   :  { %7645 = vmatprep.mubr.bf16.mxu1 %v20255_v10 }
 0x953   :  { %7436 = vmatmul.mubr.bf16.vlgmr.msra.gmra.mxu0 %v7301_v21  ;;  %v14786_v21 = vld [vmem:[%s20170_s14 + $0x350] ss:$8 sps:$4 sm:$0xff]  }
 0x954   :  { %7646 = vmatmul.mubr.bf16.vlgmr.msra.gmra.mxu1 %v7511_v60  ;;  %7824 = vmatpush1.bf16.msra.mxu0 %v14777_v54  ;;  %v14795_v60 = vld [vmem:[%s20170_s14 + $0x3d0] ss:$8 sps:$4 sm:$0xff]   ;;  %v14830_v54 = vld [vmem:[%s20170_s14 + $0x464] ss:$8 sps:$4 sm:$0xff]  }
 0x955   :  { %7445 = vmatprep.mubr.bf16.mxu0 %v20255_v10  ;;  %7825 = vmatprep.subr.bf16.mxu0 %v14782_v57  ;;  %v14828_v57 = vld [vmem:[%s20170_s14 + $0x460] ss:$8 sps:$4 sm:$0xff]  }
 0x956   :  { %7655 = vmatprep.mubr.bf16.mxu1 %v20255_v10  ;;  %8034 = vmatpush1.bf16.msra.mxu1 %v14783_v13  ;;  %v7714_v13 = vld [vmem:[#allocation3 + $0x1d] sm:$0xff] }
 0x957   :  { %8035 = vmatprep.subr.bf16.mxu1 %v14791_v63  ;;  %v14833_v63 = vld [vmem:[%s20170_s14 + $0x454] ss:$8 sps:$4 sm:$0xff]  }
 0x958   :  { %7826 = vmatpush1.bf16.msra.mxu0 %v14780_v49  ;;  %v7715_v49 = vld [vmem:[#allocation3 + $0x25] sm:$0xff] }
 0x959   :  { %7827 = vmatprep.subr.bf16.mxu0 %v14788_v8  ;;  %v7924_v8 = vld [vmem:[#allocation3 + $0x1e] sm:$0xff] }
 0x95a   :  { %8036 = vmatpush1.bf16.msra.mxu1 %v14789_v6  ;;  %v7925_v6 = vld [vmem:[#allocation3 + $0x26] sm:$0xff] }
 0x95b   :  { %7446 = vmatmul.mubr.bf16.gmra.mxu0 %v7302_v28  ;;  %8037 = vmatprep.subr.bf16.mxu1 %v14797_v23  ;;  %v14798_v28 = vld [vmem:[%s20170_s14 + $0x330] ss:$8 sps:$4 sm:$0xff]   ;;  %v7932_v23 = vpack.c.bf16 %v7925_v6, %v7924_v8 }
 0x95c   :  { %7656 = vmatmul.mubr.bf16.gmra.mxu1 %v7512_v5  ;;  %7828 = vmatpush1.bf16.msra.mxu0 %v14786_v21  ;;  %v14809_v5 = vld [vmem:[%s20170_s14 + $0x3b4] ss:$8 sps:$4 sm:$0xff]   ;;  %v14831_v21 = vld [vmem:[%s20170_s14 + $0x450] ss:$8 sps:$4 sm:$0xff]  }
 0x95d   :  { %7455 = vmatprep.mubr.bf16.mxu0 %v20255_v10  ;;  %7829 = vmatprep.subr.bf16.mxu0 %v14794_v18  ;;  %v7722_v18 = vpack.c.bf16 %v7715_v49, %v7714_v13 }
 0x95e   :  { %7665 = vmatprep.mubr.bf16.mxu1 %v20255_v10  ;;  %8038 = vmatpush1.bf16.msra.mxu1 %v14795_v60  ;;  %v14836_v60 = vld [vmem:[%s20170_s14 + $0x444] ss:$8 sps:$4 sm:$0xff]  }
 0x95f   :  { %8039 = vmatprep.subr.bf16.mxu1 %v14803_v61  ;;  %v7716_v61 = vld [vmem:[#allocation3 + $0x2d] sm:$0xff] }
 0x960   :  { %7830 = vmatpush1.bf16.msra.mxu0 %v14792_v9  ;;  %v14834_v9 = vld [vmem:[%s20170_s14 + $0x440] ss:$8 sps:$4 sm:$0xff]  }
 0x961   :  { %7831 = vmatprep.subr.bf16.mxu0 %v14800_v22  ;;  %v14839_v22 = vld [vmem:[%s20170_s14 + $0x434] ss:$8 sps:$4 sm:$0xff]  }
 0x962   :  { %8040 = vmatpush1.bf16.msra.mxu1 %v14801_v11  ;;  %v7926_v11 = vld [vmem:[#allocation3 + $0x2e] sm:$0xff] }
 0x963   :  { %7456 = vmatmul.mubr.bf16.gmra.mxu0 %v7303_v24  ;;  %8041 = vmatprep.subr.bf16.mxu1 %v14809_v5  ;;  %v14810_v24 = vld [vmem:[%s20170_s14 + $0x3a0] ss:$8 sps:$4 sm:$0xff]   ;;  %v14837_v5 = vld [vmem:[%s20170_s14 + $0x430] ss:$8 sps:$4 sm:$0xff]  }
 0x964   :  { %7666 = vmatmul.mubr.bf16.gmra.mxu1 %v7513_v31  ;;  %7832 = vmatpush1.bf16.msra.mxu0 %v14798_v28  ;;  %v14821_v31 = vld [vmem:[%s20170_s14 + $0x304] ss:$8 sps:$4 sm:$0xff]  }
 0x965   :  { %7465 = vmatprep.mubr.bf16.mxu0 %v20255_v10  ;;  %7675 = vmatprep.mubr.bf16.mxu1 %v20255_v10  ;;  %v7717_v28 = vld [vmem:[#allocation3 + $0x35] sm:$0xff] }
 0x966   :  { %7833 = vmatprep.subr.bf16.mxu0 %v14806_v40  ;;  %8042 = vmatpush1.bf16.msra.mxu1 %v14807_v42  ;;  %v7927_v40 = vld [vmem:[#allocation3 + $0x36] sm:$0xff] }
 0x967   :  { %8043 = vmatprep.subr.bf16.mxu1 %v14812_v33  ;;  %v7933_v42 = vpack.c.bf16 %v7927_v40, %v7926_v11  ;;  %v14842_v33 = vld [vmem:[%s20170_s14 + $0x424] ss:$8 sps:$4 sm:$0xff]  }
 0x968   :  { %7834 = vmatpush1.bf16.msra.mxu0 %v14804_v59  ;;  %v7723_v59 = vpack.c.bf16 %v7717_v28, %v7716_v61 }
 0x969   :  { %7835 = vmatprep.subr.bf16.mxu0 %v14815_v20  ;;  %v14840_v20 = vld [vmem:[%s20170_s14 + $0x420] ss:$8 sps:$4 sm:$0xff]  }
 0x96a   :  { %8044 = vmatpush1.bf16.msra.mxu1 %v14810_v24  ;;  %v7718_v24 = vld [vmem:[#allocation3 + $0x3d] sm:$0xff] }
 0x96b   :  { %7466 = vmatmul.mubr.bf16.gmra.mxu0 %v7304_v46  ;;  %v7510_v46 = vld [vmem:[#allocation3 + $0x49] sm:$0xff]  ;;  %8045 = vmatprep.subr.bf16.mxu1 %v14818_v44 }
 0x96c   :  { %7676 = vmatmul.mubr.bf16.gmra.mxu1 %v7514_v48  ;;  %7836 = vmatpush1.bf16.msra.mxu0 %v14813_v38  ;;  %v7515_v48 = vpack.c.bf16 %v7510_v46, %v7510_v46  ;;  %v14845_v38 = vld [vmem:[%s20170_s14 + $0x414] ss:$8 sps:$4 sm:$0xff]   ;;  %v14848_v46 = vld [vmem:[%s20170_s14 + $0x404] ss:$8 sps:$4 sm:$0xff]  }
 0x96d   :  { %7475 = vmatprep.mubr.bf16.mxu0 %v20255_v10  ;;  %7685 = vmatprep.mubr.bf16.mxu1 %v20255_v10  ;;  %v7719_v44 = vld [vmem:[#allocation3 + $0x45] sm:$0xff] }
 0x96e   :  { %7837 = vmatprep.subr.bf16.mxu0 %v14821_v31  ;;  %8046 = vmatpush1.bf16.msra.mxu1 %v14816_v1  ;;  %v7928_v31 = vld [vmem:[#allocation3 + $0x3e] sm:$0xff]  ;;  %v7929_v1 = vld [vmem:[#allocation3 + $0x46] sm:$0xff] }
 0x96f   :  { %8047 = vmatprep.subr.bf16.mxu1 %v14824_v58  ;;  %v7724_v58 = vpack.c.bf16 %v7719_v44, %v7718_v24 }
 0x970   :  { %7838 = vmatpush1.bf16.msra.mxu0 %v14819_v26  ;;  %v14843_v26 = vld [vmem:[%s20170_s14 + $0x410] ss:$8 sps:$4 sm:$0xff]  }
 0x971   :  { %8243 = vmatprep.subr.bf16.mxu0 %v14827_v2  ;;  %v7934_v2 = vpack.c.bf16 %v7929_v1, %v7928_v31 }
 0x972   :  { %8048 = vmatpush1.bf16.msra.mxu1 %v14822_v25  ;;  %v14846_v25 = vld [vmem:[%s20170_s14 + $0x400] ss:$8 sps:$4 sm:$0xff]  }
 0x973   :  { %7476 = vmatmul.mubr.bf16.gmra.mxu0 %v7305_v14  ;;  %v7720_v14 = vld [vmem:[#allocation3 + $0x4d] sm:$0xff] }
 0x974   :  { %7686 = vmatmul.mubr.bf16.gmra.mxu1 %v7515_v48  ;;  %7855 = vmatprep.mubr.bf16.mxu0 %v20255_v10  ;;  %v7930_v48 = vld [vmem:[#allocation3 + $0x4e] sm:$0xff]  ;;  %v7725_v35 = vpack.c.bf16 %v7720_v14, %v7720_v14 }
 0x975   :  { %8065 = vmatprep.mubr.bf16.mxu1 %v20255_v10  ;;  %v7935_v16 = vpack.c.bf16 %v7930_v48, %v7930_v48 }
 0x97b   :  { %7856 = vmatmul.mubr.bf16.vlgmr.msra.gmra.mxu0 %v7721_v15 }
 0x97c   :  { %8066 = vmatmul.mubr.bf16.vlgmr.msra.gmra.mxu1 %v7931_v55  ;;  %8244 = vmatpush1.bf16.msra.mxu0 %v14825_v4 }
 0x97d   :  { %7865 = vmatprep.mubr.bf16.mxu0 %v20255_v10  ;;  %8245 = vmatprep.subr.bf16.mxu0 %v14830_v54 }
 0x97e   :  { %8075 = vmatprep.mubr.bf16.mxu1 %v20255_v10 }
 0x980   :  { %8246 = vmatpush1.bf16.msra.mxu0 %v14828_v57 }
 0x981   :  { %8247 = vmatprep.subr.bf16.mxu0 %v14833_v63 }
 0x983   :  { %7866 = vmatmul.mubr.bf16.gmra.mxu0 %v7722_v18 }
 0x984   :  { %8076 = vmatmul.mubr.bf16.gmra.mxu1 %v7932_v23  ;;  %8248 = vmatpush1.bf16.msra.mxu0 %v14831_v21 }
 0x985   :  { %7875 = vmatprep.mubr.bf16.mxu0 %v20255_v10  ;;  %8249 = vmatprep.subr.bf16.mxu0 %v14836_v60 }
 0x986   :  { %8085 = vmatprep.mubr.bf16.mxu1 %v20255_v10 }
 0x988   :  { %8250 = vmatpush1.bf16.msra.mxu0 %v14834_v9 }
 0x989   :  { %8251 = vmatprep.subr.bf16.mxu0 %v14839_v22 }
 0x98b   :  { %7876 = vmatmul.mubr.bf16.gmra.mxu0 %v7723_v59 }
 0x98c   :  { %8086 = vmatmul.mubr.bf16.gmra.mxu1 %v7933_v42  ;;  %8252 = vmatpush1.bf16.msra.mxu0 %v14837_v5 }
 0x98d   :  { %7885 = vmatprep.mubr.bf16.mxu0 %v20255_v10  ;;  %8095 = vmatprep.mubr.bf16.mxu1 %v20255_v10 }
 0x98e   :  { %8253 = vmatprep.subr.bf16.mxu0 %v14842_v33 }
 0x990   :  { %8254 = vmatpush1.bf16.msra.mxu0 %v14840_v20 }
 0x991   :  { %8255 = vmatprep.subr.bf16.mxu0 %v14845_v38 }
 0x993   :  { %7886 = vmatmul.mubr.bf16.gmra.mxu0 %v7724_v58 }
 0x994   :  { %8096 = vmatmul.mubr.bf16.gmra.mxu1 %v7934_v2  ;;  %8256 = vmatpush1.bf16.msra.mxu0 %v14843_v26 }
 0x995   :  { %7895 = vmatprep.mubr.bf16.mxu0 %v20255_v10  ;;  %8105 = vmatprep.mubr.bf16.mxu1 %v20255_v10 }
 0x996   :  { %8257 = vmatprep.subr.bf16.mxu0 %v14848_v46 }
 0x998   :  { %8258 = vmatpush1.bf16.msra.mxu0 %v14846_v25 }
 0x99b   :  { %7896 = vmatmul.mubr.bf16.gmra.mxu0 %v7725_v35 }
 0x99c   :  { %8106 = vmatmul.mubr.bf16.gmra.mxu1 %v7935_v16  ;;  %8275 = vmatprep.mubr.bf16.mxu0 %v20255_v10 }
 0x9a3   :  { %8276 = vmatmul.mubr.bf16.vlgmr.msra.gmra.mxu0 %v8141_v7 }
 0x9a4   :  { %8285 = vmatprep.mubr.bf16.mxu0 %v20255_v10 }
 0x9ab   :  { %8286 = vmatmul.mubr.bf16.gmra.mxu0 %v8142_v62 }
 0x9ac   :  { %8295 = vmatprep.mubr.bf16.mxu0 %v20255_v10 }
 0x9b3   :  { %8296 = vmatmul.mubr.bf16.gmra.mxu0 %v8143_v17 }
 0x9b4   :  { %8305 = vmatprep.mubr.bf16.mxu0 %v20255_v10 }
 0x9bb   :  { %8306 = vmatmul.mubr.bf16.gmra.mxu0 %v8144_v39 }
 0x9bc   :  { %8315 = vmatprep.mubr.bf16.mxu0 %v20255_v10 }
 0x9c3   :  { %v6664_v7 = vpop.f32.mrf.mxu0  ;;  %8316 = vmatmul.mubr.bf16.gmra.mxu0 %v8145_v36 }
 0x9c4   :  { %v6825_v30 = vpop.f32.mrf.mxu1 }
 0x9c5   :  { %v6826_v45 = vadd.f32 %v6825_v30, %v6664_v7  ;;  %v6666_v0 = vpop.f32.mrf.mxu0 }
 0x9c6   :  { %v6827_v62 = vpop.f32.mrf.mxu1 }
 0x9c7   :  { %v6828_v19 = vadd.f32 %v6827_v62, %v6666_v0  ;;  %v6668_v4 = vpop.f32.mrf.mxu0 }
 0x9c8   :  { %v6829_v53 = vpop.f32.mrf.mxu1 }
 0x9c9   :  { %v6830_v51 = vadd.f32 %v6829_v53, %v6668_v4  ;;  %v18444_v17 = vpop.f32.mrf.mxu0 }
 0x9ca   :  { %v18446_v15 = vpop.f32.mrf.mxu1 }
 0x9cb   :  { %v6674_v37 = vpop.f32.mrf.mxu0 }
 0x9cc   :  { %v6835_v52 = vpop.f32.mrf.mxu1 }
 0x9cd   :  { %v6836_v39 = vadd.f32 %v6835_v52, %v6674_v37  ;;  %v6676_v10 = vpop.f32.mrf.mxu0 }
 0x9ce   :  { %v6837_v55 = vpop.f32.mrf.mxu1 }
 0x9cf   :  { %v6838_v54 = vadd.f32 %v6837_v55, %v6676_v10  ;;  %v6678_v57 = vpop.f32.mrf.mxu0 }
 0x9d0   :  { %v6839_v13 = vpop.f32.mrf.mxu1 }
 0x9d1   :  { %v6840_v63 = vadd.f32 %v6839_v13, %v6678_v57  ;;  %v18448_v49 = vpop.f32.mrf.mxu0 }
 0x9d2   :  { %v18450_v8 = vpop.f32.mrf.mxu1 }
 0x9d3   :  { %v6684_v6 = vpop.f32.mrf.mxu0 }
 0x9d4   :  { %v6845_v21 = vpop.f32.mrf.mxu1 }
 0x9d5   :  { %v6846_v18 = vadd.f32 %v6845_v21, %v6684_v6  ;;  %v6686_v23 = vpop.f32.mrf.mxu0 }
 0x9d6   :  { %v6847_v60 = vpop.f32.mrf.mxu1 }
 0x9d7   :  { %v6848_v9 = vadd.f32 %v6847_v60, %v6686_v23  ;;  %v6688_v61 = vpop.f32.mrf.mxu0 }
 0x9d8   :  { %v6849_v22 = vpop.f32.mrf.mxu1 }
 0x9d9   :  { %v6850_v28 = vadd.f32 %v6849_v22, %v6688_v61  ;;  %v18452_v11 = vpop.f32.mrf.mxu0 }
 0x9da   :  { %v18454_v40 = vpop.f32.mrf.mxu1 }
 0x9db   :  { %v6694_v5 = vpop.f32.mrf.mxu0 }
 0x9dc   :  { %v6855_v59 = vpop.f32.mrf.mxu1 }
 0x9dd   :  { %v18456_v42 = vadd.f32 %v6855_v59, %v6694_v5  ;;  %v6696_v33 = vpop.f32.mrf.mxu0 }
 0x9de   :  { %v6857_v20 = vpop.f32.mrf.mxu1 }
 0x9df   :  { %v18458_v24 = vadd.f32 %v6857_v20, %v6696_v33  ;;  %v6698_v38 = vpop.f32.mrf.mxu0 }
 0x9e0   :  { %v6859_v44 = vpop.f32.mrf.mxu1 }
 0x9e1   :  { %v18460_v31 = vadd.f32 %v6859_v44, %v6698_v38  ;;  %v18462_v1 = vpop.f32.mrf.mxu0 }
 0x9e2   :  { %v18464_v26 = vpop.f32.mrf.mxu1 }
 0x9e3   :  { %v6704_v58 = vpop.f32.mrf.mxu0 }
 0x9e4   :  { %v6865_v2 = vpop.f32.mrf.mxu1 }
 0x9e5   :  { %v18466_v46 = vadd.f32 %v6865_v2, %v6704_v58  ;;  %v6706_v25 = vpop.f32.mrf.mxu0 }
 0x9e6   :  { %v6867_v14 = vpop.f32.mrf.mxu1 }
 0x9e7   :  { %v18468_v48 = vadd.f32 %v6867_v14, %v6706_v25  ;;  %v6708_v35 = vpop.f32.mrf.mxu0 }
 0x9e8   :  { %v6869_v16 = vpop.f32.mrf.mxu1 }
 0x9e9   :  { %v6709_v43 = vpop.f32.mrf.mxu0 }
 0x9ea   :  { %v6870_v36 = vpop.f32.mrf.mxu1 }
 0x9eb   :  { %v7017_v7 = vpop.f32.mrf.mxu0 }
 0x9ec   :  { %v7227_v30 = vpop.f32.mrf.mxu1  ;;  %v7064_v0 = vadd.f32 %v7017_v7, %v6826_v45 }
 0x9ed   :  { %v7019_v62 = vpop.f32.mrf.mxu0 }
 0x9ee   :  { %v7229_v4 = vpop.f32.mrf.mxu1  ;;  %v18470_v53 = vadd.f32 %v7227_v30, %v7064_v0  ;;  %v7065_v37 = vadd.f32 %v7019_v62, %v6828_v19 }
 0x9ef   :  { %v7021_v52 = vpop.f32.mrf.mxu0 }
 0x9f0   :  { %v7231_v10 = vpop.f32.mrf.mxu1  ;;  %v18472_v55 = vadd.f32 %v7229_v4, %v7065_v37  ;;  %v7066_v57 = vadd.f32 %v7021_v52, %v6830_v51 }
 0x9f1   :  { %v18474_v13 = vpop.f32.mrf.mxu0 }
 0x9f2   :  { %v18476_v6 = vpop.f32.mrf.mxu1  ;;  %v18478_v21 = vadd.f32 %v7231_v10, %v7066_v57 }
 0x9f3   :  { %v7027_v23 = vpop.f32.mrf.mxu0 }
 0x9f4   :  { %v7237_v60 = vpop.f32.mrf.mxu1  ;;  %v7068_v61 = vadd.f32 %v7027_v23, %v6836_v39 }
 0x9f5   :  { %v7029_v45 = vpop.f32.mrf.mxu0 }
 0x9f6   :  { %v7239_v22 = vpop.f32.mrf.mxu1  ;;  %v18480_v5 = vadd.f32 %v7237_v60, %v7068_v61  ;;  %v7069_v59 = vadd.f32 %v7029_v45, %v6838_v54 }
 0x9f7   :  { %v7031_v19 = vpop.f32.mrf.mxu0 }
 0x9f8   :  { %v7241_v33 = vpop.f32.mrf.mxu1  ;;  %v18482_v20 = vadd.f32 %v7239_v22, %v7069_v59  ;;  %v7070_v38 = vadd.f32 %v7031_v19, %v6840_v63 }
 0x9f9   :  { %v18484_v51 = vpop.f32.mrf.mxu0 }
 0x9fa   :  { %v18486_v44 = vpop.f32.mrf.mxu1  ;;  %v18488_v58 = vadd.f32 %v7241_v33, %v7070_v38 }
 0x9fb   :  { %v7037_v2 = vpop.f32.mrf.mxu0 }
 0x9fc   :  { %v7247_v25 = vpop.f32.mrf.mxu1  ;;  %v7072_v14 = vadd.f32 %v7037_v2, %v6846_v18 }
 0x9fd   :  { %v7039_v39 = vpop.f32.mrf.mxu0 }
 0x9fe   :  { %v7249_v35 = vpop.f32.mrf.mxu1  ;;  %v18490_v16 = vadd.f32 %v7247_v25, %v7072_v14  ;;  %v7073_v43 = vadd.f32 %v7039_v39, %v6848_v9 }
 0x9ff   :  { %v7041_v54 = vpop.f32.mrf.mxu0 }
 0xa00   :  { %v7251_v36 = vpop.f32.mrf.mxu1  ;;  %v18492_v7 = vadd.f32 %v7249_v35, %v7073_v43  ;;  %v7074_v30 = vadd.f32 %v7041_v54, %v6850_v28 }
 0xa01   :  { %v18494_v63 = vpop.f32.mrf.mxu0 }
 0xa02   :  { %v18496_v0 = vpop.f32.mrf.mxu1  ;;  %v18498_v62 = vadd.f32 %v7251_v36, %v7074_v30 }
 0xa03   :  { %v7047_v4 = vpop.f32.mrf.mxu0 }
 0xa04   :  { %v7257_v37 = vpop.f32.mrf.mxu1  ;;  %v7076_v18 = vadd.f32 %v7047_v4, %v18456_v42 }
 0xa05   :  { %v7049_v52 = vpop.f32.mrf.mxu0 }
 0xa06   :  { %v7259_v10 = vpop.f32.mrf.mxu1  ;;  %v18501_v57 = vadd.f32 %v7257_v37, %v7076_v18  ;;  %v7077_v9 = vadd.f32 %v7049_v52, %v18458_v24 }
 0xa07   :  { %v7051_v23 = vpop.f32.mrf.mxu0 }
 0xa08   :  { %v7261_v60 = vpop.f32.mrf.mxu1  ;;  %v18504_v61 = vadd.f32 %v7259_v10, %v7077_v9  ;;  %v7078_v28 = vadd.f32 %v7051_v23, %v18460_v31 }
 0xa09   :  { %v18507_v45 = vpop.f32.mrf.mxu0 }
 0xa0a   :  { %v18509_v22 = vpop.f32.mrf.mxu1  ;;  %v18511_v59 = vadd.f32 %v7261_v60, %v7078_v28 }
 0xa0b   :  { %v7057_v19 = vpop.f32.mrf.mxu0 }
 0xa0c   :  { %v7267_v42 = vpop.f32.mrf.mxu1  ;;  %v7080_v33 = vadd.f32 %v7057_v19, %v18466_v46 }
 0xa0d   :  { %v7059_v38 = vpop.f32.mrf.mxu0 }
 0xa0e   :  { %v7269_v2 = vpop.f32.mrf.mxu1  ;;  %v18514_v25 = vadd.f32 %v7267_v42, %v7080_v33  ;;  %v7081_v24 = vadd.f32 %v7059_v38, %v18468_v48 }
 0xa0f   :  { %v7061_v14 = vpop.f32.mrf.mxu0 }
 0xa10   :  { %v7271_v39 = vpop.f32.mrf.mxu1  ;;  %v18517_v35 = vadd.f32 %v7269_v2, %v7081_v24 }
 0xa11   :  { %v7062_v31 = vpop.f32.mrf.mxu0 }
 0xa12   :  { %v7272_v43 = vpop.f32.mrf.mxu1 }
 0xa13   :  { %v7437_v54 = vpop.f32.mrf.mxu0 }
 0xa14   :  { %v7647_v36 = vpop.f32.mrf.mxu1  ;;  %v7484_v30 = vadd.f32 %v7437_v54, %v18470_v53 }
 0xa15   :  { %v7439_v4 = vpop.f32.mrf.mxu0 }
 0xa16   :  { %v7649_v37 = vpop.f32.mrf.mxu1  ;;  %v18520_v18 = vadd.f32 %v7647_v36, %v7484_v30  ;;  %v7485_v46 = vadd.f32 %v7439_v4, %v18472_v55 }
 0xa17   :  { %v7441_v52 = vpop.f32.mrf.mxu0 }
 0xa18   :  { %v7651_v10 = vpop.f32.mrf.mxu1  ;;  %v18523_v9 = vadd.f32 %v7649_v37, %v7485_v46  ;;  %v7486_v48 = vadd.f32 %v7441_v52, %v18478_v21 }
 0xa19   :  { %v18526_v23 = vpop.f32.mrf.mxu0 }
 0xa1a   :  { %v18528_v60 = vpop.f32.mrf.mxu1  ;;  %v18530_v28 = vadd.f32 %v7651_v10, %v7486_v48 }
 0xa1b   :  { %v7447_v19 = vpop.f32.mrf.mxu0 }
 0xa1c   :  { %v7657_v53 = vpop.f32.mrf.mxu1  ;;  %v7488_v42 = vadd.f32 %v7447_v19, %v18480_v5 }
 0xa1d   :  { %v7449_v33 = vpop.f32.mrf.mxu0 }
 0xa1e   :  { %v7659_v38 = vpop.f32.mrf.mxu1  ;;  %v18533_v2 = vadd.f32 %v7657_v53, %v7488_v42  ;;  %v7489_v55 = vadd.f32 %v7449_v33, %v18482_v20 }
 0xa1f   :  { %v7451_v24 = vpop.f32.mrf.mxu0 }
 0xa20   :  { %v7661_v14 = vpop.f32.mrf.mxu1  ;;  %v18536_v39 = vadd.f32 %v7659_v38, %v7489_v55  ;;  %v7490_v21 = vadd.f32 %v7451_v24, %v18488_v58 }
 0xa21   :  { %v18539_v31 = vpop.f32.mrf.mxu0 }
 0xa22   :  { %v18541_v43 = vpop.f32.mrf.mxu1  ;;  %v18543_v54 = vadd.f32 %v7661_v14, %v7490_v21 }
 0xa23   :  { %v7457_v36 = vpop.f32.mrf.mxu0 }
 0xa24   :  { %v7667_v5 = vpop.f32.mrf.mxu1  ;;  %v7492_v30 = vadd.f32 %v7457_v36, %v18490_v16 }
 0xa25   :  { %v7459_v4 = vpop.f32.mrf.mxu0 }
 0xa26   :  { %v7669_v37 = vpop.f32.mrf.mxu1  ;;  %v18546_v46 = vadd.f32 %v7667_v5, %v7492_v30  ;;  %v7493_v20 = vadd.f32 %v7459_v4, %v18492_v7 }
 0xa27   :  { %v7461_v52 = vpop.f32.mrf.mxu0 }
 0xa28   :  { %v7671_v10 = vpop.f32.mrf.mxu1  ;;  %v18549_v48 = vadd.f32 %v7669_v37, %v7493_v20  ;;  %v7494_v58 = vadd.f32 %v7461_v52, %v18498_v62 }
 0xa29   :  { %v18552_v19 = vpop.f32.mrf.mxu0 }
 0xa2a   :  { %v18554_v53 = vpop.f32.mrf.mxu1  ;;  %v18556_v42 = vadd.f32 %v7671_v10, %v7494_v58 }
 0xa2b   :  { %v7467_v33 = vpop.f32.mrf.mxu0 }
 0xa2c   :  { %v7677_v16 = vpop.f32.mrf.mxu1  ;;  %v7496_v38 = vadd.f32 %v7467_v33, %v18501_v57 }
 0xa2d   :  { %v7469_v55 = vpop.f32.mrf.mxu0 }
 0xa2e   :  { %v7679_v24 = vpop.f32.mrf.mxu1  ;;  %v18559_v14 = vadd.f32 %v7677_v16, %v7496_v38  ;;  %v7497_v7 = vadd.f32 %v7469_v55, %v18504_v61 }
 0xa2f   :  { %v7471_v21 = vpop.f32.mrf.mxu0 }
 0xa30   :  { %20256 = vst [vmem:[#allocation22_spill] sm:$0xff] %v18559_v14  ;;  %v7681_v36 = vpop.f32.mrf.mxu1  ;;  %v18562_v5 = vadd.f32 %v7679_v24, %v7497_v7  ;;  %v7498_v62 = vadd.f32 %v7471_v21, %v18511_v59 }
 0xa31   :  { %v18565_v30 = vpop.f32.mrf.mxu0 }
 0xa32   :  { %20257 = vst [vmem:[#allocation23_spill] sm:$0xff] %v18562_v5  ;;  %v18567_v4 = vpop.f32.mrf.mxu1  ;;  %v18569_v37 = vadd.f32 %v7681_v36, %v7498_v62 }
 0xa33   :  { %v7477_v20 = vpop.f32.mrf.mxu0 }
 0xa34   :  { %20258 = vst [vmem:[#allocation24_spill] sm:$0xff] %v18569_v37  ;;  %v7687_v57 = vpop.f32.mrf.mxu1  ;;  %v7500_v52 = vadd.f32 %v7477_v20, %v18514_v25 }
 0xa35   :  { %v7479_v10 = vpop.f32.mrf.mxu0 }
 0xa36   :  { %v7689_v58 = vpop.f32.mrf.mxu1  ;;  %v18572_v33 = vadd.f32 %v7687_v57, %v7500_v52  ;;  %v7501_v61 = vadd.f32 %v7479_v10, %v18517_v35 }
 0xa37   :  { %v7481_v16 = vpop.f32.mrf.mxu0 }
 0xa38   :  { %20259 = vst [vmem:[#allocation25_spill] sm:$0xff] %v18572_v33  ;;  %v7691_v38 = vpop.f32.mrf.mxu1  ;;  %v18575_v55 = vadd.f32 %v7689_v58, %v7501_v61 }
 0xa39   :  { %v7482_v59 = vpop.f32.mrf.mxu0 }
 0xa3a   :  { %20260 = vst [vmem:[#allocation26_spill] sm:$0xff] %v18575_v55  ;;  %v7692_v24 = vpop.f32.mrf.mxu1 }
 0xa3b   :  { %v18577_v7 = vpop.f32.mrf.mxu0 }
 0xa3c   :  { %v18579_v21 = vpop.f32.mrf.mxu1 }
 0xa3d   :  { %v18581_v36 = vpop.f32.mrf.mxu0 }
 0xa3e   :  { %v18583_v62 = vpop.f32.mrf.mxu1 }
 0xa3f   :  { %v7861_v25 = vpop.f32.mrf.mxu0 }
 0xa40   :  { %v18585_v20 = vpop.f32.mrf.mxu1 }
 0xa41   :  { %v7863_v57 = vpop.f32.mrf.mxu0 }
 0xa42   :  { %v18587_v52 = vpop.f32.mrf.mxu1 }
 0xa43   :  { %v7867_v35 = vpop.f32.mrf.mxu0 }
 0xa44   :  { %v18589_v10 = vpop.f32.mrf.mxu1 }
 0xa45   :  { %v7869_v58 = vpop.f32.mrf.mxu0 }
 0xa46   :  { %v18591_v61 = vpop.f32.mrf.mxu1 }
 0xa47   :  { %v7871_v16 = vpop.f32.mrf.mxu0 }
 0xa48   :  { %v18593_v38 = vpop.f32.mrf.mxu1 }
 0xa49   :  { %v18595_v59 = vpop.f32.mrf.mxu0 }
 0xa4a   :  { %v18597_v24 = vpop.f32.mrf.mxu1 }
 0xa4b   :  { %20261 = vst [vmem:[#allocation27_spill] sm:$0xff] %v18597_v24  ;;  %v18599_v47 = vpop.f32.mrf.mxu0 }
 0xa4c   :  { %v18601_v3 = vpop.f32.mrf.mxu1 }
 0xa4d   :  { %20262 = vst [vmem:[#allocation28_spill] sm:$0xff] %v18601_v3  ;;  %v18603_v50 = vpop.f32.mrf.mxu0 }
 0xa4e   :  { %v18605_v56 = vpop.f32.mrf.mxu1 }
 0xa4f   :  { %20263 = vst [vmem:[#allocation29_spill] sm:$0xff] %v18605_v56  ;;  %v18607_v55 = vpop.f32.mrf.mxu0 }
 0xa50   :  { %v18609_v12 = vpop.f32.mrf.mxu1 }
 0xa51   :  { %20264 = vst [vmem:[#allocation30_spill] sm:$0xff] %v18609_v12  ;;  %v18611_v33 = vpop.f32.mrf.mxu0 }
 0xa52   :  { %v18613_v41 = vpop.f32.mrf.mxu1 }
 0xa53   :  { %20265 = vst [vmem:[#allocation31_spill] sm:$0xff] %v18613_v41  ;;  %v18615_v34 = vpop.f32.mrf.mxu0 }
 0xa54   :  { %20266 = vst [vmem:[#allocation32_spill] sm:$0xff] %v18615_v34  ;;  %v18617_v37 = vpop.f32.mrf.mxu1 }
 0xa55   :  { %20267 = vst [vmem:[#allocation33_spill] sm:$0xff] %v18617_v37  ;;  %v18619_v29 = vpop.f32.mrf.mxu0  ;;  %v6832_v37 = vadd.f32 %v18446_v15, %v18444_v17 }
 0xa56   :  { %20268 = vst [vmem:[#allocation34_spill] sm:$0xff] %v18619_v29  ;;  %v18621_v27 = vpop.f32.mrf.mxu1 }
 0xa57   :  { %20269 = vst [vmem:[#allocation35_spill] sm:$0xff] %v18621_v27  ;;  %v18623_v5 = vpop.f32.mrf.mxu0 }
 0xa58   :  { %20270 = vst [vmem:[#allocation36_spill] sm:$0xff] %v18623_v5  ;;  %v18625_v32 = vpop.f32.mrf.mxu1  ;;  %v7067_v5 = vadd.f32 %v18474_v13, %v6832_v37  ;;  %v7914_v37 = vadd.f32 %v18607_v55, %v18556_v42  ;;  %v20280_v55 = vld [vmem:[#allocation28_spill] sm:$0xff] }
 0xa59   :  { %20271 = vst [vmem:[#allocation37_spill] sm:$0xff] %v18625_v32  ;;  %v18627_v56 = vpop.f32.mrf.mxu0 }
 0xa5a   :  { %20272 = vst [vmem:[#allocation38_spill] sm:$0xff] %v18627_v56  ;;  %v18629_v3 = vpop.f32.mrf.mxu1 }
 0xa5b   :  { %20273 = vst [vmem:[#allocation39_spill] sm:$0xff] %v18629_v3  ;;  %v18631_v12 = vpop.f32.mrf.mxu0  ;;  %v6842_v3 = vadd.f32 %v18450_v8, %v18448_v49 }
 0xa5c   :  { %v18633_v14 = vpop.f32.mrf.mxu1 }
 0xa5d   :  { %20274 = vst [vmem:[#allocation40_spill] sm:$0xff] %v18633_v14  ;;  %v18635_v41 = vpop.f32.mrf.mxu0  ;;  %v6852_v14 = vadd.f32 %v18454_v40, %v18452_v11  ;;  %v7071_v17 = vadd.f32 %v18484_v51, %v6842_v3  ;;  %v7906_v51 = vadd.f32 %v7861_v25, %v18530_v28 }
 0xa5e   :  { %20275 = vst [vmem:[#allocation41_spill] sm:$0xff] %v18635_v41  ;;  %v18637_v34 = vpop.f32.mrf.mxu1  ;;  %v6862_v41 = vadd.f32 %v18464_v26, %v18462_v1 }
 0xa5f   :  { %20276 = vst [vmem:[#allocation42_spill] sm:$0xff] %v18637_v34  ;;  %v7901_v27 = vpop.f32.mrf.mxu0  ;;  %v7277_v34 = vadd.f32 %v18476_v6, %v7067_v5  ;;  %v7281_v49 = vadd.f32 %v18486_v44, %v7071_v17  ;;  %v8116_v28 = vadd.f32 %v18585_v20, %v7906_v51  ;;  %v20278_v20 = vld [vmem:[#allocation22_spill] sm:$0xff] }
 0xa60   :  { %v8111_v29 = vpop.f32.mrf.mxu1  ;;  %v20285_v17 = vld [vmem:[#allocation34_spill] sm:$0xff] }
 0xa61   :  { %v7902_v32 = vpop.f32.mrf.mxu0  ;;  %v7075_v29 = vadd.f32 %v18494_v63, %v6852_v14  ;;  %v7487_v15 = vadd.f32 %v18526_v23, %v7277_v34  ;;  %v7491_v26 = vadd.f32 %v18539_v31, %v7281_v49  ;;  %v7904_v34 = vadd.f32 %v18577_v7, %v18520_v18 }
 0xa62   :  { %v8112_v24 = vpop.f32.mrf.mxu1  ;;  %v7079_v32 = vadd.f32 %v18507_v45, %v6862_v41  ;;  %v7909_v23 = vadd.f32 %v7869_v58, %v18536_v39  ;;  %v7912_v39 = vadd.f32 %v18599_v47, %v18546_v46  ;;  %v20281_v58 = vld [vmem:[#allocation29_spill] sm:$0xff] }
 0xa63   :  { %v8277_v56 = vpop.f32.mrf.mxu0  ;;  %v7285_v11 = vadd.f32 %v18496_v0, %v7075_v29  ;;  %v7697_v1 = vadd.f32 %v18528_v60, %v7487_v15  ;;  %v7908_v0 = vadd.f32 %v7867_v35, %v18533_v2  ;;  %v7701_v45 = vadd.f32 %v18541_v43, %v7491_v26  ;;  %v20284_v24 = vld [vmem:[#allocation23_spill] sm:$0xff] }
 0xa64   :  { %v7289_v40 = vadd.f32 %v18509_v22, %v7079_v32  ;;  %v7905_v22 = vadd.f32 %v18581_v36, %v18523_v9  ;;  %v8114_v14 = vadd.f32 %v18579_v21, %v7904_v34  ;;  %v7917_v29 = vadd.f32 %v20285_v17, %v20284_v24 }
 0xa65   :  { %v8279_v27 = vpop.f32.mrf.mxu0  ;;  %v7495_v6 = vadd.f32 %v18552_v19, %v7285_v11  ;;  %v7907_v44 = vadd.f32 %v7863_v57, %v7697_v1  ;;  %v7910_v19 = vadd.f32 %v7871_v16, %v18543_v54  ;;  %v7911_v43 = vadd.f32 %v18595_v59, %v7701_v45  ;;  %v20282_v16 = vld [vmem:[#allocation13_spill] sm:$0xff] }
 0xa66   :  { %v7499_v41 = vadd.f32 %v18565_v30, %v7289_v40  ;;  %v8118_v9 = vadd.f32 %v18589_v10, %v7908_v0  ;;  %v8115_v54 = vadd.f32 %v18583_v62, %v7905_v22  ;;  %v18690_v47 = vadd.f32 %v8277_v56, %v8114_v14  ;;  %v20279_v62 = vld [vmem:[#allocation32_spill] sm:$0xff]  ;;  %v20294_v14 = vld [vmem:[#allocation38_spill] sm:$0xff] }
 0xa67   :  { %v8281_v13 = vpop.f32.mrf.mxu0  ;;  %v7705_v31 = vadd.f32 %v18554_v53, %v7495_v6  ;;  %v8117_v2 = vadd.f32 %v18587_v52, %v7907_v44  ;;  %v7913_v53 = vadd.f32 %v18603_v50, %v18549_v48  ;;  %v8120_v36 = vadd.f32 %v18593_v38, %v7910_v19  ;;  %v20277_v50 = vld [vmem:[#allocation27_spill] sm:$0xff]  ;;  %v20283_v38 = vld [vmem:[#allocation30_spill] sm:$0xff]  ;;  %v20288_v40 = vld [vmem:[#allocation12_spill] sm:$0xff] }
 0xa68   :  { %v7709_v18 = vadd.f32 %v18567_v4, %v7499_v41  ;;  %v18680_v30 = vadd.f32 %v8281_v13, %v8116_v28  ;;  %v8119_v4 = vadd.f32 %v18591_v61, %v7909_v23  ;;  %v8121_v48 = vadd.f32 %v20277_v50, %v7911_v43  ;;  %v20286_v13 = vld [vmem:[#allocation31_spill] sm:$0xff]  ;;  %v20291_v0 = vld [vmem:[#allocation36_spill] sm:$0xff]  ;;  %v20292_v23 = vld [vmem:[#allocation14_spill] sm:$0xff] }
 0xa69   :  { %v8283_v8 = vpop.f32.mrf.mxu0  ;;  %v7915_v25 = vadd.f32 %v18611_v33, %v7705_v31  ;;  %v7916_v57 = vadd.f32 %v20279_v62, %v20278_v20  ;;  %v18697_v52 = vadd.f32 %v8279_v27, %v8115_v54  ;;  %v8122_v10 = vadd.f32 %v20280_v55, %v7912_v39  ;;  %v20293_v28 = vld [vmem:[#allocation35_spill] sm:$0xff] }
 0xa6a   :  { %v18686_v7 = vadd.f32 %v8283_v8, %v8117_v2  ;;  %v8123_v61 = vadd.f32 %v20281_v58, %v7913_v53  ;;  %v8346_v56 = vmul.f32 %v18680_v30, %v20282_v16  ;;  %v8124_v59 = vadd.f32 %v20283_v38, %v7914_v37  ;;  %v20287_v8 = vld [vmem:[#allocation11_spill] sm:$0xff] }
 0xa6b   :  { %v8287_v3 = vpop.f32.mrf.mxu0  ;;  %v8125_v49 = vadd.f32 %v20286_v13, %v7915_v25  ;;  %v8344_v11 = vmul.f32 %v18690_v47, %v20287_v8  ;;  %v8345_v51 = vmul.f32 %v18697_v52, %v20287_v8  ;;  %v8127_v19 = vadd.f32 %v20293_v28, %v7917_v29  ;;  %v20295_v53 = vld [vmem:[#allocation15_spill] sm:$0xff]  ;;  %v20302_v29 = vld [vmem:[#allocation17_spill] sm:$0xff]  ;;  %v20303_v13 = vld [vmem:[#allocation40_spill] sm:$0xff] }
 0xa6c   :  { %v18692_v46 = vadd.f32 %v8287_v3, %v8118_v9  ;;  %v8347_v27 = vmul.f32 %v18686_v7, %v20282_v16  ;;  %v20289_v3 = vld [vmem:[#allocation33_spill] sm:$0xff]  ;;  %v7919_v2 = vadd.f32 %v20294_v14, %v7709_v18 }
 0xa6d   :  { %v8289_v63 = vpop.f32.mrf.mxu0  ;;  %v8126_v6 = vadd.f32 %v20289_v3, %v7916_v57  ;;  %v8362_v22 = vadd.f32 %v8346_v56, %v8344_v11  ;;  %v20298_v57 = vld [vmem:[#allocation16_spill] sm:$0xff]  ;;  %v20301_v56 = vld [vmem:[#allocation41_spill] sm:$0xff] }
 0xa6e   :  { %v18699_v35 = vadd.f32 %v8289_v63, %v8119_v4  ;;  %v8348_v1 = vmul.f32 %v18692_v46, %v20288_v40  ;;  %v20290_v63 = vld [vmem:[#allocation24_spill] sm:$0xff]  ;;  %v8376_v43 = vadd.f32 %v8347_v27, %v8345_v51  ;;  %v20304_v51 = vld [vmem:[#allocation18_spill] sm:$0xff] }
 0xa6f   :  { %v8291_v60 = vpop.f32.mrf.mxu0  ;;  %v7918_v45 = vadd.f32 %v20291_v0, %v20290_v63  ;;  %v20305_v63 = vld [vmem:[#allocation42_spill] sm:$0xff] }
 0xa70   :  { %v18705_v33 = vadd.f32 %v8291_v60, %v8120_v36  ;;  %v8349_v41 = vmul.f32 %v18699_v35, %v20288_v40  ;;  %v8363_v39 = vadd.f32 %v8362_v22, %v8348_v1 }
 0xa71   :  { %v8293_v5 = vpop.f32.mrf.mxu0 }
 0xa72   :  { %v18712_v32 = vadd.f32 %v8293_v5, %v8121_v48  ;;  %v8350_v60 = vmul.f32 %v18705_v33, %v20292_v23  ;;  %v8377_v25 = vadd.f32 %v8376_v43, %v8349_v41  ;;  %v20297_v48 = vld [vmem:[#allocation37_spill] sm:$0xff] }
 0xa73   :  { %v8297_v21 = vpop.f32.mrf.mxu0  ;;  %v8128_v20 = vadd.f32 %v20297_v48, %v7918_v45 }
 0xa74   :  { %v18719_v26 = vadd.f32 %v8297_v21, %v8122_v10  ;;  %v8351_v5 = vmul.f32 %v18712_v32, %v20292_v23  ;;  %v20296_v21 = vld [vmem:[#allocation25_spill] sm:$0xff]  ;;  %v8364_v62 = vadd.f32 %v8363_v39, %v8350_v60  ;;  %v20299_v10 = vld [vmem:[#allocation39_spill] sm:$0xff] }
 0xa75   :  { %v8299_v42 = vpop.f32.mrf.mxu0  ;;  %v7920_v36 = vadd.f32 %v18631_v12, %v20296_v21  ;;  %v8129_v58 = vadd.f32 %v20299_v10, %v7919_v2 }
 0xa76   :  { %v18726_v34 = vadd.f32 %v8299_v42, %v8123_v61  ;;  %v8352_v54 = vmul.f32 %v18719_v26, %v20295_v53  ;;  %v20300_v61 = vld [vmem:[#allocation26_spill] sm:$0xff] }
 0xa77   :  { %v8301_v15 = vpop.f32.mrf.mxu0  ;;  %v7921_v38 = vadd.f32 %v20301_v56, %v20300_v61 }
 0xa78   :  { %v18732_v31 = vadd.f32 %v8301_v15, %v8124_v59  ;;  %v8353_v18 = vmul.f32 %v18726_v34, %v20295_v53  ;;  %v8378_v59 = vadd.f32 %v8377_v25, %v8351_v5  ;;  %v8365_v24 = vadd.f32 %v8364_v62, %v8352_v54  ;;  %v20306_v5 = vld [vmem:[#allocation19_spill] sm:$0xff] }
 0xa79   :  { %v8303_v44 = vpop.f32.mrf.mxu0  ;;  %v8131_v0 = vadd.f32 %v20305_v63, %v7921_v38 }
 0xa7a   :  { %v18740_v4 = vadd.f32 %v8303_v44, %v8125_v49  ;;  %v8354_v42 = vmul.f32 %v18732_v31, %v20298_v57  ;;  %v8130_v49 = vadd.f32 %v20303_v13, %v7920_v36  ;;  %v8379_v11 = vadd.f32 %v8378_v59, %v8353_v18 }
 0xa7b   :  { %v8307_v9 = vpop.f32.mrf.mxu0 }
 0xa7c   :  { %v18742_v37 = vadd.f32 %v8307_v9, %v8126_v6  ;;  %v8355_v17 = vmul.f32 %v18740_v4, %v20298_v57  ;;  %v8366_v3 = vadd.f32 %v8365_v24, %v8354_v42 }
 0xa7d   :  { %v8309_v50 = vpop.f32.mrf.mxu0 }
 0xa7e   :  { %v18751_v55 = vadd.f32 %v8309_v50, %v8127_v19  ;;  %v8356_v27 = vmul.f32 %v18742_v37, %v20302_v29  ;;  %v8380_v22 = vadd.f32 %v8379_v11, %v8355_v17 }
 0xa7f   :  { %v8311_v12 = vpop.f32.mrf.mxu0 }
 0xa80   :  { %v18760_v15 = vadd.f32 %v8311_v12, %v8128_v20  ;;  %v8357_v6 = vmul.f32 %v18751_v55, %v20302_v29  ;;  %v8367_v60 = vadd.f32 %v8366_v3, %v8356_v27 }
 0xa81   :  { %v8313_v1 = vpop.f32.mrf.mxu0 }
 0xa82   :  { %v8358_v41 = vmul.f32 %v18760_v15, %v20304_v51  ;;  %v18767_v44 = vadd.f32 %v8313_v1, %v8129_v58  ;;  %v8381_v2 = vadd.f32 %v8380_v22, %v8357_v6 }
 0xa83   :  { %v8317_v45 = vpop.f32.mrf.mxu0 }
 0xa84   :  { %v8359_v28 = vmul.f32 %v18767_v44, %v20304_v51  ;;  %v18772_v19 = vadd.f32 %v8317_v45, %v8130_v49  ;;  %v8368_v43 = vadd.f32 %v8367_v60, %v8358_v41  ;;  %v20307_v41 = vld [vmem:[#allocation20_spill] sm:$0xff] }
 0xa85   :  { %v8319_v14 = vpop.f32.mrf.mxu0 }
 0xa86   :  { %v8360_v9 = vmul.f32 %v18772_v19, %v20306_v5  ;;  %v18776_v39 = vadd.f32 %v8319_v14, %v8131_v0  ;;  %v8382_v21 = vadd.f32 %v8381_v2, %v8359_v28 }
 0xa87   :  { %v8321_v54 = vpop.f32.mrf.mxu0 }
 0xa88   :  { %v8369_v36 = vadd.f32 %v8368_v43, %v8360_v9  ;;  %v8361_v25 = vmul.f32 %v18776_v39, %v20306_v5 }
 0xa89   :  { %v8322_v18 = vpop.f32.mrf.mxu0 }
 0xa8a   :  { %v8370_v50 = vrot.slane %v8369_v36, 4  ;;  %v8383_v48 = vadd.f32 %v8382_v21, %v8361_v25 }
 0xa8c   :  { %v8384_v20 = vrot.slane %v8383_v48, 4  ;;  %v8371_v62 = vadd.f32 %v8370_v50, %v8369_v36 }
 0xa8e   :  { %v8372_v42 = vrot.slane %v8371_v62, 2  ;;  %v8385_v10 = vadd.f32 %v8384_v20, %v8383_v48 }
 0xa90   :  { %v8373_v58 = vadd.f32 %v8372_v42, %v8371_v62  ;;  %v8386_v61 = vrot.slane %v8385_v10, 2 }
 0xa92   :  { %v8374_v56 = vrot.slane %v8373_v58, 1  ;;  %v8387_v38 = vadd.f32 %v8386_v61, %v8385_v10 }
 0xa94   :  { %v8375_v59 = vadd.f32 %v8374_v56, %v8373_v58  ;;  %v8388_v12 = vrot.slane %v8387_v38, 1 }
 0xa96   :  { %8391 = vrot.lane.b32.xlu1 %v8375_v59, %s15073_s26  ;;  %v8389_v24 = vadd.f32 %v8388_v12, %v8387_v38 }
 0xa98   :  { %8397 = vrot.lane.b32.xlu0 %v8389_v24, %s15073_s26 }
 0xb08   :  { %v8392_v17 = vpop.permute.xlu1 %8391 }
 0xb09   :  { %v8394_v27 = vadd.f32 %v8392_v17, %v8375_v59 }
 0xb0a   :  { %v8398_v49 = vpop.permute.xlu0 %8397 }
 0xb0b   :  { %v8395_v13 = vadd.f32 %v8394_v27, %v8389_v24 }
 0xb0d   :  { %v8400_v11 = vadd.f32 %v8398_v49, %v8395_v13 }
 0xb0f   :  { %8402 = vrot.lane.b32.xlu1 %v8400_v11, %s15073_s26 }
 0xb81   :  { %v8403_v1 = vpop.permute.xlu1 %8402 }
 0xb82   :  { %v8405_v3 = vsel %vm224_vm0, %v8400_v11, %v8403_v1 }
 0xb83   :  { %v8406_v6 = vmul.f32 0.0078125, %v8405_v3 }
 0xb85   :  { %v18785_v63 = vrot.slane %v8406_v6, %v20307_v41 }
 0xb87   :  { %v8412_v0 = vsub.f32 %v18697_v52, %v18785_v63  ;;  %v8414_v45 = vsub.f32 %v18686_v7, %v18785_v63  ;;  %v8416_v22 = vsub.f32 %v18699_v35, %v18785_v63  ;;  %v8418_v60 = vsub.f32 %v18712_v32, %v18785_v63 }
 0xb88   :  { %v8420_v28 = vsub.f32 %v18726_v34, %v18785_v63  ;;  %v8422_v7 = vsub.f32 %v18740_v4, %v18785_v63  ;;  %v8424_v43 = vsub.f32 %v18751_v55, %v18785_v63  ;;  %v8426_v9 = vsub.f32 %v18767_v44, %v18785_v63 }
 0xb89   :  { %v18798_v14 = vmul.f32 %v8412_v0, %v20287_v8  ;;  %v18801_v2 = vmul.f32 %v8414_v45, %v20282_v16  ;;  %v18804_v52 = vmul.f32 %v8416_v22, %v20288_v40  ;;  %v18809_v35 = vmul.f32 %v8418_v60, %v20292_v23 }
 0xb8a   :  { %v18820_v54 = vmul.f32 %v8420_v28, %v20295_v53  ;;  %v18825_v36 = vmul.f32 %v8422_v7, %v20298_v57  ;;  %v8411_v25 = vsub.f32 %v18690_v47, %v18785_v63  ;;  %v8413_v18 = vsub.f32 %v18680_v30, %v18785_v63 }
 0xb8b   :  { %v8448_v32 = vmul.f32 %v18798_v14, %v18798_v14  ;;  %v8450_v34 = vmul.f32 %v18801_v2, %v18801_v2  ;;  %v8452_v4 = vmul.f32 %v18804_v52, %v18804_v52  ;;  %v8415_v55 = vsub.f32 %v18692_v46, %v18785_v63 }
 0xb8c   :  { %v8454_v44 = vmul.f32 %v18809_v35, %v18809_v35  ;;  %v8417_v48 = vsub.f32 %v18705_v33, %v18785_v63  ;;  %v8428_v20 = vsub.f32 %v18776_v39, %v18785_v63  ;;  %v18840_v62 = vmul.f32 %v8424_v43, %v20302_v29 }
 0xb8d   :  { %v8479_v21 = vadd.f32 %v8450_v34, %v8448_v32  ;;  %v18843_v47 = vmul.f32 %v8411_v25, %v20287_v8  ;;  %v18846_v30 = vmul.f32 %v8413_v18, %v20282_v16  ;;  %v8456_v46 = vmul.f32 %v18820_v54, %v18820_v54 }
 0xb8e   :  { %v8419_v10 = vsub.f32 %v18719_v26, %v18785_v63  ;;  %v18853_v33 = vmul.f32 %v8415_v55, %v20288_v40  ;;  %v18856_v39 = vmul.f32 %v8426_v9, %v20304_v51  ;;  %v8458_v58 = vmul.f32 %v18825_v36, %v18825_v36 }
 0xb8f   :  { %v8480_v50 = vadd.f32 %v8479_v21, %v8452_v4  ;;  %v8421_v61 = vsub.f32 %v18732_v31, %v18785_v63  ;;  %v18863_v38 = vmul.f32 %v8417_v48, %v20292_v23  ;;  %v8447_v59 = vmul.f32 %v18843_v47, %v18843_v47 }
 0xb90   :  { %v8449_v26 = vmul.f32 %v18846_v30, %v18846_v30  ;;  %v18870_v12 = vmul.f32 %v8428_v20, %v20306_v5  ;;  %v8460_v24 = vmul.f32 %v18840_v62, %v18840_v62  ;;  %v8423_v17 = vsub.f32 %v18742_v37, %v18785_v63 }
 0xb91   :  { %v8481_v42 = vadd.f32 %v8480_v50, %v8454_v44  ;;  %v18877_v27 = vmul.f32 %v8419_v10, %v20295_v53  ;;  %v8451_v13 = vmul.f32 %v18853_v33, %v18853_v33  ;;  %v8462_v11 = vmul.f32 %v18856_v39, %v18856_v39 }
 0xb92   :  { %v8465_v49 = vadd.f32 %v8449_v26, %v8447_v59  ;;  %v8425_v1 = vsub.f32 %v18760_v15, %v18785_v63  ;;  %v18886_v6 = vmul.f32 %v8421_v61, %v20298_v57  ;;  %v8453_v37 = vmul.f32 %v18863_v38, %v18863_v38 }
 0xb93   :  { %v8482_v56 = vadd.f32 %v8481_v42, %v8456_v46  ;;  %v8464_v45 = vmul.f32 %v18870_v12, %v18870_v12  ;;  %v8427_v22 = vsub.f32 %v18772_v19, %v18785_v63  ;;  %v18895_v28 = vmul.f32 %v8423_v17, %v20302_v29 }
 0xb94   :  { %v8466_v0 = vadd.f32 %v8465_v49, %v8451_v13  ;;  %v8455_v15 = vmul.f32 %v18877_v27, %v18877_v27  ;;  %v18900_v34 = vmul.f32 %v8425_v1, %v20304_v51  ;;  %v8457_v43 = vmul.f32 %v18886_v6, %v18886_v6  ;;  %v14849_v1 = vld [vmem:[%s20173_s17 + $0xf8] sm:$0xff]  }
 0xb95   :  { %v8483_v31 = vadd.f32 %v8482_v56, %v8458_v58  ;;  %v18905_v21 = vmul.f32 %v8427_v22, %v20306_v5  ;;  %v8459_v19 = vmul.f32 %v18895_v28, %v18895_v28  ;;  %13239 = vmatprep.subr.bf16.mxu1 %v14849_v1  ;;  %v14852_v22 = vld [vmem:[%s20173_s17 + $0xb0] sm:$0xff]  }
 0xb96   :  { %v8467_v7 = vadd.f32 %v8466_v0, %v8453_v37  ;;  %v8461_v18 = vmul.f32 %v18900_v34, %v18900_v34  ;;  %v14851_v37 = vld [vmem:[%s20173_s17 + $0xf0] sm:$0xff]   ;;  %v14855_v0 = vld [vmem:[%s20173_s17 + $0x78] sm:$0xff]  }
 0xb97   :  { %v8484_v3 = vadd.f32 %v8483_v31, %v8460_v24  ;;  %v8463_v50 = vmul.f32 %v18905_v21, %v18905_v21  ;;  %13285 = vmatprep.subr.bf16.mxu0 %v14855_v0  ;;  %v8343_v0 = vld [vmem:[%s20172_s16] sm:$0x3] }
 0xb98   :  { %v8468_v9 = vadd.f32 %v8467_v7, %v8455_v15  ;;  %v14853_v15 = vld [vmem:[%s20173_s17 + $0xe8] sm:$0xff]   ;;  %v14860_v7 = vld [vmem:[%s20173_s17 + $0x30] sm:$0xff]  }
 0xb99   :  { %v8485_v60 = vadd.f32 %v8484_v3, %v8462_v11  ;;  %v14850_v3 = vld [vmem:[%s20173_s17 + $0xb8] sm:$0xff]  }
 0xb9a   :  { %v8469_v63 = vadd.f32 %v8468_v9, %v8457_v43  ;;  %13240 = vmatpush3.bf16.msra.mxu1 %v14850_v3  ;;  %v14854_v43 = vld [vmem:[%s20173_s17 + $0xa8] sm:$0xff]   ;;  %v14857_v9 = vld [vmem:[%s20173_s17 + $0xe0] sm:$0xff]  }
 0xb9b   :  { %v8486_v32 = vadd.f32 %v8485_v60, %v8464_v45  ;;  %v14856_v45 = vld [vmem:[%s20173_s17 + $0x38] sm:$0xff]   ;;  %v14859_v60 = vld [vmem:[%s20173_s17 + $0x70] sm:$0xff]   ;;  %13241 = vmatprep.subr.bf16.mxu1 %v14851_v37 }
 0xb9c   :  { %v8470_v55 = vadd.f32 %v8469_v63, %v8459_v19  ;;  %13286 = vmatpush3.bf16.msra.mxu0 %v14856_v45  ;;  %v14866_v19 = vld [vmem:[%s20173_s17 + $0x60] sm:$0xff]  }
 0xb9d   :  { %v8487_v4 = vrot.slane %v8486_v32, 4  ;;  %13287 = vmatprep.subr.bf16.mxu0 %v14859_v60  ;;  %v14858_v63 = vld [vmem:[%s20173_s17 + $0xa0] sm:$0xff]   ;;  %v20308_v60 = vld [vmem:[#allocation21_spill] sm:$0xff] }
 0xb9e   :  { %v8471_v48 = vadd.f32 %v8470_v55, %v8461_v18  ;;  %13242 = vmatpush3.bf16.msra.mxu1 %v14852_v22  ;;  %v14868_v18 = vld [vmem:[%s20173_s17 + $0x20] sm:$0xff]   ;;  %v14869_v55 = vld [vmem:[%s20173_s17 + $0x58] sm:$0xff]   ;;  %v8555_v22 = vrot.slane %v8343_v0, %v20307_v41 }
 0xb9f   :  { %v8488_v25 = vadd.f32 %v8487_v4, %v8486_v32  ;;  %v14863_v32 = vld [vmem:[%s20173_s17 + $0x68] sm:$0xff]   ;;  %13243 = vmatprep.subr.bf16.mxu1 %v14853_v15  ;;  %v8342_v45 = vld [vmem:[%s20171_s15] sm:$0x3]  ;;  %v8559_v15 = vrot.slane %v8343_v0, %v20308_v60 }
 0xba0   :  { %v8472_v46 = vadd.f32 %v8471_v48, %v8463_v50  ;;  %13288 = vmatpush3.bf16.msra.mxu0 %v14860_v7  ;;  %v14864_v4 = vld [vmem:[%s20173_s17 + $0x28] sm:$0xff]   ;;  %v14865_v50 = vld [vmem:[%s20173_s17 + $0xd0] sm:$0xff]   ;;  %v14871_v48 = vld [vmem:[%s20173_s17 + $0x18] sm:$0xff]   ;;  %v8516_v7 = vrot.slane %v8342_v45, %v20307_v41 }
 0xba1   :  { %v8489_v44 = vrot.slane %v8488_v25, 2  ;;  %13289 = vmatprep.subr.bf16.mxu0 %v14863_v32  ;;  %v8520_v32 = vrot.slane %v8342_v45, %v20308_v60 }
 0xba2   :  { %v8473_v10 = vrot.slane %v8472_v46, 4  ;;  %13244 = vmatpush3.bf16.msra.mxu1 %v14854_v43  ;;  %v8563_v43 = vmul.f32 %v8559_v15, %v20287_v8 }
 0xba3   :  { %v8490_v20 = vadd.f32 %v8489_v44, %v8488_v25  ;;  %13245 = vmatprep.subr.bf16.mxu1 %v14857_v9  ;;  %v14861_v25 = vld [vmem:[%s20173_s17 + $0xd8] sm:$0xff]  }
 0xba4   :  { %v8474_v61 = vadd.f32 %v8473_v10, %v8472_v46  ;;  %13290 = vmatpush3.bf16.msra.mxu0 %v14864_v4  ;;  %v14862_v44 = vld [vmem:[%s20173_s17 + $0x98] sm:$0xff]   ;;  %v14867_v46 = vld [vmem:[%s20173_s17 + $0x90] sm:$0xff]   ;;  %v8578_v4 = vmul.f32 %v8555_v22, %v20306_v5 }
 0xba5   :  { %v8491_v42 = vrot.slane %v8490_v20, 1  ;;  %13291 = vmatprep.subr.bf16.mxu0 %v14866_v19  ;;  %v14874_v10 = vld [vmem:[%s20173_s17 + $0x10] sm:$0xff]   ;;  %v8579_v19 = vmul.f32 %v8559_v15, %v20306_v5  ;;  %v19049_v5 = vmul.f32 %v8555_v22, %v20295_v53 }
 0xba6   :  { %v8475_v56 = vrot.slane %v8474_v61, 2  ;;  %13246 = vmatpush3.bf16.msra.mxu1 %v14858_v63  ;;  %v8565_v63 = vmul.f32 %v8559_v15, %v20282_v16 }
 0xba7   :  { %v8492_v58 = vadd.f32 %v8491_v42, %v8490_v20  ;;  %13247 = vmatprep.subr.bf16.mxu1 %v14861_v25  ;;  %v14873_v20 = vld [vmem:[%s20173_s17 + $0x50] sm:$0xff]   ;;  %v14870_v42 = vld [vmem:[%s20173_s17 + $0xc8] sm:$0xff]   ;;  %v8564_v25 = vmul.f32 %v8555_v22, %v20282_v16 }
 0xba8   :  { %v8476_v59 = vadd.f32 %v8475_v56, %v8474_v61  ;;  %13292 = vmatpush3.bf16.msra.mxu0 %v14868_v18  ;;  %v14872_v61 = vld [vmem:[%s20173_s17 + $0x88] sm:$0xff]   ;;  %v14875_v56 = vld [vmem:[%s20173_s17 + $0xc0] sm:$0xff]  }
 0xba9   :  { %8500 = vrot.lane.b32.xlu1 %v8492_v58, %s15073_s26  ;;  %13293 = vmatprep.subr.bf16.mxu0 %v14869_v55 }
 0xbaa   :  { %v8477_v26 = vrot.slane %v8476_v59, 1  ;;  %13248 = vmatpush3.bf16.msra.mxu1 %v14862_v44  ;;  %v8567_v44 = vmul.f32 %v8559_v15, %v20288_v40 }
 0xbab   :  { %13249 = vmatprep.subr.bf16.mxu1 %v14865_v50  ;;  %v8566_v50 = vmul.f32 %v8555_v22, %v20288_v40  ;;  %v19061_v40 = vmul.f32 %v8559_v15, %v20302_v29 }
 0xbac   :  { %v8478_v24 = vadd.f32 %v8477_v26, %v8476_v59  ;;  %13294 = vmatpush3.bf16.msra.mxu0 %v14871_v48  ;;  %v14878_v59 = vld [vmem:[%s20173_s17 + $0x8] sm:$0xff]   ;;  %v14880_v26 = vld [vmem:[%s20173_s17 + $0x40] sm:$0xff]   ;;  %v8569_v48 = vmul.f32 %v8559_v15, %v20292_v23 }
 0xbad   :  { %13295 = vmatprep.subr.bf16.mxu0 %v14873_v20  ;;  %v19043_v20 = vmul.f32 %v8559_v15, %v20295_v53  ;;  %v19070_v53 = vmul.f32 %v8559_v15, %v20304_v51 }
 0xbae   :  { %8494 = vrot.lane.b32.xlu0 %v8478_v24, %s15073_s26  ;;  %13250 = vmatpush3.bf16.msra.mxu1 %v14867_v46 }
 0xbaf   :  { %13251 = vmatprep.subr.bf16.mxu1 %v14870_v42  ;;  %v19058_v42 = vmul.f32 %v8559_v15, %v20298_v57  ;;  %v8671_v15 = vld [vmem:[#allocation2 + $0x8] sm:$0xfe] }
 0xbb0   :  { %13296 = vmatpush3.bf16.msra.mxu0 %v14874_v10  ;;  %v19064_v10 = vmul.f32 %v8555_v22, %v20298_v57 }
 0xbb2   :  { %13252 = vmatpush3.bf16.msra.mxu1 %v14872_v61 }
 0xbb3   :  { %13253 = vmatprep.subr.bf16.mxu1 %v14875_v56 }
 0xc1b   :  { %v8501_v49 = vpop.permute.xlu1 %8500 }
 0xc20   :  { %v8495_v17 = vpop.permute.xlu0 %8494 }
 0xc21   :  { %v8497_v31 = vadd.f32 %v8495_v17, %v8478_v24  ;;  %v14876_v24 = vld [vmem:[%s20173_s17 + $0x80] sm:$0xff]   ;;  %v14879_v17 = vld [vmem:[%s20173_s17 + $0x178] sm:$0xff]  }
 0xc22   :  { %13254 = vmatpush3.bf16.msra.mxu1 %v14876_v24 }
 0xc23   :  { %v8498_v13 = vadd.f32 %v8497_v31, %v8492_v58  ;;  %v14877_v58 = vld [vmem:[%s20173_s17 + $0x48] sm:$0xff]   ;;  %v14882_v31 = vld [vmem:[%s20173_s17] sm:$0xff]   ;;  %13331 = vmatprep.subr.bf16.mxu1 %v14879_v17 }
 0xc24   :  { %13297 = vmatprep.subr.bf16.mxu0 %v14877_v58  ;;  %v19073_v58 = vmul.f32 %v8555_v22, %v20304_v51 }
 0xc25   :  { %v18915_v11 = vadd.f32 %v8501_v49, %v8498_v13  ;;  %13298 = vmatpush3.bf16.msra.mxu0 %v14878_v59  ;;  %v14887_v13 = vld [vmem:[%s20173_s17 + $0x1f8] sm:$0xff]  }
 0xc26   :  { %13299 = vmatprep.subr.bf16.mxu0 %v14880_v26 }
 0xc27   :  { %8505 = vrot.lane.b32.xlu0 %v18915_v11, %s15073_s26 }
 0xc29   :  { %13300 = vmatpush3.bf16.msra.mxu0 %v14882_v31 }
 0xc2a   :  { %13377 = vmatprep.subr.bf16.mxu0 %v14887_v13 }
 0xc99   :  { %v8506_v49 = vpop.permute.xlu0 %8505 }
 0xc9a   :  { %v8508_v1 = vsel %vm224_vm0, %v18915_v11, %v8506_v49  ;;  %v8562_v11 = vmul.f32 %v8555_v22, %v20287_v8  ;;  %v19046_v8 = vmul.f32 %v8555_v22, %v20292_v23  ;;  %v19067_v23 = vmul.f32 %v8555_v22, %v20302_v29  ;;  %v8732_v49 = vld [vmem:[#allocation2 + $0xa8] sm:$0xfc] }
 0xc9b   :  { %v8509_v3 = vmul.f32 0.0078125, %v8508_v1 }
 0xc9d   :  { %v8510_v37 = vadd.f32 1e-05, %v8509_v3 }
 0xc9f   :  { %15001 = vrsqrt.f32 %v8510_v37 }
 0xcac   :  { %v15002_v9 = vpop.eup %15001 }
 0xcad   :  { %v8523_v18 = vmul.f32 %v15002_v9, %v8516_v7  ;;  %v8524_v55 = vmul.f32 %v15002_v9, %v8520_v32 }
 0xcaf   :  { %v19052_v46 = vrot.slane %v8523_v18, %v20307_v41  ;;  %v19055_v16 = vrot.slane %v8524_v55, %v20307_v41 }
 0xcb1   :  { %v8533_v41 = vmul.f32 %v19052_v46, %v18843_v47  ;;  %v8534_v61 = vmul.f32 %v19055_v16, %v18798_v14  ;;  %v8535_v56 = vmul.f32 %v19052_v46, %v18846_v30  ;;  %v8537_v57 = vmul.f32 %v19052_v46, %v18853_v33 }
 0xcb2   :  { %v8549_v29 = vmul.f32 %v19052_v46, %v18905_v21  ;;  %v8550_v59 = vmul.f32 %v19055_v16, %v18870_v12  ;;  %v8536_v51 = vmul.f32 %v19055_v16, %v18801_v2  ;;  %v8538_v47 = vmul.f32 %v19055_v16, %v18804_v52  ;;  %v8733_v21 = vld [vmem:[#allocation2 + $0x8] sm:$0xfc] }
 0xcb3   :  { %v8580_v26 = vadd.f32 %v8562_v11, %v8533_v41  ;;  %v8581_v14 = vadd.f32 %v8563_v43, %v8534_v61  ;;  %v8582_v24 = vadd.f32 %v8564_v25, %v8535_v56  ;;  %v8584_v17 = vadd.f32 %v8566_v50, %v8537_v57 }
 0xcb4   :  { %v19091_v30 = vadd.f32 %v8578_v4, %v8549_v29  ;;  %v19093_v31 = vadd.f32 %v8579_v19, %v8550_v59  ;;  %v8583_v33 = vadd.f32 %v8565_v63, %v8536_v51  ;;  %v8585_v13 = vadd.f32 %v8567_v44, %v8538_v47  ;;  %v14881_v51 = vld [vmem:[%s20173_s17 + $0x138] sm:$0xff]  }
 0xcb5   :  { %vm8598_vm0 = vcmp.ge.f32.partialorder %v8580_v26, 0.0  ;;  %v8616_v12 = vmul.f32 0.05, %v8580_v26  ;;  %vm8599_vm6 = vcmp.ge.f32.partialorder %v8581_v14, 0.0  ;;  %v8617_v1 = vmul.f32 0.05, %v8581_v14 }
 0xcb6   :  { %v19096_v2 = vmul.f32 0.05, %v19091_v30  ;;  %vm8601_vm12 = vcmp.ge.f32.partialorder %v8583_v33, 0.0  ;;  %vm8603_vm11 = vcmp.ge.f32.partialorder %v8585_v13, 0.0  ;;  %v8619_v52 = vmul.f32 0.05, %v8583_v33 }
 0xcb7   :  { %v19098_v3 = vsel %vm8598_vm0, %v8580_v26, %v8616_v12  ;;  %v8621_v37 = vmul.f32 0.05, %v8585_v13  ;;  %v19100_v0 = vsel %vm8599_vm6, %v8581_v14, %v8617_v1  ;;  %vm8600_vm13 = vcmp.ge.f32.partialorder %v8582_v24, 0.0 }
 0xcb8   :  { %8652 = vst [vmem:[#allocation2 + $0x40] sm:$0xff] %v19098_v3  ;;  %v19103_v45 = vsel %vm8601_vm12, %v8583_v33, %v8619_v52  ;;  %8653 = vst [vmem:[#allocation2 + $0x58] sm:$0xff] %v19100_v0  ;;  %v8737_v22 = vpack.c.bf16 %v19100_v0, %v8733_v21  ;;  %vm8602_vm14 = vcmp.ge.f32.partialorder %v8584_v17, 0.0  ;;  %v8618_v60 = vmul.f32 0.05, %v8582_v24 }
 0xcb9   :  { %v19107_v7 = vsel %vm8603_vm11, %v8585_v13, %v8621_v37  ;;  %8655 = vst [vmem:[#allocation2 + $0x38] sm:$0xff] %v19103_v45  ;;  %v8620_v32 = vmul.f32 0.05, %v8584_v17  ;;  %v8736_v11 = vpack.c.bf16 %v19098_v3, %v8732_v49  ;;  %v8540_v43 = vmul.f32 %v19055_v16, %v18809_v35 }
 0xcba   :  { %8657 = vst [vmem:[#allocation2 + $0x80] sm:$0xff] %v19107_v7  ;;  %v8693_v9 = vpack.c.bf16 %v19107_v7, %v19103_v45  ;;  %v8786_v4 = vrot.slane %v8737_v22, 1  ;;  %v19117_v19 = vsel %vm8600_vm13, %v8582_v24, %v8618_v60  ;;  %v8542_v63 = vmul.f32 %v19055_v16, %v18820_v54  ;;  %v8670_v54 = vld [vmem:[#allocation2 + $0xa8] sm:$0xfe] }
 0xcbb   :  { %v19121_v25 = vsel %vm8602_vm14, %v8584_v17, %v8620_v32  ;;  %8654 = vst [vmem:[#allocation2 + $0x20] sm:$0xff] %v19117_v19  ;;  %v8783_v18 = vrot.slane %v8736_v11, 1  ;;  %v8587_v55 = vadd.f32 %v8569_v48, %v8540_v43  ;;  %v8691_v35 = vpack.c.bf16 %v19100_v0, %v8671_v15  ;;  %v14883_v17 = vld [vmem:[%s20173_s17 + $0x170] sm:$0xff]  }
 0xcbc   :  { %v8787_v44 = vrot.slane %v8693_v9, 1  ;;  %8656 = vst [vmem:[#allocation2 + $0x70] sm:$0xff] %v19121_v25  ;;  %v19128_v50 = vpack.c.bf16 %v19121_v25, %v19117_v19  ;;  %v8589_v41 = vadd.f32 %v19043_v20, %v8542_v63  ;;  %v19131_v61 = vshll.u32 %v8693_v9, 16  ;;  %v14884_v15 = vld [vmem:[%s20173_s17 + $0x130] sm:$0xff]  }
 0xcbd   :  { %vm8605_vm15 = vcmp.ge.f32.partialorder %v8587_v55, 0.0  ;;  %v8623_v56 = vmul.f32 0.05, %v8587_v55  ;;  %v8992_v57 = vshrl.u32 %v8691_v35, 16  ;;  %v8994_v29 = vshll.u32 %v8691_v35, 16 }
 0xcbe   :  { %v8788_v48 = vsel %vm807_vm1, %v8786_v4, %v8787_v44  ;;  %v8784_v59 = vrot.slane %v19128_v50, 1  ;;  %vm8607_vm2 = vcmp.ge.f32.partialorder %v8589_v41, 0.0  ;;  %v8625_v47 = vmul.f32 0.05, %v8589_v41 }
 0xcbf   :  { %8939 = vmatprep.mubr.bf16.mxu1 %v8788_v48  ;;  %v19138_v26 = vsel %vm8605_vm15, %v8587_v55, %v8623_v56  ;;  %v8996_v20 = vrot.slane %v8994_v29, 1  ;;  %v9001_v14 = vrot.slane %v19131_v61, 1  ;;  %v8690_v24 = vpack.c.bf16 %v19098_v3, %v8670_v54 }
 0xcc0   :  { %v8785_v33 = vsel %vm807_vm1, %v8783_v18, %v8784_v59  ;;  %v19148_v13 = vsel %vm8607_vm2, %v8589_v41, %v8625_v47  ;;  %8659 = vst [vmem:[#allocation2 + $0x10] sm:$0xff] %v19138_v26  ;;  %v19152_v21 = vshll.u32 %v19128_v50, 16  ;;  %v19154_v49 = vshrl.u32 %v8693_v9, 16  ;;  %v14885_v18 = vld [vmem:[%s20173_s17 + $0x168] sm:$0xff]  }
 0xcc1   :  { %8940 = vmatmul.mubr.bf16.vlgmr.msra.gmra.mxu1 %v8785_v33  ;;  %8661 = vst [vmem:[#allocation2 + $0x30] sm:$0xff] %v19148_v13  ;;  %v19159_v12 = vpack.c.bf16 %v19148_v13, %v19138_v26  ;;  %v8997_v1 = vor.u32 %v8996_v20, %v8992_v57  ;;  %v8980_v52 = vshrl.u32 %v8690_v24, 16  ;;  %v8982_v37 = vshll.u32 %v8690_v24, 16  ;;  %v14886_v57 = vld [vmem:[%s20173_s17 + $0x128] sm:$0xff]   ;;  %v14889_v20 = vld [vmem:[%s20173_s17 + $0x160] sm:$0xff]  }
 0xcc2   :  { %13332 = vmatpush3.bf16.msra.mxu1 %v14881_v51  ;;  %v8989_v22 = vrot.slane %v19152_v21, 1  ;;  %v9013_v60 = vor.u32 %v19154_v49, %v9001_v14  ;;  %v8539_v32 = vmul.f32 %v19052_v46, %v18863_v38  ;;  %v8541_v11 = vmul.f32 %v19052_v46, %v18877_v27 }
 0xcc3   :  { %v8791_v43 = vrot.slane %v19159_v12, 1  ;;  %v9002_v9 = vsel %vm1004_vm9, %v8997_v1, %v9001_v14  ;;  %v8984_v4 = vrot.slane %v8982_v37, 1  ;;  %13333 = vmatprep.subr.bf16.mxu1 %v14883_v17  ;;  %v19173_v63 = vshll.u32 %v19159_v12, 16  ;;  %v14892_v1 = vld [vmem:[%s20173_s17 + $0x1b0] sm:$0xff]  }
 0xcc4   :  { %9195 = vmatprep.mubr.bf16.mxu0 %v9002_v9  ;;  %v8586_v55 = vadd.f32 %v19046_v8, %v8539_v32  ;;  %v8588_v38 = vadd.f32 %v19049_v5, %v8541_v11  ;;  %v8544_v27 = vmul.f32 %v19055_v16, %v18825_v36  ;;  %v8546_v35 = vmul.f32 %v19055_v16, %v18840_v62  ;;  %v14888_v36 = vld [vmem:[%s20173_s17 + $0x1b8] sm:$0xff]   ;;  %v14891_v62 = vld [vmem:[%s20173_s17 + $0x1f0] sm:$0xff]  }
 0xcc5   :  { %v8792_v41 = vsel %vm807_vm1, %v8787_v44, %v8791_v43  ;;  %v8985_v54 = vor.u32 %v8984_v4, %v8980_v52  ;;  %v9017_v56 = vrot.slane %v19173_v63, 1  ;;  %v19192_v8 = vshrl.u32 %v19128_v50, 16  ;;  %v14898_v50 = vld [vmem:[%s20173_s17 + $0x1e0] sm:$0xff]  }
 0xcc6   :  { %8947 = vmatprep.mubr.bf16.mxu1 %v8792_v41  ;;  %13334 = vmatpush3.bf16.msra.mxu1 %v14884_v15  ;;  %vm8604_vm3 = vcmp.ge.f32.partialorder %v8586_v55, 0.0  ;;  %vm8606_vm4 = vcmp.ge.f32.partialorder %v8588_v38, 0.0  ;;  %v8622_v5 = vmul.f32 0.05, %v8586_v55  ;;  %v8624_v44 = vmul.f32 0.05, %v8588_v38 }
 0xcc7   :  { %v8990_v29 = vsel %vm1004_vm9, %v8985_v54, %v8989_v22  ;;  %v9018_v48 = vsel %vm1004_vm9, %v9013_v60, %v9017_v56  ;;  %v8591_v51 = vadd.f32 %v19058_v42, %v8544_v27  ;;  %v8593_v47 = vadd.f32 %v19061_v40, %v8546_v35  ;;  %13335 = vmatprep.subr.bf16.mxu1 %v14885_v18  ;;  %v14895_v15 = vld [vmem:[%s20173_s17 + $0x1e8] sm:$0xff]  }
 0xcc8   :  { %9196 = vmatmul.mubr.bf16.vlgmr.msra.gmra.mxu0 %v8990_v29  ;;  %v19207_v14 = vsel %vm8604_vm3, %v8586_v55, %v8622_v5  ;;  %v19209_v24 = vsel %vm8606_vm4, %v8588_v38, %v8624_v44  ;;  %v9005_v17 = vor.u32 %v19192_v8, %v8989_v22  ;;  %v19213_v33 = vshrl.u32 %v19159_v12, 16  ;;  %v14893_v38 = vld [vmem:[%s20173_s17 + $0x158] sm:$0xff]   ;;  %v14896_v27 = vld [vmem:[%s20173_s17 + $0x1a8] sm:$0xff]   ;;  %v14897_v44 = vld [vmem:[%s20173_s17 + $0x150] sm:$0xff]  }
 0xcc9   :  { %9203 = vmatprep.mubr.bf16.mxu0 %v9018_v48  ;;  %8658 = vst [vmem:[#allocation2 + $0x88] sm:$0xff] %v19207_v14  ;;  %8660 = vst [vmem:[#allocation2 + $0x90] sm:$0xff] %v19209_v24  ;;  %v19219_v42 = vpack.c.bf16 %v19209_v24, %v19207_v14  ;;  %vm8609_vm5 = vcmp.ge.f32.partialorder %v8591_v51, 0.0  ;;  %vm8611_vm0 = vcmp.ge.f32.partialorder %v8593_v47, 0.0  ;;  %v8627_v40 = vmul.f32 0.05, %v8591_v51  ;;  %13378 = vmatpush3.bf16.msra.mxu0 %v14888_v36 }
 0xcca   :  { %v8629_v52 = vmul.f32 0.05, %v8593_v47  ;;  %13336 = vmatpush3.bf16.msra.mxu1 %v14886_v57  ;;  %v9029_v37 = vor.u32 %v19213_v33, %v9017_v56  ;;  %v8543_v22 = vmul.f32 %v19052_v46, %v18886_v6  ;;  %v8545_v60 = vmul.f32 %v19052_v46, %v18895_v28  ;;  %13379 = vmatprep.subr.bf16.mxu0 %v14891_v62  ;;  %v14890_v6 = vld [vmem:[%s20173_s17 + $0x120] sm:$0xff]   ;;  %v14894_v56 = vld [vmem:[%s20173_s17 + $0x118] sm:$0xff]  }
 0xccb   :  { %v8789_v32 = vrot.slane %v19219_v42, 1  ;;  %v19233_v11 = vsel %vm8609_vm5, %v8591_v51, %v8627_v40  ;;  %v19236_v9 = vshll.u32 %v19219_v42, 16  ;;  %13337 = vmatprep.subr.bf16.mxu1 %v14889_v20  ;;  %v8548_v28 = vmul.f32 %v19055_v16, %v18856_v39  ;;  %v14900_v20 = vld [vmem:[%s20173_s17 + $0x1a0] sm:$0xff]   ;;  %v14901_v40 = vld [vmem:[%s20173_s17 + $0x1d8] sm:$0xff]  }
 0xccc   :  { %v19244_v4 = vsel %vm8611_vm0, %v8593_v47, %v8629_v52  ;;  %8663 = vst [vmem:[#allocation2 + $0x68] sm:$0xff] %v19233_v11  ;;  %v8590_v18 = vadd.f32 %v19064_v10, %v8543_v22  ;;  %v8592_v55 = vadd.f32 %v19067_v23, %v8545_v60  ;;  %vm8615_vm6 = vcmp.ge.f32.partialorder %v19093_v31, 0.0 }
 0xccd   :  { %v8790_v39 = vsel %vm807_vm1, %v8784_v59, %v8789_v32  ;;  %8665 = vst [vmem:[#allocation2 + $0xa0] sm:$0xff] %v19244_v4  ;;  %v19261_v16 = vpack.c.bf16 %v19244_v4, %v19233_v11  ;;  %v9009_v10 = vrot.slane %v19236_v9, 1  ;;  %v8595_v23 = vadd.f32 %v19070_v53, %v8548_v28  ;;  %13380 = vmatpush3.bf16.msra.mxu0 %v14892_v1  ;;  %v9236_v28 = vld [vmem:[#allocation2 + $0x8] sm:$0xf8] }
 0xcce   :  { %8948 = vmatmul.mubr.bf16.gmra.mxu1 %v8790_v39  ;;  %vm8608_vm12 = vcmp.ge.f32.partialorder %v8590_v18, 0.0  ;;  %vm8610_vm11 = vcmp.ge.f32.partialorder %v8592_v55, 0.0  ;;  %v8626_v59 = vmul.f32 0.05, %v8590_v18  ;;  %v8628_v35 = vmul.f32 0.05, %v8592_v55  ;;  %13381 = vmatprep.subr.bf16.mxu0 %v14895_v15 }
 0xccf   :  { %v8795_v41 = vrot.slane %v19261_v16, 1  ;;  %v9010_v54 = vsel %vm1004_vm9, %v9005_v17, %v9009_v10  ;;  %v19274_v53 = vshll.u32 %v19261_v16, 16  ;;  %13338 = vmatpush3.bf16.msra.mxu1 %v14890_v6  ;;  %vm8613_vm13 = vcmp.ge.f32.partialorder %v8595_v23, 0.0  ;;  %v9522_v39 = vld [vmem:[#allocation2 + $0x8] sm:$0x80] }
 0xcd0   :  { %9204 = vmatmul.mubr.bf16.gmra.mxu0 %v9010_v54  ;;  %v19279_v57 = vsel %vm8608_vm12, %v8590_v18, %v8626_v59  ;;  %v19281_v36 = vsel %vm8610_vm11, %v8592_v55, %v8628_v35  ;;  %v8631_v62 = vmul.f32 0.05, %v8595_v23  ;;  %v8633_v5 = vmul.f32 0.05, %v19093_v31  ;;  %13339 = vmatprep.subr.bf16.mxu1 %v14893_v38  ;;  %v14907_v38 = vld [vmem:[%s20173_s17 + $0x140] sm:$0xff]  }
 0xcd1   :  { %v8796_v29 = vsel %vm807_vm1, %v8791_v43, %v8795_v41  ;;  %v9033_v48 = vrot.slane %v19274_v53, 1  ;;  %8664 = vst [vmem:[#allocation2 + $0x98] sm:$0xff] %v19281_v36  ;;  %v19296_v51 = vpack.c.bf16 %v19281_v36, %v19279_v57  ;;  %v19299_v47 = vshrl.u32 %v19219_v42, 16  ;;  %13382 = vmatpush3.bf16.msra.mxu0 %v14896_v27  ;;  %v14905_v42 = vld [vmem:[%s20173_s17 + $0x1d0] sm:$0xff]  }
 0xcd2   :  { %8955 = vmatprep.mubr.bf16.mxu1 %v8796_v29  ;;  %v19305_v12 = vsel %vm8613_vm13, %v8595_v23, %v8631_v62  ;;  %v8651_v43 = vsel %vm8615_vm6, %v19093_v31, %v8633_v5  ;;  %v8547_v17 = vmul.f32 %v19052_v46, %v18900_v34  ;;  %13383 = vmatprep.subr.bf16.mxu0 %v14898_v50  ;;  %v14899_v34 = vld [vmem:[%s20173_s17 + $0x110] sm:$0xff]   ;;  %vm8614_vm14 = vcmp.ge.f32.partialorder %v19091_v30, 0.0  ;;  %v14902_v31 = vld [vmem:[%s20173_s17 + $0x148] sm:$0xff]   ;;  %v14908_v62 = vld [vmem:[%s20173_s17 + $0x100] sm:$0xff]  }
 0xcd3   :  { %v9034_v1 = vsel %vm1004_vm9, %v9029_v37, %v9033_v48  ;;  %v8793_v52 = vrot.slane %v19296_v51, 1  ;;  %8669 = vst [vmem:[#allocation2 + $0x78] sm:$0xff] %v8651_v43  ;;  %v9021_v22 = vor.u32 %v19299_v47, %v9009_v10  ;;  %v19321_v60 = vshll.u32 %v19296_v51, 16  ;;  %13340 = vmatpush3.bf16.msra.mxu1 %v14894_v56  ;;  %v14906_v10 = vld [vmem:[%s20173_s17 + $0x190] sm:$0xff]   ;;  %v14909_v50 = vld [vmem:[%s20173_s17 + $0x1c8] sm:$0xff]  }
 0xcd4   :  { %9211 = vmatprep.mubr.bf16.mxu0 %v9034_v1  ;;  %v8594_v46 = vadd.f32 %v19073_v58, %v8547_v17  ;;  %13341 = vmatprep.subr.bf16.mxu1 %v14897_v44  ;;  %v8650_v6 = vsel %vm8614_vm14, %v19091_v30, %v19096_v2  ;;  %v14903_v58 = vld [vmem:[%s20173_s17 + $0x198] sm:$0xff]   ;;  %v14904_v30 = vld [vmem:[%s20173_s17 + $0x108] sm:$0xff]   ;;  %v9240_v55 = vpack.c.bf16 %v19100_v0, %v9236_v28  ;;  %v19368_v56 = vshrl.u32 %v19261_v16, 16 }
 0xcd5   :  { %v8794_v37 = vsel %vm807_vm1, %v8789_v32, %v8793_v52  ;;  %v9025_v15 = vrot.slane %v19321_v60, 1  ;;  %13384 = vmatpush3.bf16.msra.mxu0 %v14900_v20  ;;  %8668 = vst [vmem:[#allocation2 + $0x50] sm:$0xff] %v8650_v6  ;;  %v9810_v59 = vpack.c.bf16 %v19103_v45, %v19100_v0  ;;  %v9526_v5 = vpack.c.bf16 %v19100_v0, %v9522_v39  ;;  %v14910_v29 = vld [vmem:[%s20173_s17 + $0x188] sm:$0xff]   ;;  %v14911_v20 = vld [vmem:[%s20173_s17 + $0x278] sm:$0xff]  }
 0xcd6   :  { %8956 = vmatmul.mubr.bf16.gmra.mxu1 %v8794_v37  ;;  %vm8612_vm15 = vcmp.ge.f32.partialorder %v8594_v46, 0.0  ;;  %v8630_v18 = vmul.f32 0.05, %v8594_v46  ;;  %13385 = vmatprep.subr.bf16.mxu0 %v14901_v40  ;;  %v9289_v44 = vshrl.u32 %v9240_v55, 16  ;;  %v9235_v43 = vld [vmem:[#allocation2 + $0xa8] sm:$0xf8]  ;;  %v9045_v40 = vor.u32 %v19368_v56, %v9033_v48 }
 0xcd7   :  { %v9026_v32 = vsel %vm1004_vm9, %v9021_v22, %v9025_v15  ;;  %13342 = vmatpush3.bf16.msra.mxu1 %v14899_v34  ;;  %v19386_v37 = vshrl.u32 %v19296_v51, 16  ;;  %v9292_v6 = vshll.u32 %v9240_v55, 16  ;;  %v9239_v55 = vpack.c.bf16 %v19098_v3, %v9235_v43  ;;  %v14919_v51 = vld [vmem:[%s20173_s17 + $0x2f8] sm:$0xff]  }
 0xcd8   :  { %9212 = vmatmul.mubr.bf16.gmra.mxu0 %v9026_v32  ;;  %v19351_v2 = vsel %vm8612_vm15, %v8594_v46, %v8630_v18  ;;  %13343 = vmatprep.subr.bf16.mxu1 %v14902_v31  ;;  %v9575_v18 = vshrl.u32 %v9526_v5, 16 }
 0xcd9   :  { %13386 = vmatpush3.bf16.msra.mxu0 %v14903_v58  ;;  %v14912_v58 = vld [vmem:[%s20173_s17 + $0x1c0] sm:$0xff]   ;;  %v9037_v16 = vor.u32 %v19386_v37, %v9025_v15  ;;  %v9277_v43 = vshrl.u32 %v9239_v55, 16 }
 0xcda   :  { %v8735_v23 = vld [vmem:[#allocation2 + $0x78] sm:$0x3]  ;;  %13387 = vmatprep.subr.bf16.mxu0 %v14905_v42  ;;  %v9578_v42 = vshll.u32 %v9526_v5, 16  ;;  %v14914_v5 = vld [vmem:[%s20173_s17 + $0x180] sm:$0xff]   ;;  %v9577_v15 = vrot.slane %v9575_v18, 3  ;;  %v9284_v18 = vrot.slane %v19192_v8, 1 }
 0xcdb   :  { %v8689_v27 = vld [vmem:[#allocation2 + $0x78] sm:$0x1]  ;;  %v8739_v35 = vpack.c.bf16 %v8735_v23, %v19305_v12  ;;  %13344 = vmatpush3.bf16.msra.mxu1 %v14904_v30  ;;  %v9521_v23 = vld [vmem:[#allocation2 + $0xa8] sm:$0x80] }
 0xcdc   :  { %v8699_v54 = vpack.c.bf16 %v8689_v27, %v19305_v12  ;;  %13345 = vmatprep.subr.bf16.mxu1 %v14907_v38  ;;  %v8734_v22 = vld [vmem:[#allocation2 + $0x50] sm:$0x3]  ;;  %v9296_v38 = vrot.slane %v19154_v49, 1 }
 0xcdd   :  { %v8799_v17 = vrot.slane %v8739_v35, 1  ;;  %v8688_v34 = vld [vmem:[#allocation2 + $0x50] sm:$0x1]  ;;  %13388 = vmatpush3.bf16.msra.mxu0 %v14906_v10  ;;  %v8738_v46 = vpack.c.bf16 %v8734_v22, %v19351_v2  ;;  %v9291_v10 = vrot.slane %v9289_v44, 1  ;;  %v9580_v44 = vrot.slane %v9578_v42, 4 }
 0xcde   :  { %v9047_v1 = vshll.u32 %v8699_v54, 16  ;;  %v8698_v31 = vpack.c.bf16 %v8688_v34, %v19351_v2  ;;  %13389 = vmatprep.subr.bf16.mxu0 %v14909_v50  ;;  %v9054_v35 = vshrl.u32 %v8699_v54, 16 }
 0xcdf   :  { %v8800_v48 = vsel %vm807_vm1, %v8795_v41, %v8799_v17  ;;  %13346 = vmatpush3.bf16.msra.mxu1 %v14908_v62  ;;  %v8797_v32 = vrot.slane %v8738_v46, 1  ;;  %v9297_v41 = vrot.slane %v19131_v61, 2  ;;  %v9294_v62 = vrot.slane %v9292_v6, 2 }
 0xce0   :  { %v9049_v28 = vrot.slane %v9047_v1, 1  ;;  %8963 = vmatprep.mubr.bf16.mxu1 %v8800_v48  ;;  %v9039_v30 = vshll.u32 %v8698_v31, 16  ;;  %13423 = vmatprep.subr.bf16.mxu1 %v14911_v20  ;;  %v9582_v20 = vrot.slane %v19154_v49, 3  ;;  %v9280_v1 = vshll.u32 %v9239_v55, 16 }
 0xce1   :  { %13390 = vmatpush3.bf16.msra.mxu0 %v14910_v29  ;;  %v8798_v27 = vsel %vm807_vm1, %v8793_v52, %v8797_v32  ;;  %v9583_v29 = vrot.slane %v19131_v61, 4  ;;  %v9295_v22 = vor.u32 %v9294_v62, %v9291_v10  ;;  %v9298_v34 = vor.u32 %v9297_v41, %v9296_v38  ;;  %v14913_v62 = vld [vmem:[%s20173_s17 + $0x238] sm:$0xff]  }
 0xce2   :  { %v9050_v39 = vsel %vm1004_vm9, %v9045_v40, %v9049_v28  ;;  %v9041_v50 = vrot.slane %v9039_v30, 1  ;;  %13391 = vmatprep.subr.bf16.mxu0 %v14912_v58  ;;  %8964 = vmatmul.mubr.bf16.gmra.mxu1 %v8798_v27  ;;  %v9056_v54 = vor.u32 %v9054_v35, %v9049_v28  ;;  %v9525_v40 = vpack.c.bf16 %v19098_v3, %v9521_v23 }
 0xce3   :  { %9219 = vmatprep.mubr.bf16.mxu0 %v9050_v39  ;;  %8971 = vmatprep.mubr.bf16.mxu1 %v8799_v17  ;;  %v9581_v49 = vor.u32 %v9580_v44, %v9577_v15  ;;  %v9584_v46 = vor.u32 %v9583_v29, %v9582_v20  ;;  %v9279_v61 = vrot.slane %v9277_v43, 1  ;;  %v9051_v48 = vshrl.u32 %v8698_v31, 16  ;;  %v14920_v29 = vld [vmem:[%s20173_s17 + $0x2b8] sm:$0xff]  }
 0xce4   :  { %v9042_v52 = vsel %vm1004_vm9, %v9037_v16, %v9041_v50  ;;  %v9563_v6 = vshrl.u32 %v9525_v40, 16  ;;  %v9566_v58 = vshll.u32 %v9525_v40, 16  ;;  %v9282_v17 = vrot.slane %v9280_v1, 2  ;;  %v9524_v40 = vld [vmem:[#allocation2 + $0x78] sm:$0x7f] }
 0xce5   :  { %9220 = vmatmul.mubr.bf16.gmra.mxu0 %v9042_v52  ;;  %v9285_v28 = vrot.slane %v19152_v21, 2  ;;  %v9299_v42 = vsel %vm1302_vm7, %v9295_v22, %v9298_v34  ;;  %v9053_v30 = vor.u32 %v9051_v48, %v9041_v50  ;;  %v9585_v55 = vsel %vm1589_vm8, %v9581_v49, %v9584_v46 }
 0xce6   :  { %9227 = vmatprep.mubr.bf16.mxu0 %v9056_v54  ;;  %13392 = vmatpush3.bf16.msra.mxu0 %v14914_v5  ;;  %v9304_v38 = vrot.slane %v19213_v33, 1  ;;  %v9305_v39 = vrot.slane %v19173_v63, 2  ;;  %v9565_v16 = vrot.slane %v9563_v6, 3  ;;  %v9568_v10 = vrot.slane %v9566_v58, 4 }
 0xce7   :  { %13469 = vmatprep.subr.bf16.mxu0 %v14919_v51  ;;  %v9570_v31 = vrot.slane %v19192_v8, 3  ;;  %v9571_v41 = vrot.slane %v19152_v21, 4  ;;  %v9283_v23 = vor.u32 %v9282_v17, %v9279_v61  ;;  %v9286_v27 = vor.u32 %v9285_v28, %v9284_v18  ;;  %v9238_v21 = vld [vmem:[#allocation2 + $0x78] sm:$0x7]  ;;  %v14923_v61 = vld [vmem:[%s20173_s17 + $0x2f0] sm:$0xff]  }
 0xce8   :  { %v9590_v35 = vrot.slane %v19213_v33, 3  ;;  %v9306_v50 = vor.u32 %v9305_v39, %v9304_v38  ;;  %v9569_v5 = vor.u32 %v9568_v10, %v9565_v16  ;;  %v9300_v44 = vrot.slane %v19299_v47, 1  ;;  %v14915_v33 = vld [vmem:[%s20173_s17 + $0x270] sm:$0xff]   ;;  %v14927_v39 = vld [vmem:[%s20173_s17 + $0x2e8] sm:$0xff]  }
 0xce9   :  { %v9572_v15 = vor.u32 %v9571_v41, %v9570_v31  ;;  %v9301_v8 = vrot.slane %v19236_v9, 2  ;;  %v9287_v20 = vsel %vm1302_vm7, %v9283_v23, %v9286_v27  ;;  %v9312_v51 = vrot.slane %v19368_v56, 1  ;;  %v9237_v17 = vld [vmem:[#allocation2 + $0x50] sm:$0x7]  ;;  %v14918_v31 = vld [vmem:[%s20173_s17 + $0x228] sm:$0xff]  }
 0xcea   :  { %8972 = vmatmul.mubr.bf16.gmra.mxu1 %v8797_v32  ;;  %v9591_v32 = vrot.slane %v19173_v63, 4  ;;  %v9313_v52 = vrot.slane %v19274_v53, 2  ;;  %v9586_v54 = vrot.slane %v19299_v47, 3  ;;  %v9587_v43 = vrot.slane %v19236_v9, 4  ;;  %v14916_v9 = vld [vmem:[%s20173_s17 + $0x230] sm:$0xff]  }
 0xceb   :  { %9472 = vmatprep.mubr.bf16.mxu1 %v9299_v42  ;;  %v9307_v1 = vsel %vm1302_vm7, %v9298_v34, %v9306_v50  ;;  %v9598_v22 = vrot.slane %v19368_v56, 3  ;;  %v9599_v49 = vrot.slane %v19274_v53, 4  ;;  %v9242_v6 = vpack.c.bf16 %v9238_v21, %v19305_v12  ;;  %v14917_v34 = vld [vmem:[%s20173_s17 + $0x268] sm:$0xff]   ;;  %v10037_v16 = vld [vmem:[#allocation2 + $0x90] sm:$0xff] }
 0xcec   :  { %v9592_v63 = vor.u32 %v9591_v32, %v9590_v35  ;;  %v9573_v47 = vsel %vm1589_vm8, %v9569_v5, %v9572_v15  ;;  %v19451_v58 = vor.u32 %v9301_v8, %v9300_v44  ;;  %v9809_v56 = vpack.c.bf16 %v19117_v19, %v19098_v3  ;;  %v14921_v32 = vld [vmem:[%s20173_s17 + $0x260] sm:$0xff]   ;;  %v9523_v44 = vld [vmem:[#allocation2 + $0x50] sm:$0x7f] }
 0xced   :  { %9228 = vmatmul.mubr.bf16.gmra.mxu0 %v9053_v30  ;;  %v9528_v48 = vpack.c.bf16 %v9524_v40, %v19305_v12  ;;  %v19462_v28 = vor.u32 %v9313_v52, %v9312_v51  ;;  %v19464_v42 = vor.u32 %v9587_v43, %v9586_v54  ;;  %v19469_v30 = vor.u32 %v9599_v49, %v9598_v22  ;;  %v14922_v40 = vld [vmem:[%s20173_s17 + $0x220] sm:$0xff]  }
 0xcee   :  { %9758 = vmatprep.mubr.bf16.mxu0 %v9585_v55  ;;  %v9593_v53 = vsel %vm1589_vm8, %v9584_v46, %v9592_v63  ;;  %v14924_v46 = vld [vmem:[%s20173_s17 + $0x2b0] sm:$0xff]   ;;  %v9326_v55 = vshrl.u32 %v9242_v6, 16  ;;  %v9329_v38 = vshll.u32 %v9242_v6, 16  ;;  %v9303_v10 = vsel %vm1302_vm7, %v9286_v27, %v19451_v58  ;;  %v10902_v22 = vld [vmem:[#allocation2] sm:$0x7f] }
 0xcef   :  { %v9308_v41 = vrot.slane %v19386_v37, 1  ;;  %v9309_v23 = vrot.slane %v19321_v60, 2  ;;  %v9241_v35 = vpack.c.bf16 %v9237_v17, %v19351_v2  ;;  %v9615_v5 = vshll.u32 %v9528_v48, 16  ;;  %v10899_v8 = vld [vmem:[#allocation2 + $0x40] sm:$0x80] }
 0xcf0   :  { %v9315_v21 = vsel %vm1302_vm7, %v9306_v50, %v19462_v28  ;;  %v19498_v51 = vpack.c.bf16 %v19279_v57, %v10037_v16  ;;  %v9601_v52 = vsel %vm1589_vm8, %v9592_v63, %v19469_v30  ;;  %v9328_v54 = vrot.slane %v9326_v55, 1 }
 0xcf1   :  { %v9331_v43 = vrot.slane %v9329_v38, 2  ;;  %v9595_v50 = vrot.slane %v19321_v60, 4  ;;  %v19517_v49 = vor.u32 %v9309_v23, %v9308_v41  ;;  %vm20312_vm1 = vsmask.f32 5376  ;;  %v10901_v60 = vld [vmem:[#allocation2 + $0x18] sm:$0x7f] }
 0xcf2   :  { %9473 = vmatmul.mubr.bf16.vlgmr.msra.gmra.mxu1 %v9287_v20  ;;  %v9589_v20 = vsel %vm1589_vm8, %v9572_v15, %v19464_v42  ;;  %v10041_v15 = vld [vmem:[#allocation2 + $0x98] sm:$0xff]  ;;  %v19511_v63 = vshll.u32 %v19498_v51, 16  ;;  %vm20326_vm2 = vmmov %vm20312_vm1 }
 0xcf3   :  { %13424 = vmatpush3.bf16.msra.mxu1 %v14913_v62  ;;  %9480 = vmatprep.mubr.bf16.mxu1 %v9307_v1  ;;  %v9612_v62 = vshrl.u32 %v9528_v48, 16  ;;  %v9527_v1 = vpack.c.bf16 %v9523_v44, %v19351_v2  ;;  %v19527_v17 = vpack.c.bf16 %v19351_v2, %v10041_v15  ;;  %v19532_v55 = vor.u32 %v9331_v43, %v9328_v54  ;;  %v14937_v43 = vld [vmem:[%s20173_s17 + $0x2d0] sm:$0xff]   ;;  %vm20327_vm3 = vmmov %vm20312_vm1 }
 0xcf4   :  { %13425 = vmatprep.subr.bf16.mxu1 %v14915_v33  ;;  %v9594_v33 = vrot.slane %v19386_v37, 3  ;;  %v14930_v37 = vld [vmem:[%s20173_s17 + $0x2e0] sm:$0xff]   ;;  %v20216_v48 = vrot.slane %v19511_v63, 1  ;;  %v9311_v44 = vsel %vm1302_vm7, %v19451_v58, %v19517_v49  ;;  %v10036_v58 = vld [vmem:[#allocation2 + $0x10] sm:$0xff]  ;;  %vm20330_vm4 = vmmov %vm20312_vm1 }
 0xcf5   :  { %9759 = vmatmul.mubr.bf16.vlgmr.msra.gmra.mxu0 %v9573_v47  ;;  %v9614_v6 = vrot.slane %v9612_v62, 3  ;;  %v9617_v47 = vrot.slane %v9615_v5, 4  ;;  %20309 = vst [vmem:[#allocation27_spill] sm:$0xff] %v19527_v17  ;;  %v9606_v41 = vshll.u32 %v9527_v1, 16  ;;  %v14929_v62 = vld [vmem:[%s20173_s17 + $0x250] sm:$0xff]   ;;  %v14935_v5 = vld [vmem:[%s20173_s17 + $0x298] sm:$0xff]   ;;  %v9333_v54 = vsel %vm1302_vm7, %v19462_v28, %v19532_v55  ;;  %vm20333_vm5 = vmmov %vm20312_vm1 }
 0xcf6   :  { %9766 = vmatprep.mubr.bf16.mxu0 %v9593_v53  ;;  %13470 = vmatpush3.bf16.msra.mxu0 %v14920_v29  ;;  %v14928_v29 = vld [vmem:[%s20173_s17 + $0x2a8] sm:$0xff]   ;;  %v9320_v53 = vshll.u32 %v9241_v35, 16  ;;  %v19534_v38 = vor.u32 %v9595_v50, %v9594_v33  ;;  %v10030_v33 = vld [vmem:[#allocation2 + $0x58] sm:$0xfe]  ;;  %v10034_v50 = vld [vmem:[#allocation2 + $0x80] sm:$0xff] }
 0xcf7   :  { %13471 = vmatprep.subr.bf16.mxu0 %v14923_v61  ;;  %13426 = vmatpush3.bf16.msra.mxu1 %v14916_v9  ;;  %v14925_v61 = vld [vmem:[%s20173_s17 + $0x258] sm:$0xff]   ;;  %v9317_v9 = vshrl.u32 %v9241_v35, 16  ;;  %v19548_v35 = vshll.u32 %v19527_v17, 16  ;;  %v14931_v15 = vld [vmem:[%s20173_s17 + $0x210] sm:$0xff]  }
 0xcf8   :  { %13427 = vmatprep.subr.bf16.mxu1 %v14917_v34  ;;  %v14932_v34 = vld [vmem:[%s20173_s17 + $0x2a0] sm:$0xff]  }
 0xcfa   :  { %13472 = vmatpush3.bf16.msra.mxu0 %v14924_v46  ;;  %9481 = vmatmul.mubr.bf16.gmra.mxu1 %v9303_v10  ;;  %v19530_v46 = vshrl.u32 %v19498_v51, 16  ;;  %v14926_v10 = vld [vmem:[%s20173_s17 + $0x218] sm:$0xff]  }
 0xcfb   :  { %13473 = vmatprep.subr.bf16.mxu0 %v14927_v39  ;;  %9488 = vmatprep.mubr.bf16.mxu1 %v9315_v21  ;;  %v14933_v39 = vld [vmem:[%s20173_s17 + $0x2d8] sm:$0xff]   ;;  %v9319_v21 = vrot.slane %v9317_v9, 1  ;;  %v14938_v9 = vld [vmem:[%s20173_s17 + $0x290] sm:$0xff]  }
 0xcfc   :  { %13428 = vmatpush3.bf16.msra.mxu1 %v14918_v31  ;;  %v9603_v31 = vshrl.u32 %v9527_v1, 16  ;;  %v10134_v23 = vor.u32 %v19530_v46, %v20216_v48  ;;  %v9608_v1 = vrot.slane %v9606_v41, 4  ;;  %v10033_v41 = vld [vmem:[#allocation2 + $0x70] sm:$0xff]  ;;  %v10964_v27 = vrot.slane %v19530_v46, 3 }
 0xcfd   :  { %9767 = vmatmul.mubr.bf16.gmra.mxu0 %v9589_v20  ;;  %13429 = vmatprep.subr.bf16.mxu1 %v14921_v32  ;;  %v19550_v32 = vor.u32 %v9617_v47, %v9614_v6  ;;  %v9322_v20 = vrot.slane %v9320_v53, 2  ;;  %v19593_v53 = vpack.c.bf16 %v10036_v58, %v10034_v50 }
 0xcfe   :  { %9774 = vmatprep.mubr.bf16.mxu0 %v9601_v52  ;;  %13474 = vmatpush3.bf16.msra.mxu0 %v14928_v29  ;;  %v19561_v29 = vld [vmem:[#allocation2 + $0x38] sm:$0xff]  ;;  %v20215_v52 = vrot.slane %v19548_v35, 1 }
 0xcff   :  { %13475 = vmatprep.subr.bf16.mxu0 %v14930_v37  ;;  %v9597_v37 = vsel %vm1589_vm8, %v19464_v42, %v19534_v38  ;;  %v14934_v42 = vld [vmem:[%s20173_s17 + $0x248] sm:$0xff]   ;;  %v10050_v6 = vpack.c.bf16 %v19561_v29, %v10030_v33  ;;  %v19588_v47 = vor.u32 %v9322_v20, %v9319_v21  ;;  %v19615_v20 = vshll.u32 %v19593_v53, 16  ;;  %v10038_v33 = vld [vmem:[#allocation2 + $0x30] sm:$0xff] }
 0xd00   :  { %13430 = vmatpush3.bf16.msra.mxu1 %v14922_v40  ;;  %v9605_v40 = vrot.slane %v9603_v31, 3  ;;  %v19579_v28 = vsel %vm1004_vm9, %v10134_v23, %v20215_v52  ;;  %v19603_v31 = vld [vmem:[#allocation2 + $0x20] sm:$0xff]  ;;  %v10035_v23 = vld [vmem:[#allocation2 + $0x88] sm:$0xff] }
 0xd01   :  { %13431 = vmatprep.subr.bf16.mxu1 %v14925_v61  ;;  %v9619_v61 = vsel %vm1589_vm8, %v19469_v30, %v19550_v32  ;;  %v14936_v30 = vld [vmem:[%s20173_s17 + $0x208] sm:$0xff]   ;;  %v19621_v58 = vpack.c.bf16 %v10035_v23, %v10033_v41  ;;  %v14951_v41 = vld [vmem:[%s20173_s17 + $0x3f8] sm:$0xff]   ;;  %v10042_v23 = vld [vmem:[#allocation2 + $0xa0] sm:$0xff]  ;;  %v10961_v45 = vrot.slane %v19615_v20, 4 }
 0xd02   :  { %13476 = vmatpush3.bf16.msra.mxu0 %v14932_v34  ;;  %9489 = vmatmul.mubr.bf16.gmra.mxu1 %v9311_v44  ;;  %v14941_v34 = vld [vmem:[%s20173_s17 + $0x2c8] sm:$0xff]   ;;  %v9324_v44 = vsel %vm1302_vm7, %v19517_v49, %v19588_v47  ;;  %v19624_v49 = vshrl.u32 %v19527_v17, 16  ;;  %vm20324_vm7 = vmmov %vm20312_vm1 }
 0xd03   :  { %13477 = vmatprep.subr.bf16.mxu0 %v14933_v39  ;;  %9496 = vmatprep.mubr.bf16.mxu1 %v9333_v54  ;;  %v10029_v39 = vld [vmem:[#allocation2 + $0x40] sm:$0xfe]  ;;  %v14942_v21 = vld [vmem:[%s20173_s17 + $0x288] sm:$0xff]  }
 0xd04   :  { %13432 = vmatpush3.bf16.msra.mxu1 %v14926_v10  ;;  %v19601_v10 = vor.u32 %v9608_v1, %v9605_v40  ;;  %v10040_v54 = vld [vmem:[#allocation2 + $0x68] sm:$0xff]  ;;  %v10049_v50 = vpack.c.bf16 %v19603_v31, %v10029_v39  ;;  %v10422_v40 = vrot.slane %v19530_v46, 2  ;;  %v19646_v39 = vshll.u32 %v19621_v58, 16 }
 0xd05   :  { %9775 = vmatmul.mubr.bf16.gmra.mxu0 %v9597_v37  ;;  %13433 = vmatprep.subr.bf16.mxu1 %v14929_v62  ;;  %v14939_v62 = vld [vmem:[%s20173_s17 + $0x240] sm:$0xff]   ;;  %v20315_v46 = vpack.c.bf16 %v19138_v26, %v19107_v7  ;;  %v10973_v7 = vrot.slane %v19548_v35, 4 }
 0xd06   :  { %9782 = vmatprep.mubr.bf16.mxu0 %v9619_v61  ;;  %13478 = vmatpush3.bf16.msra.mxu0 %v14935_v5  ;;  %v10107_v5 = vshll.u32 %v10050_v6, 16  ;;  %v9610_v37 = vsel %vm1589_vm8, %v19534_v38, %v19601_v10  ;;  %v14943_v61 = vld [vmem:[%s20173_s17 + $0x378] sm:$0xff]   ;;  %v10105_v38 = vshrl.u32 %v10050_v6, 16  ;;  %v10430_v6 = vrot.slane %v19624_v49, 2 }
 0xd07   :  { %13479 = vmatprep.subr.bf16.mxu0 %v14937_v43  ;;  %v14944_v43 = vld [vmem:[%s20173_s17 + $0x2c0] sm:$0xff]  }
 0xd08   :  { %13434 = vmatpush3.bf16.msra.mxu1 %v14931_v15  ;;  %v14940_v15 = vld [vmem:[%s20173_s17 + $0x200] sm:$0xff]   ;;  %v10109_v1 = vrot.slane %v10107_v5, 1 }
 0xd09   :  { %13435 = vmatprep.subr.bf16.mxu1 %v14934_v42  ;;  %v19637_v42 = vpack.c.bf16 %v10040_v54, %v10038_v33  ;;  %v20213_v54 = vrot.slane %v19527_v17, 3  ;;  %v14955_v17 = vld [vmem:[%s20173_s17 + $0x3f0] sm:$0xff]  }
 0xd0a   :  { %13480 = vmatpush3.bf16.msra.mxu0 %v14938_v9  ;;  %9497 = vmatmul.mubr.bf16.gmra.mxu1 %v9324_v44  ;;  %v10114_v9 = vrot.slane %v19615_v20, 1  ;;  %v10431_v44 = vrot.slane %v19548_v35, 3 }
 0xd0b   :  { %13481 = vmatprep.subr.bf16.mxu0 %v14941_v34  ;;  %9504 = vmatprep.mubr.bf16.mxu1 %v19532_v55  ;;  %v10423_v55 = vrot.slane %v19511_v63, 3  ;;  %v10095_v34 = vshll.u32 %v10049_v50, 16  ;;  %v19660_v33 = vshll.u32 %v19637_v42, 16 }
 0xd0c   :  { %13436 = vmatpush3.bf16.msra.mxu1 %v14936_v30  ;;  %v14946_v30 = vld [vmem:[%s20173_s17 + $0x280] sm:$0xff]  }
 0xd0d   :  { %9783 = vmatmul.mubr.bf16.gmra.mxu0 %v9610_v37  ;;  %13437 = vmatprep.subr.bf16.mxu1 %v14939_v62  ;;  %v19654_v62 = vshrl.u32 %v19593_v53, 16  ;;  %v19656_v5 = vor.u32 %v10423_v55, %v10422_v40  ;;  %v19667_v37 = vshrl.u32 %v19637_v42, 16  ;;  %v10097_v40 = vrot.slane %v10095_v34, 1  ;;  %v10900_v34 = vld [vmem:[#allocation2 + $0x58] sm:$0x80] }
 0xd0e   :  { %9790 = vmatprep.mubr.bf16.mxu0 %v19550_v32  ;;  %13482 = vmatpush3.bf16.msra.mxu0 %v14942_v21  ;;  %v20214_v32 = vrot.slane %v19498_v51, 3  ;;  %v10110_v21 = vor.u32 %v10109_v1, %v10105_v38  ;;  %v10102_v1 = vrot.slane %v19646_v39, 1  ;;  %v19685_v38 = vshrl.u32 %v19621_v58, 16 }
 0xd0f   :  { %13483 = vmatprep.subr.bf16.mxu0 %v14944_v43  ;;  %v19664_v43 = vpack.c.bf16 %v19305_v12, %v10042_v23  ;;  %v10093_v23 = vshrl.u32 %v10049_v50, 16 }
 0xd10   :  { %13438 = vmatpush3.bf16.msra.mxu1 %v14940_v15  ;;  %v19669_v15 = vor.u32 %v10431_v44, %v10430_v6  ;;  %v19679_v55 = vsel %vm2723_vm10, %v20214_v32, %v20213_v54  ;;  %v10130_v6 = vrot.slane %v19660_v33, 1  ;;  %v10969_v44 = vrot.slane %v19660_v33, 4  ;;  %v14945_v54 = vld [vmem:[%s20173_s17 + $0x338] sm:$0xff]  }
 0xd11   :  { %13515 = vmatprep.subr.bf16.mxu1 %v14943_v61  ;;  %v10126_v61 = vor.u32 %v19654_v62, %v10114_v9  ;;  %20311 = vst [vmem:[#allocation32_spill] sm:$0xff] %v19679_v55  ;;  %v19697_v0 = vshrl.u32 %v19664_v43, 16  ;;  %v19707_v50 = vor.u32 %v19685_v38, %v10102_v1  ;;  %v10948_v52 = vrot.slane %v19685_v38, 3 }
 0xd12   :  { %13484 = vmatpush3.bf16.msra.mxu0 %v14946_v30  ;;  %20310 = vst [vmem:[#allocation22_spill] sm:$0xff] %v19669_v15  ;;  %9505 = vmatmul.mubr.bf16.gmra.mxu1 %v19588_v47  ;;  %v19690_v47 = vsel %vm20312_vm1, %v19656_v5, %v19669_v15  ;;  %v10960_v30 = vrot.slane %v19654_v62, 3 }
 0xd13   :  { %13561 = vmatprep.subr.bf16.mxu0 %v14951_v41  ;;  %9980 = vmatprep.mubr.bf16.mxu1 %v9810_v59  ;;  %20313 = vst [vmem:[#allocation28_spill] sm:$0xff] %v19690_v47  ;;  %v10115_v41 = vsel %vm1004_vm9, %v10110_v21, %v10114_v9  ;;  %v10968_v59 = vrot.slane %v19667_v37, 3  ;;  %v10131_v9 = vsel %vm1004_vm9, %v10126_v61, %v10130_v6 }
 0xd14   :  { %v10904_v21 = vpack.c.bf16 %v19561_v29, %v10900_v34  ;;  %v10962_v32 = vor.u32 %v10961_v45, %v10960_v30  ;;  %v19718_v61 = vor.u32 %v19667_v37, %v10130_v6  ;;  %v10949_v34 = vrot.slane %v19646_v39, 4  ;;  %v14952_v30 = vld [vmem:[%s20173_s17 + $0x3b8] sm:$0xff]  }
 0xd15   :  { %9791 = vmatmul.mubr.bf16.gmra.mxu0 %v19601_v10  ;;  %v10098_v10 = vor.u32 %v10097_v40, %v10093_v23  ;;  %v10970_v16 = vor.u32 %v10969_v44, %v10968_v59  ;;  %v14947_v40 = vld [vmem:[%s20173_s17 + $0x370] sm:$0xff]   ;;  %v19724_v45 = vld [vmem:[#allocation2 + $0x78] sm:$0xff]  ;;  %v10965_v6 = vrot.slane %v19511_v63, 4 }
 0xd16   :  { %10308 = vmatprep.mubr.bf16.mxu0 %v10115_v41  ;;  %v19711_v41 = vshll.u32 %v19664_v43, 16  ;;  %v10953_v23 = vshrl.u32 %v10904_v21, 16  ;;  %v10956_v48 = vshll.u32 %v10904_v21, 16  ;;  %v19726_v59 = vld [vmem:[#allocation2 + $0x50] sm:$0xff]  ;;  %v10976_v21 = vrot.slane %v19697_v0, 3 }
 0xd17   :  { %v19729_v44 = vsel %vm1589_vm8, %v10962_v32, %v10970_v16  ;;  %v10103_v18 = vsel %vm1004_vm9, %v10098_v10, %v10102_v1  ;;  %v10950_v47 = vor.u32 %v10949_v34, %v10948_v52  ;;  %v10966_v3 = vor.u32 %v10965_v6, %v10964_v27  ;;  %v14956_v27 = vld [vmem:[%s20173_s17 + $0x3b0] sm:$0xff]   ;;  %v10048_v34 = vld [vmem:[#allocation2] sm:$0x1] }
 0xd18   :  { %20314 = vst [vmem:[#allocation29_spill] sm:$0xff] %v19729_v44  ;;  %v10955_v15 = vrot.slane %v10953_v23, 3  ;;  %v10958_v55 = vrot.slane %v10956_v48, 4  ;;  %v14948_v44 = vld [vmem:[%s20173_s17 + $0x330] sm:$0xff]   ;;  %v10977_v19 = vrot.slane %v19711_v41, 4  ;;  %v10972_v1 = vrot.slane %v19624_v49, 3 }
 0xd19   :  { %v14949_v48 = vld [vmem:[%s20173_s17 + $0x368] sm:$0xff]   ;;  %v10906_v26 = vpack.c.bf16 %v10902_v22, %v19724_v45 }
 0xd1a   :  { %9981 = vmatmul.mubr.bf16.vlgmr.msra.gmra.mxu1 %v9809_v56  ;;  %v10903_v56 = vpack.c.bf16 %v19603_v31, %v10899_v8  ;;  %v10959_v52 = vor.u32 %v10958_v55, %v10955_v15  ;;  %v10978_v8 = vor.u32 %v10977_v19, %v10976_v21  ;;  %v14959_v15 = vld [vmem:[%s20173_s17 + $0x3e8] sm:$0xff]  }
 0xd1b   :  { %13516 = vmatpush3.bf16.msra.mxu1 %v14945_v54  ;;  %9988 = vmatprep.mubr.bf16.mxu1 %v20315_v46  ;;  %v10905_v54 = vpack.c.bf16 %v10901_v60, %v19726_v59  ;;  %v10974_v60 = vor.u32 %v10973_v7, %v10972_v1  ;;  %v10990_v55 = vshrl.u32 %v10906_v26, 16  ;;  %v14950_v23 = vld [vmem:[%s20173_s17 + $0x328] sm:$0xff]   ;;  %v10146_v7 = vrot.slane %v19711_v41, 1 }
 0xd1c   :  { %13517 = vmatprep.subr.bf16.mxu1 %v14947_v40  ;;  %v10941_v10 = vshrl.u32 %v10903_v56, 16  ;;  %v10944_v40 = vshll.u32 %v10903_v56, 16  ;;  %v19766_v22 = vsel %vm1589_vm8, %v10959_v52, %v10962_v32  ;;  %v14953_v32 = vld [vmem:[%s20173_s17 + $0x360] sm:$0xff]  }
 0xd1d   :  { %10309 = vmatmul.mubr.bf16.vlgmr.msra.gmra.mxu0 %v10103_v18  ;;  %v19760_v18 = vsel %vm1589_vm8, %v10950_v47, %v10966_v3  ;;  %v10981_v21 = vshrl.u32 %v10905_v54, 16  ;;  %v19778_v46 = vsel %vm1589_vm8, %v10966_v3, %v10974_v60  ;;  %v10984_v56 = vshll.u32 %v10905_v54, 16 }
 0xd1e   :  { %10316 = vmatprep.mubr.bf16.mxu0 %v10131_v9  ;;  %13562 = vmatpush3.bf16.msra.mxu0 %v14952_v30  ;;  %v10993_v9 = vshll.u32 %v10906_v26, 16  ;;  %v19772_v30 = vsel %vm1589_vm8, %v10970_v16, %v10978_v8  ;;  %v10946_v6 = vrot.slane %v10944_v40, 4  ;;  %v14960_v16 = vld [vmem:[%s20173_s17 + $0x3a8] sm:$0xff]   ;;  %v19788_v3 = vpack.c.bf16 %v10048_v34, %v19724_v45  ;;  %v14962_v26 = vld [vmem:[%s20173_s17 + $0x3e0] sm:$0xff]   ;;  %v10358_v34 = vld [vmem:[#allocation2 + $0x58] sm:$0xe0] }
 0xd1f   :  { %13563 = vmatprep.subr.bf16.mxu0 %v14955_v17  ;;  %13518 = vmatpush3.bf16.msra.mxu1 %v14948_v44  ;;  %v10943_v17 = vrot.slane %v10941_v10, 3  ;;  %v10992_v44 = vrot.slane %v10990_v55, 3  ;;  %v10983_v52 = vrot.slane %v10981_v21, 3  ;;  %v20317_v10 = vpack.c.bf16 %v19233_v11, %v19148_v13  ;;  %v14954_v40 = vld [vmem:[%s20173_s17 + $0x320] sm:$0xff]   ;;  %v14957_v13 = vld [vmem:[%s20173_s17 + $0x358] sm:$0xff]  }
 0xd20   :  { %13519 = vmatprep.subr.bf16.mxu1 %v14949_v48  ;;  %v10995_v19 = vrot.slane %v10993_v9, 4  ;;  %v20316_v48 = vpack.c.bf16 %v19207_v14, %v19121_v25  ;;  %v20318_v25 = vrot.slane %v19511_v63, 1  ;;  %v10147_v55 = vsel %vm1004_vm9, %v19718_v61, %v10146_v7  ;;  %v10047_v61 = vld [vmem:[#allocation2 + $0x18] sm:$0x1] }
 0xd21   :  { %v10947_v1 = vor.u32 %v10946_v6, %v10943_v17  ;;  %v14965_v9 = vld [vmem:[%s20173_s17 + $0x3d8] sm:$0xff]   ;;  %v10158_v17 = vor.u32 %v19697_v0, %v10146_v7  ;;  %v14961_v6 = vld [vmem:[%s20173_s17 + $0x350] sm:$0xff]   ;;  %v19838_v21 = vpack.c.bf16 %v10047_v61, %v19726_v59  ;;  %v10357_v7 = vld [vmem:[#allocation2 + $0x40] sm:$0xe0] }
 0xd22   :  { %13564 = vmatpush3.bf16.msra.mxu0 %v14956_v27  ;;  %9989 = vmatmul.mubr.bf16.gmra.mxu1 %v20316_v48  ;;  %v19793_v54 = vor.u32 %v10995_v19, %v10992_v44  ;;  %v10986_v27 = vrot.slane %v10984_v56, 4  ;;  %v10123_v14 = vsel %vm1004_vm9, %v19707_v50, %v20318_v25  ;;  %v10160_v50 = vshll.u32 %v19788_v3, 16  ;;  %v14969_v19 = vld [vmem:[%s20173_s17 + $0x3d0] sm:$0xff]   ;;  %v14971_v25 = vld [vmem:[%s20173_s17 + $0x340] sm:$0xff]  }
 0xd23   :  { %13565 = vmatprep.subr.bf16.mxu0 %v14959_v15  ;;  %9996 = vmatprep.mubr.bf16.mxu1 %v20317_v10  ;;  %v19806_v15 = vsel %vm1589_vm8, %v10947_v1, %v10950_v47  ;;  %v14964_v47 = vld [vmem:[%s20173_s17 + $0x3a0] sm:$0xff]   ;;  %v10362_v56 = vpack.c.bf16 %v19561_v29, %v10358_v34  ;;  %v14963_v1 = vld [vmem:[%s20173_s17 + $0x310] sm:$0xff]   ;;  %v14968_v10 = vld [vmem:[%s20173_s17 + $0x308] sm:$0xff]  }
 0xd24   :  { %13520 = vmatpush3.bf16.msra.mxu1 %v14950_v23  ;;  %v19815_v11 = vsel %vm1589_vm8, %v10978_v8, %v19793_v54  ;;  %v19817_v63 = vor.u32 %v10986_v27, %v10983_v52  ;;  %v14958_v23 = vld [vmem:[%s20173_s17 + $0x318] sm:$0xff]   ;;  %v10162_v44 = vrot.slane %v10160_v50, 1  ;;  %v10152_v52 = vshll.u32 %v19838_v21, 16 }
 0xd25   :  { %10317 = vmatmul.mubr.bf16.gmra.mxu0 %v10123_v14  ;;  %13521 = vmatprep.subr.bf16.mxu1 %v14953_v32  ;;  %v20319_v32 = vpack.c.bf16 %v19279_v57, %v19209_v24  ;;  %v14966_v57 = vld [vmem:[%s20173_s17 + $0x348] sm:$0xff]   ;;  %v10414_v48 = vshll.u32 %v10362_v56, 16  ;;  %v9818_v14 = vpack.c.bf16 %v19724_v45, %v19724_v45 }
 0xd26   :  { %10324 = vmatprep.mubr.bf16.mxu0 %v10147_v55  ;;  %13566 = vmatpush3.bf16.msra.mxu0 %v14960_v16  ;;  %v19828_v8 = vsel %vm1589_vm8, %v10974_v60, %v19817_v63  ;;  %v14967_v60 = vld [vmem:[%s20173_s17 + $0x398] sm:$0xff]   ;;  %v20320_v16 = vpack.c.bf16 %v19305_v12, %v19244_v4  ;;  %v10163_v24 = vsel %vm1004_vm9, %v10158_v17, %v10162_v44  ;;  %v14970_v4 = vld [vmem:[%s20173_s17 + $0x390] sm:$0xff]   ;;  %v10411_v12 = vshrl.u32 %v10362_v56, 16  ;;  %vm20325_vm8 = vmmov %vm20312_vm1 }
 0xd27   :  { %13567 = vmatprep.subr.bf16.mxu0 %v14962_v26  ;;  %v20321_v26 = vrot.slane %v19548_v35, 1  ;;  %v10167_v55 = vshrl.u32 %v19788_v3, 16  ;;  %v14974_v35 = vld [vmem:[%s20173_s17 + $0x388] sm:$0xff]   ;;  %v10416_v61 = vrot.slane %v10414_v48, 3  ;;  %v14976_v3 = vld [vmem:[%s20173_s17 + $0x3c0] sm:$0xff]  }
 0xd28   :  { %13522 = vmatpush3.bf16.msra.mxu1 %v14954_v40  ;;  %v10154_v40 = vrot.slane %v10152_v52, 1  ;;  %v10413_v50 = vrot.slane %v10411_v12, 2  ;;  %v10406_v52 = vrot.slane %v19685_v38, 2 }
 0xd29   :  { %13523 = vmatprep.subr.bf16.mxu1 %v14957_v13  ;;  %v10150_v27 = vor.u32 %v19624_v49, %v20321_v26  ;;  %v10644_v49 = vld [vmem:[#allocation2 + $0x58] sm:$0xc0]  ;;  %v10361_v13 = vpack.c.bf16 %v19603_v31, %v10357_v7  ;;  %v10169_v17 = vor.u32 %v10167_v55, %v10162_v44  ;;  %v10434_v55 = vrot.slane %v19697_v0, 2  ;;  %v14981_v0 = vld [vmem:[%s20173_s17 + $0x468] sm:$0xff]  }
 0xd2a   :  { %13568 = vmatpush3.bf16.msra.mxu0 %v14964_v47  ;;  %9997 = vmatmul.mubr.bf16.gmra.mxu1 %v20319_v32  ;;  %v20322_v47 = vpack.c.bf16 %v19351_v2, %v19281_v36  ;;  %v14972_v36 = vld [vmem:[%s20173_s17 + $0x300] sm:$0xff]   ;;  %v10648_v2 = vpack.c.bf16 %v19561_v29, %v10644_v49  ;;  %v10417_v32 = vor.u32 %v10416_v61, %v10413_v50  ;;  %v10164_v29 = vshrl.u32 %v19838_v21, 16  ;;  %v10359_v61 = vld [vmem:[#allocation2 + $0x18] sm:$0x1f] }
 0xd2b   :  { %13569 = vmatprep.subr.bf16.mxu0 %v14965_v9  ;;  %10004 = vmatprep.mubr.bf16.mxu1 %v20320_v16  ;;  %v10418_v9 = vrot.slane %v19654_v62, 2  ;;  %v10155_v34 = vsel %vm1004_vm9, %v10150_v27, %v10154_v40  ;;  %v10399_v62 = vshrl.u32 %v10361_v13, 16  ;;  %v10698_v16 = vrot.slane %v19593_v53, 3  ;;  %vm20323_vm9 = vmmov %vm20312_vm1  ;;  %v14977_v27 = vld [vmem:[%s20173_s17 + $0x438] sm:$0xff]  }
 0xd2c   :  { %13524 = vmatpush3.bf16.msra.mxu1 %v14958_v23  ;;  %v10419_v23 = vrot.slane %v19615_v20, 3  ;;  %v14975_v20 = vld [vmem:[%s20173_s17 + $0x478] sm:$0xff]   ;;  %v10697_v56 = vrot.slane %v10648_v2, 3  ;;  %v10166_v48 = vor.u32 %v10164_v29, %v10154_v40  ;;  %v10427_v21 = vrot.slane %v19660_v33, 3  ;;  %v14979_v33 = vld [vmem:[%s20173_s17 + $0x470] sm:$0xff]  }
 0xd2d   :  { %10325 = vmatmul.mubr.bf16.gmra.mxu0 %v19579_v28  ;;  %13525 = vmatprep.subr.bf16.mxu1 %v14961_v6  ;;  %v14973_v28 = vld [vmem:[%s20173_s17 + $0x3c8] sm:$0xff]   ;;  %v10402_v6 = vshll.u32 %v10361_v13, 16  ;;  %v14980_v13 = vld [vmem:[%s20173_s17 + $0x430] sm:$0xff]  }
 0xd2e   :  { %10332 = vmatprep.mubr.bf16.mxu0 %v10163_v24  ;;  %13570 = vmatpush3.bf16.msra.mxu0 %v14967_v60  ;;  %v14978_v60 = vld [vmem:[%s20173_s17 + $0x380] sm:$0xff]   ;;  %v10420_v44 = vor.u32 %v10419_v23, %v10418_v9  ;;  %v10401_v24 = vrot.slane %v10399_v62, 2  ;;  %v10699_v7 = vsel %vm2723_vm10, %v10697_v56, %v10698_v16  ;;  %v14982_v9 = vld [vmem:[%s20173_s17 + $0x428] sm:$0xff]   ;;  %v10706_v23 = vrot.slane %v19664_v43, 3  ;;  %v14986_v56 = vld [vmem:[%s20173_s17 + $0x418] sm:$0xff]  }
 0xd2f   :  { %13571 = vmatprep.subr.bf16.mxu0 %v14969_v19  ;;  %v9817_v19 = vpack.c.bf16 %v19726_v59, %v19726_v59  ;;  %v20328_v43 = vrot.slane %v19498_v51, 3 }
 0xd30   :  { %13526 = vmatpush3.bf16.msra.mxu1 %v14963_v1  ;;  %v10643_v1 = vld [vmem:[#allocation2 + $0x40] sm:$0xc0]  ;;  %v10421_v12 = vsel %vm20323_vm9, %v10417_v32, %v10420_v44  ;;  %v14985_v32 = vld [vmem:[%s20173_s17 + $0x458] sm:$0xff]  }
 0xd31   :  { %13527 = vmatprep.subr.bf16.mxu1 %v14966_v57  ;;  %v10404_v57 = vrot.slane %v10402_v6, 3  ;;  %v10647_v53 = vpack.c.bf16 %v19603_v31, %v10643_v1  ;;  %v10702_v31 = vrot.slane %v19637_v42, 3  ;;  %v14987_v1 = vld [vmem:[%s20173_s17 + $0x450] sm:$0xff]  }
 0xd32   :  { %13572 = vmatpush3.bf16.msra.mxu0 %v14970_v4  ;;  %10005 = vmatmul.mubr.bf16.gmra.mxu1 %v20322_v47  ;;  %v10407_v4 = vrot.slane %v19646_v39, 3 }
 0xd33   :  { %13573 = vmatprep.subr.bf16.mxu0 %v14973_v28  ;;  %10012 = vmatprep.mubr.bf16.mxu1 %v9818_v14  ;;  %v10426_v28 = vrot.slane %v19667_v37, 2  ;;  %v10405_v38 = vor.u32 %v10404_v57, %v10401_v24  ;;  %v10695_v37 = vrot.slane %v19621_v58, 3  ;;  %v10703_v42 = vsel %vm2723_vm10, %v10698_v16, %v10702_v31  ;;  %v10645_v24 = vld [vmem:[#allocation2 + $0x18] sm:$0x3f] }
 0xd34   :  { %13528 = vmatpush3.bf16.msra.mxu1 %v14968_v10  ;;  %v10408_v26 = vor.u32 %v10407_v4, %v10406_v52  ;;  %v10694_v10 = vrot.slane %v10647_v53, 3  ;;  %v20329_v52 = vld [vmem:[#allocation28_spill] sm:$0xff] }
 0xd35   :  { %10333 = vmatmul.mubr.bf16.gmra.mxu0 %v10155_v34  ;;  %13529 = vmatprep.subr.bf16.mxu1 %v14971_v25  ;;  %v10428_v39 = vor.u32 %v10427_v21, %v10426_v28  ;;  %v10360_v25 = vld [vmem:[#allocation2] sm:$0x1f]  ;;  %v10701_v6 = vsel %vm2723_vm10, %v10695_v37, %v20328_v43  ;;  %v20331_v28 = vld [vmem:[#allocation32_spill] sm:$0xff] }
 0xd36   :  { %10340 = vmatprep.mubr.bf16.mxu0 %v10169_v17  ;;  %13574 = vmatpush3.bf16.msra.mxu0 %v14974_v35  ;;  %v10409_v14 = vsel %vm20324_vm7, %v10405_v38, %v10408_v26  ;;  %v10435_v35 = vrot.slane %v19711_v41, 3  ;;  %v10364_v49 = vpack.c.bf16 %v10360_v25, %v19724_v45  ;;  %v10696_v58 = vsel %vm2723_vm10, %v10694_v10, %v10695_v37  ;;  %v10646_v17 = vld [vmem:[#allocation2] sm:$0x3f]  ;;  %v14989_v53 = vld [vmem:[%s20173_s17 + $0x448] sm:$0xff]  }
 0xd37   :  { %13575 = vmatprep.subr.bf16.mxu0 %v14976_v3  ;;  %v10429_v40 = vsel %vm20325_vm8, %v10420_v44, %v10428_v39  ;;  %v14983_v3 = vld [vmem:[%s20173_s17 + $0x460] sm:$0xff]   ;;  %v10425_v34 = vsel %vm20326_vm2, %v10408_v26, %v19656_v5  ;;  %v10650_v44 = vpack.c.bf16 %v10646_v17, %v19724_v45  ;;  %v14990_v26 = vld [vmem:[%s20173_s17 + $0x408] sm:$0xff]  }
 0xd38   :  { %13530 = vmatpush3.bf16.msra.mxu1 %v14972_v36  ;;  %v10436_v41 = vor.u32 %v10435_v35, %v10434_v55  ;;  %v10448_v47 = vshrl.u32 %v10364_v49, 16  ;;  %v10451_v50 = vshll.u32 %v10364_v49, 16  ;;  %v10363_v36 = vpack.c.bf16 %v10359_v61, %v19726_v59  ;;  %v14984_v5 = vld [vmem:[%s20173_s17 + $0x420] sm:$0xff]  }
 0xd39   :  { %14301 = vmatprep.subr.bf16.mxu1 %v14975_v20  ;;  %v10710_v16 = vrot.slane %v10650_v44, 3  ;;  %v20334_v10 = vld [vmem:[#allocation27_spill] sm:$0xff] }
 0xd3a   :  { %13576 = vmatpush3.bf16.msra.mxu0 %v14978_v60  ;;  %10013 = vmatmul.mubr.bf16.gmra.mxu1 %v9817_v19  ;;  %v10437_v2 = vsel %vm20327_vm3, %v10428_v39, %v10436_v41  ;;  %v10453_v62 = vrot.slane %v10451_v50, 3  ;;  %v10707_v60 = vsel %vm2723_vm10, %v10702_v31, %v10706_v23  ;;  %v10439_v19 = vshrl.u32 %v10363_v36, 16  ;;  %v20332_v39 = vld [vmem:[#allocation22_spill] sm:$0xff]  ;;  %v20336_v31 = vld [vmem:[#allocation29_spill] sm:$0xff] }
 0xd3b   :  { %13607 = vmatprep.subr.bf16.mxu0 %v14975_v20  ;;  %10594 = vmatprep.mubr.bf16.mxu1 %v10421_v12  ;;  %v10450_v20 = vrot.slane %v10448_v47, 2  ;;  %v10442_v51 = vshll.u32 %v10363_v36, 16  ;;  %v14988_v12 = vld [vmem:[%s20173_s17 + $0x410] sm:$0xff]   ;;  %v10711_v21 = vsel %vm2723_vm10, %v10706_v23, %v10710_v16  ;;  %v20335_v37 = vrot.slane %v20334_v10, 3 }
 0xd3c   :  { %v10441_v57 = vrot.slane %v10439_v19, 2 }
 0xd3d   :  { %10341 = vmatmul.mubr.bf16.gmra.mxu0 %v10166_v48  ;;  %v10454_v29 = vor.u32 %v10453_v62, %v10450_v20  ;;  %v10444_v45 = vrot.slane %v10442_v51, 3  ;;  %v10649_v48 = vpack.c.bf16 %v10645_v24, %v19726_v59  ;;  %v14991_v59 = vld [vmem:[%s20173_s17 + $0x440] sm:$0xff]  }
 0xd3e   :  { %10850 = vmatprep.mubr.bf16.mxu0 %v10699_v7 }
 0xd3f   :  { %v10455_v4 = vsel %vm20330_vm4, %v10436_v41, %v10454_v29  ;;  %v10445_v7 = vor.u32 %v10444_v45, %v10441_v57  ;;  %v10708_v38 = vrot.slane %v10649_v48, 3 }
 0xd41   :  { %v10709_v25 = vsel %vm2723_vm10, %v20335_v37, %v10708_v38 }
 0xd42   :  { %10595 = vmatmul.mubr.bf16.vlgmr.msra.gmra.mxu1 %v10409_v14 }
 0xd43   :  { %14309 = vmatpush3.bf16.msra.mxu1 %v14977_v27  ;;  %10602 = vmatprep.mubr.bf16.mxu1 %v10429_v40 }
 0xd44   :  { %14302 = vmatprep.subr.bf16.mxu1 %v14979_v33 }
 0xd45   :  { %10851 = vmatmul.mubr.bf16.vlgmr.msra.gmra.mxu0 %v10696_v58 }
 0xd46   :  { %10858 = vmatprep.mubr.bf16.mxu0 %v10703_v42  ;;  %13608 = vmatpush3.bf16.msra.mxu0 %v14977_v27  ;;  %v10446_v27 = vsel %vm20333_vm5, %v20332_v39, %v10445_v7 }
 0xd47   :  { %13609 = vmatprep.subr.bf16.mxu0 %v14979_v33  ;;  %14310 = vmatpush3.bf16.msra.mxu1 %v14980_v13  ;;  %v14992_v33 = vld [vmem:[%s20173_s17 + $0x400] sm:$0xff]  }
 0xd48   :  { %14303 = vmatprep.subr.bf16.mxu1 %v14981_v0 }
 0xd4a   :  { %13610 = vmatpush3.bf16.msra.mxu0 %v14980_v13  ;;  %10603 = vmatmul.mubr.bf16.gmra.mxu1 %v10425_v34 }
 0xd4b   :  { %13611 = vmatprep.subr.bf16.mxu0 %v14981_v0  ;;  %10610 = vmatprep.mubr.bf16.mxu1 %v10437_v2 }
 0xd4c   :  { %14311 = vmatpush3.bf16.msra.mxu1 %v14982_v9 }
 0xd4d   :  { %10859 = vmatmul.mubr.bf16.gmra.mxu0 %v10701_v6  ;;  %14304 = vmatprep.subr.bf16.mxu1 %v14983_v3 }
 0xd4e   :  { %10866 = vmatprep.mubr.bf16.mxu0 %v10707_v60  ;;  %13612 = vmatpush3.bf16.msra.mxu0 %v14982_v9 }
 0xd4f   :  { %13613 = vmatprep.subr.bf16.mxu0 %v14983_v3 }
 0xd50   :  { %14312 = vmatpush3.bf16.msra.mxu1 %v14984_v5 }
 0xd51   :  { %14305 = vmatprep.subr.bf16.mxu1 %v14985_v32 }
 0xd52   :  { %13614 = vmatpush3.bf16.msra.mxu0 %v14984_v5  ;;  %10611 = vmatmul.mubr.bf16.gmra.mxu1 %v20329_v52 }
 0xd53   :  { %13615 = vmatprep.subr.bf16.mxu0 %v14985_v32  ;;  %10618 = vmatprep.mubr.bf16.mxu1 %v10455_v4 }
 0xd54   :  { %14313 = vmatpush3.bf16.msra.mxu1 %v14986_v56 }
 0xd55   :  { %10867 = vmatmul.mubr.bf16.gmra.mxu0 %v20331_v28  ;;  %14306 = vmatprep.subr.bf16.mxu1 %v14987_v1 }
 0xd56   :  { %10874 = vmatprep.mubr.bf16.mxu0 %v10711_v21  ;;  %13616 = vmatpush3.bf16.msra.mxu0 %v14986_v56 }
 0xd57   :  { %13617 = vmatprep.subr.bf16.mxu0 %v14987_v1 }
 0xd58   :  { %14314 = vmatpush3.bf16.msra.mxu1 %v14988_v12 }
 0xd59   :  { %14307 = vmatprep.subr.bf16.mxu1 %v14989_v53 }
 0xd5a   :  { %13618 = vmatpush3.bf16.msra.mxu0 %v14988_v12  ;;  %10619 = vmatmul.mubr.bf16.gmra.mxu1 %v10446_v27 }
 0xd5b   :  { %13619 = vmatprep.subr.bf16.mxu0 %v14989_v53  ;;  %10626 = vmatprep.mubr.bf16.mxu1 %v10454_v29 }
 0xd5c   :  { %14315 = vmatpush3.bf16.msra.mxu1 %v14990_v26 }
 0xd5d   :  { %10875 = vmatmul.mubr.bf16.gmra.mxu0 %v10709_v25  ;;  %14308 = vmatprep.subr.bf16.mxu1 %v14991_v59 }
 0xd5e   :  { %10882 = vmatprep.mubr.bf16.mxu0 %v10710_v16  ;;  %13620 = vmatpush3.bf16.msra.mxu0 %v14990_v26 }
 0xd5f   :  { %13621 = vmatprep.subr.bf16.mxu0 %v14991_v59 }
 0xd60   :  { %14316 = vmatpush3.bf16.msra.mxu1 %v14992_v33 }
 0xd62   :  { %13622 = vmatpush3.bf16.msra.mxu0 %v14992_v33  ;;  %10627 = vmatmul.mubr.bf16.gmra.mxu1 %v10445_v7 }
 0xd63   :  { %11144 = vmatprep.mubr.bf16.mxu1 %v20336_v31 }
 0xd65   :  { %10883 = vmatmul.mubr.bf16.gmra.mxu0 %v10708_v38 }
 0xd66   :  { %11136 = vmatprep.mubr.bf16.mxu0 %v19766_v22 }
 0xd6a   :  { %11145 = vmatmul.mubr.bf16.vlgmr.msra.gmra.mxu1 %v19760_v18 }
 0xd6b   :  { %11152 = vmatprep.mubr.bf16.mxu1 %v19772_v30 }
 0xd6d   :  { %11137 = vmatmul.mubr.bf16.vlgmr.msra.gmra.mxu0 %v19806_v15 }
 0xd72   :  { %11153 = vmatmul.mubr.bf16.gmra.mxu1 %v19778_v46 }
 0xd73   :  { %11160 = vmatprep.mubr.bf16.mxu1 %v19815_v11 }
 0xd7a   :  { %11161 = vmatmul.mubr.bf16.gmra.mxu1 %v19828_v8 }
 0xd7b   :  { %11168 = vmatprep.mubr.bf16.mxu1 %v19793_v54 }
 0xd81   :  { %v13255_v14 = vpop.f32.mrf.mxu1 }
 0xd82   :  { %11169 = vmatmul.mubr.bf16.gmra.mxu1 %v19817_v63 }
 0xd83   :  { %v13256_v40 = vpop.f32.mrf.mxu1 }
 0xd84   :  { %v13257_v55 = vadd.f32 %v13256_v40, %v13255_v14 }
 0xd85   :  { %v13258_v22 = vpop.f32.mrf.mxu1 }
 0xd87   :  { %v13259_v35 = vpop.f32.mrf.mxu1 }
 0xd88   :  { %v13301_v18 = vpop.f32.mrf.mxu0  ;;  %v13260_v49 = vadd.f32 %v13259_v35, %v13258_v22 }
 0xd8a   :  { %v13302_v30 = vpop.f32.mrf.mxu0 }
 0xd8b   :  { %v13303_v58 = vadd.f32 %v13302_v30, %v13301_v18 }
 0xd8c   :  { %v13304_v15 = vpop.f32.mrf.mxu0 }
 0xd8d   :  { %v19998_v13 = vadd.f32 %v13303_v58, %v13257_v55 }
 0xd8e   :  { %v13261_v46 = vpop.f32.mrf.mxu1  ;;  %v13305_v11 = vpop.f32.mrf.mxu0 }
 0xd8f   :  { %v13306_v42 = vadd.f32 %v13305_v11, %v13304_v15 }
 0xd90   :  { %v13262_v8 = vpop.f32.mrf.mxu1  ;;  %v13307_v0 = vpop.f32.mrf.mxu0 }
 0xd91   :  { %v13263_v54 = vadd.f32 %v13262_v8, %v13261_v46  ;;  %v20000_v41 = vadd.f32 %v13306_v42, %v13260_v49 }
 0xd92   :  { %v13264_v63 = vpop.f32.mrf.mxu1  ;;  %v13308_v47 = vpop.f32.mrf.mxu0 }
 0xd93   :  { %v13309_v50 = vadd.f32 %v13308_v47, %v13307_v0 }
 0xd94   :  { %v13265_v61 = vpop.f32.mrf.mxu1  ;;  %v13310_v9 = vpop.f32.mrf.mxu0 }
 0xd95   :  { %v13266_v23 = vadd.f32 %v13265_v61, %v13264_v63  ;;  %v20002_v3 = vadd.f32 %v13309_v50, %v13263_v54 }
 0xd96   :  { %v13267_v34 = vpop.f32.mrf.mxu1  ;;  %v13311_v17 = vpop.f32.mrf.mxu0 }
 0xd97   :  { %v13312_v36 = vadd.f32 %v13311_v17, %v13310_v9 }
 0xd98   :  { %v13268_v2 = vpop.f32.mrf.mxu1  ;;  %v13313_v20 = vpop.f32.mrf.mxu0 }
 0xd99   :  { %v13269_v62 = vadd.f32 %v13268_v2, %v13267_v34  ;;  %v20004_v43 = vadd.f32 %v13312_v36, %v13266_v23 }
 0xd9a   :  { %v13270_v6 = vpop.f32.mrf.mxu1  ;;  %v13314_v5 = vpop.f32.mrf.mxu0 }
 0xd9b   :  { %v13315_v60 = vadd.f32 %v13314_v5, %v13313_v20 }
 0xd9c   :  { %v13271_v32 = vpop.f32.mrf.mxu1  ;;  %v13316_v44 = vpop.f32.mrf.mxu0 }
 0xd9d   :  { %v13272_v19 = vadd.f32 %v13271_v32, %v13270_v6  ;;  %v20006_v51 = vadd.f32 %v13315_v60, %v13269_v62 }
 0xd9e   :  { %v13317_v29 = vpop.f32.mrf.mxu0 }
 0xd9f   :  { %v13318_v56 = vadd.f32 %v13317_v29, %v13316_v44 }
 0xda1   :  { %v20008_v16 = vadd.f32 %v13318_v56, %v13272_v19 }
 0xda2   :  { %v13273_v1 = vpop.f32.mrf.mxu1 }
 0xda4   :  { %v13274_v24 = vpop.f32.mrf.mxu1 }
 0xda5   :  { %v13319_v57 = vpop.f32.mrf.mxu0  ;;  %v13275_v45 = vadd.f32 %v13274_v24, %v13273_v1 }
 0xda6   :  { %v13276_v52 = vpop.f32.mrf.mxu1 }
 0xda7   :  { %v13320_v4 = vpop.f32.mrf.mxu0 }
 0xda8   :  { %v13321_v12 = vadd.f32 %v13320_v4, %v13319_v57  ;;  %v13277_v48 = vpop.f32.mrf.mxu1 }
 0xda9   :  { %v13322_v28 = vpop.f32.mrf.mxu0  ;;  %v13278_v21 = vadd.f32 %v13277_v48, %v13276_v52 }
 0xdaa   :  { %v20010_v53 = vadd.f32 %v13321_v12, %v13275_v45  ;;  %v13279_v7 = vpop.f32.mrf.mxu1 }
 0xdab   :  { %v13323_v38 = vpop.f32.mrf.mxu0 }
 0xdac   :  { %v13324_v26 = vadd.f32 %v13323_v38, %v13322_v28  ;;  %v13280_v59 = vpop.f32.mrf.mxu1 }
 0xdad   :  { %v13325_v39 = vpop.f32.mrf.mxu0  ;;  %v13281_v27 = vadd.f32 %v13280_v59, %v13279_v7 }
 0xdae   :  { %v20012_v10 = vadd.f32 %v13324_v26, %v13278_v21  ;;  %v13282_v37 = vpop.f32.mrf.mxu1 }
 0xdaf   :  { %v13326_v25 = vpop.f32.mrf.mxu0 }
 0xdb0   :  { %v13327_v33 = vadd.f32 %v13326_v25, %v13325_v39  ;;  %v13283_v31 = vpop.f32.mrf.mxu1 }
 0xdb1   :  { %v13328_v14 = vpop.f32.mrf.mxu0 }
 0xdb2   :  { %v20014_v40 = vadd.f32 %v13327_v33, %v13281_v27  ;;  %v13347_v55 = vpop.f32.mrf.mxu1 }
 0xdb3   :  { %v13329_v22 = vpop.f32.mrf.mxu0 }
 0xdb4   :  { %v13348_v35 = vpop.f32.mrf.mxu1 }
 0xdb5   :  { %v13393_v18 = vpop.f32.mrf.mxu0  ;;  %v13349_v49 = vadd.f32 %v13348_v35, %v13347_v55 }
 0xdb6   :  { %v13350_v30 = vpop.f32.mrf.mxu1 }
 0xdb7   :  { %v13394_v58 = vpop.f32.mrf.mxu0  ;;  %v9512_v15 = vadd.f32 %v13349_v49, %v19998_v13 }
 0xdb8   :  { %v13395_v46 = vadd.f32 %v13394_v58, %v13393_v18  ;;  %v13351_v11 = vpop.f32.mrf.mxu1 }
 0xdb9   :  { %v13396_v42 = vpop.f32.mrf.mxu0  ;;  %v13352_v8 = vadd.f32 %v13351_v11, %v13350_v30 }
 0xdba   :  { %v20017_v0 = vadd.f32 %v13395_v46, %v9512_v15  ;;  %v13353_v54 = vpop.f32.mrf.mxu1 }
 0xdbb   :  { %v13397_v63 = vpop.f32.mrf.mxu0  ;;  %v9513_v47 = vadd.f32 %v13352_v8, %v20000_v41 }
 0xdbc   :  { %v13398_v50 = vadd.f32 %v13397_v63, %v13396_v42  ;;  %v13354_v61 = vpop.f32.mrf.mxu1 }
 0xdbd   :  { %v13399_v9 = vpop.f32.mrf.mxu0  ;;  %v13355_v23 = vadd.f32 %v13354_v61, %v13353_v54 }
 0xdbe   :  { %v20020_v34 = vadd.f32 %v13398_v50, %v9513_v47  ;;  %v13356_v17 = vpop.f32.mrf.mxu1 }
 0xdbf   :  { %v13400_v36 = vpop.f32.mrf.mxu0  ;;  %v9514_v13 = vadd.f32 %v13355_v23, %v20002_v3 }
 0xdc0   :  { %v13401_v2 = vadd.f32 %v13400_v36, %v13399_v9  ;;  %v13357_v20 = vpop.f32.mrf.mxu1 }
 0xdc1   :  { %v13402_v62 = vpop.f32.mrf.mxu0  ;;  %v13358_v6 = vadd.f32 %v13357_v20, %v13356_v17 }
 0xdc2   :  { %v20023_v5 = vadd.f32 %v13401_v2, %v9514_v13  ;;  %v13359_v60 = vpop.f32.mrf.mxu1 }
 0xdc3   :  { %v13403_v32 = vpop.f32.mrf.mxu0  ;;  %v9515_v41 = vadd.f32 %v13358_v6, %v20004_v43 }
 0xdc4   :  { %v13404_v44 = vadd.f32 %v13403_v32, %v13402_v62  ;;  %v13360_v19 = vpop.f32.mrf.mxu1 }
 0xdc5   :  { %v13405_v29 = vpop.f32.mrf.mxu0  ;;  %v13361_v56 = vadd.f32 %v13360_v19, %v13359_v60 }
 0xdc6   :  { %v20026_v1 = vadd.f32 %v13404_v44, %v9515_v41  ;;  %v13362_v24 = vpop.f32.mrf.mxu1 }
 0xdc7   :  { %v13406_v57 = vpop.f32.mrf.mxu0  ;;  %v9516_v3 = vadd.f32 %v13361_v56, %v20006_v51 }
 0xdc8   :  { %v13407_v45 = vadd.f32 %v13406_v57, %v13405_v29  ;;  %v13363_v52 = vpop.f32.mrf.mxu1 }
 0xdc9   :  { %v13408_v4 = vpop.f32.mrf.mxu0  ;;  %v13364_v12 = vadd.f32 %v13363_v52, %v13362_v24 }
 0xdca   :  { %v20029_v48 = vadd.f32 %v13407_v45, %v9516_v3  ;;  %v13365_v28 = vpop.f32.mrf.mxu1 }
 0xdcb   :  { %v13409_v21 = vpop.f32.mrf.mxu0  ;;  %v9517_v43 = vadd.f32 %v13364_v12, %v20008_v16 }
 0xdcc   :  { %v13410_v7 = vadd.f32 %v13409_v21, %v13408_v4  ;;  %v13366_v38 = vpop.f32.mrf.mxu1 }
 0xdcd   :  { %v13411_v26 = vpop.f32.mrf.mxu0  ;;  %v13367_v59 = vadd.f32 %v13366_v38, %v13365_v28 }
 0xdce   :  { %v20032_v39 = vadd.f32 %v13410_v7, %v9517_v43  ;;  %v13368_v27 = vpop.f32.mrf.mxu1 }
 0xdcf   :  { %v13412_v37 = vpop.f32.mrf.mxu0  ;;  %v9518_v51 = vadd.f32 %v13367_v59, %v20010_v53 }
 0xdd0   :  { %v13413_v25 = vadd.f32 %v13412_v37, %v13411_v26  ;;  %v13369_v33 = vpop.f32.mrf.mxu1 }
 0xdd1   :  { %v13414_v31 = vpop.f32.mrf.mxu0  ;;  %v13370_v14 = vadd.f32 %v13369_v33, %v13368_v27 }
 0xdd2   :  { %v20035_v55 = vadd.f32 %v13413_v25, %v9518_v51  ;;  %v13371_v22 = vpop.f32.mrf.mxu1 }
 0xdd3   :  { %v13415_v35 = vpop.f32.mrf.mxu0  ;;  %v9519_v16 = vadd.f32 %v13370_v14, %v20012_v10 }
 0xdd4   :  { %v13416_v18 = vadd.f32 %v13415_v35, %v13414_v31  ;;  %v13372_v49 = vpop.f32.mrf.mxu1 }
 0xdd5   :  { %v13417_v30 = vpop.f32.mrf.mxu0  ;;  %v13373_v58 = vadd.f32 %v13372_v49, %v13371_v22 }
 0xdd6   :  { %v20038_v15 = vadd.f32 %v13416_v18, %v9519_v16  ;;  %v13374_v46 = vpop.f32.mrf.mxu1 }
 0xdd7   :  { %v13418_v11 = vpop.f32.mrf.mxu0  ;;  %v9520_v53 = vadd.f32 %v13373_v58, %v20014_v40 }
 0xdd8   :  { %v13419_v42 = vadd.f32 %v13418_v11, %v13417_v30  ;;  %v13375_v8 = vpop.f32.mrf.mxu1 }
 0xdd9   :  { %v13420_v54 = vpop.f32.mrf.mxu0 }
 0xdda   :  { %v20041_v63 = vadd.f32 %v13419_v42, %v9520_v53  ;;  %v13439_v47 = vpop.f32.mrf.mxu1 }
 0xddb   :  { %v13421_v50 = vpop.f32.mrf.mxu0 }
 0xddc   :  { %v13440_v61 = vpop.f32.mrf.mxu1 }
 0xddd   :  { %v13485_v9 = vpop.f32.mrf.mxu0  ;;  %v13441_v10 = vadd.f32 %v13440_v61, %v13439_v47 }
 0xdde   :  { %v13442_v23 = vpop.f32.mrf.mxu1 }
 0xddf   :  { %v13486_v17 = vpop.f32.mrf.mxu0  ;;  %v10020_v36 = vadd.f32 %v13441_v10, %v20017_v0 }
 0xde0   :  { %v13487_v13 = vadd.f32 %v13486_v17, %v13485_v9  ;;  %v13443_v2 = vpop.f32.mrf.mxu1 }
 0xde1   :  { %v13488_v20 = vpop.f32.mrf.mxu0  ;;  %v13444_v62 = vadd.f32 %v13443_v2, %v13442_v23 }
 0xde2   :  { %v20044_v6 = vadd.f32 %v13487_v13, %v10020_v36  ;;  %v13445_v40 = vpop.f32.mrf.mxu1 }
 0xde3   :  { %v13489_v60 = vpop.f32.mrf.mxu0  ;;  %v10021_v32 = vadd.f32 %v13444_v62, %v20020_v34 }
 0xde4   :  { %v13490_v41 = vadd.f32 %v13489_v60, %v13488_v20  ;;  %v13446_v44 = vpop.f32.mrf.mxu1 }
 0xde5   :  { %v13491_v19 = vpop.f32.mrf.mxu0  ;;  %v13447_v29 = vadd.f32 %v13446_v44, %v13445_v40 }
 0xde6   :  { %v20047_v56 = vadd.f32 %v13490_v41, %v10021_v32  ;;  %v13448_v24 = vpop.f32.mrf.mxu1 }
 0xde7   :  { %v13492_v57 = vpop.f32.mrf.mxu0  ;;  %v10022_v0 = vadd.f32 %v13447_v29, %v20023_v5 }
 0xde8   :  { %v13493_v3 = vadd.f32 %v13492_v57, %v13491_v19  ;;  %v13449_v45 = vpop.f32.mrf.mxu1 }
 0xde9   :  { %v13494_v52 = vpop.f32.mrf.mxu0  ;;  %v13450_v4 = vadd.f32 %v13449_v45, %v13448_v24 }
 0xdea   :  { %v20050_v12 = vadd.f32 %v13493_v3, %v10022_v0  ;;  %v13451_v28 = vpop.f32.mrf.mxu1 }
 0xdeb   :  { %v13495_v21 = vpop.f32.mrf.mxu0  ;;  %v10023_v34 = vadd.f32 %v13450_v4, %v20026_v1 }
 0xdec   :  { %v13496_v43 = vadd.f32 %v13495_v21, %v13494_v52  ;;  %v13452_v7 = vpop.f32.mrf.mxu1 }
 0xded   :  { %v13497_v38 = vpop.f32.mrf.mxu0  ;;  %v13453_v26 = vadd.f32 %v13452_v7, %v13451_v28 }
 0xdee   :  { %v20053_v59 = vadd.f32 %v13496_v43, %v10023_v34  ;;  %v13454_v27 = vpop.f32.mrf.mxu1 }
 0xdef   :  { %v13498_v37 = vpop.f32.mrf.mxu0  ;;  %v10024_v5 = vadd.f32 %v13453_v26, %v20029_v48 }
 0xdf0   :  { %v13499_v51 = vadd.f32 %v13498_v37, %v13497_v38  ;;  %v13455_v25 = vpop.f32.mrf.mxu1 }
 0xdf1   :  { %v13500_v33 = vpop.f32.mrf.mxu0  ;;  %v13456_v31 = vadd.f32 %v13455_v25, %v13454_v27 }
 0xdf2   :  { %v20056_v14 = vadd.f32 %v13499_v51, %v10024_v5  ;;  %v13457_v22 = vpop.f32.mrf.mxu1 }
 0xdf3   :  { %v13501_v35 = vpop.f32.mrf.mxu0  ;;  %v10025_v1 = vadd.f32 %v13456_v31, %v20032_v39 }
 0xdf4   :  { %v13502_v16 = vadd.f32 %v13501_v35, %v13500_v33  ;;  %v13458_v18 = vpop.f32.mrf.mxu1 }
 0xdf5   :  { %v13503_v49 = vpop.f32.mrf.mxu0  ;;  %v13459_v30 = vadd.f32 %v13458_v18, %v13457_v22 }
 0xdf6   :  { %v20059_v58 = vadd.f32 %v13502_v16, %v10025_v1  ;;  %v13460_v46 = vpop.f32.mrf.mxu1 }
 0xdf7   :  { %v13504_v11 = vpop.f32.mrf.mxu0  ;;  %v10026_v48 = vadd.f32 %v13459_v30, %v20035_v55 }
 0xdf8   :  { %v13505_v53 = vadd.f32 %v13504_v11, %v13503_v49  ;;  %v13461_v42 = vpop.f32.mrf.mxu1 }
 0xdf9   :  { %v13506_v8 = vpop.f32.mrf.mxu0  ;;  %v13462_v54 = vadd.f32 %v13461_v42, %v13460_v46 }
 0xdfa   :  { %v20062_v47 = vadd.f32 %v13505_v53, %v10026_v48  ;;  %v13463_v50 = vpop.f32.mrf.mxu1 }
 0xdfb   :  { %v13507_v61 = vpop.f32.mrf.mxu0  ;;  %v10027_v39 = vadd.f32 %v13462_v54, %v20038_v15 }
 0xdfc   :  { %v13508_v9 = vadd.f32 %v13507_v61, %v13506_v8  ;;  %v13464_v10 = vpop.f32.mrf.mxu1 }
 0xdfd   :  { %v13509_v23 = vpop.f32.mrf.mxu0  ;;  %v13465_v17 = vadd.f32 %v13464_v10, %v13463_v50 }
 0xdfe   :  { %v20065_v36 = vadd.f32 %v13508_v9, %v10027_v39  ;;  %v13466_v13 = vpop.f32.mrf.mxu1 }
 0xdff   :  { %v13510_v2 = vpop.f32.mrf.mxu0  ;;  %v10028_v55 = vadd.f32 %v13465_v17, %v20041_v63 }
 0xe00   :  { %v13511_v20 = vadd.f32 %v13510_v2, %v13509_v23  ;;  %v13467_v62 = vpop.f32.mrf.mxu1 }
 0xe01   :  { %v13512_v40 = vpop.f32.mrf.mxu0 }
 0xe02   :  { %v20068_v60 = vadd.f32 %v13511_v20, %v10028_v55  ;;  %v13531_v32 = vpop.f32.mrf.mxu1 }
 0xe03   :  { %v13513_v41 = vpop.f32.mrf.mxu0 }
 0xe04   :  { %v13532_v44 = vpop.f32.mrf.mxu1 }
 0xe05   :  { %v13577_v19 = vpop.f32.mrf.mxu0  ;;  %v13533_v54 = vadd.f32 %v13532_v44, %v13531_v32  ;;  %v20099_v32 = vld [vmem:[%s20174_s18] ss:$0 sm:$0xff] }
 0xe06   :  { %v13534_v15 = vpop.f32.mrf.mxu1 }
 0xe07   :  { %v13578_v29 = vpop.f32.mrf.mxu0  ;;  %v10634_v55 = vadd.f32 %v13533_v54, %v20044_v6 }
 0xe08   :  { %v13535_v24 = vpop.f32.mrf.mxu1  ;;  %v13579_v9 = vadd.f32 %v13578_v29, %v13577_v19 }
 0xe09   :  { %v13580_v57 = vpop.f32.mrf.mxu0  ;;  %v13536_v17 = vadd.f32 %v13535_v24, %v13534_v15 }
 0xe0a   :  { %v13537_v0 = vpop.f32.mrf.mxu1  ;;  %v10890_v29 = vadd.f32 %v13579_v9, %v10634_v55 }
 0xe0b   :  { %v13581_v3 = vpop.f32.mrf.mxu0 }
 0xe0c   :  { %v13538_v45 = vpop.f32.mrf.mxu1  ;;  %v13582_v41 = vadd.f32 %v13581_v3, %v13580_v57 }
 0xe0d   :  { %v13583_v52 = vpop.f32.mrf.mxu0  ;;  %v13539_v53 = vadd.f32 %v13538_v45, %v13537_v0  ;;  %v10635_v45 = vadd.f32 %v13536_v17, %v20047_v56 }
 0xe0e   :  { %v13540_v4 = vpop.f32.mrf.mxu1 }
 0xe0f   :  { %v13584_v28 = vpop.f32.mrf.mxu0  ;;  %v10636_v10 = vadd.f32 %v13539_v53, %v20050_v12 }
 0xe10   :  { %v13541_v63 = vpop.f32.mrf.mxu1  ;;  %v13585_v50 = vadd.f32 %v13584_v28, %v13583_v52 }
 0xe11   :  { %v13586_v21 = vpop.f32.mrf.mxu0  ;;  %v13542_v23 = vadd.f32 %v13541_v63, %v13540_v4 }
 0xe12   :  { %v13543_v34 = vpop.f32.mrf.mxu1  ;;  %v10892_v20 = vadd.f32 %v13585_v50, %v10636_v10 }
 0xe13   :  { %v13587_v43 = vpop.f32.mrf.mxu0  ;;  %v10637_v12 = vadd.f32 %v13542_v23, %v20053_v59 }
 0xe14   :  { %v13544_v7 = vpop.f32.mrf.mxu1  ;;  %v13588_v62 = vadd.f32 %v13587_v43, %v13586_v21  ;;  %v10891_v21 = vadd.f32 %v13582_v41, %v10635_v45 }
 0xe15   :  { %v13589_v38 = vpop.f32.mrf.mxu0  ;;  %v13545_v0 = vadd.f32 %v13544_v7, %v13543_v34 }
 0xe16   :  { %v13546_v26 = vpop.f32.mrf.mxu1  ;;  %v10893_v28 = vadd.f32 %v13588_v62, %v10637_v12 }
 0xe17   :  { %v13590_v27 = vpop.f32.mrf.mxu0  ;;  %v10638_v34 = vadd.f32 %v13545_v0, %v20056_v14 }
 0xe18   :  { %v13547_v37 = vpop.f32.mrf.mxu1  ;;  %v13591_v6 = vadd.f32 %v13590_v27, %v13589_v38 }
 0xe19   :  { %v13592_v5 = vpop.f32.mrf.mxu0  ;;  %v13548_v43 = vadd.f32 %v13547_v37, %v13546_v26 }
 0xe1a   :  { %v20070_v51 = vpop.f32.mrf.mxu1  ;;  %v10894_v56 = vadd.f32 %v13591_v6, %v10638_v34 }
 0xe1b   :  { %v13593_v25 = vpop.f32.mrf.mxu0 }
 0xe1c   :  { %v20072_v33 = vpop.f32.mrf.mxu1  ;;  %v13594_v38 = vadd.f32 %v13593_v25, %v13592_v5 }
 0xe1d   :  { %v20074_v31 = vpop.f32.mrf.mxu0  ;;  %v13551_v14 = vadd.f32 %v20072_v33, %v20070_v51 }
 0xe1e   :  { %v20076_v22 = vpop.f32.mrf.mxu1 }
 0xe1f   :  { %v20078_v35 = vpop.f32.mrf.mxu0 }
 0xe20   :  { %v20080_v1 = vpop.f32.mrf.mxu1  ;;  %v13597_v5 = vadd.f32 %v20078_v35, %v20074_v31 }
 0xe21   :  { %v20082_v16 = vpop.f32.mrf.mxu0 }
 0xe22   :  { %v20084_v18 = vpop.f32.mrf.mxu1 }
 0xe23   :  { %v20086_v49 = vpop.f32.mrf.mxu0 }
 0xe24   :  { %v20088_v30 = vpop.f32.mrf.mxu1  ;;  %v13600_v55 = vadd.f32 %v20086_v49, %v20082_v16 }
 0xe25   :  { %v20090_v46 = vpop.f32.mrf.mxu0 }
 0xe26   :  { %v13558_v11 = vpop.f32.mrf.mxu1 }
 0xe27   :  { %v20092_v48 = vpop.f32.mrf.mxu0 }
 0xe28   :  { %v13559_v42 = vpop.f32.mrf.mxu1  ;;  %v13603_v0 = vadd.f32 %v20092_v48, %v20090_v46 }
 0xe29   :  { %v13604_v8 = vpop.f32.mrf.mxu0 }
 0xe2a   :  { %v13629_v61 = vpop.f32.mrf.mxu1 }
 0xe2b   :  { %v13605_v39 = vpop.f32.mrf.mxu0 }
 0xe2c   :  { %v13630_v13 = vpop.f32.mrf.mxu1 }
 0xe2d   :  { %v13623_v2 = vpop.f32.mrf.mxu0  ;;  %v13631_v40 = vadd.f32 %v13630_v13, %v13629_v61  ;;  %v10639_v61 = vadd.f32 %v13548_v43, %v20059_v58  ;;  %v10640_v58 = vadd.f32 %v13551_v14, %v20062_v47  ;;  %v13554_v13 = vadd.f32 %v20080_v1, %v20076_v22 }
 0xe2e   :  { %v13632_v44 = vpop.f32.mrf.mxu1 }
 0xe2f   :  { %v13624_v19 = vpop.f32.mrf.mxu0  ;;  %v11178_v15 = vadd.f32 %v13631_v40, %v10892_v20  ;;  %v10895_v9 = vadd.f32 %v13594_v38, %v10639_v61  ;;  %v10641_v62 = vadd.f32 %v13554_v13, %v20065_v36  ;;  %v13557_v40 = vadd.f32 %v20088_v30, %v20084_v18 }
 0xe30   :  { %v13625_v24 = vadd.f32 %v13624_v19, %v13623_v2  ;;  %v13633_v52 = vpop.f32.mrf.mxu1  ;;  %v10896_v2 = vadd.f32 %v13597_v5, %v10640_v58 }
 0xe31   :  { %v13626_v4 = vpop.f32.mrf.mxu0  ;;  %v11194_v57 = vadd.f32 %v20099_v32, %v11178_v15  ;;  %v13634_v63 = vadd.f32 %v13633_v52, %v13632_v44  ;;  %v10897_v1 = vadd.f32 %v13600_v55, %v10641_v62  ;;  %v10642_v19 = vadd.f32 %v13557_v40, %v20068_v60 }
 0xe32   :  { %v11176_v3 = vadd.f32 %v13625_v24, %v10890_v29  ;;  %v13635_v7 = vpop.f32.mrf.mxu1 }
 0xe33   :  { %v13627_v11 = vpop.f32.mrf.mxu0  ;;  %15003 = vtanh.f32 %v11194_v57  ;;  %v11179_v53 = vadd.f32 %v13634_v63, %v10893_v28  ;;  %v10898_v46 = vadd.f32 %v13603_v0, %v10642_v19 }
 0xe34   :  { %v11192_v59 = vadd.f32 %v20099_v32, %v11176_v3  ;;  %v13628_v42 = vadd.f32 %v13627_v11, %v13626_v4  ;;  %v13636_v27 = vpop.f32.mrf.mxu1 }
 0xe35   :  { %v11195_v8 = vadd.f32 %v20099_v32, %v11179_v53  ;;  %v13637_v50 = vadd.f32 %v13636_v27, %v13635_v7 }
 0xe36   :  { %15005 = vtanh.f32 %v11192_v59  ;;  %v11177_v54 = vadd.f32 %v13628_v42, %v10891_v21  ;;  %v13638_v39 = vpop.f32.mrf.mxu1 }
 0xe37   :  { %15007 = vtanh.f32 %v11195_v8  ;;  %v11180_v37 = vadd.f32 %v13637_v50, %v10894_v56 }
 0xe38   :  { %v11193_v26 = vadd.f32 %v20099_v32, %v11177_v54  ;;  %v13639_v10 = vpop.f32.mrf.mxu1 }
 0xe39   :  { %v11196_v25 = vadd.f32 %v20099_v32, %v11180_v37  ;;  %v13640_v23 = vadd.f32 %v13639_v10, %v13638_v39 }
 0xe3a   :  { %15009 = vtanh.f32 %v11193_v26  ;;  %v13641_v17 = vpop.f32.mrf.mxu1 }
 0xe3b   :  { %15011 = vtanh.f32 %v11196_v25  ;;  %v11181_v51 = vadd.f32 %v13640_v23, %v10895_v9 }
 0xe3c   :  { %v13642_v33 = vpop.f32.mrf.mxu1 }
 0xe3d   :  { %v11197_v20 = vadd.f32 %v20099_v32, %v11181_v51  ;;  %v13643_v31 = vadd.f32 %v13642_v33, %v13641_v17 }
 0xe3e   :  { %v13644_v35 = vpop.f32.mrf.mxu1 }
 0xe3f   :  { %15013 = vtanh.f32 %v11197_v20  ;;  %v11182_v47 = vadd.f32 %v13643_v31, %v10896_v2 }
 0xe40   :  { %v15004_v41 = vpop.eup %15003  ;;  %v13645_v22 = vpop.f32.mrf.mxu1 }
 0xe41   :  { %11212 = vst [vmem:[%s20175_s19 + $0x10] sm:$0xff] %v15004_v41  ;;  %v11198_v16 = vadd.f32 %v20099_v32, %v11182_v47  ;;  %v13646_v49 = vadd.f32 %v13645_v22, %v13644_v35 }
 0xe42   :  { %v13647_v36 = vpop.f32.mrf.mxu1 }
 0xe43   :  { %v15006_v44 = vpop.eup %15005  ;;  %15015 = vtanh.f32 %v11198_v16  ;;  %v11183_v18 = vadd.f32 %v13646_v49, %v10897_v1 }
 0xe44   :  { %11210 = vst [vmem:[%s20175_s19] sm:$0xff] %v15006_v44  ;;  %v15008_v30 = vpop.eup %15007  ;;  %v13648_v29 = vpop.f32.mrf.mxu1 }
 0xe45   :  { %11213 = vst [vmem:[%s20175_s19 + $0x18] sm:$0xff] %v15008_v30  ;;  %v11199_v48 = vadd.f32 %v20099_v32, %v11183_v18  ;;  %v13649_v12 = vadd.f32 %v13648_v29, %v13647_v36 }
 0xe46   :  { %v13650_v24 = vpop.f32.mrf.mxu1 }
 0xe47   :  { %v15010_v15 = vpop.eup %15009  ;;  %15017 = vtanh.f32 %v11199_v48  ;;  %v11184_v60 = vadd.f32 %v13649_v12, %v10898_v46 }
 0xe48   :  { %11211 = vst [vmem:[%s20175_s19 + $0x8] sm:$0xff] %v15010_v15  ;;  %v15012_v45 = vpop.eup %15011  ;;  %v13651_v6 = vpop.f32.mrf.mxu1 }
 0xe49   :  { %11214 = vst [vmem:[%s20175_s19 + $0x20] sm:$0xff] %v15012_v45  ;;  %v11200_v52 = vadd.f32 %v20099_v32, %v11184_v60 }
 0xe4b   :  { %15019 = vtanh.f32 %v11200_v52 }
 0xe4c   :  { %v15014_v4 = vpop.eup %15013 }
 0xe4d   :  { %11215 = vst [vmem:[%s20175_s19 + $0x28] sm:$0xff] %v15014_v4 }
 0xe50   :  { %v15016_v28 = vpop.eup %15015 }
 0xe51   :  { %11216 = vst [vmem:[%s20175_s19 + $0x30] sm:$0xff] %v15016_v28 }
 0xe54   :  { %v15018_v57 = vpop.eup %15017 }
 0xe55   :  { %11217 = vst [vmem:[%s20175_s19 + $0x38] sm:$0xff] %v15018_v57 }
 0xe58   :  { %v15020_v3 = vpop.eup %15019 }
 0xe59   :  { %11218 = vst [vmem:[%s20175_s19 + $0x40] sm:$0xff] %v15020_v3 }
 0xe5a   :  { %11223 = vsyncpa [#allocation6], 1 }
 0xe5b   :  { %11224 = vsyncpa [#allocation8], 1 }

</bundles_post_ra>
